<compile_context>
chip_gen: v5e
topology: v5e:2x2
jax: 0.10.0
libtpu: 0.0.40
codegen_flags: <defaults>
</compile_context>

<pallas_src>
import functools

import numpy as np
import jax
import jax.numpy as jnp
from jax.experimental import pallas as pl
from jax.experimental.pallas import tpu as pltpu


# ----------------------------------------------------------------------------
# librosa-compatible (Slaney) mel filterbank, built deterministically in numpy
# ----------------------------------------------------------------------------
def _hz_to_mel(f):
    f = np.asarray(f, dtype=np.float64)
    f_sp = 200.0 / 3.0
    mels = f / f_sp
    min_log_hz = 1000.0
    min_log_mel = min_log_hz / f_sp
    logstep = np.log(6.4) / 27.0
    return np.where(
        f >= min_log_hz,
        min_log_mel + np.log(np.maximum(f, min_log_hz) / min_log_hz) / logstep,
        mels,
    )


def _mel_to_hz(m):
    m = np.asarray(m, dtype=np.float64)
    f_sp = 200.0 / 3.0
    freqs = f_sp * m
    min_log_hz = 1000.0
    min_log_mel = min_log_hz / f_sp
    logstep = np.log(6.4) / 27.0
    return np.where(
        m >= min_log_mel, min_log_hz * np.exp(logstep * (m - min_log_mel)), freqs
    )


def librosa_mel_fn(sr, n_fft, n_mels, fmin, fmax):
    if fmax is None:
        fmax = sr / 2.0
    fftfreqs = np.linspace(0.0, sr / 2.0, n_fft // 2 + 1)
    mels = np.linspace(_hz_to_mel(fmin), _hz_to_mel(fmax), n_mels + 2)
    mel_f = _mel_to_hz(mels)
    fdiff = np.diff(mel_f)
    ramps = mel_f[:, None] - fftfreqs[None, :]
    lower = -ramps[:-2] / fdiff[:-1, None]
    upper = ramps[2:] / fdiff[1:, None]
    weights = np.maximum(0.0, np.minimum(lower, upper))
    enorm = 2.0 / (mel_f[2 : n_mels + 2] - mel_f[:n_mels])
    weights *= enorm[:, None]
    return weights.astype(np.float32)  # (n_mels, n_fft//2 + 1)


def _ceil_to(x, m):
    return int(-(-x // m) * m)


_HALO = 16  # halo block size (in chunks); covers n_fft//hop - 1 <= 16 overlap


# ----------------------------------------------------------------------------
# Cached host-side constants
# ----------------------------------------------------------------------------
@functools.lru_cache(maxsize=None)
def _build_constants(n_fft, hop_length, win_length, sampling_rate,
                     n_mel_channels, mel_fmin, mel_fmax):
    n_freq = n_fft // 2 + 1
    mel_basis = librosa_mel_fn(sampling_rate, n_fft, n_mel_channels,
                               mel_fmin, mel_fmax)           # (M, n_freq)

    # Nyquist drop: for even n_fft the Nyquist bin's sin term is identically 0
    # and (for the default mel_fmax=None) its mel weight column is exactly 0,
    # so the whole bin is dead work.  If the weights are nonzero the bin stays
    # in both the cos and sin sections (sin column is 0 -> sqrt(re^2+im^2)
    # degenerates to |re|), so the kernel needs no special Nyquist path.
    if n_fft % 2 == 0 and not mel_basis[:, -1].any():
        n_bins = n_freq - 1
    else:
        n_bins = n_freq

    FP = _ceil_to(n_bins, 128)          # lane-aligned width of cos / sin parts
    M_pad = _ceil_to(n_mel_channels, 128)
    RI_W = 2 * FP                       # [cos | sin]

    # torch.hann_window(win_length) (periodic), zero-padded (centered) to n_fft
    n = np.arange(n_fft, dtype=np.float64)
    w = 0.5 * (1.0 - np.cos(2.0 * np.pi *
                            np.arange(win_length, dtype=np.float64) / win_length))
    window = np.zeros(n_fft, np.float64)
    lpad = (n_fft - win_length) // 2
    window[lpad:lpad + win_length] = w

    k = np.arange(n_bins, dtype=np.float64)
    ang = 2.0 * np.pi * np.outer(n, k) / n_fft               # (n_fft, n_bins)
    wcos = window[:, None] * np.cos(ang)
    wsin = window[:, None] * np.sin(ang)

    rhs = np.zeros((n_fft, RI_W), np.float32)
    rhs[:, :n_bins] = wcos
    rhs[:, FP:FP + n_bins] = wsin

    mel_t = np.zeros((FP, M_pad), np.float32)
    mel_t[:n_bins, :n_mel_channels] = mel_basis[:, :n_bins].T

    return (jnp.asarray(rhs, jnp.bfloat16),
            jnp.asarray(mel_t, jnp.bfloat16),
            FP, M_pad, RI_W)


# ----------------------------------------------------------------------------
# Pallas kernel: in-kernel framing -> windowed DFT -> |.| -> mel -> log10 -> T
# ----------------------------------------------------------------------------
def _audio2mel_kernel(chunks_ref, halo_ref, rhs_ref, mel_ref, out_ref):
    # chunks_ref: (1, tile_f, hop)  bf16  chunks [t*tile_f, t*tile_f + tile_f)
    # halo_ref:   (1, HALO, hop)    bf16  chunks [(t+1)*tile_f, (t+1)*tile_f+16)
    # rhs_ref:    (n_fft, 2*FP)     bf16  [window*cos | window*sin]
    # mel_ref:    (FP, M_pad)       bf16  mel filterbank (transposed, padded)
    # out_ref:    (1, M_pad, tile_f)      log-mel, already transposed
    tile_f = chunks_ref.shape[1]
    hop = chunks_ref.shape[2]
    n_fft = rhs_ref.shape[0]
    fp = mel_ref.shape[0]
    r = n_fft // hop                       # each frame spans r chunks

    # Frame i = chunks [i, i+r).  Windowed DFT as r shifted matmuls (f32 acc):
    #   ri = sum_j  C_j @ rhs[j*hop:(j+1)*hop]   with  C_j[i] = chunk_{i+j}.
    ri = jnp.dot(chunks_ref[0], rhs_ref[:hop, :],
                 preferred_element_type=jnp.float32)
    if r > 1:
        # f32 for the sublane-shifted views (robust 32-bit relayout path);
        # values are bit-exact round trips of the bf16 inputs.
        ext = jnp.concatenate([chunks_ref[0], halo_ref[0]],
                              axis=0).astype(jnp.float32)    # (tile_f+HALO, hop)
        for j in range(1, r):
            lhs = ext[j:j + tile_f, :].astype(jnp.bfloat16)
            ri = ri + jnp.dot(lhs, rhs_ref[j * hop:(j + 1) * hop, :],
                              preferred_element_type=jnp.float32)

    real = ri[:, :fp]                                        # lane-aligned
    imag = ri[:, fp:]
    mag = jnp.sqrt(real * real + imag * imag)                # (tile_f, FP) f32
    mel = jnp.dot(mag.astype(jnp.bfloat16), mel_ref[...],
                  preferred_element_type=jnp.float32)        # (tile_f, M_pad)
    log_mel = jnp.log10(jnp.maximum(mel, 1e-5))
    out_ref[0] = log_mel.T.astype(out_ref.dtype)             # (M_pad, tile_f)


# ----------------------------------------------------------------------------
# Wrapper
# ----------------------------------------------------------------------------
def audio2mel(
    audio,
    n_fft=1024,
    hop_length=256,
    win_length=1024,
    sampling_rate=22050,
    n_mel_channels=80,
    mel_fmin=0.0,
    mel_fmax=None,
    frame_tile=512,
    out_dtype=jnp.float32,
):
    """audio: (B, 1, T) float32  ->  (B, n_mel_channels, n_frames)."""
    B, _, T = audio.shape
    p = (n_fft - hop_length) // 2
    if T <= p:
        raise ValueError(f"audio too short for reflect padding: T={T}, pad={p}")
    if win_length > n_fft:
        raise ValueError("win_length must be <= n_fft")
    if n_fft % hop_length != 0 or (n_fft // hop_length) - 1 > _HALO:
        # TODO(synk): general hop/n_fft ratios need a gather-based framing path.
        raise NotImplementedError(
            "audio2mel kernel requires hop_length | n_fft and n_fft/hop <= 17")

    rhs, mel_t, FP, M_pad, RI_W = _build_constants(
        n_fft, hop_length, win_length, sampling_rate,
        n_mel_channels, mel_fmin, mel_fmax)

    hop = hop_length
    # glue: reflect pad + squeeze(1)
    x = jnp.pad(audio[:, 0, :], ((0, 0), (p, p)), mode="reflect")  # (B, T+2p)
    Tp = T + 2 * p
    n_frames = 1 + (Tp - n_fft) // hop

    # frame-tile sizing: multiples of 128 (lane-dense transposed stores, clean
    # MXU / transpose shapes); keep >= 2 tiles per batch at B == 1 (v7x cores).
    nF128 = _ceil_to(n_frames, 128)
    tile_f = min(_ceil_to(min(max(int(frame_tile), 128), 1024), 128), nF128)
    if B == 1:
        while tile_f >= 256 and pl.cdiv(nF128, tile_f) < 2:
            tile_f -= 128
    nF_pad = _ceil_to(n_frames, tile_f)
    n_tiles = nF_pad // tile_f

    # chunked (hop-sized rows) view of the padded audio in bf16; zero-pad so the
    # last frame tile's halo block is in range.  The zero padding is never read
    # by a real frame (frame i < n_frames only touches samples < Tp).
    n_chunks = nF_pad + _HALO
    need = n_chunks * hop
    x = x.astype(jnp.bfloat16)
    if need > Tp:
        x = jnp.pad(x, ((0, 0), (0, need - Tp)))
    x_ch = x[:, :need].reshape(B, n_chunks, hop)

    grid = (B, n_tiles)
    halo_stride = tile_f // _HALO
    out_bytes = np.dtype(out_dtype).itemsize

    # VMEM footprint (double-buffered blocks + f32 temporaries), with margin.
    vmem_bytes = (
        2 * (tile_f * hop * 2 + _HALO * hop * 2)        # chunk + halo buffers
        + 2 * (n_fft * RI_W * 2 + FP * M_pad * 2)       # DFT + mel constants
        + 2 * (M_pad * tile_f * out_bytes)              # output buffers
        + tile_f * RI_W * 4 + tile_f * FP * 4           # ri / mag f32 temps
        + (tile_f + _HALO) * hop * 4 + tile_f * hop * 4 # ext + shifted slice
    )
    vmem_limit = min(48 * 1024 * 1024, int(vmem_bytes * 1.5) + (8 << 20))

    cost = pl.CostEstimate(
        flops=int(B * nF_pad * (2 * n_fft * RI_W + 2 * FP * M_pad)),
        transcendentals=int(B * nF_pad * (FP + M_pad)),
        bytes_accessed=int(x_ch.size * 2 + B * n_tiles * _HALO * hop * 2
                           + rhs.size * 2 + mel_t.size * 2
                           + B * M_pad * nF_pad * out_bytes),
    )

    out = pl.pallas_call(
        _audio2mel_kernel,
        out_shape=jax.ShapeDtypeStruct((B, M_pad, nF_pad), out_dtype),
        grid_spec=pltpu.PrefetchScalarGridSpec(
            num_scalar_prefetch=0,
            grid=grid,
            in_specs=[
                # chunk tile and its 16-chunk halo (same HBM array, two views)
                pl.BlockSpec((1, tile_f, hop), lambda b, t: (b, t, 0)),
                pl.BlockSpec((1, _HALO, hop),
                             lambda b, t: (b, (t + 1) * halo_stride, 0)),
                # grid-invariant operands (pl.Buffered(1) single-buffering would
                # reclaim ~2.4 MiB; footprint already fits on all generations)
                pl.BlockSpec((n_fft, RI_W), lambda b, t: (0, 0)),
                pl.BlockSpec((FP, M_pad), lambda b, t: (0, 0)),
            ],
            out_specs=pl.BlockSpec((1, M_pad, tile_f), lambda b, t: (b, 0, t)),
        ),
        compiler_params=pltpu.CompilerParams(
            dimension_semantics=("parallel", "parallel"),
            vmem_limit_bytes=int(vmem_limit),
        ),
        cost_estimate=cost,
    )(x_ch, x_ch, rhs, mel_t)

    # trim mel-channel and frame padding; already in (B, n_mels, n_frames) order
    return out[:, :n_mel_channels, :n_frames]


# ----------------------------------------------------------------------------
# Pure-numpy float64 reference (independent: uses np.fft.rfft)
# ----------------------------------------------------------------------------
def _reference_log_mel(audio_np, n_fft=1024, hop_length=256, win_length=1024,
                       sampling_rate=22050, n_mel_channels=80,
                       mel_fmin=0.0, mel_fmax=None):
    p = (n_fft - hop_length) // 2
    x = np.pad(audio_np[:, 0, :].astype(np.float64), ((0, 0), (p, p)),
               mode="reflect")
    n_frames = 1 + (x.shape[1] - n_fft) // hop_length
    idx = (np.arange(n_frames)[:, None] * hop_length
           + np.arange(n_fft)[None, :])
    frames = x[:, idx]                                    # (B, nF, n_fft)
    w = 0.5 * (1.0 - np.cos(2.0 * np.pi * np.arange(win_length) / win_length))
    window = np.zeros(n_fft)
    lpad = (n_fft - win_length) // 2
    window[lpad:lpad + win_length] = w
    spec = np.fft.rfft(frames * window, n=n_fft, axis=-1)
    mag = np.abs(spec)                                    # (B, nF, n_freq)
    mel_basis = librosa_mel_fn(sampling_rate, n_fft, n_mel_channels,
                               mel_fmin, mel_fmax).astype(np.float64)
    mel = np.einsum("mf,bnf->bmn", mel_basis, mag)
    return np.log10(np.maximum(mel, 1e-5))


if __name__ == "__main__":
    key = jax.random.PRNGKey(0)
    B, T = 2, 4096  # small audio: 16 STFT frames with default n_fft/hop
    audio = jax.random.normal(key, (B, 1, T), dtype=jnp.float32)

    log_mel = audio2mel(audio)
    log_mel = jax.block_until_ready(log_mel)

    assert log_mel.shape == (B, 80, 16), log_mel.shape
    assert bool(jnp.all(jnp.isfinite(log_mel)))

    # loose correctness check (bf16 MXU operands vs float64 reference)
    ref = _reference_log_mel(np.asarray(audio, np.float64))
    max_err = float(np.max(np.abs(np.asarray(log_mel, np.float64) - ref)))
    assert max_err < 0.3, f"max abs log-mel error too large: {max_err}"

    print("KERNEL_OK")
</pallas_src>

<mosaic_0001>
module attributes {stable_mosaic.version = 11 : i64} {
  func.func @_audio2mel_kernel(%arg0: i32, %arg1: i32, %arg2: memref<1x128x256xbf16, #tpu.memory_space<vmem>>, %arg3: memref<1x16x256xbf16, #tpu.memory_space<vmem>>, %arg4: memref<1024x1024xbf16, #tpu.memory_space<vmem>>, %arg5: memref<512x128xbf16, #tpu.memory_space<vmem>>, %arg6: memref<1x128x128xf32, #tpu.memory_space<vmem>>) attributes {dimension_semantics = [#tpu.dimension_semantics<parallel>, #tpu.dimension_semantics<parallel>], iteration_bounds = array<i64: 2, 1>, scalar_prefetch = 0 : i64, scratch_operands = 0 : i64, tpu.core_type = #tpu.core_type<tc>, window_params = [{transform_indices = @transform_0, window_bounds = array<i64: 1, 128, 256>}, {transform_indices = @transform_1, window_bounds = array<i64: 1, 16, 256>}, {pipeline_mode = #tpu.pipeline_mode<synchronous>, transform_indices = @transform_2, window_bounds = array<i64: 1024, 1024>}, {pipeline_mode = #tpu.pipeline_mode<synchronous>, transform_indices = @transform_3, window_bounds = array<i64: 512, 128>}, {transform_indices = @transform_4, window_bounds = array<i64: 1, 128, 128>}]} {
    %c0 = arith.constant 0 : index
    %c0_0 = arith.constant 0 : index
    %c0_1 = arith.constant 0 : index
    %0 = vector.load %arg2[%c0, %c0_0, %c0_1] : memref<1x128x256xbf16, #tpu.memory_space<vmem>>, vector<1x128x256xbf16>
    %1 = vector.shape_cast %0 : vector<1x128x256xbf16> to vector<128x256xbf16>
    %c0_2 = arith.constant 0 : index
    %c0_3 = arith.constant 0 : index
    %2 = vector.load %arg4[%c0_2, %c0_3] : memref<1024x1024xbf16, #tpu.memory_space<vmem>>, vector<256x1024xbf16>
    %cst = arith.constant dense<0.000000e+00> : vector<128x1024xf32>
    %3 = tpu.matmul %1, %2, %cst {dimension_numbers = #tpu.dot_dimension_numbers<[1], [0], [0], [1], [0, 0, 1, 1], [], []>} : vector<128x256xbf16>, vector<256x1024xbf16>, vector<128x1024xf32> -> vector<128x1024xf32>
    %c0_4 = arith.constant 0 : index
    %c0_5 = arith.constant 0 : index
    %c0_6 = arith.constant 0 : index
    %4 = vector.load %arg2[%c0_4, %c0_5, %c0_6] : memref<1x128x256xbf16, #tpu.memory_space<vmem>>, vector<1x128x256xbf16>
    %5 = vector.shape_cast %4 : vector<1x128x256xbf16> to vector<128x256xbf16>
    %c0_7 = arith.constant 0 : index
    %c0_8 = arith.constant 0 : index
    %c0_9 = arith.constant 0 : index
    %6 = vector.load %arg3[%c0_7, %c0_8, %c0_9] : memref<1x16x256xbf16, #tpu.memory_space<vmem>>, vector<1x16x256xbf16>
    %7 = vector.shape_cast %6 : vector<1x16x256xbf16> to vector<16x256xbf16>
    %8 = tpu.concatenate %5, %7 in 0 : vector<128x256xbf16>, vector<16x256xbf16> -> vector<144x256xbf16>
    %9 = arith.extf %8 : vector<144x256xbf16> to vector<144x256xf32>
    %10 = vector.extract_strided_slice %9 {offsets = [1, 0], sizes = [128, 256], strides = [1, 1]} : vector<144x256xf32> to vector<128x256xf32>
    %11 = arith.truncf %10 : vector<128x256xf32> to vector<128x256xbf16>
    %c256 = arith.constant 256 : index
    %c0_10 = arith.constant 0 : index
    %12 = vector.load %arg4[%c256, %c0_10] : memref<1024x1024xbf16, #tpu.memory_space<vmem>>, vector<256x1024xbf16>
    %cst_11 = arith.constant dense<0.000000e+00> : vector<128x1024xf32>
    %13 = tpu.matmul %11, %12, %cst_11 {dimension_numbers = #tpu.dot_dimension_numbers<[1], [0], [0], [1], [0, 0, 1, 1], [], []>} : vector<128x256xbf16>, vector<256x1024xbf16>, vector<128x1024xf32> -> vector<128x1024xf32>
    %14 = arith.addf %3, %13 : vector<128x1024xf32>
    %15 = vector.extract_strided_slice %9 {offsets = [2, 0], sizes = [128, 256], strides = [1, 1]} : vector<144x256xf32> to vector<128x256xf32>
    %16 = arith.truncf %15 : vector<128x256xf32> to vector<128x256xbf16>
    %c512 = arith.constant 512 : index
    %c0_12 = arith.constant 0 : index
    %17 = vector.load %arg4[%c512, %c0_12] : memref<1024x1024xbf16, #tpu.memory_space<vmem>>, vector<256x1024xbf16>
    %cst_13 = arith.constant dense<0.000000e+00> : vector<128x1024xf32>
    %18 = tpu.matmul %16, %17, %cst_13 {dimension_numbers = #tpu.dot_dimension_numbers<[1], [0], [0], [1], [0, 0, 1, 1], [], []>} : vector<128x256xbf16>, vector<256x1024xbf16>, vector<128x1024xf32> -> vector<128x1024xf32>
    %19 = arith.addf %14, %18 : vector<128x1024xf32>
    %20 = vector.extract_strided_slice %9 {offsets = [3, 0], sizes = [128, 256], strides = [1, 1]} : vector<144x256xf32> to vector<128x256xf32>
    %21 = arith.truncf %20 : vector<128x256xf32> to vector<128x256xbf16>
    %c768 = arith.constant 768 : index
    %c0_14 = arith.constant 0 : index
    %22 = vector.load %arg4[%c768, %c0_14] : memref<1024x1024xbf16, #tpu.memory_space<vmem>>, vector<256x1024xbf16>
    %cst_15 = arith.constant dense<0.000000e+00> : vector<128x1024xf32>
    %23 = tpu.matmul %21, %22, %cst_15 {dimension_numbers = #tpu.dot_dimension_numbers<[1], [0], [0], [1], [0, 0, 1, 1], [], []>} : vector<128x256xbf16>, vector<256x1024xbf16>, vector<128x1024xf32> -> vector<128x1024xf32>
    %24 = arith.addf %19, %23 : vector<128x1024xf32>
    %25 = vector.extract_strided_slice %24 {offsets = [0, 0], sizes = [128, 512], strides = [1, 1]} : vector<128x1024xf32> to vector<128x512xf32>
    %26 = vector.extract_strided_slice %24 {offsets = [0, 512], sizes = [128, 512], strides = [1, 1]} : vector<128x1024xf32> to vector<128x512xf32>
    %27 = arith.mulf %25, %25 : vector<128x512xf32>
    %28 = arith.mulf %26, %26 : vector<128x512xf32>
    %29 = arith.addf %27, %28 : vector<128x512xf32>
    %30 = math.sqrt %29 : vector<128x512xf32>
    %31 = arith.truncf %30 : vector<128x512xf32> to vector<128x512xbf16>
    %c0_16 = arith.constant 0 : index
    %c0_17 = arith.constant 0 : index
    %32 = vector.load %arg5[%c0_16, %c0_17] : memref<512x128xbf16, #tpu.memory_space<vmem>>, vector<512x128xbf16>
    %cst_18 = arith.constant dense<0.000000e+00> : vector<128x128xf32>
    %33 = tpu.matmul %31, %32, %cst_18 {dimension_numbers = #tpu.dot_dimension_numbers<[1], [0], [0], [1], [0, 0, 1, 1], [], []>} : vector<128x512xbf16>, vector<512x128xbf16>, vector<128x128xf32> -> vector<128x128xf32>
    %cst_19 = arith.constant 9.99999974E-6 : f32
    %34 = vector.broadcast %cst_19 : f32 to vector<128x128xf32>
    %35 = arith.maximumf %33, %34 : vector<128x128xf32>
    %36 = math.log %35 : vector<128x128xf32>
    %cst_20 = arith.constant 0.434294492 : f32
    %37 = vector.broadcast %cst_20 : f32 to vector<128x128xf32>
    %38 = arith.mulf %36, %37 : vector<128x128xf32>
    %39 = tpu.transpose %38, [1, 0] : vector<128x128xf32> -> vector<128x128xf32>
    %c0_21 = arith.constant 0 : index
    %c0_22 = arith.constant 0 : index
    %c0_23 = arith.constant 0 : index
    %40 = vector.load %arg6[%c0_21, %c0_22, %c0_23] : memref<1x128x128xf32, #tpu.memory_space<vmem>>, vector<1x128x128xf32>
    %41 = vector.shape_cast %40 : vector<1x128x128xf32> to vector<128x128xf32>
    %42 = vector.shape_cast %39 : vector<128x128xf32> to vector<1x128x128xf32>
    tpu.vector_store %arg6[%c0_21, %c0_22, %c0_23], %42 {strides = array<i32>} : memref<1x128x128xf32, #tpu.memory_space<vmem>>, vector<1x128x128xf32>,
    return
  }
  func.func @transform_0(%arg0: i32, %arg1: i32) -> (i32, i32, i32) {
    %c0_i32 = arith.constant 0 : i32
    %c0_i32_0 = arith.constant 0 : i32
    return %arg0, %arg1, %c0_i32 : i32, i32, i32
  }
  func.func @transform_1(%arg0: i32, %arg1: i32) -> (i32, i32, i32) {
    %c1_i32 = arith.constant 1 : i32
    %0 = arith.addi %arg1, %c1_i32 : i32
    %c8_i32 = arith.constant 8 : i32
    %1 = arith.muli %0, %c8_i32 : i32
    %c0_i32 = arith.constant 0 : i32
    %c0_i32_0 = arith.constant 0 : i32
    return %arg0, %1, %c0_i32 : i32, i32, i32
  }
  func.func @transform_2(%arg0: i32, %arg1: i32) -> (i32, i32) {
    %c0_i32 = arith.constant 0 : i32
    %c0_i32_0 = arith.constant 0 : i32
    %c0_i32_1 = arith.constant 0 : i32
    return %c0_i32, %c0_i32_0 : i32, i32
  }
  func.func @transform_3(%arg0: i32, %arg1: i32) -> (i32, i32) {
    %c0_i32 = arith.constant 0 : i32
    %c0_i32_0 = arith.constant 0 : i32
    %c0_i32_1 = arith.constant 0 : i32
    return %c0_i32, %c0_i32_0 : i32, i32
  }
  func.func @transform_4(%arg0: i32, %arg1: i32) -> (i32, i32, i32) {
    %c0_i32 = arith.constant 0 : i32
    %c0_i32_0 = arith.constant 0 : i32
    return %arg0, %c0_i32, %arg1 : i32, i32, i32
  }
}

</mosaic_0001>

<bundles_post_ra>
// kernel: tpu_custom_call.1
= control target key start
LH: loop header
LB: loop body
LE: loop exit
PB: predicated region body
PF: predicated region fallthrough
CT: control target
= control target key end

     0   :  { %s15952_s0 = inlined_call_operand.hbm [shape: bf16[2,144,256], index: 0, kind: input, shape index: {}]   ;;  %s15953_s1 = inlined_call_operand.hbm [shape: bf16[2,144,256], index: 1, kind: input, shape index: {}]   ;;  %s15954_s2 = inlined_call_operand.hbm [shape: bf16[1024,1024], index: 2, kind: input, shape index: {}]   ;;  %s15955_s3 = inlined_call_operand.hbm [shape: bf16[512,128], index: 3, kind: input, shape index: {}]   ;;  %s15956_s4 = inlined_call_operand.hbm [shape: f32[2,128,128], index: 4, kind: output, shape index: {}]  }
   0x1   :  { %16035 = sst [smem:[#allocation142_spill]] %s15952_s0 }
   0x2   :  { %16036 = sst [smem:[#allocation143_spill]] %s15954_s2 }
   0x3   :  { %16037 = sst [smem:[#allocation144_spill]] %s15955_s3 }
   0x4   :  { %9 = vsyncpa [#allocation3], 0 }
   0x5   :  { %11 = vsyncpa [#allocation3 + $0x1], 0 }
   0x6   :  { %12 = vsyncpa [#allocation6], 0 }
   0x7   :  { %14 = vsyncpa [#allocation6 + $0x1], 0 }
   0x8   :  { %15 = vsyncpa [#allocation9], 0 }
   0x9   :  { %16 = vsyncpa [#allocation4], 0 }
   0xa   :  { %18 = vsyncpa [#allocation4 + $0x1], 0  ;;  %s12322_s15 = smov 0   ;;  %s12324_s16 = smov 0  }
   0xb   :  { %s12326_s17 = smov 0   ;;  %s12328_s18 = smov 0  }
   0xc   :  { %s12330_s19 = smov 0   ;;  %s12332_s20 = smov 0  }
   0xd LB: > { %16038 = sst [smem:[#allocation16_spill]] %s12281_s19  ;;  %s12353_s21 = sadd.s32 4294967295, %s12285_s20   ;;  %s12285_s20 = sphi %s12332_s20, %s24_s20   ;;  %s12281_s19 = sphi %s12330_s19, %s16883_s19   ;;  %s12277_s18 = sphi %s12328_s18, %s16882_s18   ;;  %s12273_s17 = sphi %s12326_s17, %s16886_s17   ;;  %s12269_s16 = sphi %s12324_s16, %s16885_s16   ;;  %s12265_s15 = sphi %s12322_s15, %s16884_s15  }
   0xe   : > { %s8983_s22 = sadd.s32 4294967294, %s12285_s20   ;;  %p58_p0 = scmp.ne.s32.totalorder %s12269_s16, %s12265_s15 }
   0xf   : > { %p59_p1 = scmp.eq.s32.totalorder %s12353_s21, 0  ;;  %p158_p2 = scmp.eq.s32.totalorder %s12353_s21, 1 }
  0x10   : > { %p164_p3 = scmp.eq.s32.totalorder %s8983_s22, 1  ;;  %p8984_p5 = scmp.ge.s32.totalorder %s12285_s20, 1 }
  0x11   : > { %p12362_p4 = por %p59_p1, %p58_p0  ;;  %p171_p7 = scmp.lt.s32.totalorder %s12285_s20, 3 }
  0x12   : > { %p12367_p6 = por %p164_p3, %p58_p0  ;;  %s16041_s2 = sld [smem:[#allocation143_spill]] }
  0x13   : > { %p12375_p8 = pnand %p8984_p5, %p171_p7  ;;  %s12287_s29 = smov [#allocation7]  }
  0x14   : > { %s184_s30 = sshll.u32 %s12287_s29, 4  ;;  %p8987_p11 = scmp.ge.s32.totalorder %s12285_s20, 2  ;;  %s185_s30 = int_to_ptr.vmem [resolvable:$true] %s184_s30 }
  0x15   : > { %p11829_p9 = pneg %p12375_p8  ;;  %s16043_s3 = sld [smem:[#allocation144_spill]] }
  0x16   : > { %s12288_s8 = smov 512   ;;  %s12289_s9 = smov 32  }
  0x17   : > { %p11830_p10 = pnand %p11829_p9, %p59_p1  ;;  %s12290_s10 = smov [#allocation8]  }
  0x18   : > { %s182_s27 = sshll.u32 %s16041_s2, 4  ;;  %s198_s11 = sshll.u32 %s12290_s10, 4  ;;  %s183_s27 = int_to_ptr.hbm [resolvable:$true] %s182_s27  ;;  %s199_s11 = int_to_ptr.vmem [resolvable:$true] %s198_s11 }
  0x19   : > { %11832 = dma.hbm_to_vmem [thread:$0]  (!%p11830_p10), %s183_s27, 65536, %s185_s30, [#allocation6], %s12288_s8, %s12288_s8, %s12289_s9  }
  0x1a   : > { %s12291_s12 = smov 64   ;;  %s12292_s13 = smov 4  }
  0x1b   : > { %s196_s7 = sshll.u32 %s16043_s3, 4  ;;  %s36_s14 = sadd.s32 1, %s12281_s19  ;;  %s197_s7 = int_to_ptr.hbm [resolvable:$true] %s196_s7 }
  0x1c   : > { %11835 = dma.hbm_to_vmem [thread:$0]  (!%p11830_p10), %s197_s7, 4096, %s199_s11, [#allocation9], %s12291_s12, %s12291_s12, %s12292_s13  }
  0x1d   : > { %s45_s22 = sadd.s32 1, %s12273_s17  ;;  %p38_p12 = scmp.ge.s32.totalorder %s36_s14, 2 }
  0x1e   : > { %p52_p13 = scmp.ne.s32.totalorder %s12273_s17, %s12269_s16  ;;  %p53_p0 = scmp.eq.s32.totalorder %s12285_s20, 0 }
  0x1f   : > { %p11849_p3 = scmp.lt.s32.totalorder %s12285_s20, 2  ;;  %s16888_s14 = smov (%p38_p12, %s36_s14), 0 }
  0x20   : > { %16044 = sst [smem:[#allocation17_spill]] %s16888_s14  ;;  %p12395_p5 = por %p53_p0, %p52_p13 }
  0x21   : > { %p12401_p7 = por %p158_p2, %p52_p13  ;;  %s40_s27 = ssub.s32 %s12281_s19, %s16888_s14 }
  0x22   : > { %s212_s29 = sand.u32 1, %s12273_s17   ;;  %p43_p9 = scmp.eq.s32.totalorder %s40_s27, 0 }
  0x23   : > { %s8988_s30 = sshll.u32 %s212_s29, 7  ;;  %s11814_s5 = smul.u32 144, %s12281_s19 }
  0x24   : > { %s12410_s6 = scalar_select %p43_p9, %s12273_s17, %s45_s22  }
  0x25   : > { %s16047_s0 = sld [smem:[#allocation142_spill]]  ;;  %s216_s11 = scalar_lea.vmem [#allocation2], %s8988_s30 }
  0x26   : > { %s235_s12 = sshll.u32 %s216_s11, 4  ;;  %p12419_p2 = pnand %p11849_p3, %p12395_p5  ;;  %s236_s12 = int_to_ptr.vmem [resolvable:$true] %s235_s12 }
  0x27   : > { %s245_s27 = sand.u32 1, %s12285_s20   ;;  %s213_s22 = scalar_lea.sflag [#allocation3], %s212_s29 }
  0x28   : > { %s12293_s2 = smov 128   ;;  %s12294_s3 = smov 8  }
  0x29   : > { %s8990_s7 = sshll.u32 %s212_s29, 4  ;;  %s246_s19 = scalar_lea.sflag [#allocation6], %s245_s27 }
  0x2b   : > { %s231_s9 = scalar_lea.hbm %s16047_s0, %s11814_s5  ;;  %s249_s0 = scalar_lea.vmem [#allocation5], %s8990_s7 }
  0x2c   : > { %s233_s10 = sshll.u32 %s231_s9, 4  ;;  %s8896_s9 = scalar_lea.hbm %s15953_s1, %s11814_s5  ;;  %s234_s10 = int_to_ptr.hbm [resolvable:$true] %s233_s10 }
  0x2d   : > { %11839 = dma.hbm_to_vmem [thread:$0]  (!%p12419_p2), %s234_s10, 2048, %s236_s12, %s213_s22, %s12293_s2, %s12293_s2, %s12294_s3  }
  0x2e   : > { %s8897_s11 = scalar_lea.hbm %s8896_s9, 128  ;;  %s262_s14 = sshll.u32 %s249_s0, 4  ;;  %s263_s14 = int_to_ptr.vmem [resolvable:$true] %s262_s14 }
  0x2f   : > { %s260_s25 = sshll.u32 %s8897_s11, 4  ;;  %274 = sbr.rel (%p12375_p8) target bundleno = 2648 (0xa58), region = 36  ;;  %s261_s25 = int_to_ptr.hbm [resolvable:$true] %s260_s25 }
  0x30   : > { %11842 = dma.hbm_to_vmem [thread:$0]  (!%p12419_p2), %s261_s25, 256, %s263_s14, %s246_s19, %s12293_s2, %s12293_s2, %s12294_s3  }
  0x34   : > { %s12434_s10 = sand.u32 1, %s12269_s16  }
  0x35   : > { %s8993_s29 = sshll.u32 %s12434_s10, 7  ;;  %s277_s5 = scalar_lea.sflag [#allocation3], %s12434_s10 }
  0x36   : > { %s12440_s12 = scalar_lea.vmem [#allocation2], %s8993_s29 }
  0x37   : > { %12244 = dma.done.wait (%p12362_p4), %s277_s5, 2048  }
  0x38   : > { %12246 = vsyncadd (%p12362_p4), %s277_s5, 4294965248  ;;  %s286_s0 = sand.u32 1, %s12353_s21   ;;  %s8994_s2 = sshll.u32 %s12434_s10, 4 }
  0x39   : > { %s287_s3 = scalar_lea.sflag [#allocation6], %s286_s0  ;;  %s12448_s19 = scalar_lea.vmem [#allocation5], %s8994_s2 }
  0x3a   : > { %12248 = dma.done.wait (%p12362_p4), %s287_s3, 256  }
  0x3b   : > { %12250 = vsyncadd (%p12362_p4), %s287_s3, 4294967040 }
  0x3c   : > { %12252 = dma.done.wait (%p59_p1), [#allocation6], 65536  }
  0x3d   : > { %12254 = vsyncadd (%p59_p1), [#allocation6], 4294901760 }
  0x3e   : > { %12256 = dma.done.wait (%p59_p1), [#allocation9], 4096  }
  0x3f   : > { %12258 = vsyncadd (%p59_p1), [#allocation9], 4294963200  ;;  %v9296_v0 = vld [vmem:[#allocation7 + $0x5c0] sm:$0xf]  ;;  %v11453_v5 = vld [vmem:[#allocation7 + $0x5c4] sm:$0xf] }
  0x40   : > { %v11457_v1 = vld [vmem:[#allocation7 + $0x5dc] sm:$0xf0]  ;;  %v9298_v6 = vld [vmem:[#allocation7 + $0x5e0] sm:$0xf0]  ;;  %vm756_vm0 = vsmask.f32 7424 }
  0x41   : > { %v9552_v2 = vld [vmem:[#allocation7 + $0x7c0] sm:$0xf]  ;;  %v9297_v3 = vor.u32 %v11457_v1, %v9296_v0  ;;  %v9301_v8 = vor.u32 %v11453_v5, %v9298_v6  ;;  %v11517_v9 = vld [vmem:[#allocation7 + $0x7c4] sm:$0xf]  ;;  %vm3903_vm1 = vcmask 1046528   ;;  %s15895_s21 = scalar_lea.vmem [#allocation10], %s8993_s29 }
  0x42   : > { %v11521_v4 = vld [vmem:[#allocation7 + $0x7dc] sm:$0xf0]  ;;  %v9554_v10 = vld [vmem:[#allocation7 + $0x7e0] sm:$0xf0]  ;;  %vm5634_vm2 = vsmask.f32 6400 }
  0x43   : > { %v9553_v7 = vor.u32 %v11521_v4, %v9552_v2  ;;  %v9264_v11 = vld [vmem:[#allocation7 + $0x580] sm:$0xf]  ;;  %1549 = vmatpush.bf16.msra.mxu0 %v9297_v3  ;;  %v9557_v12 = vor.u32 %v11517_v9, %v9554_v10  ;;  %1647 = vmatpush.bf16.msra.mxu2 %v9301_v8  ;;  %v11445_v18 = vld [vmem:[#allocation7 + $0x584] sm:$0xf]  ;;  %s11813_s23 = sshll.u32 %s12277_s18, 7  ;;  %s8847_s27 = sshll.u32 %s15895_s21, 4  ;;  %s8848_s27 = int_to_ptr.vmem [resolvable:$true] %s8847_s27 }
  0x44   : > { %v11449_v13 = vld [vmem:[#allocation7 + $0x59c] sm:$0xf0]  ;;  %v9266_v19 = vld [vmem:[#allocation7 + $0x5a0] sm:$0xf0]  ;;  %s8846_s13 = scalar_lea.hbm %s15956_s4, %s11813_s23  ;;  %s8834_s7 = scalar_lea.sflag [#allocation4], %s12434_s10 }
  0x45   : > { %v9520_v14 = vld [vmem:[#allocation7 + $0x780] sm:$0xf]  ;;  %1598 = vmatpush.bf16.msra.mxu1 %v9553_v7  ;;  %v9265_v16 = vor.u32 %v11449_v13, %v9264_v11  ;;  %v11509_v20 = vld [vmem:[#allocation7 + $0x784] sm:$0xf]  ;;  %1696 = vmatpush.bf16.msra.mxu3 %v9557_v12  ;;  %v9269_v21 = vor.u32 %v11445_v18, %v9266_v19  ;;  %s8849_s22 = sshll.u32 %s8846_s13, 4  ;;  %s12211_s11 = scalar_lea.hbm %s15956_s4, 256  ;;  %s8850_s22 = int_to_ptr.hbm [resolvable:$true] %s8849_s22 }
  0x46   : > { %v11513_v15 = vld [vmem:[#allocation7 + $0x79c] sm:$0xf0]  ;;  %v9522_v22 = vld [vmem:[#allocation7 + $0x7a0] sm:$0xf0]  ;;  %s12205_s8 = sshra.s32 %s8850_s22, 4  ;;  %s12206_s8 = int_to_ptr.hbm [resolvable:$true] %s12205_s8 }
  0x47   : > { %v9521_v17 = vor.u32 %v11513_v15, %v9520_v14  ;;  %v9232_v23 = vld [vmem:[#allocation7 + $0x540] sm:$0xf]  ;;  %v9525_v25 = vor.u32 %v11509_v20, %v9522_v22  ;;  %v11437_v28 = vld [vmem:[#allocation7 + $0x544] sm:$0xf]  ;;  %1550 = vmatpush.bf16.msra.mxu0 %v9265_v16  ;;  %1648 = vmatpush.bf16.msra.mxu2 %v9269_v21  ;;  %v9008_v22 = vld [vmem:[%s12440_s12 + $0x10] sm:$0xf]  ;;  %p12212_p10 = scmp.lt.s32.totalorder %s12206_s8, %s15956_s4 }
  0x48   : > { %v11441_v24 = vld [vmem:[#allocation7 + $0x55c] sm:$0xf0]  ;;  %v9234_v30 = vld [vmem:[#allocation7 + $0x560] sm:$0xf0]  ;;  %s12207_s30 = scalar_lea.hbm %s12206_s8, 128 }
  0x49   : > { %v9488_v26 = vld [vmem:[#allocation7 + $0x740] sm:$0xf]  ;;  %v9233_v29 = vor.u32 %v11441_v24, %v9232_v23  ;;  %v11501_v31 = vld [vmem:[#allocation7 + $0x744] sm:$0xf]  ;;  %1599 = vmatpush.bf16.msra.mxu1 %v9521_v17  ;;  %v9237_v34 = vor.u32 %v11437_v28, %v9234_v30  ;;  %1697 = vmatpush.bf16.msra.mxu3 %v9525_v25  ;;  %v11252_v17 = vld [vmem:[%s12440_s12 + $0x4] sm:$0xf0]  ;;  %p12208_p1 = scmp.ne.s32.totalorder %s12206_s8, %s12207_s30  ;;  %p12213_p12 = scmp.lt.s32.totalorder %s12211_s11, %s12207_s30 }
  0x4a   : > { %v11505_v27 = vld [vmem:[#allocation7 + $0x75c] sm:$0xf0]  ;;  %v9490_v32 = vld [vmem:[#allocation7 + $0x760] sm:$0xf0]  ;;  %v11254_v23 = vld [vmem:[%s12440_s12 + $0x14] sm:$0xf0] }
  0x4b   : > { %v9489_v33 = vor.u32 %v11505_v27, %v9488_v26  ;;  %v9200_v35 = vld [vmem:[#allocation7 + $0x500] sm:$0xf]  ;;  %v9493_v38 = vor.u32 %v11501_v31, %v9490_v32  ;;  %v11429_v40 = vld [vmem:[#allocation7 + $0x504] sm:$0xf]  ;;  %1551 = vmatpush.bf16.msra.mxu0 %v9233_v29  ;;  %1649 = vmatpush.bf16.msra.mxu2 %v9237_v34  ;;  %v12468_v29 = vor.u32 %v11254_v23, %v9008_v22  ;;  %v9002_v31 = vld [vmem:[%s12440_s12 + $0x8] sm:$0xf0]  ;;  %p12209_p4 = pnand %p12208_p1, %p12401_p7  ;;  %p12214_p13 = por %p12213_p12, %p12212_p10 }
  0x4c   : > { %v11433_v36 = vld [vmem:[#allocation7 + $0x51c] sm:$0xf0]  ;;  %v9202_v41 = vld [vmem:[#allocation7 + $0x520] sm:$0xf0]  ;;  %v11253_v32 = vld [vmem:[%s12440_s12 + $0x14] sm:$0xf] }
  0x4d   : > { %v9456_v37 = vld [vmem:[#allocation7 + $0x700] sm:$0xf]  ;;  %v11493_v42 = vld [vmem:[#allocation7 + $0x704] sm:$0xf]  ;;  %v9201_v44 = vor.u32 %v11433_v36, %v9200_v35  ;;  %1600 = vmatpush.bf16.msra.mxu1 %v9489_v33  ;;  %v9205_v46 = vor.u32 %v11429_v40, %v9202_v41  ;;  %1698 = vmatpush.bf16.msra.mxu3 %v9493_v38  ;;  %16050 = vst [vmem:[#allocation19_spill] sm:$0xff] %v12468_v29  ;;  %v15989_v41 = vshll.u32 %v12468_v29, 16  ;;  %p12210_p8 = pneg %p12209_p4 }
  0x4e   : > { %v11497_v39 = vld [vmem:[#allocation7 + $0x71c] sm:$0xf0]  ;;  %v9458_v43 = vld [vmem:[#allocation7 + $0x720] sm:$0xf0]  ;;  %v11438_v23 = vld [vmem:[#allocation7 + $0x54c] sm:$0xf] }
  0x4f   : > { %v9457_v45 = vor.u32 %v11497_v39, %v9456_v37  ;;  %v9168_v47 = vld [vmem:[#allocation7 + $0x4c0] sm:$0xf]  ;;  %v9461_v50 = vor.u32 %v11493_v42, %v9458_v43  ;;  %v11421_v52 = vld [vmem:[#allocation7 + $0x4c4] sm:$0xf]  ;;  %1552 = vmatpush.bf16.msra.mxu0 %v9201_v44  ;;  %1650 = vmatpush.bf16.msra.mxu2 %v9205_v46  ;;  %v9010_v37 = vld [vmem:[%s12440_s12 + $0x18] sm:$0xf0]  ;;  %p12215_p0 = pnand %p12214_p13, %p12210_p8 }
  0x50   : > { %v11425_v48 = vld [vmem:[#allocation7 + $0x4dc] sm:$0xf0]  ;;  %v9170_v53 = vld [vmem:[#allocation7 + $0x4e0] sm:$0xf0]  ;;  %v12479_v42 = vor.u32 %v11253_v32, %v9010_v37  ;;  %v11454_v43 = vld [vmem:[#allocation7 + $0x5cc] sm:$0xf] }
  0x51   : > { %v9424_v49 = vld [vmem:[#allocation7 + $0x6c0] sm:$0xf]  ;;  %v11485_v54 = vld [vmem:[#allocation7 + $0x6c4] sm:$0xf]  ;;  %v9169_v56 = vor.u32 %v11425_v48, %v9168_v47  ;;  %1601 = vmatpush.bf16.msra.mxu1 %v9457_v45  ;;  %v9173_v58 = vor.u32 %v11421_v52, %v9170_v53  ;;  %1699 = vmatpush.bf16.msra.mxu3 %v9461_v50  ;;  %v9306_v47 = vld [vmem:[#allocation7 + $0x5e8] sm:$0xf0] }
  0x52   : > { %v11489_v51 = vld [vmem:[#allocation7 + $0x6dc] sm:$0xf0]  ;;  %v9426_v55 = vld [vmem:[#allocation7 + $0x6e0] sm:$0xf0]  ;;  %16052 = vst [vmem:[#allocation21_spill] sm:$0xff] %v12479_v42  ;;  %v12487_v50 = vrot.slane %v15989_v41, 1 }
  0x53   : > { %v9425_v57 = vor.u32 %v11489_v51, %v9424_v49  ;;  %v9136_v59 = vld [vmem:[#allocation7 + $0x480] sm:$0xf]  ;;  %v9429_v62 = vor.u32 %v11485_v54, %v9426_v55  ;;  %v11413_v0 = vld [vmem:[#allocation7 + $0x484] sm:$0xf]  ;;  %1553 = vmatpush.bf16.msra.mxu0 %v9169_v56  ;;  %1651 = vmatpush.bf16.msra.mxu2 %v9173_v58  ;;  %v15985_v51 = vshll.u32 %v12479_v42, 16  ;;  %v15990_v37 = vshrl.u32 %v12468_v29, 16 }
  0x54   : > { %v11417_v60 = vld [vmem:[#allocation7 + $0x49c] sm:$0xf0]  ;;  %v9138_v1 = vld [vmem:[#allocation7 + $0x4a0] sm:$0xf0]  ;;  %v11518_v52 = vld [vmem:[#allocation7 + $0x7cc] sm:$0xf] }
  0x55   : > { %v9392_v61 = vld [vmem:[#allocation7 + $0x680] sm:$0xf]  ;;  %v11477_v2 = vld [vmem:[#allocation7 + $0x684] sm:$0xf]  ;;  %v9137_v5 = vor.u32 %v11417_v60, %v9136_v59  ;;  %1602 = vmatpush.bf16.msra.mxu1 %v9425_v57  ;;  %v9141_v10 = vor.u32 %v11413_v0, %v9138_v1  ;;  %1700 = vmatpush.bf16.msra.mxu3 %v9429_v62  ;;  %v9562_v53 = vld [vmem:[#allocation7 + $0x7e8] sm:$0xf0]  ;;  %v9309_v59 = vor.u32 %v11454_v43, %v9306_v47 }
  0x56   : > { %v11481_v63 = vld [vmem:[#allocation7 + $0x69c] sm:$0xf0]  ;;  %v9394_v3 = vld [vmem:[#allocation7 + $0x6a0] sm:$0xf0]  ;;  %v12496_v58 = vrot.slane %v15985_v51, 1  ;;  %v15986_v43 = vshrl.u32 %v12479_v42, 16 }
  0x57   : > { %v9104_v4 = vld [vmem:[#allocation7 + $0x440] sm:$0xf]  ;;  %v9393_v9 = vor.u32 %v11481_v63, %v9392_v61  ;;  %v11405_v11 = vld [vmem:[#allocation7 + $0x444] sm:$0xf]  ;;  %v9397_v14 = vor.u32 %v11477_v2, %v9394_v3  ;;  %1554 = vmatpush.bf16.msra.mxu0 %v9137_v5  ;;  %1652 = vmatpush.bf16.msra.mxu2 %v9141_v10  ;;  %v9304_v60 = vld [vmem:[#allocation7 + $0x5c8] sm:$0xf]  ;;  %v9565_v63 = vor.u32 %v11518_v52, %v9562_v53 }
  0x58   : > { %v11409_v6 = vld [vmem:[#allocation7 + $0x45c] sm:$0xf0]  ;;  %v9106_v12 = vld [vmem:[#allocation7 + $0x460] sm:$0xf0]  ;;  %v11458_v61 = vld [vmem:[#allocation7 + $0x5e4] sm:$0xf0]  ;;  %v791_v53 = vor.u32 %v15986_v43, %v12496_v58 }
  0x59   : > { %v9360_v7 = vld [vmem:[#allocation7 + $0x640] sm:$0xf]  ;;  %v11469_v13 = vld [vmem:[#allocation7 + $0x644] sm:$0xf]  ;;  %v9105_v25 = vor.u32 %v11409_v6, %v9104_v4  ;;  %1603 = vmatpush.bf16.msra.mxu1 %v9393_v9  ;;  %v9109_v33 = vor.u32 %v11405_v11, %v9106_v12  ;;  %1701 = vmatpush.bf16.msra.mxu3 %v9397_v14  ;;  %v9560_v0 = vld [vmem:[#allocation7 + $0x7c8] sm:$0xf] }
  0x5a   : > { %v11473_v8 = vld [vmem:[#allocation7 + $0x65c] sm:$0xf0]  ;;  %v9362_v15 = vld [vmem:[#allocation7 + $0x660] sm:$0xf0]  ;;  %v11522_v1 = vld [vmem:[#allocation7 + $0x7e4] sm:$0xf0] }
  0x5b   : > { %v9000_v16 = vld [vmem:[%s12440_s12] sm:$0xf]  ;;  %v9361_v26 = vor.u32 %v11473_v8, %v9360_v7  ;;  %v11397_v27 = vld [vmem:[#allocation7 + $0x404] sm:$0xf]  ;;  %v9365_v39 = vor.u32 %v11469_v13, %v9362_v15  ;;  %1555 = vmatpush.bf16.msra.mxu0 %v9105_v25  ;;  %1653 = vmatpush.bf16.msra.mxu2 %v9109_v33  ;;  %v11446_v2 = vld [vmem:[#allocation7 + $0x58c] sm:$0xf]  ;;  %v9305_v8 = vor.u32 %v11458_v61, %v9304_v60 }
  0x5c   : > { %v9072_v18 = vld [vmem:[#allocation7 + $0x400] sm:$0xf]  ;;  %v12466_v24 = vor.u32 %v11252_v17, %v9000_v16  ;;  %v9074_v28 = vld [vmem:[#allocation7 + $0x420] sm:$0xf0]  ;;  %v9274_v4 = vld [vmem:[#allocation7 + $0x5a8] sm:$0xf0]  ;;  %v9561_v12 = vor.u32 %v11522_v1, %v9560_v0 }
  0x5d   : > { %v11401_v19 = vld [vmem:[#allocation7 + $0x41c] sm:$0xf0]  ;;  %v11251_v30 = vld [vmem:[%s12440_s12 + $0x4] sm:$0xf]  ;;  %1604 = vmatpush.bf16.msra.mxu1 %v9361_v26  ;;  %v9077_v54 = vor.u32 %v11397_v27, %v9074_v28  ;;  %1702 = vmatpush.bf16.msra.mxu3 %v9365_v39  ;;  %v11510_v5 = vld [vmem:[#allocation7 + $0x78c] sm:$0xf]  ;;  %v9277_v14 = vor.u32 %v11446_v2, %v9274_v4 }
  0x5e   : > { %v9328_v20 = vld [vmem:[#allocation7 + $0x600] sm:$0xf]  ;;  %16049 = vst [vmem:[#allocation18_spill] sm:$0xff] %v12466_v24  ;;  %v11461_v34 = vld [vmem:[#allocation7 + $0x604] sm:$0xf]  ;;  %v15992_v35 = vshrl.u32 %v12466_v24, 16  ;;  %v12476_v38 = vor.u32 %v11251_v30, %v9002_v31  ;;  %v9073_v48 = vor.u32 %v11401_v19, %v9072_v18 }
  0x5f   : > { %v11465_v21 = vld [vmem:[#allocation7 + $0x61c] sm:$0xf0]  ;;  %v15991_v36 = vshll.u32 %v12466_v24, 16  ;;  %v9330_v40 = vld [vmem:[#allocation7 + $0x620] sm:$0xf0]  ;;  %1654 = vmatpush.bf16.msra.mxu2 %v9077_v54 }
  0x60   : > { %16051 = vst [vmem:[#allocation20_spill] sm:$0xff] %v12476_v38  ;;  %v15988_v45 = vshrl.u32 %v12476_v38, 16  ;;  %v15987_v46 = vshll.u32 %v12476_v38, 16  ;;  %v9329_v49 = vor.u32 %v11465_v21, %v9328_v20  ;;  %v9333_v57 = vor.u32 %v11461_v34, %v9330_v40  ;;  %1556 = vmatpush.bf16.msra.mxu0 %v9073_v48  ;;  %v9530_v6 = vld [vmem:[#allocation7 + $0x7a8] sm:$0xf0] }
  0x61   : > { %v762_v44 = vrot.slane %v15991_v36, 1  ;;  %v9016_v9 = vld [vmem:[%s12440_s12 + $0x20] sm:$0xf]  ;;  %v11256_v10 = vld [vmem:[%s12440_s12 + $0x24] sm:$0xf0]  ;;  %v9533_v17 = vor.u32 %v11510_v5, %v9530_v6 }
  0x62   : > { %v774_v56 = vrot.slane %v15987_v46, 1  ;;  %1605 = vmatpush.bf16.msra.mxu1 %v9329_v49  ;;  %v11255_v11 = vld [vmem:[%s12440_s12 + $0x24] sm:$0xf]  ;;  %1703 = vmatpush.bf16.msra.mxu3 %v9333_v57  ;;  %v9018_v13 = vld [vmem:[%s12440_s12 + $0x28] sm:$0xf0]  ;;  %v12515_v20 = vor.u32 %v11256_v10, %v9016_v9  ;;  %v783_v49 = vor.u32 %v15990_v37, %v12487_v50 }
  0x63   : > { %v763_v55 = vor.u32 %v762_v44, %v15992_v35  ;;  %1843 = vmatpush.bf16.msrb.mxu2 %v9309_v59  ;;  %v9272_v15 = vld [vmem:[#allocation7 + $0x588] sm:$0xf]  ;;  %v12518_v21 = vor.u32 %v11255_v11, %v9018_v13  ;;  %v9242_v25 = vld [vmem:[#allocation7 + $0x568] sm:$0xf0]  ;;  %v9024_v57 = vld [vmem:[%s12440_s12 + $0x30] sm:$0xf] }
  0x64   : > { %v775_v62 = vor.u32 %v774_v56, %v15988_v45  ;;  %v11450_v16 = vld [vmem:[#allocation7 + $0x5a4] sm:$0xf0]  ;;  %16053 = vst [vmem:[#allocation22_spill] sm:$0xff] %v12515_v20  ;;  %1745 = vmatpush.bf16.msrb.mxu0 %v9305_v8  ;;  %v11502_v26 = vld [vmem:[#allocation7 + $0x74c] sm:$0xf]  ;;  %v9245_v28 = vor.u32 %v11438_v23, %v9242_v25  ;;  %v15983_v39 = vshll.u32 %v12515_v20, 16 }
  0x65   : > { %v12502_v3 = vsel %vm756_vm0, %v763_v55, %v12487_v50  ;;  %v9528_v18 = vld [vmem:[#allocation7 + $0x788] sm:$0xf]  ;;  %16054 = vst [vmem:[#allocation23_spill] sm:$0xff] %v12518_v21  ;;  %v9273_v22 = vor.u32 %v11450_v16, %v9272_v15  ;;  %v9498_v30 = vld [vmem:[#allocation7 + $0x768] sm:$0xf0]  ;;  %v15981_v44 = vshll.u32 %v12518_v21, 16 }
  0x66   : > { %v12506_v7 = vsel %vm756_vm0, %v775_v62, %v12496_v58  ;;  %1557 = vmatmul.bf16.vlgmr.msra.gmra.mxu0 %v12502_v3  ;;  %1892 = vmatpush.bf16.msrb.mxu3 %v9565_v63  ;;  %v11514_v19 = vld [vmem:[#allocation7 + $0x7a4] sm:$0xf0]  ;;  %v9501_v32 = vor.u32 %v11502_v26, %v9498_v30  ;;  %v787_v52 = vrot.slane %v15983_v39, 1  ;;  %v11258_v50 = vld [vmem:[%s12440_s12 + $0x34] sm:$0xf0]  ;;  %v15984_v11 = vshrl.u32 %v12515_v20, 16 }
  0x67   : > { %1606 = vmatmul.bf16.vlgmr.msra.gmra.mxu1 %v12506_v7  ;;  %1655 = vmatmul.bf16.vlgmr.msra.gmra.mxu2 %v12502_v3  ;;  %v9529_v27 = vor.u32 %v11514_v19, %v9528_v18  ;;  %v9240_v31 = vld [vmem:[#allocation7 + $0x548] sm:$0xf]  ;;  %v795_v54 = vrot.slane %v15981_v44, 1  ;;  %v11257_v59 = vld [vmem:[%s12440_s12 + $0x34] sm:$0xf]  ;;  %v12547_v58 = vor.u32 %v11258_v50, %v9024_v57 }
  0x68   : > { %1704 = vmatmul.bf16.vlgmr.msra.gmra.mxu3 %v12506_v7  ;;  %1794 = vmatpush.bf16.msrb.mxu1 %v9561_v12  ;;  %v11442_v33 = vld [vmem:[#allocation7 + $0x564] sm:$0xf0]  ;;  %v12535_v55 = vsel %vm756_vm0, %v783_v49, %v787_v52  ;;  %v9026_v60 = vld [vmem:[%s12440_s12 + $0x38] sm:$0xf0]  ;;  %v11430_v62 = vld [vmem:[#allocation7 + $0x50c] sm:$0xf]  ;;  %v799_v16 = vor.u32 %v15984_v11, %v787_v52 }
  0x69   : > { %1844 = vmatpush.bf16.msrb.mxu2 %v9277_v14  ;;  %v9496_v34 = vld [vmem:[#allocation7 + $0x748] sm:$0xf]  ;;  %1746 = vmatpush.bf16.msrb.mxu0 %v9273_v22  ;;  %v9241_v47 = vor.u32 %v11442_v33, %v9240_v31  ;;  %v12538_v56 = vsel %vm756_vm0, %v791_v53, %v795_v54  ;;  %16055 = vst [vmem:[#allocation24_spill] sm:$0xff] %v12547_v58  ;;  %v9210_v63 = vld [vmem:[#allocation7 + $0x528] sm:$0xf0]  ;;  %v15979_v12 = vshll.u32 %v12547_v58, 16 }
  0x6a   : > { %1893 = vmatpush.bf16.msrb.mxu3 %v9533_v17  ;;  %v11506_v40 = vld [vmem:[#allocation7 + $0x764] sm:$0xf0]  ;;  %v12550_v61 = vor.u32 %v11257_v59, %v9026_v60  ;;  %v11494_v0 = vld [vmem:[#allocation7 + $0x70c] sm:$0xf]  ;;  %v9213_v1 = vor.u32 %v11430_v62, %v9210_v63  ;;  %v15982_v14 = vshrl.u32 %v12518_v21, 16  ;;  %v15980_v50 = vshrl.u32 %v12547_v58, 16 }
  0x6b   : > { %v9497_v48 = vor.u32 %v11506_v40, %v9496_v34  ;;  %v9466_v2 = vld [vmem:[#allocation7 + $0x728] sm:$0xf0]  ;;  %v9208_v4 = vld [vmem:[#allocation7 + $0x508] sm:$0xf]  ;;  %v803_v17 = vrot.slane %v15979_v12, 1 }
  0x6c   : > { %1795 = vmatpush.bf16.msrb.mxu1 %v9529_v27  ;;  %16056 = vst [vmem:[#allocation25_spill] sm:$0xff] %v12550_v61  ;;  %v11434_v5 = vld [vmem:[#allocation7 + $0x524] sm:$0xf0]  ;;  %v9469_v6 = vor.u32 %v11494_v0, %v9466_v2  ;;  %v15969_v15 = vshll.u32 %v12550_v61, 16  ;;  %v807_v18 = vor.u32 %v15982_v14, %v795_v54  ;;  %v9032_v25 = vld [vmem:[%s12440_s12 + $0x40] sm:$0xf] }
  0x6d   : > { %1845 = vmatpush.bf16.msrb.mxu2 %v9245_v28  ;;  %1747 = vmatpush.bf16.msrb.mxu0 %v9241_v47  ;;  %v9209_v8 = vor.u32 %v11434_v5, %v9208_v4  ;;  %v9464_v9 = vld [vmem:[#allocation7 + $0x708] sm:$0xf]  ;;  %v12565_v22 = vsel %vm756_vm0, %v799_v16, %v803_v17  ;;  %v11259_v27 = vld [vmem:[%s12440_s12 + $0x44] sm:$0xf]  ;;  %v9034_v28 = vld [vmem:[%s12440_s12 + $0x48] sm:$0xf0]  ;;  %v815_v0 = vor.u32 %v15980_v50, %v803_v17 }
  0x6e   : > { %1894 = vmatpush.bf16.msrb.mxu3 %v9501_v32  ;;  %v11498_v10 = vld [vmem:[#allocation7 + $0x724] sm:$0xf0]  ;;  %v811_v19 = vrot.slane %v15969_v15, 1  ;;  %v12580_v31 = vor.u32 %v11259_v27, %v9034_v28  ;;  %v11422_v32 = vld [vmem:[#allocation7 + $0x4cc] sm:$0xf]  ;;  %v15974_v62 = vshrl.u32 %v12550_v61, 16 }
  0x6f   : > { %v9465_v13 = vor.u32 %v11498_v10, %v9464_v9  ;;  %v11260_v26 = vld [vmem:[%s12440_s12 + $0x44] sm:$0xf0]  ;;  %v9178_v33 = vld [vmem:[#allocation7 + $0x4e8] sm:$0xf0]  ;;  %v11262_v9 = vld [vmem:[%s12440_s12 + $0x54] sm:$0xf0] }
  0x70   : > { %1796 = vmatpush.bf16.msrb.mxu1 %v9497_v48  ;;  %v12568_v23 = vsel %vm756_vm0, %v807_v18, %v811_v19  ;;  %v12577_v30 = vor.u32 %v11260_v26, %v9032_v25  ;;  %16058 = vst [vmem:[#allocation27_spill] sm:$0xff] %v12580_v31  ;;  %v11486_v34 = vld [vmem:[#allocation7 + $0x6cc] sm:$0xf]  ;;  %v9181_v40 = vor.u32 %v11422_v32, %v9178_v33  ;;  %v9176_v48 = vld [vmem:[#allocation7 + $0x4c8] sm:$0xf]  ;;  %v15965_v63 = vshll.u32 %v12580_v31, 16 }
  0x71   : > { %1846 = vmatpush.bf16.msrb.mxu2 %v9213_v1  ;;  %1748 = vmatpush.bf16.msrb.mxu0 %v9209_v8  ;;  %v9434_v47 = vld [vmem:[#allocation7 + $0x6e8] sm:$0xf0]  ;;  %v11426_v49 = vld [vmem:[#allocation7 + $0x4e4] sm:$0xf0]  ;;  %v823_v2 = vor.u32 %v15974_v62, %v811_v19  ;;  %v9040_v8 = vld [vmem:[%s12440_s12 + $0x50] sm:$0xf] }
  0x72   : > { %1895 = vmatpush.bf16.msrb.mxu3 %v9469_v6  ;;  %16057 = vst [vmem:[#allocation26_spill] sm:$0xff] %v12577_v30  ;;  %v9437_v52 = vor.u32 %v11486_v34, %v9434_v47  ;;  %v9177_v53 = vor.u32 %v11426_v49, %v9176_v48  ;;  %v9432_v54 = vld [vmem:[#allocation7 + $0x6c8] sm:$0xf]  ;;  %v15967_v59 = vshll.u32 %v12577_v30, 16  ;;  %v827_v4 = vrot.slane %v15965_v63, 1 }
  0x73   : > { %v11490_v57 = vld [vmem:[#allocation7 + $0x6e4] sm:$0xf0]  ;;  %v11261_v10 = vld [vmem:[%s12440_s12 + $0x54] sm:$0xf]  ;;  %v12607_v16 = vor.u32 %v11262_v9, %v9040_v8  ;;  %v11414_v18 = vld [vmem:[#allocation7 + $0x48c] sm:$0xf] }
  0x74   : > { %1797 = vmatpush.bf16.msrb.mxu1 %v9465_v13  ;;  %v9433_v60 = vor.u32 %v11490_v57, %v9432_v54  ;;  %v819_v1 = vrot.slane %v15967_v59, 1  ;;  %v12598_v6 = vsel %vm756_vm0, %v823_v2, %v827_v4  ;;  %v9042_v13 = vld [vmem:[%s12440_s12 + $0x58] sm:$0xf0]  ;;  %v9146_v19 = vld [vmem:[#allocation7 + $0x4a8] sm:$0xf0]  ;;  %v15968_v48 = vshrl.u32 %v12577_v30, 16 }
  0x75   : > { %1847 = vmatpush.bf16.msrb.mxu2 %v9181_v40  ;;  %1749 = vmatpush.bf16.msrb.mxu0 %v9177_v53  ;;  %16059 = vst [vmem:[#allocation28_spill] sm:$0xff] %v12607_v16  ;;  %v12610_v17 = vor.u32 %v11261_v10, %v9042_v13  ;;  %v11478_v25 = vld [vmem:[#allocation7 + $0x68c] sm:$0xf]  ;;  %v9149_v26 = vor.u32 %v11414_v18, %v9146_v19  ;;  %v9144_v28 = vld [vmem:[#allocation7 + $0x488] sm:$0xf]  ;;  %v15963_v49 = vshll.u32 %v12607_v16, 16 }
  0x76   : > { %1562 = vmatmul.bf16.gmra.mxu0 %v12535_v55  ;;  %1896 = vmatpush.bf16.msrb.mxu3 %v9437_v52  ;;  %v12595_v5 = vsel %vm756_vm0, %v815_v0, %v819_v1  ;;  %v9402_v27 = vld [vmem:[#allocation7 + $0x6a8] sm:$0xf0]  ;;  %v11418_v32 = vld [vmem:[#allocation7 + $0x4a4] sm:$0xf0]  ;;  %v15966_v53 = vshrl.u32 %v12580_v31, 16  ;;  %v831_v57 = vor.u32 %v15968_v48, %v819_v1 }
  0x77   : > { %1611 = vmatmul.bf16.gmra.mxu1 %v12538_v56  ;;  %1660 = vmatmul.bf16.gmra.mxu2 %v12535_v55  ;;  %16060 = vst [vmem:[#allocation29_spill] sm:$0xff] %v12610_v17  ;;  %v9405_v33 = vor.u32 %v11478_v25, %v9402_v27  ;;  %v9145_v34 = vor.u32 %v11418_v32, %v9144_v28  ;;  %v9400_v40 = vld [vmem:[#allocation7 + $0x688] sm:$0xf]  ;;  %v15961_v54 = vshll.u32 %v12610_v17, 16  ;;  %v9048_v10 = vld [vmem:[%s12440_s12 + $0x60] sm:$0xf] }
  0x78   : > { %1709 = vmatmul.bf16.gmra.mxu3 %v12538_v56  ;;  %1798 = vmatpush.bf16.msrb.mxu1 %v9433_v60  ;;  %v11482_v47 = vld [vmem:[#allocation7 + $0x6a4] sm:$0xf0]  ;;  %v835_v60 = vrot.slane %v15963_v49, 1  ;;  %v839_v0 = vor.u32 %v15966_v53, %v827_v4  ;;  %v11263_v18 = vld [vmem:[%s12440_s12 + $0x64] sm:$0xf] }
  0x79   : > { %1848 = vmatpush.bf16.msrb.mxu2 %v9149_v26  ;;  %v9401_v52 = vor.u32 %v11482_v47, %v9400_v40  ;;  %1750 = vmatpush.bf16.msrb.mxu0 %v9145_v34  ;;  %v843_v2 = vrot.slane %v15961_v54, 1  ;;  %v11264_v13 = vld [vmem:[%s12440_s12 + $0x64] sm:$0xf0]  ;;  %v9050_v19 = vld [vmem:[%s12440_s12 + $0x68] sm:$0xf0] }
  0x7a   : > { %1897 = vmatpush.bf16.msrb.mxu3 %v9405_v33  ;;  %v12625_v8 = vsel %vm756_vm0, %v831_v57, %v835_v60  ;;  %v12637_v1 = vor.u32 %v11264_v13, %v9048_v10  ;;  %v12640_v4 = vor.u32 %v11263_v18, %v9050_v19  ;;  %v11406_v25 = vld [vmem:[#allocation7 + $0x44c] sm:$0xf]  ;;  %v9112_v33 = vld [vmem:[#allocation7 + $0x448] sm:$0xf]  ;;  %v15962_v18 = vshrl.u32 %v12610_v17, 16 }
  0x7b   : > { %v12628_v9 = vsel %vm756_vm0, %v839_v0, %v843_v2  ;;  %v9114_v26 = vld [vmem:[#allocation7 + $0x468] sm:$0xf0]  ;;  %v11410_v34 = vld [vmem:[#allocation7 + $0x464] sm:$0xf0]  ;;  %v15964_v0 = vshrl.u32 %v12607_v16, 16 }
  0x7c   : > { %1799 = vmatpush.bf16.msrb.mxu1 %v9401_v52  ;;  %16061 = vst [vmem:[#allocation30_spill] sm:$0xff] %v12637_v1  ;;  %v11470_v27 = vld [vmem:[#allocation7 + $0x64c] sm:$0xf]  ;;  %v9117_v28 = vor.u32 %v11406_v25, %v9114_v26  ;;  %v9113_v47 = vor.u32 %v11410_v34, %v9112_v33  ;;  %v9368_v52 = vld [vmem:[#allocation7 + $0x648] sm:$0xf]  ;;  %v15960_v10 = vshll.u32 %v12637_v1, 16 }
  0x7d   : > { %16062 = vst [vmem:[#allocation31_spill] sm:$0xff] %v12640_v4  ;;  %v9370_v32 = vld [vmem:[#allocation7 + $0x668] sm:$0xf0]  ;;  %v11474_v57 = vld [vmem:[#allocation7 + $0x664] sm:$0xf0]  ;;  %v15959_v19 = vshll.u32 %v12640_v4, 16  ;;  %v847_v25 = vor.u32 %v15964_v0, %v835_v60 }
  0x7e   : > { %v9373_v40 = vor.u32 %v11470_v27, %v9370_v32  ;;  %1849 = vmatpush.bf16.msrb.mxu2 %v9117_v28  ;;  %v9369_v13 = vor.u32 %v11474_v57, %v9368_v52  ;;  %1751 = vmatpush.bf16.msrb.mxu0 %v9113_v47  ;;  %v851_v26 = vrot.slane %v15960_v10, 1  ;;  %v855_v27 = vor.u32 %v15962_v18, %v843_v2  ;;  %v9056_v33 = vld [vmem:[%s12440_s12 + $0x70] sm:$0xf]  ;;  %v11265_v47 = vld [vmem:[%s12440_s12 + $0x74] sm:$0xf] }
  0x7f   : > { %v859_v28 = vrot.slane %v15959_v19, 1  ;;  %v9058_v52 = vld [vmem:[%s12440_s12 + $0x78] sm:$0xf0]  ;;  %v11398_v57 = vld [vmem:[#allocation7 + $0x40c] sm:$0xf]  ;;  %v15973_v18 = vshrl.u32 %v12637_v1, 16 }
  0x80   : > { %1898 = vmatpush.bf16.msrb.mxu3 %v9373_v40  ;;  %1800 = vmatpush.bf16.msrb.mxu1 %v9369_v13  ;;  %v12655_v32 = vsel %vm756_vm0, %v847_v25, %v851_v26  ;;  %v11266_v40 = vld [vmem:[%s12440_s12 + $0x74] sm:$0xf0]  ;;  %v12669_v2 = vor.u32 %v11265_v47, %v9058_v52  ;;  %v9082_v13 = vld [vmem:[#allocation7 + $0x428] sm:$0xf0]  ;;  %v9080_v10 = vld [vmem:[#allocation7 + $0x408] sm:$0xf] }
  0x81   : > { %v12659_v34 = vsel %vm756_vm0, %v855_v27, %v859_v28  ;;  %v12667_v60 = vor.u32 %v11266_v40, %v9056_v33  ;;  %v11462_v25 = vld [vmem:[#allocation7 + $0x60c] sm:$0xf]  ;;  %v9085_v27 = vor.u32 %v11398_v57, %v9082_v13  ;;  %v11402_v54 = vld [vmem:[#allocation7 + $0x424] sm:$0xf0]  ;;  %v15972_v0 = vshrl.u32 %v12640_v4, 16 }
  0x82   : > { %16064 = vst [vmem:[#allocation33_spill] sm:$0xff] %v12669_v2  ;;  %v9338_v19 = vld [vmem:[#allocation7 + $0x628] sm:$0xf0]  ;;  %v9081_v33 = vor.u32 %v11402_v54, %v9080_v10  ;;  %v9336_v40 = vld [vmem:[#allocation7 + $0x608] sm:$0xf]  ;;  %v15970_v63 = vshll.u32 %v12669_v2, 16  ;;  %v863_v54 = vor.u32 %v15973_v18, %v851_v26 }
  0x83   : > { %16063 = vst [vmem:[#allocation32_spill] sm:$0xff] %v12667_v60  ;;  %v9341_v49 = vor.u32 %v11462_v25, %v9338_v19  ;;  %v11466_v47 = vld [vmem:[#allocation7 + $0x624] sm:$0xf0]  ;;  %v15971_v52 = vshll.u32 %v12667_v60, 16  ;;  %v9064_v53 = vld [vmem:[%s12448_s19] sm:$0xf]  ;;  %1850 = vmatpush.bf16.msrb.mxu2 %v9085_v27  ;;  %v871_v15 = vor.u32 %v15972_v0, %v859_v28 }
  0x84   : > { %v9337_v57 = vor.u32 %v11466_v47, %v9336_v40  ;;  %v11396_v13 = vld [vmem:[%s12448_s19 + $0x4] sm:$0xf0]  ;;  %v11395_v59 = vld [vmem:[%s12448_s19 + $0x4] sm:$0xf]  ;;  %v9066_v48 = vld [vmem:[%s12448_s19 + $0x8] sm:$0xf0]  ;;  %1752 = vmatpush.bf16.msrb.mxu0 %v9081_v33 }
  0x85   : > { %1899 = vmatpush.bf16.msrb.mxu3 %v9341_v49  ;;  %v867_v10 = vrot.slane %v15971_v52, 1  ;;  %v9065_v19 = vor.u32 %v11396_v13, %v9064_v53  ;;  %v9069_v25 = vor.u32 %v11395_v59, %v9066_v48  ;;  %v875_v27 = vrot.slane %v15970_v63, 1  ;;  %v11455_v53 = vld [vmem:[#allocation7 + $0x5d4] sm:$0xf]  ;;  %v9568_v52 = vld [vmem:[#allocation7 + $0x7d0] sm:$0xf] }
  0x86   : > { %1567 = vmatmul.bf16.gmra.mxu0 %v12565_v22  ;;  %1801 = vmatpush.bf16.msrb.mxu1 %v9337_v57  ;;  %v9314_v26 = vld [vmem:[#allocation7 + $0x5f0] sm:$0xf0]  ;;  %v11523_v18 = vld [vmem:[#allocation7 + $0x7ec] sm:$0xf0] }
  0x87   : > { %1616 = vmatmul.bf16.gmra.mxu1 %v12568_v23  ;;  %1665 = vmatmul.bf16.gmra.mxu2 %v12565_v22  ;;  %v12689_v40 = vsel %vm756_vm0, %v863_v54, %v867_v10  ;;  %v608_v49 = vunpack.c.l.bf16 %v9065_v19  ;;  %v609_v33 = vunpack.c.l.bf16 %v9069_v25  ;;  %v12692_v47 = vsel %vm756_vm0, %v871_v15, %v875_v27  ;;  %v11519_v28 = vld [vmem:[#allocation7 + $0x7d4] sm:$0xf]  ;;  %v11507_v50 = vld [vmem:[#allocation7 + $0x76c] sm:$0xf0] }
  0x88   : > { %1714 = vmatmul.bf16.gmra.mxu3 %v12568_v23  ;;  %v9317_v57 = vor.u32 %v11455_v53, %v9314_v26  ;;  %v9570_v13 = vld [vmem:[#allocation7 + $0x7f0] sm:$0xf0]  ;;  %v15978_v15 = vshrl.u32 %v12667_v60, 16  ;;  %v15977_v25 = vshrl.u32 %v12669_v2, 16  ;;  %v9569_v62 = vor.u32 %v11523_v18, %v9568_v52  ;;  %v11499_v11 = vld [vmem:[#allocation7 + $0x72c] sm:$0xf0] }
  0x89   : > { %v12697_v59 = vpack.c.bf16 %v608_v49, %v608_v49  ;;  %v12699_v48 = vpack.c.bf16 %v609_v33, %v609_v33  ;;  %v9573_v54 = vor.u32 %v11519_v28, %v9570_v13  ;;  %v9312_v49 = vld [vmem:[#allocation7 + $0x5d0] sm:$0xf]  ;;  %v9282_v18 = vld [vmem:[#allocation7 + $0x5b0] sm:$0xf0] }
  0x8a   : > { %2039 = vmatpush.bf16.msra.mxu2 %v9317_v57  ;;  %v11459_v33 = vld [vmem:[#allocation7 + $0x5ec] sm:$0xf0]  ;;  %v879_v53 = vor.u32 %v15978_v15, %v867_v10  ;;  %v887_v28 = vor.u32 %v15977_v25, %v875_v27  ;;  %1990 = vmatpush.bf16.msra.mxu1 %v9569_v62  ;;  %v11511_v52 = vld [vmem:[#allocation7 + $0x794] sm:$0xf] }
  0x8b   : > { %16065 = vst [vmem:[#allocation34_spill] sm:$0xff] %v12697_v59  ;;  %v15976_v19 = vshll.u32 %v12697_v59, 16  ;;  %v15975_v63 = vshll.u32 %v12699_v48, 16  ;;  %2088 = vmatpush.bf16.msra.mxu3 %v9573_v54  ;;  %v9313_v0 = vor.u32 %v11459_v33, %v9312_v49  ;;  %v9538_v27 = vld [vmem:[#allocation7 + $0x7b0] sm:$0xf0] }
  0x8c   : > { %16066 = vst [vmem:[#allocation35_spill] sm:$0xff] %v12699_v48  ;;  %v9541_v62 = vor.u32 %v11511_v52, %v9538_v27  ;;  %v9280_v49 = vld [vmem:[#allocation7 + $0x590] sm:$0xf]  ;;  %v11503_v52 = vld [vmem:[#allocation7 + $0x754] sm:$0xf] }
  0x8d   : > { %v883_v26 = vrot.slane %v15976_v19, 1  ;;  %1941 = vmatpush.bf16.msra.mxu0 %v9313_v0  ;;  %v891_v57 = vrot.slane %v15975_v63, 1  ;;  %v11447_v0 = vld [vmem:[#allocation7 + $0x594] sm:$0xf]  ;;  %v11451_v33 = vld [vmem:[#allocation7 + $0x5ac] sm:$0xf0] }
  0x8e   : > { %v9285_v10 = vor.u32 %v11447_v0, %v9282_v18  ;;  %v11439_v0 = vld [vmem:[#allocation7 + $0x554] sm:$0xf]  ;;  %v11491_v45 = vld [vmem:[#allocation7 + $0x6ec] sm:$0xf0] }
  0x8f   : > { %v12715_v13 = vsel %vm756_vm0, %v879_v53, %v883_v26  ;;  %v12718_v54 = vsel %vm756_vm0, %v887_v28, %v891_v57  ;;  %2089 = vmatpush.bf16.msra.mxu3 %v9541_v62  ;;  %v9536_v53 = vld [vmem:[#allocation7 + $0x790] sm:$0xf]  ;;  %v9281_v26 = vor.u32 %v11451_v33, %v9280_v49  ;;  %v9250_v18 = vld [vmem:[#allocation7 + $0x570] sm:$0xf0] }
  0x90   : > { %2040 = vmatpush.bf16.msra.mxu2 %v9285_v10  ;;  %v11515_v28 = vld [vmem:[#allocation7 + $0x7ac] sm:$0xf0]  ;;  %v9253_v10 = vor.u32 %v11439_v0, %v9250_v18  ;;  %v9506_v27 = vld [vmem:[#allocation7 + $0x770] sm:$0xf0] }
  0x91   : > { %v9537_v57 = vor.u32 %v11515_v28, %v9536_v53  ;;  %1942 = vmatpush.bf16.msra.mxu0 %v9281_v26  ;;  %v9509_v49 = vor.u32 %v11503_v52, %v9506_v27  ;;  %v9248_v26 = vld [vmem:[#allocation7 + $0x550] sm:$0xf] }
  0x92   : > { %v11443_v28 = vld [vmem:[#allocation7 + $0x56c] sm:$0xf0] }
  0x93   : > { %1991 = vmatpush.bf16.msra.mxu1 %v9537_v57  ;;  %2090 = vmatpush.bf16.msra.mxu3 %v9509_v49  ;;  %v9504_v57 = vld [vmem:[#allocation7 + $0x750] sm:$0xf]  ;;  %v9249_v12 = vor.u32 %v11443_v28, %v9248_v26  ;;  %v11431_v49 = vld [vmem:[#allocation7 + $0x514] sm:$0xf] }
  0x94   : > { %2041 = vmatpush.bf16.msra.mxu2 %v9253_v10  ;;  %v9505_v44 = vor.u32 %v11507_v50, %v9504_v57  ;;  %v9218_v50 = vld [vmem:[#allocation7 + $0x530] sm:$0xf0]  ;;  %v11483_v35 = vld [vmem:[#allocation7 + $0x6ac] sm:$0xf0] }
  0x95   : > { %1943 = vmatpush.bf16.msra.mxu0 %v9249_v12  ;;  %v11495_v12 = vld [vmem:[#allocation7 + $0x714] sm:$0xf] }
  0x96   : > { %1572 = vmatmul.bf16.gmra.mxu0 %v12595_v5 }
  0x97   : > { %1621 = vmatmul.bf16.gmra.mxu1 %v12598_v6  ;;  %1670 = vmatmul.bf16.gmra.mxu2 %v12595_v5 }
  0x98   : > { %1719 = vmatmul.bf16.gmra.mxu3 %v12598_v6  ;;  %1992 = vmatpush.bf16.msra.mxu1 %v9505_v44  ;;  %v9221_v44 = vor.u32 %v11431_v49, %v9218_v50 }
  0x9a   : > { %2042 = vmatpush.bf16.msra.mxu2 %v9221_v44 }
  0xa6   : > { %1577 = vmatmul.bf16.gmra.mxu0 %v12625_v8 }
  0xa7   : > { %1626 = vmatmul.bf16.gmra.mxu1 %v12628_v9  ;;  %1675 = vmatmul.bf16.gmra.mxu2 %v12625_v8 }
  0xa8   : > { %1724 = vmatmul.bf16.gmra.mxu3 %v12628_v9 }
  0xb6   : > { %1582 = vmatmul.bf16.gmra.mxu0 %v12655_v32 }
  0xb7   : > { %1631 = vmatmul.bf16.gmra.mxu1 %v12659_v34  ;;  %1680 = vmatmul.bf16.gmra.mxu2 %v12655_v32 }
  0xb8   : > { %1729 = vmatmul.bf16.gmra.mxu3 %v12659_v34 }
  0xc6   : > { %1587 = vmatmul.bf16.gmra.mxu0 %v12689_v40 }
  0xc7   : > { %1636 = vmatmul.bf16.gmra.mxu1 %v12692_v47  ;;  %1685 = vmatmul.bf16.gmra.mxu2 %v12689_v40 }
  0xc8   : > { %1734 = vmatmul.bf16.gmra.mxu3 %v12692_v47 }
  0xd6   : > { %1592 = vmatmul.bf16.gmra.mxu0 %v12715_v13 }
  0xd7   : > { %1641 = vmatmul.bf16.gmra.mxu1 %v12718_v54  ;;  %1690 = vmatmul.bf16.gmra.mxu2 %v12715_v13 }
  0xd8   : > { %1739 = vmatmul.bf16.gmra.mxu3 %v12718_v54 }
  0xe3   : > { %v1558_v63 = vpop.f32.mrf.mxu0 }
  0xe4   : > { %v1607_v19 = vpop.f32.mrf.mxu1 }
  0xe5   : > { %v12724_v25 = vadd.f32 %v1607_v19, %v1558_v63 }
  0xe6   : > { %1753 = vmatmul.bf16.vlgmr.msrb.gmra.mxu0 %v12502_v3 }
  0xe7   : > { %1802 = vmatmul.bf16.vlgmr.msrb.gmra.mxu1 %v12506_v7  ;;  %1851 = vmatmul.bf16.vlgmr.msrb.gmra.mxu2 %v12502_v3 }
  0xe8   : > { %1900 = vmatmul.bf16.vlgmr.msrb.gmra.mxu3 %v12506_v7 }
  0xea   : > { %v1656_v62 = vpop.f32.mrf.mxu2 }
  0xeb   : > { %v1705_v33 = vpop.f32.mrf.mxu3  ;;  %v1560_v53 = vpop.f32.mrf.mxu0 }
  0xec   : > { %v12730_v63 = vadd.f32 %v1705_v33, %v1656_v62  ;;  %v1609_v19 = vpop.f32.mrf.mxu1  ;;  %v9474_v33 = vld [vmem:[#allocation7 + $0x730] sm:$0xf0] }
  0xed   : > { %v12732_v15 = vadd.f32 %v1609_v19, %v1560_v53  ;;  %v9477_v19 = vor.u32 %v11495_v12, %v9474_v33 }
  0xef   : > { %2091 = vmatpush.bf16.msra.mxu3 %v9477_v19  ;;  %v11423_v19 = vld [vmem:[#allocation7 + $0x4d4] sm:$0xf] }
  0xf2   : > { %v1658_v0 = vpop.f32.mrf.mxu2 }
  0xf3   : > { %v1707_v18 = vpop.f32.mrf.mxu3  ;;  %v1563_v52 = vpop.f32.mrf.mxu0 }
  0xf4   : > { %v12734_v27 = vadd.f32 %v1707_v18, %v1658_v0  ;;  %v1612_v10 = vpop.f32.mrf.mxu1  ;;  %v9216_v18 = vld [vmem:[#allocation7 + $0x510] sm:$0xf] }
  0xf5   : > { %v12736_v62 = vadd.f32 %v1612_v10, %v1563_v52  ;;  %v11435_v52 = vld [vmem:[#allocation7 + $0x52c] sm:$0xf0] }
  0xf6   : > { %1758 = vmatmul.bf16.gmra.mxu0 %v12535_v55  ;;  %v9472_v10 = vld [vmem:[#allocation7 + $0x710] sm:$0xf]  ;;  %v9217_v39 = vor.u32 %v11435_v52, %v9216_v18 }
  0xf7   : > { %1807 = vmatmul.bf16.gmra.mxu1 %v12538_v56  ;;  %1856 = vmatmul.bf16.gmra.mxu2 %v12535_v55  ;;  %v9473_v51 = vor.u32 %v11499_v11, %v9472_v10  ;;  %v9186_v11 = vld [vmem:[#allocation7 + $0x4f0] sm:$0xf0] }
  0xf8   : > { %1905 = vmatmul.bf16.gmra.mxu3 %v12538_v56  ;;  %1944 = vmatpush.bf16.msra.mxu0 %v9217_v39  ;;  %v11487_v39 = vld [vmem:[#allocation7 + $0x6d4] sm:$0xf] }
  0xf9   : > { %1993 = vmatpush.bf16.msra.mxu1 %v9473_v51  ;;  %v9189_v51 = vor.u32 %v11423_v19, %v9186_v11 }
  0xfa   : > { %v1661_v53 = vpop.f32.mrf.mxu2 }
  0xfb   : > { %v1710_v26 = vpop.f32.mrf.mxu3  ;;  %v1565_v28 = vpop.f32.mrf.mxu0  ;;  %2043 = vmatpush.bf16.msra.mxu2 %v9189_v51 }
  0xfc   : > { %v12742_v57 = vadd.f32 %v1710_v26, %v1661_v53  ;;  %v1614_v0 = vpop.f32.mrf.mxu1  ;;  %v9442_v26 = vld [vmem:[#allocation7 + $0x6f0] sm:$0xf0] }
  0xfd   : > { %v12744_v14 = vadd.f32 %v1614_v0, %v1565_v28  ;;  %v9445_v0 = vor.u32 %v11487_v39, %v9442_v26 }
  0xff   : > { %2092 = vmatpush.bf16.msra.mxu3 %v9445_v0  ;;  %v11415_v0 = vld [vmem:[#allocation7 + $0x494] sm:$0xf] }
 0x102   : > { %v1663_v49 = vpop.f32.mrf.mxu2 }
 0x103   : > { %v1712_v50 = vpop.f32.mrf.mxu3  ;;  %v1568_v12 = vpop.f32.mrf.mxu0 }
 0x104   : > { %v12746_v33 = vadd.f32 %v1712_v50, %v1663_v49  ;;  %v1617_v44 = vpop.f32.mrf.mxu1  ;;  %v9184_v50 = vld [vmem:[#allocation7 + $0x4d0] sm:$0xf] }
 0x105   : > { %v12748_v53 = vadd.f32 %v1617_v44, %v1568_v12  ;;  %v11427_v12 = vld [vmem:[#allocation7 + $0x4ec] sm:$0xf0] }
 0x106   : > { %1763 = vmatmul.bf16.gmra.mxu0 %v12565_v22  ;;  %v9440_v44 = vld [vmem:[#allocation7 + $0x6d0] sm:$0xf]  ;;  %v9185_v46 = vor.u32 %v11427_v12, %v9184_v50 }
 0x107   : > { %1812 = vmatmul.bf16.gmra.mxu1 %v12568_v23  ;;  %1861 = vmatmul.bf16.gmra.mxu2 %v12565_v22  ;;  %v9441_v41 = vor.u32 %v11491_v45, %v9440_v44  ;;  %v9154_v45 = vld [vmem:[#allocation7 + $0x4b0] sm:$0xf0] }
 0x108   : > { %1910 = vmatmul.bf16.gmra.mxu3 %v12568_v23  ;;  %1945 = vmatpush.bf16.msra.mxu0 %v9185_v46  ;;  %v11479_v46 = vld [vmem:[#allocation7 + $0x694] sm:$0xf] }
 0x109   : > { %1994 = vmatpush.bf16.msra.mxu1 %v9441_v41  ;;  %v9157_v41 = vor.u32 %v11415_v0, %v9154_v45 }
 0x10a   : > { %v1666_v28 = vpop.f32.mrf.mxu2 }
 0x10b   : > { %v1715_v18 = vpop.f32.mrf.mxu3  ;;  %v1570_v52 = vpop.f32.mrf.mxu0  ;;  %2044 = vmatpush.bf16.msra.mxu2 %v9157_v41 }
 0x10c   : > { %v12754_v10 = vadd.f32 %v1715_v18, %v1666_v28  ;;  %v1619_v49 = vpop.f32.mrf.mxu1  ;;  %v9410_v18 = vld [vmem:[#allocation7 + $0x6b0] sm:$0xf0] }
 0x10d   : > { %v12756_v43 = vadd.f32 %v1619_v49, %v1570_v52  ;;  %v9413_v49 = vor.u32 %v11479_v46, %v9410_v18 }
 0x10f   : > { %2093 = vmatpush.bf16.msra.mxu3 %v9413_v49  ;;  %v11407_v49 = vld [vmem:[#allocation7 + $0x454] sm:$0xf] }
 0x112   : > { %v1668_v19 = vpop.f32.mrf.mxu2 }
 0x113   : > { %v1717_v11 = vpop.f32.mrf.mxu3  ;;  %v1573_v39 = vpop.f32.mrf.mxu0 }
 0x114   : > { %v12758_v26 = vadd.f32 %v1717_v11, %v1668_v19  ;;  %v1622_v51 = vpop.f32.mrf.mxu1  ;;  %v9152_v11 = vld [vmem:[#allocation7 + $0x490] sm:$0xf] }
 0x115   : > { %v12760_v28 = vadd.f32 %v1622_v51, %v1573_v39  ;;  %v11419_v39 = vld [vmem:[#allocation7 + $0x4ac] sm:$0xf0] }
 0x116   : > { %1768 = vmatmul.bf16.gmra.mxu0 %v12595_v5  ;;  %v9408_v51 = vld [vmem:[#allocation7 + $0x690] sm:$0xf]  ;;  %v9153_v36 = vor.u32 %v11419_v39, %v9152_v11 }
 0x117   : > { %1817 = vmatmul.bf16.gmra.mxu1 %v12598_v6  ;;  %1866 = vmatmul.bf16.gmra.mxu2 %v12595_v5  ;;  %v9409_v48 = vor.u32 %v11483_v35, %v9408_v51  ;;  %v9122_v35 = vld [vmem:[#allocation7 + $0x470] sm:$0xf0] }
 0x118   : > { %1915 = vmatmul.bf16.gmra.mxu3 %v12598_v6  ;;  %1946 = vmatpush.bf16.msra.mxu0 %v9153_v36  ;;  %v11471_v36 = vld [vmem:[#allocation7 + $0x654] sm:$0xf] }
 0x119   : > { %1995 = vmatpush.bf16.msra.mxu1 %v9409_v48  ;;  %v9125_v48 = vor.u32 %v11407_v49, %v9122_v35 }
 0x11a   : > { %v1671_v52 = vpop.f32.mrf.mxu2 }
 0x11b   : > { %v1720_v50 = vpop.f32.mrf.mxu3  ;;  %v1575_v12 = vpop.f32.mrf.mxu0  ;;  %2045 = vmatpush.bf16.msra.mxu2 %v9125_v48 }
 0x11c   : > { %v12766_v44 = vadd.f32 %v1720_v50, %v1671_v52  ;;  %v1624_v19 = vpop.f32.mrf.mxu1  ;;  %v9378_v50 = vld [vmem:[#allocation7 + $0x670] sm:$0xf0] }
 0x11d   : > { %v12768_v37 = vadd.f32 %v1624_v19, %v1575_v12  ;;  %v9381_v19 = vor.u32 %v11471_v36, %v9378_v50 }
 0x11f   : > { %16067 = vst [vmem:[#allocation36_spill] sm:$0xff] %v12768_v37  ;;  %2094 = vmatpush.bf16.msra.mxu3 %v9381_v19  ;;  %v11399_v19 = vld [vmem:[#allocation7 + $0x414] sm:$0xf] }
 0x122   : > { %v1673_v0 = vpop.f32.mrf.mxu2 }
 0x123   : > { %v1722_v45 = vpop.f32.mrf.mxu3  ;;  %v1578_v46 = vpop.f32.mrf.mxu0 }
 0x124   : > { %v12770_v18 = vadd.f32 %v1722_v45, %v1673_v0  ;;  %v1627_v41 = vpop.f32.mrf.mxu1  ;;  %v9120_v45 = vld [vmem:[#allocation7 + $0x450] sm:$0xf] }
 0x125   : > { %v12772_v52 = vadd.f32 %v1627_v41, %v1578_v46  ;;  %v11411_v46 = vld [vmem:[#allocation7 + $0x46c] sm:$0xf0] }
 0x126   : > { %16068 = vst [vmem:[#allocation37_spill] sm:$0xff] %v12770_v18  ;;  %1773 = vmatmul.bf16.gmra.mxu0 %v12625_v8  ;;  %v9376_v41 = vld [vmem:[#allocation7 + $0x650] sm:$0xf] }
 0x127   : > { %16069 = vst [vmem:[#allocation38_spill] sm:$0xff] %v12772_v52  ;;  %1822 = vmatmul.bf16.gmra.mxu1 %v12628_v9  ;;  %1871 = vmatmul.bf16.gmra.mxu2 %v12625_v8  ;;  %v9121_v52 = vor.u32 %v11411_v46, %v9120_v45  ;;  %v11475_v18 = vld [vmem:[#allocation7 + $0x66c] sm:$0xf0] }
 0x128   : > { %1920 = vmatmul.bf16.gmra.mxu3 %v12628_v9  ;;  %v9377_v37 = vor.u32 %v11475_v18, %v9376_v41  ;;  %v9090_v18 = vld [vmem:[#allocation7 + $0x430] sm:$0xf0] }
 0x129   : > { %1947 = vmatpush.bf16.msra.mxu0 %v9121_v52  ;;  %v11463_v52 = vld [vmem:[#allocation7 + $0x614] sm:$0xf] }
 0x12a   : > { %v1676_v12 = vpop.f32.mrf.mxu2  ;;  %1996 = vmatpush.bf16.msra.mxu1 %v9377_v37  ;;  %v9093_v37 = vor.u32 %v11399_v19, %v9090_v18 }
 0x12b   : > { %v1725_v11 = vpop.f32.mrf.mxu3  ;;  %v1580_v39 = vpop.f32.mrf.mxu0 }
 0x12c   : > { %v12778_v51 = vadd.f32 %v1725_v11, %v1676_v12  ;;  %v1629_v0 = vpop.f32.mrf.mxu1  ;;  %v9346_v11 = vld [vmem:[#allocation7 + $0x630] sm:$0xf0]  ;;  %2046 = vmatpush.bf16.msra.mxu2 %v9093_v37 }
 0x12d   : > { %v12780_v59 = vadd.f32 %v1629_v0, %v1580_v39  ;;  %v9349_v0 = vor.u32 %v11463_v52, %v9346_v11 }
 0x12e   : > { %16070 = vst [vmem:[#allocation39_spill] sm:$0xff] %v12778_v51 }
 0x12f   : > { %16071 = vst [vmem:[#allocation40_spill] sm:$0xff] %v12780_v59  ;;  %2095 = vmatpush.bf16.msra.mxu3 %v9349_v0  ;;  %v11467_v59 = vld [vmem:[#allocation7 + $0x62c] sm:$0xf0]  ;;  %v11456_v0 = vld [vmem:[#allocation7 + $0x5dc] sm:$0xf] }
 0x132   : > { %v1678_v49 = vpop.f32.mrf.mxu2 }
 0x133   : > { %v1727_v35 = vpop.f32.mrf.mxu3  ;;  %v1583_v36 = vpop.f32.mrf.mxu0 }
 0x134   : > { %v12782_v50 = vadd.f32 %v1727_v35, %v1678_v49  ;;  %v1632_v48 = vpop.f32.mrf.mxu1  ;;  %v9088_v35 = vld [vmem:[#allocation7 + $0x410] sm:$0xf] }
 0x135   : > { %v12784_v12 = vadd.f32 %v1632_v48, %v1583_v36  ;;  %v11403_v36 = vld [vmem:[#allocation7 + $0x42c] sm:$0xf0] }
 0x136   : > { %16072 = vst [vmem:[#allocation41_spill] sm:$0xff] %v12782_v50  ;;  %1778 = vmatmul.bf16.gmra.mxu0 %v12655_v32  ;;  %v9344_v48 = vld [vmem:[#allocation7 + $0x610] sm:$0xf]  ;;  %v9089_v50 = vor.u32 %v11403_v36, %v9088_v35 }
 0x137   : > { %16073 = vst [vmem:[#allocation42_spill] sm:$0xff] %v12784_v12  ;;  %1827 = vmatmul.bf16.gmra.mxu1 %v12659_v34  ;;  %1876 = vmatmul.bf16.gmra.mxu2 %v12655_v32  ;;  %v9345_v51 = vor.u32 %v11467_v59, %v9344_v48  ;;  %v9322_v59 = vld [vmem:[#allocation7 + $0x5f8] sm:$0xf0] }
 0x138   : > { %1925 = vmatmul.bf16.gmra.mxu3 %v12659_v34  ;;  %1948 = vmatpush.bf16.msra.mxu0 %v9089_v50  ;;  %v11520_v50 = vld [vmem:[#allocation7 + $0x7dc] sm:$0xf] }
 0x139   : > { %1997 = vmatpush.bf16.msra.mxu1 %v9345_v51  ;;  %v9325_v51 = vor.u32 %v11456_v0, %v9322_v59 }
 0x13a   : > { %v1681_v39 = vpop.f32.mrf.mxu2 }
 0x13b   : > { %v1730_v45 = vpop.f32.mrf.mxu3  ;;  %v1585_v46 = vpop.f32.mrf.mxu0  ;;  %2235 = vmatpush.bf16.msrb.mxu2 %v9325_v51 }
 0x13c   : > { %v12790_v41 = vadd.f32 %v1730_v45, %v1681_v39  ;;  %v1634_v49 = vpop.f32.mrf.mxu1  ;;  %v9578_v45 = vld [vmem:[#allocation7 + $0x7f8] sm:$0xf0] }
 0x13d   : > { %v12792_v12 = vadd.f32 %v1634_v49, %v1585_v46  ;;  %v9581_v49 = vor.u32 %v11520_v50, %v9578_v45 }
 0x13e   : > { %16074 = vst [vmem:[#allocation43_spill] sm:$0xff] %v12790_v41 }
 0x13f   : > { %16075 = vst [vmem:[#allocation44_spill] sm:$0xff] %v12792_v12  ;;  %2284 = vmatpush.bf16.msrb.mxu3 %v9581_v49  ;;  %v11524_v12 = vld [vmem:[#allocation7 + $0x7f4] sm:$0xf0]  ;;  %v11448_v49 = vld [vmem:[#allocation7 + $0x59c] sm:$0xf] }
 0x142   : > { %v1683_v19 = vpop.f32.mrf.mxu2 }
 0x143   : > { %v1732_v18 = vpop.f32.mrf.mxu3  ;;  %v1588_v52 = vpop.f32.mrf.mxu0 }
 0x144   : > { %v12794_v11 = vadd.f32 %v1732_v18, %v1683_v19  ;;  %v1637_v37 = vpop.f32.mrf.mxu1  ;;  %v9320_v18 = vld [vmem:[#allocation7 + $0x5d8] sm:$0xf] }
 0x145   : > { %v12796_v39 = vadd.f32 %v1637_v37, %v1588_v52  ;;  %v11460_v52 = vld [vmem:[#allocation7 + $0x5f4] sm:$0xf0] }
 0x146   : > { %16076 = vst [vmem:[#allocation45_spill] sm:$0xff] %v12794_v11  ;;  %1783 = vmatmul.bf16.gmra.mxu0 %v12689_v40  ;;  %v9576_v37 = vld [vmem:[#allocation7 + $0x7d8] sm:$0xf]  ;;  %v9321_v11 = vor.u32 %v11460_v52, %v9320_v18 }
 0x147   : > { %16077 = vst [vmem:[#allocation46_spill] sm:$0xff] %v12796_v39  ;;  %1832 = vmatmul.bf16.gmra.mxu1 %v12692_v47  ;;  %1881 = vmatmul.bf16.gmra.mxu2 %v12689_v40  ;;  %v9577_v41 = vor.u32 %v11524_v12, %v9576_v37  ;;  %v9290_v12 = vld [vmem:[#allocation7 + $0x5b8] sm:$0xf0] }
 0x148   : > { %1930 = vmatmul.bf16.gmra.mxu3 %v12692_v47  ;;  %2137 = vmatpush.bf16.msrb.mxu0 %v9321_v11  ;;  %v11512_v11 = vld [vmem:[#allocation7 + $0x79c] sm:$0xf] }
 0x149   : > { %2186 = vmatpush.bf16.msrb.mxu1 %v9577_v41  ;;  %v9293_v41 = vor.u32 %v11448_v49, %v9290_v12 }
 0x14a   : > { %v1686_v46 = vpop.f32.mrf.mxu2 }
 0x14b   : > { %v1735_v35 = vpop.f32.mrf.mxu3  ;;  %v1590_v36 = vpop.f32.mrf.mxu0  ;;  %2236 = vmatpush.bf16.msrb.mxu2 %v9293_v41 }
 0x14c   : > { %v12802_v48 = vadd.f32 %v1735_v35, %v1686_v46  ;;  %v1639_v19 = vpop.f32.mrf.mxu1  ;;  %v9546_v35 = vld [vmem:[#allocation7 + $0x7b8] sm:$0xf0] }
 0x14d   : > { %v12804_v39 = vadd.f32 %v1639_v19, %v1590_v36  ;;  %v9549_v19 = vor.u32 %v11512_v11, %v9546_v35 }
 0x14e   : > { %16078 = vst [vmem:[#allocation47_spill] sm:$0xff] %v12802_v48 }
 0x14f   : > { %16079 = vst [vmem:[#allocation48_spill] sm:$0xff] %v12804_v39  ;;  %2285 = vmatpush.bf16.msrb.mxu3 %v9549_v19  ;;  %v11516_v39 = vld [vmem:[#allocation7 + $0x7b4] sm:$0xf0]  ;;  %v11440_v19 = vld [vmem:[#allocation7 + $0x55c] sm:$0xf] }
 0x152   : > { %v1688_v0 = vpop.f32.mrf.mxu2 }
 0x153   : > { %v1737_v59 = vpop.f32.mrf.mxu3  ;;  %v1593_v50 = vpop.f32.mrf.mxu0 }
 0x154   : > { %v12806_v45 = vadd.f32 %v1737_v59, %v1688_v0  ;;  %v1642_v51 = vpop.f32.mrf.mxu1  ;;  %v9288_v59 = vld [vmem:[#allocation7 + $0x598] sm:$0xf] }
 0x155   : > { %v12808_v46 = vadd.f32 %v1642_v51, %v1593_v50  ;;  %v11452_v50 = vld [vmem:[#allocation7 + $0x5b4] sm:$0xf0] }
 0x156   : > { %16080 = vst [vmem:[#allocation49_spill] sm:$0xff] %v12806_v45  ;;  %1788 = vmatmul.bf16.gmra.mxu0 %v12715_v13  ;;  %v9544_v51 = vld [vmem:[#allocation7 + $0x798] sm:$0xf]  ;;  %v9289_v45 = vor.u32 %v11452_v50, %v9288_v59 }
 0x157   : > { %16081 = vst [vmem:[#allocation50_spill] sm:$0xff] %v12808_v46  ;;  %1837 = vmatmul.bf16.gmra.mxu1 %v12718_v54  ;;  %1886 = vmatmul.bf16.gmra.mxu2 %v12715_v13  ;;  %v9545_v48 = vor.u32 %v11516_v39, %v9544_v51  ;;  %v9258_v39 = vld [vmem:[#allocation7 + $0x578] sm:$0xf0] }
 0x158   : > { %1935 = vmatmul.bf16.gmra.mxu3 %v12718_v54  ;;  %2138 = vmatpush.bf16.msrb.mxu0 %v9289_v45  ;;  %v11504_v45 = vld [vmem:[#allocation7 + $0x75c] sm:$0xf] }
 0x159   : > { %2187 = vmatpush.bf16.msrb.mxu1 %v9545_v48  ;;  %v9261_v48 = vor.u32 %v11440_v19, %v9258_v39 }
 0x15a   : > { %v1691_v36 = vpop.f32.mrf.mxu2 }
 0x15b   : > { %v1740_v18 = vpop.f32.mrf.mxu3  ;;  %v1595_v52 = vpop.f32.mrf.mxu0  ;;  %2237 = vmatpush.bf16.msrb.mxu2 %v9261_v48 }
 0x15c   : > { %v12814_v37 = vadd.f32 %v1740_v18, %v1691_v36  ;;  %v1644_v0 = vpop.f32.mrf.mxu1  ;;  %v9514_v18 = vld [vmem:[#allocation7 + $0x778] sm:$0xf0] }
 0x15d   : > { %v12816_v46 = vadd.f32 %v1644_v0, %v1595_v52  ;;  %v9517_v0 = vor.u32 %v11504_v45, %v9514_v18 }
 0x15e   : > { %16082 = vst [vmem:[#allocation51_spill] sm:$0xff] %v12814_v37 }
 0x15f   : > { %16083 = vst [vmem:[#allocation52_spill] sm:$0xff] %v12816_v46  ;;  %2286 = vmatpush.bf16.msrb.mxu3 %v9517_v0  ;;  %v11508_v46 = vld [vmem:[#allocation7 + $0x774] sm:$0xf0]  ;;  %v11432_v0 = vld [vmem:[#allocation7 + $0x51c] sm:$0xf] }
 0x162   : > { %v1693_v49 = vpop.f32.mrf.mxu2 }
 0x163   : > { %v1742_v12 = vpop.f32.mrf.mxu3  ;;  %v1754_v11 = vpop.f32.mrf.mxu0 }
 0x164   : > { %v12818_v35 = vadd.f32 %v1742_v12, %v1693_v49  ;;  %v1803_v41 = vpop.f32.mrf.mxu1  ;;  %v9256_v12 = vld [vmem:[#allocation7 + $0x558] sm:$0xf] }
 0x165   : > { %v12820_v36 = vadd.f32 %v1803_v41, %v1754_v11  ;;  %v11444_v11 = vld [vmem:[#allocation7 + $0x574] sm:$0xf0] }
 0x166   : > { %16084 = vst [vmem:[#allocation53_spill] sm:$0xff] %v12818_v35  ;;  %1949 = vmatmul.bf16.vlgmr.msra.gmra.mxu0 %v12502_v3  ;;  %v9512_v41 = vld [vmem:[#allocation7 + $0x758] sm:$0xf]  ;;  %v9257_v35 = vor.u32 %v11444_v11, %v9256_v12 }
 0x167   : > { %16085 = vst [vmem:[#allocation54_spill] sm:$0xff] %v12820_v36  ;;  %1998 = vmatmul.bf16.vlgmr.msra.gmra.mxu1 %v12506_v7  ;;  %2047 = vmatmul.bf16.vlgmr.msra.gmra.mxu2 %v12502_v3  ;;  %v9513_v37 = vor.u32 %v11508_v46, %v9512_v41  ;;  %v9226_v46 = vld [vmem:[#allocation7 + $0x538] sm:$0xf0] }
 0x168   : > { %2096 = vmatmul.bf16.vlgmr.msra.gmra.mxu3 %v12506_v7  ;;  %2139 = vmatpush.bf16.msrb.mxu0 %v9257_v35  ;;  %v11496_v35 = vld [vmem:[#allocation7 + $0x71c] sm:$0xf] }
 0x169   : > { %2188 = vmatpush.bf16.msrb.mxu1 %v9513_v37  ;;  %v9229_v37 = vor.u32 %v11432_v0, %v9226_v46 }
 0x16a   : > { %v1852_v52 = vpop.f32.mrf.mxu2 }
 0x16b   : > { %v1901_v59 = vpop.f32.mrf.mxu3  ;;  %v1756_v50 = vpop.f32.mrf.mxu0  ;;  %2238 = vmatpush.bf16.msrb.mxu2 %v9229_v37 }
 0x16c   : > { %v12826_v51 = vadd.f32 %v1901_v59, %v1852_v52  ;;  %v1805_v49 = vpop.f32.mrf.mxu1  ;;  %v9482_v59 = vld [vmem:[#allocation7 + $0x738] sm:$0xf0] }
 0x16d   : > { %v12828_v36 = vadd.f32 %v1805_v49, %v1756_v50  ;;  %v9485_v49 = vor.u32 %v11496_v35, %v9482_v59 }
 0x16e   : > { %16086 = vst [vmem:[#allocation55_spill] sm:$0xff] %v12826_v51 }
 0x16f   : > { %16087 = vst [vmem:[#allocation56_spill] sm:$0xff] %v12828_v36  ;;  %2287 = vmatpush.bf16.msrb.mxu3 %v9485_v49  ;;  %v11500_v36 = vld [vmem:[#allocation7 + $0x734] sm:$0xf0]  ;;  %v11424_v49 = vld [vmem:[#allocation7 + $0x4dc] sm:$0xf] }
 0x172   : > { %v1854_v19 = vpop.f32.mrf.mxu2 }
 0x173   : > { %v1903_v39 = vpop.f32.mrf.mxu3  ;;  %v1759_v45 = vpop.f32.mrf.mxu0 }
 0x174   : > { %v12830_v18 = vadd.f32 %v1903_v39, %v1854_v19  ;;  %v1808_v48 = vpop.f32.mrf.mxu1  ;;  %v9224_v39 = vld [vmem:[#allocation7 + $0x518] sm:$0xf] }
 0x175   : > { %v12832_v52 = vadd.f32 %v1808_v48, %v1759_v45  ;;  %v11436_v45 = vld [vmem:[#allocation7 + $0x534] sm:$0xf0] }
 0x176   : > { %16088 = vst [vmem:[#allocation57_spill] sm:$0xff] %v12830_v18  ;;  %1954 = vmatmul.bf16.gmra.mxu0 %v12535_v55  ;;  %v9480_v48 = vld [vmem:[#allocation7 + $0x718] sm:$0xf]  ;;  %v9225_v18 = vor.u32 %v11436_v45, %v9224_v39 }
 0x177   : > { %16089 = vst [vmem:[#allocation58_spill] sm:$0xff] %v12832_v52  ;;  %2003 = vmatmul.bf16.gmra.mxu1 %v12538_v56  ;;  %2052 = vmatmul.bf16.gmra.mxu2 %v12535_v55  ;;  %v9481_v51 = vor.u32 %v11500_v36, %v9480_v48  ;;  %v9194_v36 = vld [vmem:[#allocation7 + $0x4f8] sm:$0xf0] }
 0x178   : > { %2101 = vmatmul.bf16.gmra.mxu3 %v12538_v56  ;;  %2140 = vmatpush.bf16.msrb.mxu0 %v9225_v18  ;;  %v11488_v18 = vld [vmem:[#allocation7 + $0x6dc] sm:$0xf] }
 0x179   : > { %2189 = vmatpush.bf16.msrb.mxu1 %v9481_v51  ;;  %v9197_v51 = vor.u32 %v11424_v49, %v9194_v36 }
 0x17a   : > { %v1857_v50 = vpop.f32.mrf.mxu2 }
 0x17b   : > { %v1906_v12 = vpop.f32.mrf.mxu3  ;;  %v1761_v11 = vpop.f32.mrf.mxu0  ;;  %2239 = vmatpush.bf16.msrb.mxu2 %v9197_v51 }
 0x17c   : > { %v12838_v41 = vadd.f32 %v1906_v12, %v1857_v50  ;;  %v1810_v19 = vpop.f32.mrf.mxu1  ;;  %v9450_v12 = vld [vmem:[#allocation7 + $0x6f8] sm:$0xf0] }
 0x17d   : > { %v12840_v52 = vadd.f32 %v1810_v19, %v1761_v11  ;;  %v9453_v19 = vor.u32 %v11488_v18, %v9450_v12 }
 0x17e   : > { %16090 = vst [vmem:[#allocation59_spill] sm:$0xff] %v12838_v41 }
 0x17f   : > { %16091 = vst [vmem:[#allocation60_spill] sm:$0xff] %v12840_v52  ;;  %2288 = vmatpush.bf16.msrb.mxu3 %v9453_v19  ;;  %v11492_v52 = vld [vmem:[#allocation7 + $0x6f4] sm:$0xf0]  ;;  %v11416_v19 = vld [vmem:[#allocation7 + $0x49c] sm:$0xf] }
 0x182   : > { %v1859_v0 = vpop.f32.mrf.mxu2 }
 0x183   : > { %v1908_v46 = vpop.f32.mrf.mxu3  ;;  %v1764_v35 = vpop.f32.mrf.mxu0 }
 0x184   : > { %v12842_v59 = vadd.f32 %v1908_v46, %v1859_v0  ;;  %v1813_v37 = vpop.f32.mrf.mxu1  ;;  %v9192_v46 = vld [vmem:[#allocation7 + $0x4d8] sm:$0xf] }
 0x185   : > { %v12844_v50 = vadd.f32 %v1813_v37, %v1764_v35  ;;  %v11428_v35 = vld [vmem:[#allocation7 + $0x4f4] sm:$0xf0] }
 0x186   : > { %16092 = vst [vmem:[#allocation61_spill] sm:$0xff] %v12842_v59  ;;  %1959 = vmatmul.bf16.gmra.mxu0 %v12565_v22  ;;  %v9448_v37 = vld [vmem:[#allocation7 + $0x6d8] sm:$0xf]  ;;  %v9193_v59 = vor.u32 %v11428_v35, %v9192_v46 }
 0x187   : > { %16093 = vst [vmem:[#allocation62_spill] sm:$0xff] %v12844_v50  ;;  %2008 = vmatmul.bf16.gmra.mxu1 %v12568_v23  ;;  %2057 = vmatmul.bf16.gmra.mxu2 %v12565_v22  ;;  %v9449_v41 = vor.u32 %v11492_v52, %v9448_v37  ;;  %v9162_v52 = vld [vmem:[#allocation7 + $0x4b8] sm:$0xf0] }
 0x188   : > { %2106 = vmatmul.bf16.gmra.mxu3 %v12568_v23  ;;  %2141 = vmatpush.bf16.msrb.mxu0 %v9193_v59  ;;  %v11480_v59 = vld [vmem:[#allocation7 + $0x69c] sm:$0xf] }
 0x189   : > { %2190 = vmatpush.bf16.msrb.mxu1 %v9449_v41  ;;  %v9165_v41 = vor.u32 %v11416_v19, %v9162_v52 }
 0x18a   : > { %v1862_v11 = vpop.f32.mrf.mxu2 }
 0x18b   : > { %v1911_v39 = vpop.f32.mrf.mxu3  ;;  %v1766_v45 = vpop.f32.mrf.mxu0  ;;  %2240 = vmatpush.bf16.msrb.mxu2 %v9165_v41 }
 0x18c   : > { %v12850_v48 = vadd.f32 %v1911_v39, %v1862_v11  ;;  %v1815_v0 = vpop.f32.mrf.mxu1  ;;  %v9418_v39 = vld [vmem:[#allocation7 + $0x6b8] sm:$0xf0] }
 0x18d   : > { %v12852_v50 = vadd.f32 %v1815_v0, %v1766_v45  ;;  %v9421_v0 = vor.u32 %v11480_v59, %v9418_v39 }
 0x18e   : > { %16094 = vst [vmem:[#allocation63_spill] sm:$0xff] %v12850_v48 }
 0x18f   : > { %16095 = vst [vmem:[#allocation64_spill] sm:$0xff] %v12852_v50  ;;  %2289 = vmatpush.bf16.msrb.mxu3 %v9421_v0  ;;  %v11484_v50 = vld [vmem:[#allocation7 + $0x6b4] sm:$0xf0]  ;;  %v11408_v0 = vld [vmem:[#allocation7 + $0x45c] sm:$0xf] }
 0x192   : > { %v1864_v49 = vpop.f32.mrf.mxu2 }
 0x193   : > { %v1913_v36 = vpop.f32.mrf.mxu3  ;;  %v1769_v18 = vpop.f32.mrf.mxu0 }
 0x194   : > { %v12854_v12 = vadd.f32 %v1913_v36, %v1864_v49  ;;  %v1818_v51 = vpop.f32.mrf.mxu1  ;;  %v9160_v36 = vld [vmem:[#allocation7 + $0x498] sm:$0xf] }
 0x195   : > { %v12856_v11 = vadd.f32 %v1818_v51, %v1769_v18  ;;  %v11420_v18 = vld [vmem:[#allocation7 + $0x4b4] sm:$0xf0] }
 0x196   : > { %16096 = vst [vmem:[#allocation65_spill] sm:$0xff] %v12854_v12  ;;  %1964 = vmatmul.bf16.gmra.mxu0 %v12595_v5  ;;  %v9416_v51 = vld [vmem:[#allocation7 + $0x698] sm:$0xf]  ;;  %v9161_v12 = vor.u32 %v11420_v18, %v9160_v36 }
 0x197   : > { %16097 = vst [vmem:[#allocation66_spill] sm:$0xff] %v12856_v11  ;;  %2013 = vmatmul.bf16.gmra.mxu1 %v12598_v6  ;;  %2062 = vmatmul.bf16.gmra.mxu2 %v12595_v5  ;;  %v9417_v48 = vor.u32 %v11484_v50, %v9416_v51  ;;  %v9130_v50 = vld [vmem:[#allocation7 + $0x478] sm:$0xf0] }
 0x198   : > { %2111 = vmatmul.bf16.gmra.mxu3 %v12598_v6  ;;  %2142 = vmatpush.bf16.msrb.mxu0 %v9161_v12  ;;  %v11472_v12 = vld [vmem:[#allocation7 + $0x65c] sm:$0xf] }
 0x199   : > { %2191 = vmatpush.bf16.msrb.mxu1 %v9417_v48  ;;  %v9133_v48 = vor.u32 %v11408_v0, %v9130_v50 }
 0x19a   : > { %v1867_v45 = vpop.f32.mrf.mxu2 }
 0x19b   : > { %v1916_v46 = vpop.f32.mrf.mxu3  ;;  %v1771_v35 = vpop.f32.mrf.mxu0  ;;  %2241 = vmatpush.bf16.msrb.mxu2 %v9133_v48 }
 0x19c   : > { %v12862_v37 = vadd.f32 %v1916_v46, %v1867_v45  ;;  %v1820_v49 = vpop.f32.mrf.mxu1  ;;  %v9386_v46 = vld [vmem:[#allocation7 + $0x678] sm:$0xf0] }
 0x19d   : > { %v12864_v11 = vadd.f32 %v1820_v49, %v1771_v35  ;;  %v9389_v49 = vor.u32 %v11472_v12, %v9386_v46 }
 0x19e   : > { %16098 = vst [vmem:[#allocation67_spill] sm:$0xff] %v12862_v37 }
 0x19f   : > { %16099 = vst [vmem:[#allocation68_spill] sm:$0xff] %v12864_v11  ;;  %2290 = vmatpush.bf16.msrb.mxu3 %v9389_v49  ;;  %v11476_v11 = vld [vmem:[#allocation7 + $0x674] sm:$0xf0]  ;;  %v11400_v49 = vld [vmem:[#allocation7 + $0x41c] sm:$0xf] }
 0x1a2   : > { %v1869_v19 = vpop.f32.mrf.mxu2 }
 0x1a3   : > { %v1918_v52 = vpop.f32.mrf.mxu3  ;;  %v1774_v59 = vpop.f32.mrf.mxu0 }
 0x1a4   : > { %v12866_v39 = vadd.f32 %v1918_v52, %v1869_v19  ;;  %v1823_v41 = vpop.f32.mrf.mxu1  ;;  %v9128_v52 = vld [vmem:[#allocation7 + $0x458] sm:$0xf] }
 0x1a5   : > { %v12868_v45 = vadd.f32 %v1823_v41, %v1774_v59  ;;  %v11412_v59 = vld [vmem:[#allocation7 + $0x474] sm:$0xf0] }
 0x1a6   : > { %16100 = vst [vmem:[#allocation69_spill] sm:$0xff] %v12866_v39  ;;  %1969 = vmatmul.bf16.gmra.mxu0 %v12625_v8  ;;  %v9384_v41 = vld [vmem:[#allocation7 + $0x658] sm:$0xf]  ;;  %v9129_v39 = vor.u32 %v11412_v59, %v9128_v52 }
 0x1a7   : > { %16101 = vst [vmem:[#allocation70_spill] sm:$0xff] %v12868_v45  ;;  %2018 = vmatmul.bf16.gmra.mxu1 %v12628_v9  ;;  %2067 = vmatmul.bf16.gmra.mxu2 %v12625_v8  ;;  %v9385_v37 = vor.u32 %v11476_v11, %v9384_v41  ;;  %v9098_v11 = vld [vmem:[#allocation7 + $0x438] sm:$0xf0] }
 0x1a8   : > { %2116 = vmatmul.bf16.gmra.mxu3 %v12628_v9  ;;  %2143 = vmatpush.bf16.msrb.mxu0 %v9129_v39  ;;  %v11464_v39 = vld [vmem:[#allocation7 + $0x61c] sm:$0xf] }
 0x1a9   : > { %2192 = vmatpush.bf16.msrb.mxu1 %v9385_v37  ;;  %v9101_v37 = vor.u32 %v11400_v49, %v9098_v11 }
 0x1aa   : > { %v1872_v35 = vpop.f32.mrf.mxu2 }
 0x1ab   : > { %v1921_v36 = vpop.f32.mrf.mxu3  ;;  %v1776_v18 = vpop.f32.mrf.mxu0  ;;  %2242 = vmatpush.bf16.msrb.mxu2 %v9101_v37 }
 0x1ac   : > { %v12874_v51 = vadd.f32 %v1921_v36, %v1872_v35  ;;  %v1825_v19 = vpop.f32.mrf.mxu1  ;;  %v9354_v36 = vld [vmem:[#allocation7 + $0x638] sm:$0xf0] }
 0x1ad   : > { %v12876_v45 = vadd.f32 %v1825_v19, %v1776_v18  ;;  %v9357_v19 = vor.u32 %v11464_v39, %v9354_v36 }
 0x1ae   : > { %16102 = vst [vmem:[#allocation71_spill] sm:$0xff] %v12874_v51 }
 0x1af   : > { %16103 = vst [vmem:[#allocation72_spill] sm:$0xff] %v12876_v45  ;;  %2291 = vmatpush.bf16.msrb.mxu3 %v9357_v19  ;;  %v11468_v45 = vld [vmem:[#allocation7 + $0x634] sm:$0xf0]  ;;  %v11323_v19 = vld [vmem:[#allocation7 + $0x1c4] sm:$0xf] }
 0x1b2   : > { %v1874_v0 = vpop.f32.mrf.mxu2 }
 0x1b3   : > { %v1923_v50 = vpop.f32.mrf.mxu3  ;;  %v1779_v12 = vpop.f32.mrf.mxu0 }
 0x1b4   : > { %v12878_v46 = vadd.f32 %v1923_v50, %v1874_v0  ;;  %v1828_v48 = vpop.f32.mrf.mxu1  ;;  %v9096_v50 = vld [vmem:[#allocation7 + $0x418] sm:$0xf] }
 0x1b5   : > { %v12880_v35 = vadd.f32 %v1828_v48, %v1779_v12  ;;  %v11404_v12 = vld [vmem:[#allocation7 + $0x434] sm:$0xf0] }
 0x1b6   : > { %16104 = vst [vmem:[#allocation73_spill] sm:$0xff] %v12878_v46  ;;  %1974 = vmatmul.bf16.gmra.mxu0 %v12655_v32  ;;  %v9352_v48 = vld [vmem:[#allocation7 + $0x618] sm:$0xf]  ;;  %v9097_v46 = vor.u32 %v11404_v12, %v9096_v50 }
 0x1b7   : > { %16105 = vst [vmem:[#allocation74_spill] sm:$0xff] %v12880_v35  ;;  %2023 = vmatmul.bf16.gmra.mxu1 %v12659_v34  ;;  %2072 = vmatmul.bf16.gmra.mxu2 %v12655_v32  ;;  %v9353_v51 = vor.u32 %v11468_v45, %v9352_v48  ;;  %v9810_v45 = vld [vmem:[#allocation7 + $0x1e0] sm:$0xf0] }
 0x1b8   : > { %2121 = vmatmul.bf16.gmra.mxu3 %v12659_v34  ;;  %2144 = vmatpush.bf16.msrb.mxu0 %v9097_v46  ;;  %v11387_v46 = vld [vmem:[#allocation7 + $0x3c4] sm:$0xf] }
 0x1b9   : > { %2193 = vmatpush.bf16.msrb.mxu1 %v9353_v51  ;;  %v9813_v51 = vor.u32 %v11323_v19, %v9810_v45 }
 0x1ba   : > { %v1877_v18 = vpop.f32.mrf.mxu2 }
 0x1bb   : > { %v1926_v52 = vpop.f32.mrf.mxu3  ;;  %v1781_v59 = vpop.f32.mrf.mxu0  ;;  %3071 = vmatpush.bf16.msra.mxu2 %v9813_v51 }
 0x1bc   : > { %v12886_v41 = vadd.f32 %v1926_v52, %v1877_v18  ;;  %v1830_v0 = vpop.f32.mrf.mxu1  ;;  %v10066_v52 = vld [vmem:[#allocation7 + $0x3e0] sm:$0xf0] }
 0x1bd   : > { %v12888_v35 = vadd.f32 %v1830_v0, %v1781_v59  ;;  %v10069_v0 = vor.u32 %v11387_v46, %v10066_v52 }
 0x1be   : > { %16106 = vst [vmem:[#allocation75_spill] sm:$0xff] %v12886_v41 }
 0x1bf   : > { %16107 = vst [vmem:[#allocation76_spill] sm:$0xff] %v12888_v35  ;;  %3120 = vmatpush.bf16.msra.mxu3 %v10069_v0  ;;  %v11391_v35 = vld [vmem:[#allocation7 + $0x3dc] sm:$0xf0]  ;;  %v11315_v0 = vld [vmem:[#allocation7 + $0x184] sm:$0xf] }
 0x1c2   : > { %v1879_v49 = vpop.f32.mrf.mxu2 }
 0x1c3   : > { %v1928_v11 = vpop.f32.mrf.mxu3  ;;  %v1784_v39 = vpop.f32.mrf.mxu0 }
 0x1c4   : > { %v12890_v36 = vadd.f32 %v1928_v11, %v1879_v49  ;;  %v1833_v37 = vpop.f32.mrf.mxu1  ;;  %v9808_v11 = vld [vmem:[#allocation7 + $0x1c0] sm:$0xf] }
 0x1c5   : > { %v12892_v18 = vadd.f32 %v1833_v37, %v1784_v39  ;;  %v11327_v39 = vld [vmem:[#allocation7 + $0x1dc] sm:$0xf0] }
 0x1c6   : > { %16108 = vst [vmem:[#allocation77_spill] sm:$0xff] %v12890_v36  ;;  %1979 = vmatmul.bf16.gmra.mxu0 %v12689_v40  ;;  %v10064_v37 = vld [vmem:[#allocation7 + $0x3c0] sm:$0xf]  ;;  %v9809_v36 = vor.u32 %v11327_v39, %v9808_v11 }
 0x1c7   : > { %16109 = vst [vmem:[#allocation78_spill] sm:$0xff] %v12892_v18  ;;  %2028 = vmatmul.bf16.gmra.mxu1 %v12692_v47  ;;  %2077 = vmatmul.bf16.gmra.mxu2 %v12689_v40  ;;  %v10065_v41 = vor.u32 %v11391_v35, %v10064_v37  ;;  %v9778_v35 = vld [vmem:[#allocation7 + $0x1a0] sm:$0xf0] }
 0x1c8   : > { %2126 = vmatmul.bf16.gmra.mxu3 %v12692_v47  ;;  %2973 = vmatpush.bf16.msra.mxu0 %v9809_v36  ;;  %v11379_v36 = vld [vmem:[#allocation7 + $0x384] sm:$0xf] }
 0x1c9   : > { %3022 = vmatpush.bf16.msra.mxu1 %v10065_v41  ;;  %v9781_v41 = vor.u32 %v11315_v0, %v9778_v35 }
 0x1ca   : > { %v1882_v59 = vpop.f32.mrf.mxu2 }
 0x1cb   : > { %v1931_v50 = vpop.f32.mrf.mxu3  ;;  %v1786_v12 = vpop.f32.mrf.mxu0  ;;  %3072 = vmatpush.bf16.msra.mxu2 %v9781_v41 }
 0x1cc   : > { %v12898_v48 = vadd.f32 %v1931_v50, %v1882_v59  ;;  %v1835_v49 = vpop.f32.mrf.mxu1  ;;  %v10034_v50 = vld [vmem:[#allocation7 + $0x3a0] sm:$0xf0] }
 0x1cd   : > { %v12900_v18 = vadd.f32 %v1835_v49, %v1786_v12  ;;  %v10037_v49 = vor.u32 %v11379_v36, %v10034_v50 }
 0x1ce   : > { %16110 = vst [vmem:[#allocation79_spill] sm:$0xff] %v12898_v48 }
 0x1cf   : > { %16111 = vst [vmem:[#allocation80_spill] sm:$0xff] %v12900_v18  ;;  %3121 = vmatpush.bf16.msra.mxu3 %v10037_v49  ;;  %v11383_v18 = vld [vmem:[#allocation7 + $0x39c] sm:$0xf0]  ;;  %v11307_v49 = vld [vmem:[#allocation7 + $0x144] sm:$0xf] }
 0x1d2   : > { %v1884_v19 = vpop.f32.mrf.mxu2 }
 0x1d3   : > { %v1933_v45 = vpop.f32.mrf.mxu3  ;;  %v1789_v46 = vpop.f32.mrf.mxu0 }
 0x1d4   : > { %v12902_v52 = vadd.f32 %v1933_v45, %v1884_v19  ;;  %v1838_v51 = vpop.f32.mrf.mxu1  ;;  %v9776_v45 = vld [vmem:[#allocation7 + $0x180] sm:$0xf] }
 0x1d5   : > { %v12904_v59 = vadd.f32 %v1838_v51, %v1789_v46  ;;  %v11319_v46 = vld [vmem:[#allocation7 + $0x19c] sm:$0xf0] }
 0x1d6   : > { %16112 = vst [vmem:[#allocation81_spill] sm:$0xff] %v12902_v52  ;;  %1984 = vmatmul.bf16.gmra.mxu0 %v12715_v13  ;;  %v10032_v51 = vld [vmem:[#allocation7 + $0x380] sm:$0xf]  ;;  %v9777_v52 = vor.u32 %v11319_v46, %v9776_v45 }
 0x1d7   : > { %16113 = vst [vmem:[#allocation82_spill] sm:$0xff] %v12904_v59  ;;  %2033 = vmatmul.bf16.gmra.mxu1 %v12718_v54  ;;  %2082 = vmatmul.bf16.gmra.mxu2 %v12715_v13  ;;  %v10033_v48 = vor.u32 %v11383_v18, %v10032_v51  ;;  %v9746_v18 = vld [vmem:[#allocation7 + $0x160] sm:$0xf0] }
 0x1d8   : > { %2131 = vmatmul.bf16.gmra.mxu3 %v12718_v54  ;;  %2974 = vmatpush.bf16.msra.mxu0 %v9777_v52  ;;  %v11371_v52 = vld [vmem:[#allocation7 + $0x344] sm:$0xf] }
 0x1d9   : > { %3023 = vmatpush.bf16.msra.mxu1 %v10033_v48  ;;  %v9749_v48 = vor.u32 %v11307_v49, %v9746_v18 }
 0x1da   : > { %v1887_v12 = vpop.f32.mrf.mxu2 }
 0x1db   : > { %v1936_v11 = vpop.f32.mrf.mxu3  ;;  %v1791_v39 = vpop.f32.mrf.mxu0  ;;  %3073 = vmatpush.bf16.msra.mxu2 %v9749_v48 }
 0x1dc   : > { %v12910_v37 = vadd.f32 %v1936_v11, %v1887_v12  ;;  %v1840_v19 = vpop.f32.mrf.mxu1  ;;  %v10002_v11 = vld [vmem:[#allocation7 + $0x360] sm:$0xf0] }
 0x1dd   : > { %v12912_v59 = vadd.f32 %v1840_v19, %v1791_v39  ;;  %v10005_v19 = vor.u32 %v11371_v52, %v10002_v11 }
 0x1df   : > { %3122 = vmatpush.bf16.msra.mxu3 %v10005_v19  ;;  %v11299_v19 = vld [vmem:[#allocation7 + $0x104] sm:$0xf] }
 0x1e2   : > { %v1889_v0 = vpop.f32.mrf.mxu2 }
 0x1e3   : > { %v1938_v35 = vpop.f32.mrf.mxu3  ;;  %v1950_v36 = vpop.f32.mrf.mxu0 }
 0x1e4   : > { %v12914_v50 = vadd.f32 %v1938_v35, %v1889_v0  ;;  %v1999_v41 = vpop.f32.mrf.mxu1  ;;  %v9744_v35 = vld [vmem:[#allocation7 + $0x140] sm:$0xf] }
 0x1e5   : > { %v12916_v12 = vadd.f32 %v1999_v41, %v1950_v36  ;;  %v11311_v36 = vld [vmem:[#allocation7 + $0x15c] sm:$0xf0] }
 0x1e6   : > { %16114 = vst [vmem:[#allocation83_spill] sm:$0xff] %v12914_v50  ;;  %2145 = vmatmul.bf16.vlgmr.msrb.gmra.mxu0 %v12502_v3  ;;  %v10000_v41 = vld [vmem:[#allocation7 + $0x340] sm:$0xf] }
 0x1e7   : > { %16115 = vst [vmem:[#allocation84_spill] sm:$0xff] %v12916_v12  ;;  %2194 = vmatmul.bf16.vlgmr.msrb.gmra.mxu1 %v12506_v7  ;;  %2243 = vmatmul.bf16.vlgmr.msrb.gmra.mxu2 %v12502_v3  ;;  %v11375_v12 = vld [vmem:[#allocation7 + $0x35c] sm:$0xf0] }
 0x1e8   : > { %2292 = vmatmul.bf16.vlgmr.msrb.gmra.mxu3 %v12506_v7  ;;  %v9745_v7 = vor.u32 %v11311_v36, %v9744_v35  ;;  %v10001_v50 = vor.u32 %v11375_v12, %v10000_v41  ;;  %v9714_v12 = vld [vmem:[#allocation7 + $0x120] sm:$0xf0] }
 0x1ea   : > { %v2048_v39 = vpop.f32.mrf.mxu2  ;;  %2975 = vmatpush.bf16.msra.mxu0 %v9745_v7  ;;  %3024 = vmatpush.bf16.msra.mxu1 %v10001_v50  ;;  %v9717_v50 = vor.u32 %v11299_v19, %v9714_v12 }
 0x1eb   : > { %v2097_v45 = vpop.f32.mrf.mxu3  ;;  %v1952_v46 = vpop.f32.mrf.mxu0 }
 0x1ec   : > { %v12922_v51 = vadd.f32 %v2097_v45, %v2048_v39  ;;  %v2001_v0 = vpop.f32.mrf.mxu1  ;;  %v11363_v45 = vld [vmem:[#allocation7 + $0x304] sm:$0xf]  ;;  %3074 = vmatpush.bf16.msra.mxu2 %v9717_v50 }
 0x1ed   : > { %v12924_v3 = vadd.f32 %v2001_v0, %v1952_v46  ;;  %v9970_v46 = vld [vmem:[#allocation7 + $0x320] sm:$0xf0] }
 0x1ee   : > { %v9973_v35 = vor.u32 %v11363_v45, %v9970_v46 }
 0x1f0   : > { %3123 = vmatpush.bf16.msra.mxu3 %v9973_v35  ;;  %v11291_v35 = vld [vmem:[#allocation7 + $0xc4] sm:$0xf] }
 0x1f2   : > { %v2050_v49 = vpop.f32.mrf.mxu2 }
 0x1f3   : > { %v2099_v18 = vpop.f32.mrf.mxu3  ;;  %v1955_v52 = vpop.f32.mrf.mxu0 }
 0x1f4   : > { %v12926_v11 = vadd.f32 %v2099_v18, %v2050_v49  ;;  %v2004_v48 = vpop.f32.mrf.mxu1  ;;  %v9712_v18 = vld [vmem:[#allocation7 + $0x100] sm:$0xf] }
 0x1f5   : > { %v12928_v39 = vadd.f32 %v2004_v48, %v1955_v52  ;;  %v11303_v52 = vld [vmem:[#allocation7 + $0x11c] sm:$0xf0] }
 0x1f6   : > { %16116 = vst [vmem:[#allocation85_spill] sm:$0xff] %v12926_v11  ;;  %2150 = vmatmul.bf16.gmra.mxu0 %v12535_v55  ;;  %v9968_v48 = vld [vmem:[#allocation7 + $0x300] sm:$0xf] }
 0x1f7   : > { %16117 = vst [vmem:[#allocation86_spill] sm:$0xff] %v12928_v39  ;;  %2199 = vmatmul.bf16.gmra.mxu1 %v12538_v56  ;;  %2248 = vmatmul.bf16.gmra.mxu2 %v12535_v55  ;;  %v11367_v39 = vld [vmem:[#allocation7 + $0x31c] sm:$0xf0] }
 0x1f8   : > { %2297 = vmatmul.bf16.gmra.mxu3 %v12538_v56  ;;  %v9713_v56 = vor.u32 %v11303_v52, %v9712_v18  ;;  %v9969_v11 = vor.u32 %v11367_v39, %v9968_v48  ;;  %v9682_v39 = vld [vmem:[#allocation7 + $0xe0] sm:$0xf0] }
 0x1fa   : > { %v2053_v0 = vpop.f32.mrf.mxu2  ;;  %2976 = vmatpush.bf16.msra.mxu0 %v9713_v56  ;;  %3025 = vmatpush.bf16.msra.mxu1 %v9969_v11  ;;  %v9685_v11 = vor.u32 %v11291_v35, %v9682_v39 }
 0x1fb   : > { %v2102_v36 = vpop.f32.mrf.mxu3  ;;  %v1957_v41 = vpop.f32.mrf.mxu0 }
 0x1fc   : > { %v12934_v7 = vadd.f32 %v2102_v36, %v2053_v0  ;;  %v2006_v49 = vpop.f32.mrf.mxu1  ;;  %v11355_v36 = vld [vmem:[#allocation7 + $0x2c4] sm:$0xf]  ;;  %3075 = vmatpush.bf16.msra.mxu2 %v9685_v11 }
 0x1fd   : > { %v12936_v55 = vadd.f32 %v2006_v49, %v1957_v41  ;;  %v9938_v41 = vld [vmem:[#allocation7 + $0x2e0] sm:$0xf0] }
 0x1fe   : > { %v9941_v18 = vor.u32 %v11355_v36, %v9938_v41 }
 0x200   : > { %3124 = vmatpush.bf16.msra.mxu3 %v9941_v18  ;;  %v11283_v18 = vld [vmem:[#allocation7 + $0x84] sm:$0xf] }
 0x202   : > { %v2055_v19 = vpop.f32.mrf.mxu2 }
 0x203   : > { %v2104_v12 = vpop.f32.mrf.mxu3  ;;  %v1960_v45 = vpop.f32.mrf.mxu0 }
 0x204   : > { %v12938_v46 = vadd.f32 %v2104_v12, %v2055_v19  ;;  %v2009_v50 = vpop.f32.mrf.mxu1  ;;  %v9680_v12 = vld [vmem:[#allocation7 + $0xc0] sm:$0xf] }
 0x205   : > { %v12940_v0 = vadd.f32 %v2009_v50, %v1960_v45  ;;  %v11295_v45 = vld [vmem:[#allocation7 + $0xdc] sm:$0xf0] }
 0x206   : > { %16118 = vst [vmem:[#allocation87_spill] sm:$0xff] %v12938_v46  ;;  %2155 = vmatmul.bf16.gmra.mxu0 %v12565_v22  ;;  %v9936_v50 = vld [vmem:[#allocation7 + $0x2c0] sm:$0xf] }
 0x207   : > { %16119 = vst [vmem:[#allocation88_spill] sm:$0xff] %v12940_v0  ;;  %2204 = vmatmul.bf16.gmra.mxu1 %v12568_v23  ;;  %2253 = vmatmul.bf16.gmra.mxu2 %v12565_v22  ;;  %v11359_v0 = vld [vmem:[#allocation7 + $0x2dc] sm:$0xf0] }
 0x208   : > { %2302 = vmatmul.bf16.gmra.mxu3 %v12568_v23  ;;  %v9681_v23 = vor.u32 %v11295_v45, %v9680_v12  ;;  %v9937_v46 = vor.u32 %v11359_v0, %v9936_v50  ;;  %v9650_v0 = vld [vmem:[#allocation7 + $0xa0] sm:$0xf0] }
 0x20a   : > { %v2058_v49 = vpop.f32.mrf.mxu2  ;;  %2977 = vmatpush.bf16.msra.mxu0 %v9681_v23  ;;  %3026 = vmatpush.bf16.msra.mxu1 %v9937_v46  ;;  %v9653_v46 = vor.u32 %v11283_v18, %v9650_v0 }
 0x20b   : > { %v2107_v52 = vpop.f32.mrf.mxu3  ;;  %v1962_v48 = vpop.f32.mrf.mxu0 }
 0x20c   : > { %v12946_v56 = vadd.f32 %v2107_v52, %v2058_v49  ;;  %v2011_v19 = vpop.f32.mrf.mxu1  ;;  %v11347_v52 = vld [vmem:[#allocation7 + $0x284] sm:$0xf]  ;;  %3076 = vmatpush.bf16.msra.mxu2 %v9653_v46 }
 0x20d   : > { %v12948_v22 = vadd.f32 %v2011_v19, %v1962_v48  ;;  %v9906_v48 = vld [vmem:[#allocation7 + $0x2a0] sm:$0xf0] }
 0x20e   : > { %v9909_v12 = vor.u32 %v11347_v52, %v9906_v48 }
 0x210   : > { %3125 = vmatpush.bf16.msra.mxu3 %v9909_v12  ;;  %v11275_v12 = vld [vmem:[#allocation7 + $0x44] sm:$0xf] }
 0x212   : > { %v2060_v35 = vpop.f32.mrf.mxu2 }
 0x213   : > { %v2109_v39 = vpop.f32.mrf.mxu3  ;;  %v1965_v36 = vpop.f32.mrf.mxu0 }
 0x214   : > { %v12950_v41 = vadd.f32 %v2109_v39, %v2060_v35  ;;  %v2014_v11 = vpop.f32.mrf.mxu1  ;;  %v9648_v39 = vld [vmem:[#allocation7 + $0x80] sm:$0xf] }
 0x215   : > { %v12952_v49 = vadd.f32 %v2014_v11, %v1965_v36  ;;  %v11287_v36 = vld [vmem:[#allocation7 + $0x9c] sm:$0xf0] }
 0x216   : > { %16120 = vst [vmem:[#allocation89_spill] sm:$0xff] %v12950_v41  ;;  %2160 = vmatmul.bf16.gmra.mxu0 %v12595_v5  ;;  %v9904_v11 = vld [vmem:[#allocation7 + $0x280] sm:$0xf] }
 0x217   : > { %16121 = vst [vmem:[#allocation90_spill] sm:$0xff] %v12952_v49  ;;  %2209 = vmatmul.bf16.gmra.mxu1 %v12598_v6  ;;  %2258 = vmatmul.bf16.gmra.mxu2 %v12595_v5  ;;  %v11351_v49 = vld [vmem:[#allocation7 + $0x29c] sm:$0xf0] }
 0x218   : > { %2307 = vmatmul.bf16.gmra.mxu3 %v12598_v6  ;;  %v9649_v6 = vor.u32 %v11287_v36, %v9648_v39  ;;  %v9905_v41 = vor.u32 %v11351_v49, %v9904_v11  ;;  %v9618_v49 = vld [vmem:[#allocation7 + $0x60] sm:$0xf0] }
 0x21a   : > { %v2063_v19 = vpop.f32.mrf.mxu2  ;;  %2978 = vmatpush.bf16.msra.mxu0 %v9649_v6  ;;  %3027 = vmatpush.bf16.msra.mxu1 %v9905_v41  ;;  %v9621_v41 = vor.u32 %v11275_v12, %v9618_v49 }
 0x21b   : > { %v2112_v45 = vpop.f32.mrf.mxu3  ;;  %v1967_v50 = vpop.f32.mrf.mxu0 }
 0x21c   : > { %v12958_v23 = vadd.f32 %v2112_v45, %v2063_v19  ;;  %v2016_v35 = vpop.f32.mrf.mxu1  ;;  %v11339_v45 = vld [vmem:[#allocation7 + $0x244] sm:$0xf]  ;;  %3077 = vmatpush.bf16.msra.mxu2 %v9621_v41 }
 0x21d   : > { %v12960_v5 = vadd.f32 %v2016_v35, %v1967_v50  ;;  %v9874_v50 = vld [vmem:[#allocation7 + $0x260] sm:$0xf0] }
 0x21e   : > { %v9877_v39 = vor.u32 %v11339_v45, %v9874_v50 }
 0x220   : > { %3126 = vmatpush.bf16.msra.mxu3 %v9877_v39  ;;  %v11267_v39 = vld [vmem:[#allocation7 + $0x4] sm:$0xf] }
 0x222   : > { %v2065_v18 = vpop.f32.mrf.mxu2 }
 0x223   : > { %v2114_v0 = vpop.f32.mrf.mxu3  ;;  %v1970_v52 = vpop.f32.mrf.mxu0 }
 0x224   : > { %v12962_v48 = vadd.f32 %v2114_v0, %v2065_v18  ;;  %v2019_v46 = vpop.f32.mrf.mxu1  ;;  %v9616_v0 = vld [vmem:[#allocation7 + $0x40] sm:$0xf] }
 0x225   : > { %v12964_v19 = vadd.f32 %v2019_v46, %v1970_v52  ;;  %v11279_v52 = vld [vmem:[#allocation7 + $0x5c] sm:$0xf0] }
 0x226   : > { %16122 = vst [vmem:[#allocation91_spill] sm:$0xff] %v12962_v48  ;;  %2165 = vmatmul.bf16.gmra.mxu0 %v12625_v8  ;;  %v9872_v46 = vld [vmem:[#allocation7 + $0x240] sm:$0xf] }
 0x227   : > { %16123 = vst [vmem:[#allocation92_spill] sm:$0xff] %v12964_v19  ;;  %2214 = vmatmul.bf16.gmra.mxu1 %v12628_v9  ;;  %2263 = vmatmul.bf16.gmra.mxu2 %v12625_v8  ;;  %v11343_v19 = vld [vmem:[#allocation7 + $0x25c] sm:$0xf0] }
 0x228   : > { %2312 = vmatmul.bf16.gmra.mxu3 %v12628_v9  ;;  %v9617_v9 = vor.u32 %v11279_v52, %v9616_v0  ;;  %v9873_v48 = vor.u32 %v11343_v19, %v9872_v46  ;;  %v9586_v19 = vld [vmem:[#allocation7 + $0x20] sm:$0xf0] }
 0x22a   : > { %v2068_v35 = vpop.f32.mrf.mxu2  ;;  %2979 = vmatpush.bf16.msra.mxu0 %v9617_v9  ;;  %3028 = vmatpush.bf16.msra.mxu1 %v9873_v48  ;;  %v9589_v48 = vor.u32 %v11267_v39, %v9586_v19 }
 0x22b   : > { %v2117_v36 = vpop.f32.mrf.mxu3  ;;  %v1972_v11 = vpop.f32.mrf.mxu0 }
 0x22c   : > { %v12970_v6 = vadd.f32 %v2117_v36, %v2068_v35  ;;  %v2021_v18 = vpop.f32.mrf.mxu1  ;;  %v11331_v36 = vld [vmem:[#allocation7 + $0x204] sm:$0xf]  ;;  %3078 = vmatpush.bf16.msra.mxu2 %v9589_v48 }
 0x22d   : > { %v12972_v8 = vadd.f32 %v2021_v18, %v1972_v11  ;;  %v9842_v11 = vld [vmem:[#allocation7 + $0x220] sm:$0xf0] }
 0x22e   : > { %v9845_v0 = vor.u32 %v11331_v36, %v9842_v11 }
 0x230   : > { %3127 = vmatpush.bf16.msra.mxu3 %v9845_v0  ;;  %v11324_v0 = vld [vmem:[#allocation7 + $0x1cc] sm:$0xf] }
 0x232   : > { %v2070_v12 = vpop.f32.mrf.mxu2 }
 0x233   : > { %v2119_v49 = vpop.f32.mrf.mxu3  ;;  %v1975_v45 = vpop.f32.mrf.mxu0 }
 0x234   : > { %v12974_v50 = vadd.f32 %v2119_v49, %v2070_v12  ;;  %v2024_v41 = vpop.f32.mrf.mxu1  ;;  %v9584_v49 = vld [vmem:[#allocation7] sm:$0xf] }
 0x235   : > { %v12976_v35 = vadd.f32 %v2024_v41, %v1975_v45  ;;  %v11271_v45 = vld [vmem:[#allocation7 + $0x1c] sm:$0xf0] }
 0x236   : > { %16124 = vst [vmem:[#allocation93_spill] sm:$0xff] %v12974_v50  ;;  %2170 = vmatmul.bf16.gmra.mxu0 %v12655_v32  ;;  %v9840_v41 = vld [vmem:[#allocation7 + $0x200] sm:$0xf] }
 0x237   : > { %16125 = vst [vmem:[#allocation94_spill] sm:$0xff] %v12976_v35  ;;  %2219 = vmatmul.bf16.gmra.mxu1 %v12659_v34  ;;  %2268 = vmatmul.bf16.gmra.mxu2 %v12655_v32  ;;  %v11335_v35 = vld [vmem:[#allocation7 + $0x21c] sm:$0xf0] }
 0x238   : > { %2317 = vmatmul.bf16.gmra.mxu3 %v12659_v34  ;;  %v9585_v34 = vor.u32 %v11271_v45, %v9584_v49  ;;  %v9841_v50 = vor.u32 %v11335_v35, %v9840_v41  ;;  %v9818_v35 = vld [vmem:[#allocation7 + $0x1e8] sm:$0xf0] }
 0x23a   : > { %v2073_v18 = vpop.f32.mrf.mxu2  ;;  %2980 = vmatpush.bf16.msra.mxu0 %v9585_v34  ;;  %3029 = vmatpush.bf16.msra.mxu1 %v9841_v50  ;;  %v9821_v50 = vor.u32 %v11324_v0, %v9818_v35 }
 0x23b   : > { %v2122_v52 = vpop.f32.mrf.mxu3  ;;  %v1977_v46 = vpop.f32.mrf.mxu0 }
 0x23c   : > { %v12982_v9 = vadd.f32 %v2122_v52, %v2073_v18  ;;  %v2026_v12 = vpop.f32.mrf.mxu1  ;;  %v11388_v52 = vld [vmem:[#allocation7 + $0x3cc] sm:$0xf]  ;;  %3267 = vmatpush.bf16.msrb.mxu2 %v9821_v50 }
 0x23d   : > { %v12984_v32 = vadd.f32 %v2026_v12, %v1977_v46  ;;  %v10074_v46 = vld [vmem:[#allocation7 + $0x3e8] sm:$0xf0] }
 0x23e   : > { %v10077_v49 = vor.u32 %v11388_v52, %v10074_v46 }
 0x240   : > { %3316 = vmatpush.bf16.msrb.mxu3 %v10077_v49  ;;  %v11316_v49 = vld [vmem:[#allocation7 + $0x18c] sm:$0xf] }
 0x242   : > { %v2075_v39 = vpop.f32.mrf.mxu2 }
 0x243   : > { %v2124_v19 = vpop.f32.mrf.mxu3  ;;  %v1980_v36 = vpop.f32.mrf.mxu0 }
 0x244   : > { %v12986_v11 = vadd.f32 %v2124_v19, %v2075_v39  ;;  %v2029_v48 = vpop.f32.mrf.mxu1  ;;  %v9816_v19 = vld [vmem:[#allocation7 + $0x1c8] sm:$0xf] }
 0x245   : > { %v12988_v18 = vadd.f32 %v2029_v48, %v1980_v36  ;;  %v11328_v36 = vld [vmem:[#allocation7 + $0x1e4] sm:$0xf0] }
 0x246   : > { %16126 = vst [vmem:[#allocation95_spill] sm:$0xff] %v12986_v11  ;;  %2175 = vmatmul.bf16.gmra.mxu0 %v12689_v40  ;;  %v10072_v48 = vld [vmem:[#allocation7 + $0x3c8] sm:$0xf] }
 0x247   : > { %16127 = vst [vmem:[#allocation96_spill] sm:$0xff] %v12988_v18  ;;  %2224 = vmatmul.bf16.gmra.mxu1 %v12692_v47  ;;  %2273 = vmatmul.bf16.gmra.mxu2 %v12689_v40  ;;  %v11392_v18 = vld [vmem:[#allocation7 + $0x3e4] sm:$0xf0] }
 0x248   : > { %2322 = vmatmul.bf16.gmra.mxu3 %v12692_v47  ;;  %v9817_v47 = vor.u32 %v11328_v36, %v9816_v19  ;;  %v10073_v11 = vor.u32 %v11392_v18, %v10072_v48  ;;  %v9786_v18 = vld [vmem:[#allocation7 + $0x1a8] sm:$0xf0] }
 0x24a   : > { %v2078_v12 = vpop.f32.mrf.mxu2  ;;  %3169 = vmatpush.bf16.msrb.mxu0 %v9817_v47  ;;  %3218 = vmatpush.bf16.msrb.mxu1 %v10073_v11  ;;  %v9789_v11 = vor.u32 %v11316_v49, %v9786_v18 }
 0x24b   : > { %v2127_v45 = vpop.f32.mrf.mxu3  ;;  %v1982_v41 = vpop.f32.mrf.mxu0 }
 0x24c   : > { %v12994_v34 = vadd.f32 %v2127_v45, %v2078_v12  ;;  %v2031_v39 = vpop.f32.mrf.mxu1  ;;  %v11380_v45 = vld [vmem:[#allocation7 + $0x38c] sm:$0xf]  ;;  %3268 = vmatpush.bf16.msrb.mxu2 %v9789_v11 }
 0x24d   : > { %v12996_v40 = vadd.f32 %v2031_v39, %v1982_v41  ;;  %v10042_v41 = vld [vmem:[#allocation7 + $0x3a8] sm:$0xf0] }
 0x24e   : > { %v10045_v19 = vor.u32 %v11380_v45, %v10042_v41 }
 0x250   : > { %3317 = vmatpush.bf16.msrb.mxu3 %v10045_v19  ;;  %v11308_v19 = vld [vmem:[#allocation7 + $0x14c] sm:$0xf] }
 0x252   : > { %v2080_v0 = vpop.f32.mrf.mxu2 }
 0x253   : > { %v2129_v35 = vpop.f32.mrf.mxu3  ;;  %v1985_v52 = vpop.f32.mrf.mxu0 }
 0x254   : > { %v12998_v46 = vadd.f32 %v2129_v35, %v2080_v0  ;;  %v2034_v50 = vpop.f32.mrf.mxu1  ;;  %v9784_v35 = vld [vmem:[#allocation7 + $0x188] sm:$0xf] }
 0x255   : > { %v13000_v12 = vadd.f32 %v2034_v50, %v1985_v52  ;;  %v11320_v52 = vld [vmem:[#allocation7 + $0x1a4] sm:$0xf0] }
 0x256   : > { %16128 = vst [vmem:[#allocation97_spill] sm:$0xff] %v12998_v46  ;;  %2180 = vmatmul.bf16.gmra.mxu0 %v12715_v13  ;;  %v10040_v50 = vld [vmem:[#allocation7 + $0x388] sm:$0xf] }
 0x257   : > { %16129 = vst [vmem:[#allocation98_spill] sm:$0xff] %v13000_v12  ;;  %2229 = vmatmul.bf16.gmra.mxu1 %v12718_v54  ;;  %2278 = vmatmul.bf16.gmra.mxu2 %v12715_v13  ;;  %v11384_v12 = vld [vmem:[#allocation7 + $0x3a4] sm:$0xf0] }
 0x258   : > { %2327 = vmatmul.bf16.gmra.mxu3 %v12718_v54  ;;  %v9785_v54 = vor.u32 %v11320_v52, %v9784_v35  ;;  %v10041_v46 = vor.u32 %v11384_v12, %v10040_v50  ;;  %v9754_v12 = vld [vmem:[#allocation7 + $0x168] sm:$0xf0] }
 0x25a   : > { %v2083_v39 = vpop.f32.mrf.mxu2  ;;  %3170 = vmatpush.bf16.msrb.mxu0 %v9785_v54  ;;  %3219 = vmatpush.bf16.msrb.mxu1 %v10041_v46  ;;  %v9757_v46 = vor.u32 %v11308_v19, %v9754_v12 }
 0x25b   : > { %v2132_v36 = vpop.f32.mrf.mxu3  ;;  %v1987_v48 = vpop.f32.mrf.mxu0 }
 0x25c   : > { %v13006_v47 = vadd.f32 %v2132_v36, %v2083_v39  ;;  %v2036_v0 = vpop.f32.mrf.mxu1  ;;  %v11372_v36 = vld [vmem:[#allocation7 + $0x34c] sm:$0xf]  ;;  %3269 = vmatpush.bf16.msrb.mxu2 %v9757_v46 }
 0x25d   : > { %v13008_v13 = vadd.f32 %v2036_v0, %v1987_v48  ;;  %v10010_v48 = vld [vmem:[#allocation7 + $0x368] sm:$0xf0] }
 0x25e   : > { %16130 = vst [vmem:[#allocation99_spill] sm:$0xff] %v13006_v47  ;;  %v10013_v35 = vor.u32 %v11372_v36, %v10010_v48 }
 0x25f   : > { %16131 = vst [vmem:[#allocation100_spill] sm:$0xff] %v13008_v13  ;;  %v11376_v13 = vld [vmem:[#allocation7 + $0x364] sm:$0xf0] }
 0x260   : > { %3318 = vmatpush.bf16.msrb.mxu3 %v10013_v35  ;;  %v11300_v35 = vld [vmem:[#allocation7 + $0x10c] sm:$0xf] }
 0x262   : > { %v2085_v49 = vpop.f32.mrf.mxu2 }
 0x263   : > { %v2134_v18 = vpop.f32.mrf.mxu3  ;;  %v2146_v45 = vpop.f32.mrf.mxu0 }
 0x264   : > { %v13010_v41 = vadd.f32 %v2134_v18, %v2085_v49  ;;  %v2195_v11 = vpop.f32.mrf.mxu1  ;;  %v9752_v18 = vld [vmem:[#allocation7 + $0x148] sm:$0xf] }
 0x265   : > { %v13012_v39 = vadd.f32 %v2195_v11, %v2146_v45  ;;  %v11312_v45 = vld [vmem:[#allocation7 + $0x164] sm:$0xf0] }
 0x266   : > { %16132 = vst [vmem:[#allocation101_spill] sm:$0xff] %v13010_v41  ;;  %2981 = vmatmul.bf16.vlgmr.msra.gmra.mxu0 %v12466_v24  ;;  %v10008_v11 = vld [vmem:[#allocation7 + $0x348] sm:$0xf]  ;;  %v9753_v41 = vor.u32 %v11312_v45, %v9752_v18 }
 0x267   : > { %16133 = vst [vmem:[#allocation102_spill] sm:$0xff] %v13012_v39  ;;  %3030 = vmatmul.bf16.vlgmr.msra.gmra.mxu1 %v12476_v38  ;;  %3079 = vmatmul.bf16.vlgmr.msra.gmra.mxu2 %v12466_v24  ;;  %v10009_v47 = vor.u32 %v11376_v13, %v10008_v11  ;;  %v9722_v13 = vld [vmem:[#allocation7 + $0x128] sm:$0xf0] }
 0x268   : > { %3128 = vmatmul.bf16.vlgmr.msra.gmra.mxu3 %v12476_v38  ;;  %3171 = vmatpush.bf16.msrb.mxu0 %v9753_v41  ;;  %v11364_v41 = vld [vmem:[#allocation7 + $0x30c] sm:$0xf] }
 0x269   : > { %3220 = vmatpush.bf16.msrb.mxu1 %v10009_v47  ;;  %v9725_v47 = vor.u32 %v11300_v35, %v9722_v13 }
 0x26a   : > { %v2244_v0 = vpop.f32.mrf.mxu2 }
 0x26b   : > { %v2293_v52 = vpop.f32.mrf.mxu3  ;;  %v2148_v50 = vpop.f32.mrf.mxu0  ;;  %3270 = vmatpush.bf16.msrb.mxu2 %v9725_v47 }
 0x26c   : > { %v13018_v54 = vadd.f32 %v2293_v52, %v2244_v0  ;;  %v2197_v49 = vpop.f32.mrf.mxu1  ;;  %v9978_v52 = vld [vmem:[#allocation7 + $0x328] sm:$0xf0] }
 0x26d   : > { %v13020_v39 = vadd.f32 %v2197_v49, %v2148_v50  ;;  %v9981_v49 = vor.u32 %v11364_v41, %v9978_v52 }
 0x26e   : > { %16134 = vst [vmem:[#allocation103_spill] sm:$0xff] %v13018_v54 }
 0x26f   : > { %16135 = vst [vmem:[#allocation104_spill] sm:$0xff] %v13020_v39  ;;  %3319 = vmatpush.bf16.msrb.mxu3 %v9981_v49  ;;  %v11368_v39 = vld [vmem:[#allocation7 + $0x324] sm:$0xf0]  ;;  %v11292_v49 = vld [vmem:[#allocation7 + $0xcc] sm:$0xf] }
 0x272   : > { %v2246_v19 = vpop.f32.mrf.mxu2 }
 0x273   : > { %v2295_v12 = vpop.f32.mrf.mxu3  ;;  %v2151_v36 = vpop.f32.mrf.mxu0 }
 0x274   : > { %v13022_v48 = vadd.f32 %v2295_v12, %v2246_v19  ;;  %v2200_v46 = vpop.f32.mrf.mxu1  ;;  %v9720_v12 = vld [vmem:[#allocation7 + $0x108] sm:$0xf] }
 0x275   : > { %v13024_v0 = vadd.f32 %v2200_v46, %v2151_v36  ;;  %v11304_v36 = vld [vmem:[#allocation7 + $0x124] sm:$0xf0] }
 0x276   : > { %16136 = vst [vmem:[#allocation105_spill] sm:$0xff] %v13022_v48  ;;  %2986 = vmatmul.bf16.gmra.mxu0 %v12468_v29  ;;  %v9976_v46 = vld [vmem:[#allocation7 + $0x308] sm:$0xf]  ;;  %v9721_v48 = vor.u32 %v11304_v36, %v9720_v12 }
 0x277   : > { %16137 = vst [vmem:[#allocation106_spill] sm:$0xff] %v13024_v0  ;;  %3035 = vmatmul.bf16.gmra.mxu1 %v12479_v42  ;;  %3084 = vmatmul.bf16.gmra.mxu2 %v12468_v29  ;;  %v9977_v54 = vor.u32 %v11368_v39, %v9976_v46  ;;  %v9690_v39 = vld [vmem:[#allocation7 + $0xe8] sm:$0xf0] }
 0x278   : > { %3133 = vmatmul.bf16.gmra.mxu3 %v12479_v42  ;;  %3172 = vmatpush.bf16.msrb.mxu0 %v9721_v48  ;;  %v11356_v48 = vld [vmem:[#allocation7 + $0x2cc] sm:$0xf] }
 0x279   : > { %3221 = vmatpush.bf16.msrb.mxu1 %v9977_v54  ;;  %v9693_v54 = vor.u32 %v11292_v49, %v9690_v39 }
 0x27a   : > { %v2249_v50 = vpop.f32.mrf.mxu2 }
 0x27b   : > { %v2298_v18 = vpop.f32.mrf.mxu3  ;;  %v2153_v45 = vpop.f32.mrf.mxu0  ;;  %3271 = vmatpush.bf16.msrb.mxu2 %v9693_v54 }
 0x27c   : > { %v13030_v11 = vadd.f32 %v2298_v18, %v2249_v50  ;;  %v2202_v19 = vpop.f32.mrf.mxu1  ;;  %v9946_v18 = vld [vmem:[#allocation7 + $0x2e8] sm:$0xf0] }
 0x27d   : > { %v13032_v0 = vadd.f32 %v2202_v19, %v2153_v45  ;;  %v9949_v19 = vor.u32 %v11356_v48, %v9946_v18 }
 0x27e   : > { %16138 = vst [vmem:[#allocation107_spill] sm:$0xff] %v13030_v11 }
 0x27f   : > { %16139 = vst [vmem:[#allocation108_spill] sm:$0xff] %v13032_v0  ;;  %3320 = vmatpush.bf16.msrb.mxu3 %v9949_v19  ;;  %v11360_v0 = vld [vmem:[#allocation7 + $0x2e4] sm:$0xf0]  ;;  %v11284_v19 = vld [vmem:[#allocation7 + $0x8c] sm:$0xf] }
 0x282   : > { %v2251_v35 = vpop.f32.mrf.mxu2 }
 0x283   : > { %v2300_v13 = vpop.f32.mrf.mxu3  ;;  %v2156_v41 = vpop.f32.mrf.mxu0 }
 0x284   : > { %v13034_v52 = vadd.f32 %v2300_v13, %v2251_v35  ;;  %v2205_v47 = vpop.f32.mrf.mxu1  ;;  %v9688_v13 = vld [vmem:[#allocation7 + $0xc8] sm:$0xf] }
 0x285   : > { %v13036_v50 = vadd.f32 %v2205_v47, %v2156_v41  ;;  %v11296_v41 = vld [vmem:[#allocation7 + $0xe4] sm:$0xf0] }
 0x286   : > { %16140 = vst [vmem:[#allocation109_spill] sm:$0xff] %v13034_v52  ;;  %2991 = vmatmul.bf16.gmra.mxu0 %v12515_v20  ;;  %v9944_v47 = vld [vmem:[#allocation7 + $0x2c8] sm:$0xf]  ;;  %v9689_v52 = vor.u32 %v11296_v41, %v9688_v13 }
 0x287   : > { %16141 = vst [vmem:[#allocation110_spill] sm:$0xff] %v13036_v50  ;;  %3040 = vmatmul.bf16.gmra.mxu1 %v12518_v21  ;;  %3089 = vmatmul.bf16.gmra.mxu2 %v12515_v20  ;;  %v9945_v11 = vor.u32 %v11360_v0, %v9944_v47  ;;  %v9658_v0 = vld [vmem:[#allocation7 + $0xa8] sm:$0xf0] }
 0x288   : > { %3138 = vmatmul.bf16.gmra.mxu3 %v12518_v21  ;;  %3173 = vmatpush.bf16.msrb.mxu0 %v9689_v52  ;;  %v11348_v52 = vld [vmem:[#allocation7 + $0x28c] sm:$0xf] }
 0x289   : > { %3222 = vmatpush.bf16.msrb.mxu1 %v9945_v11  ;;  %v9661_v11 = vor.u32 %v11284_v19, %v9658_v0 }
 0x28a   : > { %v2254_v45 = vpop.f32.mrf.mxu2 }
 0x28b   : > { %v2303_v12 = vpop.f32.mrf.mxu3  ;;  %v2158_v36 = vpop.f32.mrf.mxu0  ;;  %3272 = vmatpush.bf16.msrb.mxu2 %v9661_v11 }
 0x28c   : > { %v13042_v46 = vadd.f32 %v2303_v12, %v2254_v45  ;;  %v2207_v35 = vpop.f32.mrf.mxu1  ;;  %v9914_v12 = vld [vmem:[#allocation7 + $0x2a8] sm:$0xf0] }
 0x28d   : > { %v13044_v50 = vadd.f32 %v2207_v35, %v2158_v36  ;;  %v9917_v35 = vor.u32 %v11348_v52, %v9914_v12 }
 0x28e   : > { %16142 = vst [vmem:[#allocation111_spill] sm:$0xff] %v13042_v46 }
 0x28f   : > { %16143 = vst [vmem:[#allocation112_spill] sm:$0xff] %v13044_v50  ;;  %3321 = vmatpush.bf16.msrb.mxu3 %v9917_v35  ;;  %v11352_v50 = vld [vmem:[#allocation7 + $0x2a4] sm:$0xf0]  ;;  %v11276_v35 = vld [vmem:[#allocation7 + $0x4c] sm:$0xf] }
 0x292   : > { %v2256_v49 = vpop.f32.mrf.mxu2 }
 0x293   : > { %v2305_v39 = vpop.f32.mrf.mxu3  ;;  %v2161_v48 = vpop.f32.mrf.mxu0 }
 0x294   : > { %v13046_v18 = vadd.f32 %v2305_v39, %v2256_v49  ;;  %v2210_v54 = vpop.f32.mrf.mxu1  ;;  %v9656_v39 = vld [vmem:[#allocation7 + $0x88] sm:$0xf] }
 0x295   : > { %v13048_v45 = vadd.f32 %v2210_v54, %v2161_v48  ;;  %v11288_v48 = vld [vmem:[#allocation7 + $0xa4] sm:$0xf0] }
 0x296   : > { %16144 = vst [vmem:[#allocation113_spill] sm:$0xff] %v13046_v18  ;;  %2996 = vmatmul.bf16.gmra.mxu0 %v12547_v58  ;;  %v9912_v54 = vld [vmem:[#allocation7 + $0x288] sm:$0xf]  ;;  %v9657_v18 = vor.u32 %v11288_v48, %v9656_v39 }
 0x297   : > { %16145 = vst [vmem:[#allocation114_spill] sm:$0xff] %v13048_v45  ;;  %3045 = vmatmul.bf16.gmra.mxu1 %v12550_v61  ;;  %3094 = vmatmul.bf16.gmra.mxu2 %v12547_v58  ;;  %v9913_v46 = vor.u32 %v11352_v50, %v9912_v54  ;;  %v9626_v50 = vld [vmem:[#allocation7 + $0x68] sm:$0xf0] }
 0x298   : > { %3143 = vmatmul.bf16.gmra.mxu3 %v12550_v61  ;;  %3174 = vmatpush.bf16.msrb.mxu0 %v9657_v18  ;;  %v11340_v18 = vld [vmem:[#allocation7 + $0x24c] sm:$0xf] }
 0x299   : > { %3223 = vmatpush.bf16.msrb.mxu1 %v9913_v46  ;;  %v9629_v46 = vor.u32 %v11276_v35, %v9626_v50 }
 0x29a   : > { %v2259_v36 = vpop.f32.mrf.mxu2 }
 0x29b   : > { %v2308_v13 = vpop.f32.mrf.mxu3  ;;  %v2163_v41 = vpop.f32.mrf.mxu0  ;;  %3273 = vmatpush.bf16.msrb.mxu2 %v9629_v46 }
 0x29c   : > { %v13054_v47 = vadd.f32 %v2308_v13, %v2259_v36  ;;  %v2212_v49 = vpop.f32.mrf.mxu1  ;;  %v9882_v13 = vld [vmem:[#allocation7 + $0x268] sm:$0xf0] }
 0x29d   : > { %v13056_v45 = vadd.f32 %v2212_v49, %v2163_v41  ;;  %v9885_v49 = vor.u32 %v11340_v18, %v9882_v13 }
 0x29e   : > { %16146 = vst [vmem:[#allocation115_spill] sm:$0xff] %v13054_v47 }
 0x29f   : > { %16147 = vst [vmem:[#allocation116_spill] sm:$0xff] %v13056_v45  ;;  %3322 = vmatpush.bf16.msrb.mxu3 %v9885_v49  ;;  %v11344_v45 = vld [vmem:[#allocation7 + $0x264] sm:$0xf0]  ;;  %v11268_v49 = vld [vmem:[#allocation7 + $0xc] sm:$0xf] }
 0x2a2   : > { %v2261_v19 = vpop.f32.mrf.mxu2 }
 0x2a3   : > { %v2310_v0 = vpop.f32.mrf.mxu3  ;;  %v2166_v52 = vpop.f32.mrf.mxu0 }
 0x2a4   : > { %v13058_v12 = vadd.f32 %v2310_v0, %v2261_v19  ;;  %v2215_v11 = vpop.f32.mrf.mxu1  ;;  %v9624_v0 = vld [vmem:[#allocation7 + $0x48] sm:$0xf] }
 0x2a5   : > { %v13060_v36 = vadd.f32 %v2215_v11, %v2166_v52  ;;  %v11280_v52 = vld [vmem:[#allocation7 + $0x64] sm:$0xf0] }
 0x2a6   : > { %16148 = vst [vmem:[#allocation117_spill] sm:$0xff] %v13058_v12  ;;  %3001 = vmatmul.bf16.gmra.mxu0 %v12577_v30  ;;  %v9880_v11 = vld [vmem:[#allocation7 + $0x248] sm:$0xf]  ;;  %v9625_v12 = vor.u32 %v11280_v52, %v9624_v0 }
 0x2a7   : > { %16149 = vst [vmem:[#allocation118_spill] sm:$0xff] %v13060_v36  ;;  %3050 = vmatmul.bf16.gmra.mxu1 %v12580_v31  ;;  %3099 = vmatmul.bf16.gmra.mxu2 %v12577_v30  ;;  %v9881_v47 = vor.u32 %v11344_v45, %v9880_v11  ;;  %v9594_v45 = vld [vmem:[#allocation7 + $0x28] sm:$0xf0] }
 0x2a8   : > { %3148 = vmatmul.bf16.gmra.mxu3 %v12580_v31  ;;  %3175 = vmatpush.bf16.msrb.mxu0 %v9625_v12  ;;  %v11332_v12 = vld [vmem:[#allocation7 + $0x20c] sm:$0xf] }
 0x2a9   : > { %3224 = vmatpush.bf16.msrb.mxu1 %v9881_v47  ;;  %v9597_v47 = vor.u32 %v11268_v49, %v9594_v45 }
 0x2aa   : > { %v2264_v41 = vpop.f32.mrf.mxu2 }
 0x2ab   : > { %v2313_v39 = vpop.f32.mrf.mxu3  ;;  %v2168_v48 = vpop.f32.mrf.mxu0  ;;  %3274 = vmatpush.bf16.msrb.mxu2 %v9597_v47 }
 0x2ac   : > { %v13066_v54 = vadd.f32 %v2313_v39, %v2264_v41  ;;  %v2217_v19 = vpop.f32.mrf.mxu1  ;;  %v9850_v39 = vld [vmem:[#allocation7 + $0x228] sm:$0xf0] }
 0x2ad   : > { %v13068_v36 = vadd.f32 %v2217_v19, %v2168_v48  ;;  %v9853_v19 = vor.u32 %v11332_v12, %v9850_v39 }
 0x2ae   : > { %16150 = vst [vmem:[#allocation119_spill] sm:$0xff] %v13066_v54 }
 0x2af   : > { %16151 = vst [vmem:[#allocation120_spill] sm:$0xff] %v13068_v36  ;;  %3323 = vmatpush.bf16.msrb.mxu3 %v9853_v19  ;;  %v11336_v36 = vld [vmem:[#allocation7 + $0x224] sm:$0xf0]  ;;  %v11325_v19 = vld [vmem:[#allocation7 + $0x1d4] sm:$0xf] }
 0x2b2   : > { %v2266_v35 = vpop.f32.mrf.mxu2 }
 0x2b3   : > { %v2315_v50 = vpop.f32.mrf.mxu3  ;;  %v2171_v18 = vpop.f32.mrf.mxu0 }
 0x2b4   : > { %v13070_v13 = vadd.f32 %v2315_v50, %v2266_v35  ;;  %v2220_v46 = vpop.f32.mrf.mxu1  ;;  %v9592_v50 = vld [vmem:[#allocation7 + $0x8] sm:$0xf] }
 0x2b5   : > { %v13072_v41 = vadd.f32 %v2220_v46, %v2171_v18  ;;  %v11272_v18 = vld [vmem:[#allocation7 + $0x24] sm:$0xf0] }
 0x2b6   : > { %16152 = vst [vmem:[#allocation121_spill] sm:$0xff] %v13070_v13  ;;  %3006 = vmatmul.bf16.gmra.mxu0 %v12607_v16  ;;  %v9848_v46 = vld [vmem:[#allocation7 + $0x208] sm:$0xf]  ;;  %v9593_v13 = vor.u32 %v11272_v18, %v9592_v50 }
 0x2b7   : > { %16153 = vst [vmem:[#allocation122_spill] sm:$0xff] %v13072_v41  ;;  %3055 = vmatmul.bf16.gmra.mxu1 %v12610_v17  ;;  %3104 = vmatmul.bf16.gmra.mxu2 %v12607_v16  ;;  %v9849_v54 = vor.u32 %v11336_v36, %v9848_v46  ;;  %v9826_v36 = vld [vmem:[#allocation7 + $0x1f0] sm:$0xf0] }
 0x2b8   : > { %3153 = vmatmul.bf16.gmra.mxu3 %v12610_v17  ;;  %3176 = vmatpush.bf16.msrb.mxu0 %v9593_v13  ;;  %v11389_v13 = vld [vmem:[#allocation7 + $0x3d4] sm:$0xf] }
 0x2b9   : > { %3225 = vmatpush.bf16.msrb.mxu1 %v9849_v54  ;;  %v9829_v54 = vor.u32 %v11325_v19, %v9826_v36 }
 0x2ba   : > { %v2269_v48 = vpop.f32.mrf.mxu2 }
 0x2bb   : > { %v2318_v0 = vpop.f32.mrf.mxu3  ;;  %v2173_v52 = vpop.f32.mrf.mxu0  ;;  %3463 = vmatpush.bf16.msra.mxu2 %v9829_v54 }
 0x2bc   : > { %v13078_v11 = vadd.f32 %v2318_v0, %v2269_v48  ;;  %v2222_v35 = vpop.f32.mrf.mxu1  ;;  %v10082_v0 = vld [vmem:[#allocation7 + $0x3f0] sm:$0xf0] }
 0x2bd   : > { %v13080_v41 = vadd.f32 %v2222_v35, %v2173_v52  ;;  %v10085_v35 = vor.u32 %v11389_v13, %v10082_v0 }
 0x2be   : > { %16154 = vst [vmem:[#allocation123_spill] sm:$0xff] %v13078_v11 }
 0x2bf   : > { %16155 = vst [vmem:[#allocation124_spill] sm:$0xff] %v13080_v41  ;;  %3512 = vmatpush.bf16.msra.mxu3 %v10085_v35  ;;  %v11393_v41 = vld [vmem:[#allocation7 + $0x3ec] sm:$0xf0]  ;;  %v11317_v35 = vld [vmem:[#allocation7 + $0x194] sm:$0xf] }
 0x2c2   : > { %v2271_v49 = vpop.f32.mrf.mxu2 }
 0x2c3   : > { %v2320_v45 = vpop.f32.mrf.mxu3  ;;  %v2176_v12 = vpop.f32.mrf.mxu0 }
 0x2c4   : > { %v13082_v39 = vadd.f32 %v2320_v45, %v2271_v49  ;;  %v2225_v47 = vpop.f32.mrf.mxu1 }
 0x2c5   : > { %v13084_v48 = vadd.f32 %v2225_v47, %v2176_v12  ;;  %v9824_v12 = vld [vmem:[#allocation7 + $0x1d0] sm:$0xf] }
 0x2c6   : > { %16156 = vst [vmem:[#allocation125_spill] sm:$0xff] %v13082_v39  ;;  %3011 = vmatmul.bf16.gmra.mxu0 %v12637_v1  ;;  %v11329_v47 = vld [vmem:[#allocation7 + $0x1ec] sm:$0xf0] }
 0x2c7   : > { %16157 = vst [vmem:[#allocation126_spill] sm:$0xff] %v13084_v48  ;;  %3060 = vmatmul.bf16.gmra.mxu1 %v12640_v4  ;;  %3109 = vmatmul.bf16.gmra.mxu2 %v12637_v1  ;;  %v10080_v48 = vld [vmem:[#allocation7 + $0x3d0] sm:$0xf]  ;;  %v9825_v39 = vor.u32 %v11329_v47, %v9824_v12 }
 0x2c8   : > { %3158 = vmatmul.bf16.gmra.mxu3 %v12640_v4  ;;  %v10081_v11 = vor.u32 %v11393_v41, %v10080_v48  ;;  %v9794_v41 = vld [vmem:[#allocation7 + $0x1b0] sm:$0xf0] }
 0x2c9   : > { %3365 = vmatpush.bf16.msra.mxu0 %v9825_v39  ;;  %v11381_v39 = vld [vmem:[#allocation7 + $0x394] sm:$0xf] }
 0x2ca   : > { %v2274_v52 = vpop.f32.mrf.mxu2  ;;  %3414 = vmatpush.bf16.msra.mxu1 %v10081_v11  ;;  %v9797_v11 = vor.u32 %v11317_v35, %v9794_v41  ;;  %v10050_v48 = vld [vmem:[#allocation7 + $0x3b0] sm:$0xf0] }
 0x2cb   : > { %v2323_v50 = vpop.f32.mrf.mxu3  ;;  %v2178_v18 = vpop.f32.mrf.mxu0 }
 0x2cc   : > { %v13090_v46 = vadd.f32 %v2323_v50, %v2274_v52  ;;  %v2227_v49 = vpop.f32.mrf.mxu1  ;;  %3464 = vmatpush.bf16.msra.mxu2 %v9797_v11 }
 0x2cd   : > { %v13092_v45 = vadd.f32 %v2227_v49, %v2178_v18  ;;  %v10053_v18 = vor.u32 %v11381_v39, %v10050_v48 }
 0x2ce   : > { %16158 = vst [vmem:[#allocation127_spill] sm:$0xff] %v13090_v46 }
 0x2cf   : > { %16159 = vst [vmem:[#allocation128_spill] sm:$0xff] %v13092_v45  ;;  %3513 = vmatpush.bf16.msra.mxu3 %v10053_v18  ;;  %v11385_v45 = vld [vmem:[#allocation7 + $0x3ac] sm:$0xf0]  ;;  %v10018_v18 = vld [vmem:[#allocation7 + $0x370] sm:$0xf0] }
 0x2d2   : > { %v2276_v19 = vpop.f32.mrf.mxu2 }
 0x2d3   : > { %v2325_v36 = vpop.f32.mrf.mxu3  ;;  %v2181_v13 = vpop.f32.mrf.mxu0 }
 0x2d4   : > { %v13094_v0 = vadd.f32 %v2325_v36, %v2276_v19  ;;  %v2230_v54 = vpop.f32.mrf.mxu1 }
 0x2d5   : > { %v13096_v52 = vadd.f32 %v2230_v54, %v2181_v13  ;;  %v9792_v13 = vld [vmem:[#allocation7 + $0x190] sm:$0xf] }
 0x2d6   : > { %16160 = vst [vmem:[#allocation129_spill] sm:$0xff] %v13094_v0  ;;  %3016 = vmatmul.bf16.gmra.mxu0 %v12667_v60  ;;  %v11321_v54 = vld [vmem:[#allocation7 + $0x1ac] sm:$0xf0] }
 0x2d7   : > { %16161 = vst [vmem:[#allocation130_spill] sm:$0xff] %v13096_v52  ;;  %3065 = vmatmul.bf16.gmra.mxu1 %v12669_v2  ;;  %3114 = vmatmul.bf16.gmra.mxu2 %v12667_v60  ;;  %v10048_v52 = vld [vmem:[#allocation7 + $0x390] sm:$0xf]  ;;  %v9793_v0 = vor.u32 %v11321_v54, %v9792_v13 }
 0x2d8   : > { %3163 = vmatmul.bf16.gmra.mxu3 %v12669_v2  ;;  %v10049_v46 = vor.u32 %v11385_v45, %v10048_v52  ;;  %v11309_v45 = vld [vmem:[#allocation7 + $0x154] sm:$0xf] }
 0x2d9   : > { %3366 = vmatpush.bf16.msra.mxu0 %v9793_v0  ;;  %v11373_v0 = vld [vmem:[#allocation7 + $0x354] sm:$0xf] }
 0x2da   : > { %v2279_v50 = vpop.f32.mrf.mxu2  ;;  %3415 = vmatpush.bf16.msra.mxu1 %v10049_v46  ;;  %v9762_v46 = vld [vmem:[#allocation7 + $0x170] sm:$0xf0] }
 0x2db   : > { %v2328_v49 = vpop.f32.mrf.mxu3  ;;  %v2183_v12 = vpop.f32.mrf.mxu0  ;;  %v9765_v52 = vor.u32 %v11309_v45, %v9762_v46  ;;  %v11377_v46 = vld [vmem:[#allocation7 + $0x36c] sm:$0xf0] }
 0x2dc   : > { %v13102_v47 = vadd.f32 %v2328_v49, %v2279_v50  ;;  %v2232_v19 = vpop.f32.mrf.mxu1 }
 0x2dd   : > { %v13104_v36 = vadd.f32 %v2232_v19, %v2183_v12  ;;  %v10021_v19 = vor.u32 %v11373_v0, %v10018_v18  ;;  %3465 = vmatpush.bf16.msra.mxu2 %v9765_v52 }
 0x2df   : > { %16162 = vst [vmem:[#allocation131_spill] sm:$0xff] %v13104_v36  ;;  %3514 = vmatpush.bf16.msra.mxu3 %v10021_v19 }
 0x2e2   : > { %v2281_v35 = vpop.f32.mrf.mxu2 }
 0x2e3   : > { %v2330_v41 = vpop.f32.mrf.mxu3  ;;  %v2982_v39 = vpop.f32.mrf.mxu0 }
 0x2e4   : > { %v13106_v48 = vadd.f32 %v2330_v41, %v2281_v35  ;;  %v2983_v11 = vadd.f32 %v2982_v39, %v12724_v25  ;;  %v3031_v50 = vpop.f32.mrf.mxu1 }
 0x2e6   : > { %16163 = vst [vmem:[#allocation132_spill] sm:$0xff] %v13106_v48  ;;  %v13109_v49 = vadd.f32 %v3031_v50, %v2983_v11  ;;  %3177 = vmatmul.bf16.vlgmr.msrb.gmra.mxu0 %v12466_v24  ;;  %v9760_v11 = vld [vmem:[#allocation7 + $0x150] sm:$0xf] }
 0x2e7   : > { %3226 = vmatmul.bf16.vlgmr.msrb.gmra.mxu1 %v12476_v38  ;;  %3275 = vmatmul.bf16.vlgmr.msrb.gmra.mxu2 %v12466_v24  ;;  %v11313_v50 = vld [vmem:[#allocation7 + $0x16c] sm:$0xf0] }
 0x2e8   : > { %16164 = vst [vmem:[#allocation133_spill] sm:$0xff] %v13109_v49  ;;  %3324 = vmatmul.bf16.vlgmr.msrb.gmra.mxu3 %v12476_v38  ;;  %v10016_v49 = vld [vmem:[#allocation7 + $0x350] sm:$0xf]  ;;  %v9761_v45 = vor.u32 %v11313_v50, %v9760_v11 }
 0x2e9   : > { %v10017_v36 = vor.u32 %v11377_v46, %v10016_v49  ;;  %v9730_v49 = vld [vmem:[#allocation7 + $0x130] sm:$0xf0] }
 0x2ea   : > { %v3080_v12 = vpop.f32.mrf.mxu2  ;;  %3367 = vmatpush.bf16.msra.mxu0 %v9761_v45 }
 0x2eb   : > { %v3081_v25 = vadd.f32 %v3080_v12, %v12730_v63  ;;  %v3129_v13 = vpop.f32.mrf.mxu3  ;;  %v2984_v54 = vpop.f32.mrf.mxu0  ;;  %3416 = vmatpush.bf16.msra.mxu1 %v10017_v36  ;;  %v11301_v36 = vld [vmem:[#allocation7 + $0x114] sm:$0xf] }
 0x2ec   : > { %v2985_v35 = vadd.f32 %v2984_v54, %v12732_v15  ;;  %v3033_v41 = vpop.f32.mrf.mxu1  ;;  %v9986_v54 = vld [vmem:[#allocation7 + $0x330] sm:$0xf0] }
 0x2ed   : > { %v13117_v39 = vadd.f32 %v3129_v13, %v3081_v25  ;;  %v9733_v13 = vor.u32 %v11301_v36, %v9730_v49  ;;  %v11369_v36 = vld [vmem:[#allocation7 + $0x32c] sm:$0xf0] }
 0x2ee   : > { %v13119_v48 = vadd.f32 %v3033_v41, %v2985_v35 }
 0x2ef   : > { %3466 = vmatpush.bf16.msra.mxu2 %v9733_v13 }
 0x2f2   : > { %v3082_v63 = vpop.f32.mrf.mxu2 }
 0x2f3   : > { %v3083_v0 = vadd.f32 %v3082_v63, %v12734_v27  ;;  %v3131_v52 = vpop.f32.mrf.mxu3  ;;  %v2987_v18 = vpop.f32.mrf.mxu0  ;;  %v11365_v27 = vld [vmem:[#allocation7 + $0x314] sm:$0xf] }
 0x2f4   : > { %v2988_v15 = vadd.f32 %v2987_v18, %v12736_v62  ;;  %v3036_v12 = vpop.f32.mrf.mxu1  ;;  %v9989_v62 = vor.u32 %v11365_v27, %v9986_v54  ;;  %v9984_v18 = vld [vmem:[#allocation7 + $0x310] sm:$0xf] }
 0x2f5   : > { %v13123_v19 = vadd.f32 %v3131_v52, %v3083_v0  ;;  %v9728_v0 = vld [vmem:[#allocation7 + $0x110] sm:$0xf]  ;;  %v9985_v49 = vor.u32 %v11369_v36, %v9984_v18 }
 0x2f6   : > { %v13125_v25 = vadd.f32 %v3036_v12, %v2988_v15  ;;  %3182 = vmatmul.bf16.gmra.mxu0 %v12468_v29  ;;  %3515 = vmatpush.bf16.msra.mxu3 %v9989_v62  ;;  %v11305_v52 = vld [vmem:[#allocation7 + $0x12c] sm:$0xf0] }
 0x2f7   : > { %3231 = vmatmul.bf16.gmra.mxu1 %v12479_v42  ;;  %3280 = vmatmul.bf16.gmra.mxu2 %v12468_v29  ;;  %v9729_v12 = vor.u32 %v11305_v52, %v9728_v0 }
 0x2f8   : > { %3329 = vmatmul.bf16.gmra.mxu3 %v12479_v42  ;;  %3417 = vmatpush.bf16.msra.mxu1 %v9985_v49 }
 0x2f9   : > { %3368 = vmatpush.bf16.msra.mxu0 %v9729_v12 }
 0x2fa   : > { %v3085_v35 = vpop.f32.mrf.mxu2 }
 0x2fb   : > { %v3086_v41 = vadd.f32 %v3085_v35, %v12742_v57  ;;  %v3134_v11 = vpop.f32.mrf.mxu3  ;;  %v2989_v50 = vpop.f32.mrf.mxu0 }
 0x2fc   : > { %v2990_v45 = vadd.f32 %v2989_v50, %v12744_v14  ;;  %v3038_v46 = vpop.f32.mrf.mxu1  ;;  %v9698_v50 = vld [vmem:[#allocation7 + $0xf0] sm:$0xf0] }
 0x2fd   : > { %v13133_v63 = vadd.f32 %v3134_v11, %v3086_v41  ;;  %v11293_v11 = vld [vmem:[#allocation7 + $0xd4] sm:$0xf] }
 0x2fe   : > { %v13135_v15 = vadd.f32 %v3038_v46, %v2990_v45  ;;  %v9701_v45 = vor.u32 %v11293_v11, %v9698_v50  ;;  %v9954_v46 = vld [vmem:[#allocation7 + $0x2f0] sm:$0xf0]  ;;  %v11361_v11 = vld [vmem:[#allocation7 + $0x2ec] sm:$0xf0] }
 0x300   : > { %3467 = vmatpush.bf16.msra.mxu2 %v9701_v45 }
 0x302   : > { %v3087_v57 = vpop.f32.mrf.mxu2 }
 0x303   : > { %v3088_v27 = vadd.f32 %v3087_v57, %v12746_v33  ;;  %v3136_v13 = vpop.f32.mrf.mxu3  ;;  %v2992_v54 = vpop.f32.mrf.mxu0  ;;  %v11357_v33 = vld [vmem:[#allocation7 + $0x2d4] sm:$0xf] }
 0x304   : > { %v2993_v14 = vadd.f32 %v2992_v54, %v12748_v53  ;;  %v3041_v35 = vpop.f32.mrf.mxu1  ;;  %v9957_v53 = vor.u32 %v11357_v33, %v9954_v46  ;;  %v9952_v54 = vld [vmem:[#allocation7 + $0x2d0] sm:$0xf] }
 0x305   : > { %v13139_v62 = vadd.f32 %v3136_v13, %v3088_v27  ;;  %v9696_v27 = vld [vmem:[#allocation7 + $0xd0] sm:$0xf]  ;;  %v9953_v50 = vor.u32 %v11361_v11, %v9952_v54 }
 0x306   : > { %v13141_v41 = vadd.f32 %v3041_v35, %v2993_v14  ;;  %3187 = vmatmul.bf16.gmra.mxu0 %v12515_v20  ;;  %3516 = vmatpush.bf16.msra.mxu3 %v9957_v53  ;;  %v11297_v13 = vld [vmem:[#allocation7 + $0xec] sm:$0xf0] }
 0x307   : > { %3236 = vmatmul.bf16.gmra.mxu1 %v12518_v21  ;;  %3285 = vmatmul.bf16.gmra.mxu2 %v12515_v20  ;;  %v9697_v35 = vor.u32 %v11297_v13, %v9696_v27  ;;  %v16166_v11 = vld [vmem:[#allocation36_spill] sm:$0xff] }
 0x308   : > { %3334 = vmatmul.bf16.gmra.mxu3 %v12518_v21  ;;  %3418 = vmatpush.bf16.msra.mxu1 %v9953_v50 }
 0x309   : > { %3369 = vmatpush.bf16.msra.mxu0 %v9697_v35 }
 0x30a   : > { %v3090_v0 = vpop.f32.mrf.mxu2 }
 0x30b   : > { %v3091_v52 = vadd.f32 %v3090_v0, %v12754_v10  ;;  %v3139_v18 = vpop.f32.mrf.mxu3  ;;  %v2994_v12 = vpop.f32.mrf.mxu0 }
 0x30c   : > { %v2995_v36 = vadd.f32 %v2994_v12, %v12756_v43  ;;  %v3043_v49 = vpop.f32.mrf.mxu1  ;;  %v9666_v12 = vld [vmem:[#allocation7 + $0xb0] sm:$0xf0] }
 0x30d   : > { %v13149_v57 = vadd.f32 %v3139_v18, %v3091_v52  ;;  %v11285_v18 = vld [vmem:[#allocation7 + $0x94] sm:$0xf] }
 0x30e   : > { %v13151_v14 = vadd.f32 %v3043_v49, %v2995_v36  ;;  %v9669_v36 = vor.u32 %v11285_v18, %v9666_v12  ;;  %v9922_v49 = vld [vmem:[#allocation7 + $0x2b0] sm:$0xf0]  ;;  %v11353_v12 = vld [vmem:[#allocation7 + $0x2ac] sm:$0xf0] }
 0x310   : > { %3468 = vmatpush.bf16.msra.mxu2 %v9669_v36 }
 0x312   : > { %v3092_v10 = vpop.f32.mrf.mxu2 }
 0x313   : > { %v3093_v33 = vadd.f32 %v3092_v10, %v12758_v26  ;;  %v3141_v45 = vpop.f32.mrf.mxu3  ;;  %v2997_v46 = vpop.f32.mrf.mxu0  ;;  %v11349_v26 = vld [vmem:[#allocation7 + $0x294] sm:$0xf] }
 0x314   : > { %v2998_v43 = vadd.f32 %v2997_v46, %v12760_v28  ;;  %v3046_v0 = vpop.f32.mrf.mxu1  ;;  %v9925_v28 = vor.u32 %v11349_v26, %v9922_v49  ;;  %v11289_v46 = vld [vmem:[#allocation7 + $0xac] sm:$0xf0]  ;;  %v16169_v26 = vld [vmem:[#allocation37_spill] sm:$0xff] }
 0x315   : > { %v13155_v53 = vadd.f32 %v3141_v45, %v3093_v33  ;;  %v9664_v45 = vld [vmem:[#allocation7 + $0x90] sm:$0xf] }
 0x316   : > { %v13157_v52 = vadd.f32 %v3046_v0, %v2998_v43  ;;  %3192 = vmatmul.bf16.gmra.mxu0 %v12547_v58  ;;  %3517 = vmatpush.bf16.msra.mxu3 %v9925_v28  ;;  %v9920_v43 = vld [vmem:[#allocation7 + $0x290] sm:$0xf]  ;;  %v9665_v18 = vor.u32 %v11289_v46, %v9664_v45  ;;  %v9890_v46 = vld [vmem:[#allocation7 + $0x270] sm:$0xf0] }
 0x317   : > { %3241 = vmatmul.bf16.gmra.mxu1 %v12550_v61  ;;  %3290 = vmatmul.bf16.gmra.mxu2 %v12547_v58 }
 0x318   : > { %16165 = vst [vmem:[#allocation134_spill] sm:$0xff] %v13157_v52  ;;  %3339 = vmatmul.bf16.gmra.mxu3 %v12550_v61  ;;  %v9921_v52 = vor.u32 %v11353_v12, %v9920_v43  ;;  %3370 = vmatpush.bf16.msra.mxu0 %v9665_v18  ;;  %v16173_v12 = vld [vmem:[#allocation39_spill] sm:$0xff] }
 0x31a   : > { %v3095_v27 = vpop.f32.mrf.mxu2  ;;  %3419 = vmatpush.bf16.msra.mxu1 %v9921_v52  ;;  %v11277_v52 = vld [vmem:[#allocation7 + $0x54] sm:$0xf] }
 0x31b   : > { %v3096_v13 = vadd.f32 %v3095_v27, %v12766_v44  ;;  %v3144_v54 = vpop.f32.mrf.mxu3  ;;  %v2999_v35 = vpop.f32.mrf.mxu0 }
 0x31c   : > { %v3000_v50 = vadd.f32 %v2999_v35, %v16166_v11  ;;  %v3048_v10 = vpop.f32.mrf.mxu1  ;;  %v16170_v35 = vld [vmem:[#allocation38_spill] sm:$0xff] }
 0x31d   : > { %v13165_v33 = vadd.f32 %v3144_v54, %v3096_v13 }
 0x31e   : > { %v13167_v0 = vadd.f32 %v3048_v10, %v3000_v50  ;;  %v9634_v50 = vld [vmem:[#allocation7 + $0x70] sm:$0xf0] }
 0x31f   : > { %16167 = vst [vmem:[#allocation36_spill] sm:$0xff] %v13165_v33  ;;  %v11341_v10 = vld [vmem:[#allocation7 + $0x254] sm:$0xf]  ;;  %v9637_v45 = vor.u32 %v11277_v52, %v9634_v50  ;;  %v11345_v50 = vld [vmem:[#allocation7 + $0x26c] sm:$0xf0] }
 0x320   : > { %16168 = vst [vmem:[#allocation135_spill] sm:$0xff] %v13167_v0  ;;  %v9893_v18 = vor.u32 %v11341_v10, %v9890_v46  ;;  %v16177_v46 = vld [vmem:[#allocation41_spill] sm:$0xff] }
 0x321   : > { %3469 = vmatpush.bf16.msra.mxu2 %v9637_v45 }
 0x322   : > { %v3097_v44 = vpop.f32.mrf.mxu2  ;;  %3518 = vmatpush.bf16.msra.mxu3 %v9893_v18 }
 0x323   : > { %v3098_v49 = vadd.f32 %v3097_v44, %v16169_v26  ;;  %v3146_v36 = vpop.f32.mrf.mxu3  ;;  %v3002_v27 = vpop.f32.mrf.mxu0 }
 0x324   : > { %v3003_v11 = vadd.f32 %v3002_v27, %v16170_v35  ;;  %v3051_v28 = vpop.f32.mrf.mxu1 }
 0x325   : > { %v13171_v13 = vadd.f32 %v3146_v36, %v3098_v49  ;;  %v16174_v36 = vld [vmem:[#allocation40_spill] sm:$0xff] }
 0x326   : > { %v13173_v54 = vadd.f32 %v3051_v28, %v3003_v11  ;;  %3197 = vmatmul.bf16.gmra.mxu0 %v12577_v30  ;;  %v9632_v28 = vld [vmem:[#allocation7 + $0x50] sm:$0xf] }
 0x327   : > { %16171 = vst [vmem:[#allocation37_spill] sm:$0xff] %v13171_v13  ;;  %3246 = vmatmul.bf16.gmra.mxu1 %v12580_v31  ;;  %3295 = vmatmul.bf16.gmra.mxu2 %v12577_v30  ;;  %v9888_v13 = vld [vmem:[#allocation7 + $0x250] sm:$0xf] }
 0x328   : > { %16172 = vst [vmem:[#allocation38_spill] sm:$0xff] %v13173_v54  ;;  %3344 = vmatmul.bf16.gmra.mxu3 %v12580_v31  ;;  %v11281_v54 = vld [vmem:[#allocation7 + $0x6c] sm:$0xf0]  ;;  %v9889_v33 = vor.u32 %v11345_v50, %v9888_v13  ;;  %v9602_v13 = vld [vmem:[#allocation7 + $0x30] sm:$0xf0]  ;;  %v16181_v50 = vld [vmem:[#allocation43_spill] sm:$0xff] }
 0x329   : > { %v9633_v52 = vor.u32 %v11281_v54, %v9632_v28  ;;  %v11333_v54 = vld [vmem:[#allocation7 + $0x214] sm:$0xf] }
 0x32a   : > { %v3100_v43 = vpop.f32.mrf.mxu2  ;;  %3420 = vmatpush.bf16.msra.mxu1 %v9889_v33  ;;  %v11269_v33 = vld [vmem:[#allocation7 + $0x14] sm:$0xf] }
 0x32b   : > { %v3101_v44 = vadd.f32 %v3100_v43, %v16173_v12  ;;  %v3149_v26 = vpop.f32.mrf.mxu3  ;;  %v3004_v49 = vpop.f32.mrf.mxu0  ;;  %3371 = vmatpush.bf16.msra.mxu0 %v9633_v52 }
 0x32c   : > { %v3005_v27 = vadd.f32 %v3004_v49, %v16174_v36  ;;  %v3053_v35 = vpop.f32.mrf.mxu1  ;;  %v16178_v49 = vld [vmem:[#allocation42_spill] sm:$0xff] }
 0x32d   : > { %v13181_v11 = vadd.f32 %v3149_v26, %v3101_v44 }
 0x32e   : > { %v13183_v0 = vadd.f32 %v3053_v35, %v3005_v27  ;;  %v9605_v27 = vor.u32 %v11269_v33, %v9602_v13  ;;  %v9858_v35 = vld [vmem:[#allocation7 + $0x230] sm:$0xf0]  ;;  %v11337_v13 = vld [vmem:[#allocation7 + $0x22c] sm:$0xf0] }
 0x32f   : > { %16175 = vst [vmem:[#allocation39_spill] sm:$0xff] %v13181_v11  ;;  %v9861_v52 = vor.u32 %v11333_v54, %v9858_v35  ;;  %v16185_v35 = vld [vmem:[#allocation45_spill] sm:$0xff] }
 0x330   : > { %16176 = vst [vmem:[#allocation40_spill] sm:$0xff] %v13183_v0  ;;  %3470 = vmatpush.bf16.msra.mxu2 %v9605_v27 }
 0x331   : > { %3519 = vmatpush.bf16.msra.mxu3 %v9861_v52 }
 0x332   : > { %v3102_v10 = vpop.f32.mrf.mxu2 }
 0x333   : > { %v3103_v43 = vadd.f32 %v3102_v10, %v16177_v46  ;;  %v3151_v45 = vpop.f32.mrf.mxu3  ;;  %v3007_v12 = vpop.f32.mrf.mxu0 }
 0x334   : > { %v3008_v36 = vadd.f32 %v3007_v12, %v16178_v49  ;;  %v3056_v18 = vpop.f32.mrf.mxu1 }
 0x335   : > { %v13187_v44 = vadd.f32 %v3151_v45, %v3103_v43  ;;  %v16182_v45 = vld [vmem:[#allocation44_spill] sm:$0xff] }
 0x336   : > { %v13189_v26 = vadd.f32 %v3056_v18, %v3008_v36  ;;  %3202 = vmatmul.bf16.gmra.mxu0 %v12607_v16  ;;  %v9600_v18 = vld [vmem:[#allocation7 + $0x10] sm:$0xf] }
 0x337   : > { %16179 = vst [vmem:[#allocation41_spill] sm:$0xff] %v13187_v44  ;;  %3251 = vmatmul.bf16.gmra.mxu1 %v12610_v17  ;;  %3300 = vmatmul.bf16.gmra.mxu2 %v12607_v16  ;;  %v9856_v44 = vld [vmem:[#allocation7 + $0x210] sm:$0xf] }
 0x338   : > { %16180 = vst [vmem:[#allocation42_spill] sm:$0xff] %v13189_v26  ;;  %3349 = vmatmul.bf16.gmra.mxu3 %v12610_v17  ;;  %v11273_v26 = vld [vmem:[#allocation7 + $0x2c] sm:$0xf0]  ;;  %v9857_v11 = vor.u32 %v11337_v13, %v9856_v44  ;;  %v9834_v44 = vld [vmem:[#allocation7 + $0x1f8] sm:$0xf0]  ;;  %v16189_v13 = vld [vmem:[#allocation47_spill] sm:$0xff] }
 0x339   : > { %v9601_v33 = vor.u32 %v11273_v26, %v9600_v18  ;;  %v11390_v26 = vld [vmem:[#allocation7 + $0x3dc] sm:$0xf] }
 0x33a   : > { %v3105_v28 = vpop.f32.mrf.mxu2  ;;  %3421 = vmatpush.bf16.msra.mxu1 %v9857_v11  ;;  %v11326_v11 = vld [vmem:[#allocation7 + $0x1dc] sm:$0xf] }
 0x33b   : > { %v3106_v10 = vadd.f32 %v3105_v28, %v16181_v50  ;;  %v3154_v46 = vpop.f32.mrf.mxu3  ;;  %v3009_v43 = vpop.f32.mrf.mxu0  ;;  %3372 = vmatpush.bf16.msra.mxu0 %v9601_v33 }
 0x33c   : > { %v3010_v12 = vadd.f32 %v3009_v43, %v16182_v45  ;;  %v3058_v49 = vpop.f32.mrf.mxu1  ;;  %v16186_v43 = vld [vmem:[#allocation46_spill] sm:$0xff] }
 0x33d   : > { %v13197_v36 = vadd.f32 %v3154_v46, %v3106_v10 }
 0x33e   : > { %v13199_v0 = vadd.f32 %v3058_v49, %v3010_v12  ;;  %v9837_v12 = vor.u32 %v11326_v11, %v9834_v44  ;;  %v10090_v49 = vld [vmem:[#allocation7 + $0x3f8] sm:$0xf0]  ;;  %v11394_v44 = vld [vmem:[#allocation7 + $0x3f4] sm:$0xf0] }
 0x33f   : > { %16183 = vst [vmem:[#allocation43_spill] sm:$0xff] %v13197_v36  ;;  %v10093_v33 = vor.u32 %v11390_v26, %v10090_v49  ;;  %v16193_v49 = vld [vmem:[#allocation49_spill] sm:$0xff] }
 0x340   : > { %16184 = vst [vmem:[#allocation44_spill] sm:$0xff] %v13199_v0  ;;  %3659 = vmatpush.bf16.msrb.mxu2 %v9837_v12 }
 0x341   : > { %3708 = vmatpush.bf16.msrb.mxu3 %v10093_v33 }
 0x342   : > { %v3107_v54 = vpop.f32.mrf.mxu2 }
 0x343   : > { %v3108_v28 = vadd.f32 %v3107_v54, %v16185_v35  ;;  %v3156_v27 = vpop.f32.mrf.mxu3  ;;  %v3012_v50 = vpop.f32.mrf.mxu0 }
 0x344   : > { %v3013_v45 = vadd.f32 %v3012_v50, %v16186_v43  ;;  %v3061_v52 = vpop.f32.mrf.mxu1 }
 0x345   : > { %v13203_v10 = vadd.f32 %v3156_v27, %v3108_v28  ;;  %v16190_v27 = vld [vmem:[#allocation48_spill] sm:$0xff] }
 0x346   : > { %v13205_v46 = vadd.f32 %v3061_v52, %v3013_v45  ;;  %3207 = vmatmul.bf16.gmra.mxu0 %v12637_v1  ;;  %v9832_v52 = vld [vmem:[#allocation7 + $0x1d8] sm:$0xf] }
 0x347   : > { %16187 = vst [vmem:[#allocation45_spill] sm:$0xff] %v13203_v10  ;;  %3256 = vmatmul.bf16.gmra.mxu1 %v12640_v4  ;;  %3305 = vmatmul.bf16.gmra.mxu2 %v12637_v1  ;;  %v10088_v10 = vld [vmem:[#allocation7 + $0x3d8] sm:$0xf] }
 0x348   : > { %16188 = vst [vmem:[#allocation46_spill] sm:$0xff] %v13205_v46  ;;  %3354 = vmatmul.bf16.gmra.mxu3 %v12640_v4  ;;  %v11330_v46 = vld [vmem:[#allocation7 + $0x1f4] sm:$0xf0]  ;;  %v10089_v36 = vor.u32 %v11394_v44, %v10088_v10  ;;  %v9802_v10 = vld [vmem:[#allocation7 + $0x1b8] sm:$0xf0]  ;;  %v16197_v44 = vld [vmem:[#allocation51_spill] sm:$0xff] }
 0x349   : > { %v9833_v11 = vor.u32 %v11330_v46, %v9832_v52  ;;  %v11382_v46 = vld [vmem:[#allocation7 + $0x39c] sm:$0xf] }
 0x34a   : > { %v3110_v18 = vpop.f32.mrf.mxu2  ;;  %3610 = vmatpush.bf16.msrb.mxu1 %v10089_v36  ;;  %v11318_v36 = vld [vmem:[#allocation7 + $0x19c] sm:$0xf] }
 0x34b   : > { %v3111_v54 = vadd.f32 %v3110_v18, %v16189_v13  ;;  %v3159_v35 = vpop.f32.mrf.mxu3  ;;  %v3014_v28 = vpop.f32.mrf.mxu0  ;;  %3561 = vmatpush.bf16.msrb.mxu0 %v9833_v11 }
 0x34c   : > { %v3015_v50 = vadd.f32 %v3014_v28, %v16190_v27  ;;  %v3063_v43 = vpop.f32.mrf.mxu1  ;;  %v16194_v28 = vld [vmem:[#allocation50_spill] sm:$0xff] }
 0x34d   : > { %v13213_v45 = vadd.f32 %v3159_v35, %v3111_v54 }
 0x34e   : > { %v13215_v0 = vadd.f32 %v3063_v43, %v3015_v50  ;;  %v9805_v50 = vor.u32 %v11318_v36, %v9802_v10  ;;  %v10058_v43 = vld [vmem:[#allocation7 + $0x3b8] sm:$0xf0]  ;;  %v11386_v10 = vld [vmem:[#allocation7 + $0x3b4] sm:$0xf0] }
 0x34f   : > { %16191 = vst [vmem:[#allocation47_spill] sm:$0xff] %v13213_v45  ;;  %v10061_v11 = vor.u32 %v11382_v46, %v10058_v43  ;;  %v16201_v43 = vld [vmem:[#allocation53_spill] sm:$0xff] }
 0x350   : > { %16192 = vst [vmem:[#allocation48_spill] sm:$0xff] %v13215_v0  ;;  %3660 = vmatpush.bf16.msrb.mxu2 %v9805_v50 }
 0x351   : > { %3709 = vmatpush.bf16.msrb.mxu3 %v10061_v11 }
 0x352   : > { %v3112_v26 = vpop.f32.mrf.mxu2 }
 0x353   : > { %v3113_v18 = vadd.f32 %v3112_v26, %v16193_v49  ;;  %v3161_v12 = vpop.f32.mrf.mxu3  ;;  %v3017_v13 = vpop.f32.mrf.mxu0 }
 0x354   : > { %v3018_v27 = vadd.f32 %v3017_v13, %v16194_v28  ;;  %v3066_v33 = vpop.f32.mrf.mxu1 }
 0x355   : > { %v13219_v54 = vadd.f32 %v3161_v12, %v3113_v18  ;;  %v16198_v12 = vld [vmem:[#allocation52_spill] sm:$0xff] }
 0x356   : > { %v13221_v35 = vadd.f32 %v3066_v33, %v3018_v27  ;;  %3212 = vmatmul.bf16.gmra.mxu0 %v12667_v60  ;;  %v9800_v33 = vld [vmem:[#allocation7 + $0x198] sm:$0xf] }
 0x357   : > { %16195 = vst [vmem:[#allocation49_spill] sm:$0xff] %v13219_v54  ;;  %3261 = vmatmul.bf16.gmra.mxu1 %v12669_v2  ;;  %3310 = vmatmul.bf16.gmra.mxu2 %v12667_v60  ;;  %v10056_v54 = vld [vmem:[#allocation7 + $0x398] sm:$0xf] }
 0x358   : > { %16196 = vst [vmem:[#allocation50_spill] sm:$0xff] %v13221_v35  ;;  %3359 = vmatmul.bf16.gmra.mxu3 %v12669_v2  ;;  %v11322_v35 = vld [vmem:[#allocation7 + $0x1b4] sm:$0xf0]  ;;  %v10057_v45 = vor.u32 %v11386_v10, %v10056_v54  ;;  %v9770_v54 = vld [vmem:[#allocation7 + $0x178] sm:$0xf0]  ;;  %v16205_v10 = vld [vmem:[#allocation55_spill] sm:$0xff] }
 0x359   : > { %v9801_v36 = vor.u32 %v11322_v35, %v9800_v33  ;;  %v11374_v35 = vld [vmem:[#allocation7 + $0x35c] sm:$0xf] }
 0x35a   : > { %v3115_v52 = vpop.f32.mrf.mxu2  ;;  %3611 = vmatpush.bf16.msrb.mxu1 %v10057_v45  ;;  %v11310_v45 = vld [vmem:[#allocation7 + $0x15c] sm:$0xf] }
 0x35b   : > { %v3116_v26 = vadd.f32 %v3115_v52, %v16197_v44  ;;  %v3164_v49 = vpop.f32.mrf.mxu3  ;;  %v3019_v18 = vpop.f32.mrf.mxu0  ;;  %3562 = vmatpush.bf16.msrb.mxu0 %v9801_v36 }
 0x35c   : > { %v3020_v13 = vadd.f32 %v3019_v18, %v16198_v12  ;;  %v3068_v28 = vpop.f32.mrf.mxu1  ;;  %v16202_v18 = vld [vmem:[#allocation54_spill] sm:$0xff] }
 0x35d   : > { %v13229_v27 = vadd.f32 %v3164_v49, %v3116_v26 }
 0x35e   : > { %v13231_v0 = vadd.f32 %v3068_v28, %v3020_v13  ;;  %v9773_v13 = vor.u32 %v11310_v45, %v9770_v54  ;;  %v10026_v28 = vld [vmem:[#allocation7 + $0x378] sm:$0xf0]  ;;  %v11378_v54 = vld [vmem:[#allocation7 + $0x374] sm:$0xf0] }
 0x35f   : > { %16199 = vst [vmem:[#allocation51_spill] sm:$0xff] %v13229_v27  ;;  %v10029_v36 = vor.u32 %v11374_v35, %v10026_v28  ;;  %v16209_v28 = vld [vmem:[#allocation57_spill] sm:$0xff] }
 0x360   : > { %16200 = vst [vmem:[#allocation52_spill] sm:$0xff] %v13231_v0  ;;  %3661 = vmatpush.bf16.msrb.mxu2 %v9773_v13 }
 0x361   : > { %3710 = vmatpush.bf16.msrb.mxu3 %v10029_v36 }
 0x362   : > { %v3117_v46 = vpop.f32.mrf.mxu2 }
 0x363   : > { %v3118_v52 = vadd.f32 %v3117_v46, %v16201_v43  ;;  %v3166_v50 = vpop.f32.mrf.mxu3  ;;  %v3178_v44 = vpop.f32.mrf.mxu0 }
 0x364   : > { %v3179_v12 = vadd.f32 %v3178_v44, %v16202_v18  ;;  %v3227_v11 = vpop.f32.mrf.mxu1 }
 0x365   : > { %v13235_v26 = vadd.f32 %v3166_v50, %v3118_v52  ;;  %v16206_v50 = vld [vmem:[#allocation56_spill] sm:$0xff] }
 0x366   : > { %v13237_v49 = vadd.f32 %v3227_v11, %v3179_v12  ;;  %3373 = vmatmul.bf16.vlgmr.msra.gmra.mxu0 %v12466_v24  ;;  %v9768_v11 = vld [vmem:[#allocation7 + $0x158] sm:$0xf] }
 0x367   : > { %16203 = vst [vmem:[#allocation53_spill] sm:$0xff] %v13235_v26  ;;  %3422 = vmatmul.bf16.vlgmr.msra.gmra.mxu1 %v12476_v38  ;;  %3471 = vmatmul.bf16.vlgmr.msra.gmra.mxu2 %v12466_v24  ;;  %v10024_v26 = vld [vmem:[#allocation7 + $0x358] sm:$0xf] }
 0x368   : > { %16204 = vst [vmem:[#allocation54_spill] sm:$0xff] %v13237_v49  ;;  %3520 = vmatmul.bf16.vlgmr.msra.gmra.mxu3 %v12476_v38  ;;  %v11314_v49 = vld [vmem:[#allocation7 + $0x174] sm:$0xf0]  ;;  %v10025_v27 = vor.u32 %v11378_v54, %v10024_v26  ;;  %v9738_v26 = vld [vmem:[#allocation7 + $0x138] sm:$0xf0]  ;;  %v16213_v54 = vld [vmem:[#allocation59_spill] sm:$0xff] }
 0x369   : > { %v9769_v45 = vor.u32 %v11314_v49, %v9768_v11  ;;  %v11366_v49 = vld [vmem:[#allocation7 + $0x31c] sm:$0xf] }
 0x36a   : > { %v3276_v33 = vpop.f32.mrf.mxu2  ;;  %3612 = vmatpush.bf16.msrb.mxu1 %v10025_v27  ;;  %v11302_v27 = vld [vmem:[#allocation7 + $0x11c] sm:$0xf] }
 0x36b   : > { %v3277_v46 = vadd.f32 %v3276_v33, %v16205_v10  ;;  %v3325_v43 = vpop.f32.mrf.mxu3  ;;  %v3180_v52 = vpop.f32.mrf.mxu0  ;;  %3563 = vmatpush.bf16.msrb.mxu0 %v9769_v45 }
 0x36c   : > { %v3181_v44 = vadd.f32 %v3180_v52, %v16206_v50  ;;  %v3229_v18 = vpop.f32.mrf.mxu1  ;;  %v16210_v52 = vld [vmem:[#allocation58_spill] sm:$0xff] }
 0x36d   : > { %v13245_v12 = vadd.f32 %v3325_v43, %v3277_v46 }
 0x36e   : > { %v13247_v0 = vadd.f32 %v3229_v18, %v3181_v44  ;;  %v9741_v44 = vor.u32 %v11302_v27, %v9738_v26  ;;  %v9994_v18 = vld [vmem:[#allocation7 + $0x338] sm:$0xf0]  ;;  %v11370_v26 = vld [vmem:[#allocation7 + $0x334] sm:$0xf0] }
 0x36f   : > { %16207 = vst [vmem:[#allocation55_spill] sm:$0xff] %v13245_v12  ;;  %v9997_v45 = vor.u32 %v11366_v49, %v9994_v18  ;;  %v16217_v18 = vld [vmem:[#allocation61_spill] sm:$0xff] }
 0x370   : > { %16208 = vst [vmem:[#allocation56_spill] sm:$0xff] %v13247_v0  ;;  %3662 = vmatpush.bf16.msrb.mxu2 %v9741_v44 }
 0x371   : > { %3711 = vmatpush.bf16.msrb.mxu3 %v9997_v45 }
 0x372   : > { %v3278_v35 = vpop.f32.mrf.mxu2 }
 0x373   : > { %v3279_v33 = vadd.f32 %v3278_v35, %v16209_v28  ;;  %v3327_v13 = vpop.f32.mrf.mxu3  ;;  %v3183_v10 = vpop.f32.mrf.mxu0 }
 0x374   : > { %v3184_v50 = vadd.f32 %v3183_v10, %v16210_v52  ;;  %v3232_v36 = vpop.f32.mrf.mxu1 }
 0x375   : > { %v13251_v46 = vadd.f32 %v3327_v13, %v3279_v33  ;;  %v16214_v13 = vld [vmem:[#allocation60_spill] sm:$0xff] }
 0x376   : > { %v13253_v43 = vadd.f32 %v3232_v36, %v3184_v50  ;;  %3378 = vmatmul.bf16.gmra.mxu0 %v12468_v29  ;;  %v9736_v36 = vld [vmem:[#allocation7 + $0x118] sm:$0xf] }
 0x377   : > { %16211 = vst [vmem:[#allocation57_spill] sm:$0xff] %v13251_v46  ;;  %3427 = vmatmul.bf16.gmra.mxu1 %v12479_v42  ;;  %3476 = vmatmul.bf16.gmra.mxu2 %v12468_v29  ;;  %v9992_v46 = vld [vmem:[#allocation7 + $0x318] sm:$0xf] }
 0x378   : > { %16212 = vst [vmem:[#allocation58_spill] sm:$0xff] %v13253_v43  ;;  %3525 = vmatmul.bf16.gmra.mxu3 %v12479_v42  ;;  %v11306_v43 = vld [vmem:[#allocation7 + $0x134] sm:$0xf0]  ;;  %v9993_v12 = vor.u32 %v11370_v26, %v9992_v46  ;;  %v9706_v46 = vld [vmem:[#allocation7 + $0xf8] sm:$0xf0]  ;;  %v16221_v26 = vld [vmem:[#allocation63_spill] sm:$0xff] }
 0x379   : > { %v9737_v27 = vor.u32 %v11306_v43, %v9736_v36  ;;  %v11358_v43 = vld [vmem:[#allocation7 + $0x2dc] sm:$0xf] }
 0x37a   : > { %v3281_v11 = vpop.f32.mrf.mxu2  ;;  %3613 = vmatpush.bf16.msrb.mxu1 %v9993_v12  ;;  %v11294_v12 = vld [vmem:[#allocation7 + $0xdc] sm:$0xf] }
 0x37b   : > { %v3282_v35 = vadd.f32 %v3281_v11, %v16213_v54  ;;  %v3330_v28 = vpop.f32.mrf.mxu3  ;;  %v3185_v33 = vpop.f32.mrf.mxu0  ;;  %3564 = vmatpush.bf16.msrb.mxu0 %v9737_v27 }
 0x37c   : > { %v3186_v10 = vadd.f32 %v3185_v33, %v16214_v13  ;;  %v3234_v52 = vpop.f32.mrf.mxu1  ;;  %v16218_v33 = vld [vmem:[#allocation62_spill] sm:$0xff] }
 0x37d   : > { %v13261_v50 = vadd.f32 %v3330_v28, %v3282_v35 }
 0x37e   : > { %v13263_v0 = vadd.f32 %v3234_v52, %v3186_v10  ;;  %v9709_v10 = vor.u32 %v11294_v12, %v9706_v46  ;;  %v9962_v52 = vld [vmem:[#allocation7 + $0x2f8] sm:$0xf0]  ;;  %v11362_v46 = vld [vmem:[#allocation7 + $0x2f4] sm:$0xf0] }
 0x37f   : > { %16215 = vst [vmem:[#allocation59_spill] sm:$0xff] %v13261_v50  ;;  %v9965_v27 = vor.u32 %v11358_v43, %v9962_v52  ;;  %v16225_v52 = vld [vmem:[#allocation65_spill] sm:$0xff] }
 0x380   : > { %16216 = vst [vmem:[#allocation60_spill] sm:$0xff] %v13263_v0  ;;  %3663 = vmatpush.bf16.msrb.mxu2 %v9709_v10 }
 0x381   : > { %3712 = vmatpush.bf16.msrb.mxu3 %v9965_v27 }
 0x382   : > { %v3283_v49 = vpop.f32.mrf.mxu2 }
 0x383   : > { %v3284_v11 = vadd.f32 %v3283_v49, %v16217_v18  ;;  %v3332_v44 = vpop.f32.mrf.mxu3  ;;  %v3188_v54 = vpop.f32.mrf.mxu0 }
 0x384   : > { %v3189_v13 = vadd.f32 %v3188_v54, %v16218_v33  ;;  %v3237_v45 = vpop.f32.mrf.mxu1 }
 0x385   : > { %v13267_v35 = vadd.f32 %v3332_v44, %v3284_v11  ;;  %v16222_v44 = vld [vmem:[#allocation64_spill] sm:$0xff] }
 0x386   : > { %v13269_v28 = vadd.f32 %v3237_v45, %v3189_v13  ;;  %3383 = vmatmul.bf16.gmra.mxu0 %v12515_v20  ;;  %v9704_v45 = vld [vmem:[#allocation7 + $0xd8] sm:$0xf] }
 0x387   : > { %16219 = vst [vmem:[#allocation61_spill] sm:$0xff] %v13267_v35  ;;  %3432 = vmatmul.bf16.gmra.mxu1 %v12518_v21  ;;  %3481 = vmatmul.bf16.gmra.mxu2 %v12515_v20  ;;  %v9960_v35 = vld [vmem:[#allocation7 + $0x2d8] sm:$0xf] }
 0x388   : > { %16220 = vst [vmem:[#allocation62_spill] sm:$0xff] %v13269_v28  ;;  %3530 = vmatmul.bf16.gmra.mxu3 %v12518_v21  ;;  %v11298_v28 = vld [vmem:[#allocation7 + $0xf4] sm:$0xf0]  ;;  %v9961_v50 = vor.u32 %v11362_v46, %v9960_v35  ;;  %v9674_v35 = vld [vmem:[#allocation7 + $0xb8] sm:$0xf0]  ;;  %v16229_v46 = vld [vmem:[#allocation67_spill] sm:$0xff] }
 0x389   : > { %v9705_v12 = vor.u32 %v11298_v28, %v9704_v45  ;;  %v11350_v28 = vld [vmem:[#allocation7 + $0x29c] sm:$0xf] }
 0x38a   : > { %v3286_v36 = vpop.f32.mrf.mxu2  ;;  %3614 = vmatpush.bf16.msrb.mxu1 %v9961_v50  ;;  %v11286_v50 = vld [vmem:[#allocation7 + $0x9c] sm:$0xf] }
 0x38b   : > { %v3287_v49 = vadd.f32 %v3286_v36, %v16221_v26  ;;  %v3335_v18 = vpop.f32.mrf.mxu3  ;;  %v3190_v11 = vpop.f32.mrf.mxu0  ;;  %3565 = vmatpush.bf16.msrb.mxu0 %v9705_v12 }
 0x38c   : > { %v3191_v54 = vadd.f32 %v3190_v11, %v16222_v44  ;;  %v3239_v33 = vpop.f32.mrf.mxu1  ;;  %v16226_v11 = vld [vmem:[#allocation66_spill] sm:$0xff] }
 0x38d   : > { %v13277_v13 = vadd.f32 %v3335_v18, %v3287_v49 }
 0x38e   : > { %v13279_v0 = vadd.f32 %v3239_v33, %v3191_v54  ;;  %v9677_v54 = vor.u32 %v11286_v50, %v9674_v35  ;;  %v9930_v33 = vld [vmem:[#allocation7 + $0x2b8] sm:$0xf0]  ;;  %v11354_v35 = vld [vmem:[#allocation7 + $0x2b4] sm:$0xf0] }
 0x38f   : > { %16223 = vst [vmem:[#allocation63_spill] sm:$0xff] %v13277_v13  ;;  %v9933_v12 = vor.u32 %v11350_v28, %v9930_v33  ;;  %v16233_v33 = vld [vmem:[#allocation69_spill] sm:$0xff] }
 0x390   : > { %16224 = vst [vmem:[#allocation64_spill] sm:$0xff] %v13279_v0  ;;  %3664 = vmatpush.bf16.msrb.mxu2 %v9677_v54 }
 0x391   : > { %3713 = vmatpush.bf16.msrb.mxu3 %v9933_v12 }
 0x392   : > { %v3288_v43 = vpop.f32.mrf.mxu2 }
 0x393   : > { %v3289_v36 = vadd.f32 %v3288_v43, %v16225_v52  ;;  %v3337_v10 = vpop.f32.mrf.mxu3  ;;  %v3193_v26 = vpop.f32.mrf.mxu0 }
 0x394   : > { %v3194_v44 = vadd.f32 %v3193_v26, %v16226_v11  ;;  %v3242_v27 = vpop.f32.mrf.mxu1 }
 0x395   : > { %v13283_v49 = vadd.f32 %v3337_v10, %v3289_v36  ;;  %v16230_v10 = vld [vmem:[#allocation68_spill] sm:$0xff] }
 0x396   : > { %v13285_v18 = vadd.f32 %v3242_v27, %v3194_v44  ;;  %3388 = vmatmul.bf16.gmra.mxu0 %v12547_v58  ;;  %v9672_v27 = vld [vmem:[#allocation7 + $0x98] sm:$0xf] }
 0x397   : > { %16227 = vst [vmem:[#allocation65_spill] sm:$0xff] %v13283_v49  ;;  %3437 = vmatmul.bf16.gmra.mxu1 %v12550_v61  ;;  %3486 = vmatmul.bf16.gmra.mxu2 %v12547_v58  ;;  %v9928_v49 = vld [vmem:[#allocation7 + $0x298] sm:$0xf] }
 0x398   : > { %16228 = vst [vmem:[#allocation66_spill] sm:$0xff] %v13285_v18  ;;  %3535 = vmatmul.bf16.gmra.mxu3 %v12550_v61  ;;  %v11290_v18 = vld [vmem:[#allocation7 + $0xb4] sm:$0xf0]  ;;  %v9929_v13 = vor.u32 %v11354_v35, %v9928_v49  ;;  %v9642_v49 = vld [vmem:[#allocation7 + $0x78] sm:$0xf0]  ;;  %v16237_v35 = vld [vmem:[#allocation71_spill] sm:$0xff] }
 0x399   : > { %v9673_v50 = vor.u32 %v11290_v18, %v9672_v27  ;;  %v11342_v18 = vld [vmem:[#allocation7 + $0x25c] sm:$0xf] }
 0x39a   : > { %v3291_v45 = vpop.f32.mrf.mxu2  ;;  %3615 = vmatpush.bf16.msrb.mxu1 %v9929_v13  ;;  %v11278_v13 = vld [vmem:[#allocation7 + $0x5c] sm:$0xf] }
 0x39b   : > { %v3292_v43 = vadd.f32 %v3291_v45, %v16229_v46  ;;  %v3340_v52 = vpop.f32.mrf.mxu3  ;;  %v3195_v36 = vpop.f32.mrf.mxu0  ;;  %3566 = vmatpush.bf16.msrb.mxu0 %v9673_v50 }
 0x39c   : > { %v3196_v26 = vadd.f32 %v3195_v36, %v16230_v10  ;;  %v3244_v11 = vpop.f32.mrf.mxu1  ;;  %v16234_v36 = vld [vmem:[#allocation70_spill] sm:$0xff] }
 0x39d   : > { %v13293_v44 = vadd.f32 %v3340_v52, %v3292_v43 }
 0x39e   : > { %v13295_v0 = vadd.f32 %v3244_v11, %v3196_v26  ;;  %v9645_v26 = vor.u32 %v11278_v13, %v9642_v49  ;;  %v9898_v11 = vld [vmem:[#allocation7 + $0x278] sm:$0xf0]  ;;  %v11346_v49 = vld [vmem:[#allocation7 + $0x274] sm:$0xf0] }
 0x39f   : > { %16231 = vst [vmem:[#allocation67_spill] sm:$0xff] %v13293_v44  ;;  %v9901_v50 = vor.u32 %v11342_v18, %v9898_v11  ;;  %v16241_v11 = vld [vmem:[#allocation73_spill] sm:$0xff] }
 0x3a0   : > { %16232 = vst [vmem:[#allocation68_spill] sm:$0xff] %v13295_v0  ;;  %3665 = vmatpush.bf16.msrb.mxu2 %v9645_v26 }
 0x3a1   : > { %3714 = vmatpush.bf16.msrb.mxu3 %v9901_v50 }
 0x3a2   : > { %v3293_v28 = vpop.f32.mrf.mxu2 }
 0x3a3   : > { %v3294_v45 = vadd.f32 %v3293_v28, %v16233_v33  ;;  %v3342_v54 = vpop.f32.mrf.mxu3  ;;  %v3198_v46 = vpop.f32.mrf.mxu0 }
 0x3a4   : > { %v3199_v10 = vadd.f32 %v3198_v46, %v16234_v36  ;;  %v3247_v12 = vpop.f32.mrf.mxu1 }
 0x3a5   : > { %v13299_v43 = vadd.f32 %v3342_v54, %v3294_v45  ;;  %v16238_v54 = vld [vmem:[#allocation72_spill] sm:$0xff] }
 0x3a6   : > { %v13301_v52 = vadd.f32 %v3247_v12, %v3199_v10  ;;  %3393 = vmatmul.bf16.gmra.mxu0 %v12577_v30  ;;  %v9640_v12 = vld [vmem:[#allocation7 + $0x58] sm:$0xf] }
 0x3a7   : > { %16235 = vst [vmem:[#allocation69_spill] sm:$0xff] %v13299_v43  ;;  %3442 = vmatmul.bf16.gmra.mxu1 %v12580_v31  ;;  %3491 = vmatmul.bf16.gmra.mxu2 %v12577_v30  ;;  %v9896_v43 = vld [vmem:[#allocation7 + $0x258] sm:$0xf] }
 0x3a8   : > { %16236 = vst [vmem:[#allocation70_spill] sm:$0xff] %v13301_v52  ;;  %3540 = vmatmul.bf16.gmra.mxu3 %v12580_v31  ;;  %v11282_v52 = vld [vmem:[#allocation7 + $0x74] sm:$0xf0]  ;;  %v9897_v44 = vor.u32 %v11346_v49, %v9896_v43  ;;  %v9610_v43 = vld [vmem:[#allocation7 + $0x38] sm:$0xf0]  ;;  %v16245_v49 = vld [vmem:[#allocation75_spill] sm:$0xff] }
 0x3a9   : > { %v9641_v13 = vor.u32 %v11282_v52, %v9640_v12  ;;  %v11334_v52 = vld [vmem:[#allocation7 + $0x21c] sm:$0xf] }
 0x3aa   : > { %v3296_v27 = vpop.f32.mrf.mxu2  ;;  %3616 = vmatpush.bf16.msrb.mxu1 %v9897_v44  ;;  %v11270_v44 = vld [vmem:[#allocation7 + $0x1c] sm:$0xf] }
 0x3ab   : > { %v3297_v28 = vadd.f32 %v3296_v27, %v16237_v35  ;;  %v3345_v33 = vpop.f32.mrf.mxu3  ;;  %v3200_v45 = vpop.f32.mrf.mxu0  ;;  %3567 = vmatpush.bf16.msrb.mxu0 %v9641_v13 }
 0x3ac   : > { %v3201_v46 = vadd.f32 %v3200_v45, %v16238_v54  ;;  %v3249_v36 = vpop.f32.mrf.mxu1  ;;  %v16242_v45 = vld [vmem:[#allocation74_spill] sm:$0xff] }
 0x3ad   : > { %v13309_v10 = vadd.f32 %v3345_v33, %v3297_v28 }
 0x3ae   : > { %v13311_v0 = vadd.f32 %v3249_v36, %v3201_v46  ;;  %v9613_v46 = vor.u32 %v11270_v44, %v9610_v43  ;;  %v9866_v36 = vld [vmem:[#allocation7 + $0x238] sm:$0xf0]  ;;  %v11338_v43 = vld [vmem:[#allocation7 + $0x234] sm:$0xf0] }
 0x3af   : > { %16239 = vst [vmem:[#allocation71_spill] sm:$0xff] %v13309_v10  ;;  %v9869_v13 = vor.u32 %v11334_v52, %v9866_v36  ;;  %v16249_v36 = vld [vmem:[#allocation77_spill] sm:$0xff] }
 0x3b0   : > { %16240 = vst [vmem:[#allocation72_spill] sm:$0xff] %v13311_v0  ;;  %3666 = vmatpush.bf16.msrb.mxu2 %v9613_v46 }
 0x3b1   : > { %3715 = vmatpush.bf16.msrb.mxu3 %v9869_v13 }
 0x3b2   : > { %v3298_v18 = vpop.f32.mrf.mxu2 }
 0x3b3   : > { %v3299_v27 = vadd.f32 %v3298_v18, %v16241_v11  ;;  %v3347_v26 = vpop.f32.mrf.mxu3  ;;  %v3203_v35 = vpop.f32.mrf.mxu0 }
 0x3b4   : > { %v3204_v54 = vadd.f32 %v3203_v35, %v16242_v45  ;;  %v3252_v50 = vpop.f32.mrf.mxu1 }
 0x3b5   : > { %v13315_v28 = vadd.f32 %v3347_v26, %v3299_v27  ;;  %v16246_v26 = vld [vmem:[#allocation76_spill] sm:$0xff] }
 0x3b6   : > { %v13317_v33 = vadd.f32 %v3252_v50, %v3204_v54  ;;  %3398 = vmatmul.bf16.gmra.mxu0 %v12607_v16  ;;  %v9608_v50 = vld [vmem:[#allocation7 + $0x18] sm:$0xf] }
 0x3b7   : > { %16243 = vst [vmem:[#allocation73_spill] sm:$0xff] %v13315_v28  ;;  %3447 = vmatmul.bf16.gmra.mxu1 %v12610_v17  ;;  %3496 = vmatmul.bf16.gmra.mxu2 %v12607_v16  ;;  %v9864_v28 = vld [vmem:[#allocation7 + $0x218] sm:$0xf] }
 0x3b8   : > { %16244 = vst [vmem:[#allocation74_spill] sm:$0xff] %v13317_v33  ;;  %3545 = vmatmul.bf16.gmra.mxu3 %v12610_v17  ;;  %v11274_v33 = vld [vmem:[#allocation7 + $0x34] sm:$0xf0]  ;;  %v9865_v10 = vor.u32 %v11338_v43, %v9864_v28  ;;  %v10322_v28 = vld [vmem:[#allocation7 + $0x9e0] sm:$0xf0]  ;;  %v16253_v43 = vld [vmem:[#allocation79_spill] sm:$0xff] }
 0x3b9   : > { %v9609_v44 = vor.u32 %v11274_v33, %v9608_v50  ;;  %v11645_v33 = vld [vmem:[#allocation7 + $0xbc4] sm:$0xf] }
 0x3ba   : > { %v3301_v12 = vpop.f32.mrf.mxu2  ;;  %3617 = vmatpush.bf16.msrb.mxu1 %v9865_v10  ;;  %v11581_v10 = vld [vmem:[#allocation7 + $0x9c4] sm:$0xf] }
 0x3bb   : > { %v3302_v18 = vadd.f32 %v3301_v12, %v16245_v49  ;;  %v3350_v11 = vpop.f32.mrf.mxu3  ;;  %v3205_v27 = vpop.f32.mrf.mxu0  ;;  %3568 = vmatpush.bf16.msrb.mxu0 %v9609_v44 }
 0x3bc   : > { %v3206_v35 = vadd.f32 %v3205_v27, %v16246_v26  ;;  %v3254_v45 = vpop.f32.mrf.mxu1  ;;  %v16250_v27 = vld [vmem:[#allocation78_spill] sm:$0xff] }
 0x3bd   : > { %v13325_v54 = vadd.f32 %v3350_v11, %v3302_v18 }
 0x3be   : > { %v13327_v0 = vadd.f32 %v3254_v45, %v3206_v35  ;;  %v10325_v35 = vor.u32 %v11581_v10, %v10322_v28  ;;  %v10578_v45 = vld [vmem:[#allocation7 + $0xbe0] sm:$0xf0]  ;;  %v11649_v28 = vld [vmem:[#allocation7 + $0xbdc] sm:$0xf0] }
 0x3bf   : > { %16247 = vst [vmem:[#allocation75_spill] sm:$0xff] %v13325_v54  ;;  %v10581_v44 = vor.u32 %v11645_v33, %v10578_v45  ;;  %v16255_v45 = vld [vmem:[#allocation81_spill] sm:$0xff] }
 0x3c0   : > { %16248 = vst [vmem:[#allocation76_spill] sm:$0xff] %v13327_v0  ;;  %4692 = vmatpush.bf16.msra.mxu2 %v10325_v35 }
 0x3c1   : > { %4741 = vmatpush.bf16.msra.mxu3 %v10581_v44 }
 0x3c2   : > { %v3303_v52 = vpop.f32.mrf.mxu2 }
 0x3c3   : > { %v3304_v12 = vadd.f32 %v3303_v52, %v16249_v36  ;;  %v3352_v46 = vpop.f32.mrf.mxu3  ;;  %v3208_v49 = vpop.f32.mrf.mxu0 }
 0x3c4   : > { %v3209_v26 = vadd.f32 %v3208_v49, %v16250_v27  ;;  %v3257_v13 = vpop.f32.mrf.mxu1 }
 0x3c5   : > { %v13331_v18 = vadd.f32 %v3352_v46, %v3304_v12  ;;  %v16254_v46 = vld [vmem:[#allocation80_spill] sm:$0xff] }
 0x3c6   : > { %v13333_v11 = vadd.f32 %v3257_v13, %v3209_v26  ;;  %3403 = vmatmul.bf16.gmra.mxu0 %v12637_v1  ;;  %v10320_v13 = vld [vmem:[#allocation7 + $0x9c0] sm:$0xf] }
 0x3c7   : > { %16251 = vst [vmem:[#allocation77_spill] sm:$0xff] %v13331_v18  ;;  %3452 = vmatmul.bf16.gmra.mxu1 %v12640_v4  ;;  %3501 = vmatmul.bf16.gmra.mxu2 %v12637_v1  ;;  %v10576_v18 = vld [vmem:[#allocation7 + $0xbc0] sm:$0xf] }
 0x3c8   : > { %16252 = vst [vmem:[#allocation78_spill] sm:$0xff] %v13333_v11  ;;  %3550 = vmatmul.bf16.gmra.mxu3 %v12640_v4  ;;  %v11585_v11 = vld [vmem:[#allocation7 + $0x9dc] sm:$0xf0]  ;;  %v10577_v54 = vor.u32 %v11649_v28, %v10576_v18  ;;  %v10290_v18 = vld [vmem:[#allocation7 + $0x9a0] sm:$0xf0] }
 0x3c9   : > { %v10321_v10 = vor.u32 %v11585_v11, %v10320_v13  ;;  %v11637_v11 = vld [vmem:[#allocation7 + $0xb84] sm:$0xf] }
 0x3ca   : > { %v3306_v50 = vpop.f32.mrf.mxu2  ;;  %4643 = vmatpush.bf16.msra.mxu1 %v10577_v54  ;;  %v11573_v54 = vld [vmem:[#allocation7 + $0x984] sm:$0xf] }
 0x3cb   : > { %v3307_v52 = vadd.f32 %v3306_v50, %v16253_v43  ;;  %v3355_v36 = vpop.f32.mrf.mxu3  ;;  %v3210_v12 = vpop.f32.mrf.mxu0  ;;  %4594 = vmatpush.bf16.msra.mxu0 %v10321_v10 }
 0x3cc   : > { %v3211_v49 = vadd.f32 %v3210_v12, %v16254_v46  ;;  %v3259_v27 = vpop.f32.mrf.mxu1  ;;  %v16256_v12 = vld [vmem:[#allocation82_spill] sm:$0xff] }
 0x3cd   : > { %v13341_v26 = vadd.f32 %v3355_v36, %v3307_v52 }
 0x3ce   : > { %v13343_v0 = vadd.f32 %v3259_v27, %v3211_v49  ;;  %v10293_v49 = vor.u32 %v11573_v54, %v10290_v18  ;;  %v10546_v27 = vld [vmem:[#allocation7 + $0xba0] sm:$0xf0]  ;;  %v11641_v18 = vld [vmem:[#allocation7 + $0xb9c] sm:$0xf0] }
 0x3cf   : > { %v10549_v10 = vor.u32 %v11637_v11, %v10546_v27  ;;  %v16259_v11 = vld [vmem:[#allocation83_spill] sm:$0xff] }
 0x3d0   : > { %4693 = vmatpush.bf16.msra.mxu2 %v10293_v49 }
 0x3d1   : > { %4742 = vmatpush.bf16.msra.mxu3 %v10549_v10 }
 0x3d2   : > { %v3308_v33 = vpop.f32.mrf.mxu2 }
 0x3d3   : > { %v3309_v50 = vadd.f32 %v3308_v33, %v16255_v45  ;;  %v3357_v35 = vpop.f32.mrf.mxu3  ;;  %v3213_v43 = vpop.f32.mrf.mxu0 }
 0x3d4   : > { %v3214_v46 = vadd.f32 %v3213_v43, %v16256_v12  ;;  %v3262_v44 = vpop.f32.mrf.mxu1  ;;  %v10288_v12 = vld [vmem:[#allocation7 + $0x980] sm:$0xf] }
 0x3d5   : > { %v13347_v52 = vadd.f32 %v3357_v35, %v3309_v50 }
 0x3d6   : > { %v13349_v36 = vadd.f32 %v3262_v44, %v3214_v46  ;;  %3408 = vmatmul.bf16.gmra.mxu0 %v12667_v60  ;;  %v11577_v46 = vld [vmem:[#allocation7 + $0x99c] sm:$0xf0] }
 0x3d7   : > { %16257 = vst [vmem:[#allocation79_spill] sm:$0xff] %v13347_v52  ;;  %3457 = vmatmul.bf16.gmra.mxu1 %v12669_v2  ;;  %3506 = vmatmul.bf16.gmra.mxu2 %v12667_v60  ;;  %v10544_v44 = vld [vmem:[#allocation7 + $0xb80] sm:$0xf]  ;;  %v10289_v54 = vor.u32 %v11577_v46, %v10288_v12  ;;  %v10514_v46 = vld [vmem:[#allocation7 + $0xb60] sm:$0xf0] }
 0x3d8   : > { %16258 = vst [vmem:[#allocation80_spill] sm:$0xff] %v13349_v36  ;;  %3555 = vmatmul.bf16.gmra.mxu3 %v12669_v2  ;;  %v10545_v52 = vor.u32 %v11641_v18, %v10544_v44 }
 0x3d9   : > { %4595 = vmatpush.bf16.msra.mxu0 %v10289_v54 }
 0x3da   : > { %v3311_v13 = vpop.f32.mrf.mxu2  ;;  %4644 = vmatpush.bf16.msra.mxu1 %v10545_v52  ;;  %v11565_v52 = vld [vmem:[#allocation7 + $0x944] sm:$0xf] }
 0x3db   : > { %v3312_v28 = vadd.f32 %v3311_v13, %v12910_v37  ;;  %v3360_v33 = vpop.f32.mrf.mxu3  ;;  %v3215_v45 = vpop.f32.mrf.mxu0 }
 0x3dc   : > { %v3216_v50 = vadd.f32 %v3215_v45, %v12912_v59  ;;  %v3264_v35 = vpop.f32.mrf.mxu1  ;;  %v16260_v59 = vld [vmem:[#allocation84_spill] sm:$0xff] }
 0x3dd   : > { %v13357_v43 = vadd.f32 %v3360_v33, %v3312_v28 }
 0x3de   : > { %v13359_v36 = vadd.f32 %v3264_v35, %v3216_v50  ;;  %v10258_v50 = vld [vmem:[#allocation7 + $0x960] sm:$0xf0] }
 0x3df   : > { %v11629_v35 = vld [vmem:[#allocation7 + $0xb44] sm:$0xf]  ;;  %v10261_v12 = vor.u32 %v11565_v52, %v10258_v50  ;;  %v11633_v50 = vld [vmem:[#allocation7 + $0xb5c] sm:$0xf0] }
 0x3e0   : > { %v10517_v54 = vor.u32 %v11629_v35, %v10514_v46  ;;  %v16263_v35 = vld [vmem:[#allocation85_spill] sm:$0xff] }
 0x3e1   : > { %4694 = vmatpush.bf16.msra.mxu2 %v10261_v12 }
 0x3e2   : > { %v3313_v37 = vpop.f32.mrf.mxu2  ;;  %4743 = vmatpush.bf16.msra.mxu3 %v10517_v54 }
 0x3e3   : > { %v3314_v27 = vadd.f32 %v3313_v37, %v16259_v11  ;;  %v3362_v49 = vpop.f32.mrf.mxu3  ;;  %v3374_v13 = vpop.f32.mrf.mxu0 }
 0x3e4   : > { %v3375_v45 = vadd.f32 %v3374_v13, %v16260_v59  ;;  %v3423_v10 = vpop.f32.mrf.mxu1  ;;  %v10256_v59 = vld [vmem:[#allocation7 + $0x940] sm:$0xf] }
 0x3e5   : > { %v13363_v28 = vadd.f32 %v3362_v49, %v3314_v27 }
 0x3e6   : > { %v13365_v33 = vadd.f32 %v3423_v10, %v3375_v45  ;;  %3569 = vmatmul.bf16.vlgmr.msrb.gmra.mxu0 %v12466_v24  ;;  %v11569_v45 = vld [vmem:[#allocation7 + $0x95c] sm:$0xf0] }
 0x3e7   : > { %16261 = vst [vmem:[#allocation81_spill] sm:$0xff] %v13363_v28  ;;  %3618 = vmatmul.bf16.vlgmr.msrb.gmra.mxu1 %v12476_v38  ;;  %3667 = vmatmul.bf16.vlgmr.msrb.gmra.mxu2 %v12466_v24  ;;  %v10512_v10 = vld [vmem:[#allocation7 + $0xb40] sm:$0xf]  ;;  %v10257_v52 = vor.u32 %v11569_v45, %v10256_v59  ;;  %v10482_v45 = vld [vmem:[#allocation7 + $0xb20] sm:$0xf0] }
 0x3e8   : > { %16262 = vst [vmem:[#allocation82_spill] sm:$0xff] %v13365_v33  ;;  %3716 = vmatmul.bf16.vlgmr.msrb.gmra.mxu3 %v12476_v38  ;;  %v10513_v28 = vor.u32 %v11633_v50, %v10512_v10 }
 0x3e9   : > { %4596 = vmatpush.bf16.msra.mxu0 %v10257_v52 }
 0x3ea   : > { %v3472_v44 = vpop.f32.mrf.mxu2  ;;  %4645 = vmatpush.bf16.msra.mxu1 %v10513_v28  ;;  %v11557_v28 = vld [vmem:[#allocation7 + $0x904] sm:$0xf] }
 0x3eb   : > { %v3473_v18 = vadd.f32 %v3472_v44, %v12922_v51  ;;  %v3521_v37 = vpop.f32.mrf.mxu3  ;;  %v3376_v11 = vpop.f32.mrf.mxu0 }
 0x3ec   : > { %v3377_v27 = vadd.f32 %v3376_v11, %v12924_v3  ;;  %v3425_v49 = vpop.f32.mrf.mxu1  ;;  %v16264_v3 = vld [vmem:[#allocation86_spill] sm:$0xff] }
 0x3ed   : > { %v13373_v13 = vadd.f32 %v3521_v37, %v3473_v18 }
 0x3ee   : > { %v13375_v33 = vadd.f32 %v3425_v49, %v3377_v27  ;;  %v10226_v27 = vld [vmem:[#allocation7 + $0x920] sm:$0xf0] }
 0x3ef   : > { %v11621_v49 = vld [vmem:[#allocation7 + $0xb04] sm:$0xf]  ;;  %v10229_v59 = vor.u32 %v11557_v28, %v10226_v27  ;;  %v11625_v27 = vld [vmem:[#allocation7 + $0xb1c] sm:$0xf0] }
 0x3f0   : > { %v10485_v52 = vor.u32 %v11621_v49, %v10482_v45  ;;  %v16267_v49 = vld [vmem:[#allocation87_spill] sm:$0xff] }
 0x3f1   : > { %4695 = vmatpush.bf16.msra.mxu2 %v10229_v59 }
 0x3f2   : > { %v3474_v51 = vpop.f32.mrf.mxu2  ;;  %4744 = vmatpush.bf16.msra.mxu3 %v10485_v52 }
 0x3f3   : > { %v3475_v46 = vadd.f32 %v3474_v51, %v16263_v35  ;;  %v3523_v12 = vpop.f32.mrf.mxu3  ;;  %v3379_v44 = vpop.f32.mrf.mxu0 }
 0x3f4   : > { %v3380_v11 = vadd.f32 %v3379_v44, %v16264_v3  ;;  %v3428_v54 = vpop.f32.mrf.mxu1  ;;  %v10224_v3 = vld [vmem:[#allocation7 + $0x900] sm:$0xf] }
 0x3f5   : > { %v13379_v18 = vadd.f32 %v3523_v12, %v3475_v46 }
 0x3f6   : > { %v13381_v37 = vadd.f32 %v3428_v54, %v3380_v11  ;;  %3574 = vmatmul.bf16.gmra.mxu0 %v12468_v29  ;;  %v11561_v11 = vld [vmem:[#allocation7 + $0x91c] sm:$0xf0] }
 0x3f7   : > { %16265 = vst [vmem:[#allocation83_spill] sm:$0xff] %v13379_v18  ;;  %3623 = vmatmul.bf16.gmra.mxu1 %v12479_v42  ;;  %3672 = vmatmul.bf16.gmra.mxu2 %v12468_v29  ;;  %v10480_v54 = vld [vmem:[#allocation7 + $0xb00] sm:$0xf]  ;;  %v10225_v28 = vor.u32 %v11561_v11, %v10224_v3  ;;  %v10450_v11 = vld [vmem:[#allocation7 + $0xae0] sm:$0xf0] }
 0x3f8   : > { %16266 = vst [vmem:[#allocation84_spill] sm:$0xff] %v13381_v37  ;;  %3721 = vmatmul.bf16.gmra.mxu3 %v12479_v42  ;;  %v10481_v18 = vor.u32 %v11625_v27, %v10480_v54 }
 0x3f9   : > { %4597 = vmatpush.bf16.msra.mxu0 %v10225_v28 }
 0x3fa   : > { %v3477_v10 = vpop.f32.mrf.mxu2  ;;  %4646 = vmatpush.bf16.msra.mxu1 %v10481_v18  ;;  %v11549_v18 = vld [vmem:[#allocation7 + $0x8c4] sm:$0xf] }
 0x3fb   : > { %v3478_v50 = vadd.f32 %v3477_v10, %v12934_v7  ;;  %v3526_v51 = vpop.f32.mrf.mxu3  ;;  %v3381_v35 = vpop.f32.mrf.mxu0 }
 0x3fc   : > { %v3382_v46 = vadd.f32 %v3381_v35, %v12936_v55  ;;  %v3430_v12 = vpop.f32.mrf.mxu1  ;;  %v16268_v55 = vld [vmem:[#allocation88_spill] sm:$0xff] }
 0x3fd   : > { %v13389_v44 = vadd.f32 %v3526_v51, %v3478_v50 }
 0x3fe   : > { %v13391_v37 = vadd.f32 %v3430_v12, %v3382_v46  ;;  %v10194_v46 = vld [vmem:[#allocation7 + $0x8e0] sm:$0xf0] }
 0x3ff   : > { %v11613_v12 = vld [vmem:[#allocation7 + $0xac4] sm:$0xf]  ;;  %v10197_v3 = vor.u32 %v11549_v18, %v10194_v46  ;;  %v11617_v46 = vld [vmem:[#allocation7 + $0xadc] sm:$0xf0] }
 0x400   : > { %v10453_v28 = vor.u32 %v11613_v12, %v10450_v11  ;;  %v16271_v12 = vld [vmem:[#allocation89_spill] sm:$0xff] }
 0x401   : > { %4696 = vmatpush.bf16.msra.mxu2 %v10197_v3 }
 0x402   : > { %v3479_v7 = vpop.f32.mrf.mxu2  ;;  %4745 = vmatpush.bf16.msra.mxu3 %v10453_v28 }
 0x403   : > { %v3480_v45 = vadd.f32 %v3479_v7, %v16267_v49  ;;  %v3528_v59 = vpop.f32.mrf.mxu3  ;;  %v3384_v10 = vpop.f32.mrf.mxu0 }
 0x404   : > { %v3385_v35 = vadd.f32 %v3384_v10, %v16268_v55  ;;  %v3433_v52 = vpop.f32.mrf.mxu1  ;;  %v10192_v55 = vld [vmem:[#allocation7 + $0x8c0] sm:$0xf] }
 0x405   : > { %v13395_v50 = vadd.f32 %v3528_v59, %v3480_v45 }
 0x406   : > { %v13397_v51 = vadd.f32 %v3433_v52, %v3385_v35  ;;  %3579 = vmatmul.bf16.gmra.mxu0 %v12515_v20  ;;  %v11553_v35 = vld [vmem:[#allocation7 + $0x8dc] sm:$0xf0] }
 0x407   : > { %16269 = vst [vmem:[#allocation85_spill] sm:$0xff] %v13395_v50  ;;  %3628 = vmatmul.bf16.gmra.mxu1 %v12518_v21  ;;  %3677 = vmatmul.bf16.gmra.mxu2 %v12515_v20  ;;  %v10448_v52 = vld [vmem:[#allocation7 + $0xac0] sm:$0xf]  ;;  %v10193_v18 = vor.u32 %v11553_v35, %v10192_v55  ;;  %v10418_v35 = vld [vmem:[#allocation7 + $0xaa0] sm:$0xf0] }
 0x408   : > { %16270 = vst [vmem:[#allocation86_spill] sm:$0xff] %v13397_v51  ;;  %3726 = vmatmul.bf16.gmra.mxu3 %v12518_v21  ;;  %v10449_v50 = vor.u32 %v11617_v46, %v10448_v52 }
 0x409   : > { %4598 = vmatpush.bf16.msra.mxu0 %v10193_v18 }
 0x40a   : > { %v3482_v54 = vpop.f32.mrf.mxu2  ;;  %4647 = vmatpush.bf16.msra.mxu1 %v10449_v50  ;;  %v11541_v50 = vld [vmem:[#allocation7 + $0x884] sm:$0xf] }
 0x40b   : > { %v3483_v27 = vadd.f32 %v3482_v54, %v12946_v56  ;;  %v3531_v7 = vpop.f32.mrf.mxu3  ;;  %v3386_v49 = vpop.f32.mrf.mxu0 }
 0x40c   : > { %v3387_v45 = vadd.f32 %v3386_v49, %v12948_v22  ;;  %v3435_v59 = vpop.f32.mrf.mxu1  ;;  %v16272_v22 = vld [vmem:[#allocation90_spill] sm:$0xff] }
 0x40d   : > { %v13405_v10 = vadd.f32 %v3531_v7, %v3483_v27 }
 0x40e   : > { %v13407_v51 = vadd.f32 %v3435_v59, %v3387_v45  ;;  %v10162_v45 = vld [vmem:[#allocation7 + $0x8a0] sm:$0xf0] }
 0x40f   : > { %v11605_v59 = vld [vmem:[#allocation7 + $0xa84] sm:$0xf]  ;;  %v10165_v55 = vor.u32 %v11541_v50, %v10162_v45  ;;  %v11609_v45 = vld [vmem:[#allocation7 + $0xa9c] sm:$0xf0] }
 0x410   : > { %v10421_v18 = vor.u32 %v11605_v59, %v10418_v35  ;;  %v16275_v59 = vld [vmem:[#allocation91_spill] sm:$0xff] }
 0x411   : > { %4697 = vmatpush.bf16.msra.mxu2 %v10165_v55 }
 0x412   : > { %v3484_v56 = vpop.f32.mrf.mxu2  ;;  %4746 = vmatpush.bf16.msra.mxu3 %v10421_v18 }
 0x413   : > { %v3485_v11 = vadd.f32 %v3484_v56, %v16271_v12  ;;  %v3533_v3 = vpop.f32.mrf.mxu3  ;;  %v3389_v54 = vpop.f32.mrf.mxu0 }
 0x414   : > { %v3390_v49 = vadd.f32 %v3389_v54, %v16272_v22  ;;  %v3438_v28 = vpop.f32.mrf.mxu1  ;;  %v10160_v22 = vld [vmem:[#allocation7 + $0x880] sm:$0xf] }
 0x415   : > { %v13411_v27 = vadd.f32 %v3533_v3, %v3485_v11 }
 0x416   : > { %v13413_v7 = vadd.f32 %v3438_v28, %v3390_v49  ;;  %3584 = vmatmul.bf16.gmra.mxu0 %v12547_v58  ;;  %v11545_v49 = vld [vmem:[#allocation7 + $0x89c] sm:$0xf0] }
 0x417   : > { %16273 = vst [vmem:[#allocation87_spill] sm:$0xff] %v13411_v27  ;;  %3633 = vmatmul.bf16.gmra.mxu1 %v12550_v61  ;;  %3682 = vmatmul.bf16.gmra.mxu2 %v12547_v58  ;;  %v10416_v28 = vld [vmem:[#allocation7 + $0xa80] sm:$0xf]  ;;  %v10161_v50 = vor.u32 %v11545_v49, %v10160_v22  ;;  %v10386_v49 = vld [vmem:[#allocation7 + $0xa60] sm:$0xf0] }
 0x418   : > { %16274 = vst [vmem:[#allocation88_spill] sm:$0xff] %v13413_v7  ;;  %3731 = vmatmul.bf16.gmra.mxu3 %v12550_v61  ;;  %v10417_v27 = vor.u32 %v11609_v45, %v10416_v28 }
 0x419   : > { %4599 = vmatpush.bf16.msra.mxu0 %v10161_v50 }
 0x41a   : > { %v3487_v52 = vpop.f32.mrf.mxu2  ;;  %4648 = vmatpush.bf16.msra.mxu1 %v10417_v27  ;;  %v11533_v27 = vld [vmem:[#allocation7 + $0x844] sm:$0xf] }
 0x41b   : > { %v3488_v46 = vadd.f32 %v3487_v52, %v12958_v23  ;;  %v3536_v56 = vpop.f32.mrf.mxu3  ;;  %v3391_v12 = vpop.f32.mrf.mxu0 }
 0x41c   : > { %v3392_v11 = vadd.f32 %v3391_v12, %v12960_v5  ;;  %v3440_v3 = vpop.f32.mrf.mxu1  ;;  %v16276_v5 = vld [vmem:[#allocation92_spill] sm:$0xff] }
 0x41d   : > { %v13421_v54 = vadd.f32 %v3536_v56, %v3488_v46 }
 0x41e   : > { %v13423_v7 = vadd.f32 %v3440_v3, %v3392_v11  ;;  %v10130_v11 = vld [vmem:[#allocation7 + $0x860] sm:$0xf0] }
 0x41f   : > { %v11597_v3 = vld [vmem:[#allocation7 + $0xa44] sm:$0xf]  ;;  %v10133_v22 = vor.u32 %v11533_v27, %v10130_v11  ;;  %v11601_v11 = vld [vmem:[#allocation7 + $0xa5c] sm:$0xf0] }
 0x420   : > { %v10389_v50 = vor.u32 %v11597_v3, %v10386_v49  ;;  %v16279_v3 = vld [vmem:[#allocation93_spill] sm:$0xff] }
 0x421   : > { %4698 = vmatpush.bf16.msra.mxu2 %v10133_v22 }
 0x422   : > { %v3489_v23 = vpop.f32.mrf.mxu2  ;;  %4747 = vmatpush.bf16.msra.mxu3 %v10389_v50 }
 0x423   : > { %v3490_v35 = vadd.f32 %v3489_v23, %v16275_v59  ;;  %v3538_v55 = vpop.f32.mrf.mxu3  ;;  %v3394_v52 = vpop.f32.mrf.mxu0 }
 0x424   : > { %v3395_v12 = vadd.f32 %v3394_v52, %v16276_v5  ;;  %v3443_v18 = vpop.f32.mrf.mxu1  ;;  %v10128_v5 = vld [vmem:[#allocation7 + $0x840] sm:$0xf] }
 0x425   : > { %v13427_v46 = vadd.f32 %v3538_v55, %v3490_v35 }
 0x426   : > { %v13429_v56 = vadd.f32 %v3443_v18, %v3395_v12  ;;  %3589 = vmatmul.bf16.gmra.mxu0 %v12577_v30  ;;  %v11537_v12 = vld [vmem:[#allocation7 + $0x85c] sm:$0xf0] }
 0x427   : > { %16277 = vst [vmem:[#allocation89_spill] sm:$0xff] %v13427_v46  ;;  %3638 = vmatmul.bf16.gmra.mxu1 %v12580_v31  ;;  %3687 = vmatmul.bf16.gmra.mxu2 %v12577_v30  ;;  %v10384_v18 = vld [vmem:[#allocation7 + $0xa40] sm:$0xf]  ;;  %v10129_v27 = vor.u32 %v11537_v12, %v10128_v5  ;;  %v10354_v12 = vld [vmem:[#allocation7 + $0xa20] sm:$0xf0] }
 0x428   : > { %16278 = vst [vmem:[#allocation90_spill] sm:$0xff] %v13429_v56  ;;  %3736 = vmatmul.bf16.gmra.mxu3 %v12580_v31  ;;  %v10385_v46 = vor.u32 %v11601_v11, %v10384_v18 }
 0x429   : > { %4600 = vmatpush.bf16.msra.mxu0 %v10129_v27 }
 0x42a   : > { %v3492_v28 = vpop.f32.mrf.mxu2  ;;  %4649 = vmatpush.bf16.msra.mxu1 %v10385_v46  ;;  %v11525_v46 = vld [vmem:[#allocation7 + $0x804] sm:$0xf] }
 0x42b   : > { %v3493_v45 = vadd.f32 %v3492_v28, %v12970_v6  ;;  %v3541_v23 = vpop.f32.mrf.mxu3  ;;  %v3396_v59 = vpop.f32.mrf.mxu0 }
 0x42c   : > { %v3397_v35 = vadd.f32 %v3396_v59, %v12972_v8  ;;  %v3445_v55 = vpop.f32.mrf.mxu1  ;;  %v16280_v8 = vld [vmem:[#allocation94_spill] sm:$0xff] }
 0x42d   : > { %v13437_v52 = vadd.f32 %v3541_v23, %v3493_v45 }
 0x42e   : > { %v13439_v56 = vadd.f32 %v3445_v55, %v3397_v35  ;;  %v10098_v35 = vld [vmem:[#allocation7 + $0x820] sm:$0xf0] }
 0x42f   : > { %v11589_v55 = vld [vmem:[#allocation7 + $0xa04] sm:$0xf]  ;;  %v10101_v5 = vor.u32 %v11525_v46, %v10098_v35  ;;  %v11593_v35 = vld [vmem:[#allocation7 + $0xa1c] sm:$0xf0] }
 0x430   : > { %v10357_v27 = vor.u32 %v11589_v55, %v10354_v12  ;;  %v16283_v55 = vld [vmem:[#allocation95_spill] sm:$0xff] }
 0x431   : > { %4699 = vmatpush.bf16.msra.mxu2 %v10101_v5 }
 0x432   : > { %v3494_v6 = vpop.f32.mrf.mxu2  ;;  %4748 = vmatpush.bf16.msra.mxu3 %v10357_v27 }
 0x433   : > { %v3495_v49 = vadd.f32 %v3494_v6, %v16279_v3  ;;  %v3543_v22 = vpop.f32.mrf.mxu3  ;;  %v3399_v28 = vpop.f32.mrf.mxu0 }
 0x434   : > { %v3400_v59 = vadd.f32 %v3399_v28, %v16280_v8  ;;  %v3448_v50 = vpop.f32.mrf.mxu1  ;;  %v10096_v8 = vld [vmem:[#allocation7 + $0x800] sm:$0xf] }
 0x435   : > { %v13443_v45 = vadd.f32 %v3543_v22, %v3495_v49 }
 0x436   : > { %v13445_v23 = vadd.f32 %v3448_v50, %v3400_v59  ;;  %3594 = vmatmul.bf16.gmra.mxu0 %v12607_v16  ;;  %v11529_v59 = vld [vmem:[#allocation7 + $0x81c] sm:$0xf0] }
 0x437   : > { %16281 = vst [vmem:[#allocation91_spill] sm:$0xff] %v13443_v45  ;;  %3643 = vmatmul.bf16.gmra.mxu1 %v12610_v17  ;;  %3692 = vmatmul.bf16.gmra.mxu2 %v12607_v16  ;;  %v10352_v50 = vld [vmem:[#allocation7 + $0xa00] sm:$0xf]  ;;  %v10097_v46 = vor.u32 %v11529_v59, %v10096_v8  ;;  %v10586_v59 = vld [vmem:[#allocation7 + $0xbe8] sm:$0xf0] }
 0x438   : > { %16282 = vst [vmem:[#allocation92_spill] sm:$0xff] %v13445_v23  ;;  %3741 = vmatmul.bf16.gmra.mxu3 %v12610_v17  ;;  %v10353_v45 = vor.u32 %v11593_v35, %v10352_v50 }
 0x439   : > { %4601 = vmatpush.bf16.msra.mxu0 %v10097_v46 }
 0x43a   : > { %v3497_v18 = vpop.f32.mrf.mxu2  ;;  %4650 = vmatpush.bf16.msra.mxu1 %v10353_v45  ;;  %v11582_v45 = vld [vmem:[#allocation7 + $0x9cc] sm:$0xf] }
 0x43b   : > { %v3498_v11 = vadd.f32 %v3497_v18, %v12982_v9  ;;  %v3546_v6 = vpop.f32.mrf.mxu3  ;;  %v3401_v3 = vpop.f32.mrf.mxu0 }
 0x43c   : > { %v3402_v49 = vadd.f32 %v3401_v3, %v12984_v32  ;;  %v3450_v22 = vpop.f32.mrf.mxu1  ;;  %v16284_v32 = vld [vmem:[#allocation96_spill] sm:$0xff] }
 0x43d   : > { %v13453_v28 = vadd.f32 %v3546_v6, %v3498_v11 }
 0x43e   : > { %v13455_v23 = vadd.f32 %v3450_v22, %v3402_v49  ;;  %v10330_v49 = vld [vmem:[#allocation7 + $0x9e8] sm:$0xf0] }
 0x43f   : > { %v11646_v22 = vld [vmem:[#allocation7 + $0xbcc] sm:$0xf]  ;;  %v10333_v8 = vor.u32 %v11582_v45, %v10330_v49  ;;  %v11650_v49 = vld [vmem:[#allocation7 + $0xbe4] sm:$0xf0] }
 0x440   : > { %v10589_v46 = vor.u32 %v11646_v22, %v10586_v59  ;;  %v16289_v22 = vld [vmem:[#allocation97_spill] sm:$0xff] }
 0x441   : > { %4888 = vmatpush.bf16.msrb.mxu2 %v10333_v8 }
 0x442   : > { %v3499_v9 = vpop.f32.mrf.mxu2  ;;  %4937 = vmatpush.bf16.msrb.mxu3 %v10589_v46 }
 0x443   : > { %v3500_v12 = vadd.f32 %v3499_v9, %v16283_v55  ;;  %v3548_v5 = vpop.f32.mrf.mxu3  ;;  %v3404_v18 = vpop.f32.mrf.mxu0 }
 0x444   : > { %v3405_v3 = vadd.f32 %v3404_v18, %v16284_v32  ;;  %v3453_v27 = vpop.f32.mrf.mxu1  ;;  %v10328_v32 = vld [vmem:[#allocation7 + $0x9c8] sm:$0xf] }
 0x445   : > { %v13459_v11 = vadd.f32 %v3548_v5, %v3500_v12 }
 0x446   : > { %v13461_v6 = vadd.f32 %v3453_v27, %v3405_v3  ;;  %3599 = vmatmul.bf16.gmra.mxu0 %v12637_v1  ;;  %v11586_v3 = vld [vmem:[#allocation7 + $0x9e4] sm:$0xf0] }
 0x447   : > { %16285 = vst [vmem:[#allocation93_spill] sm:$0xff] %v13459_v11  ;;  %3648 = vmatmul.bf16.gmra.mxu1 %v12640_v4  ;;  %3697 = vmatmul.bf16.gmra.mxu2 %v12637_v1  ;;  %v10584_v27 = vld [vmem:[#allocation7 + $0xbc8] sm:$0xf]  ;;  %v10329_v45 = vor.u32 %v11586_v3, %v10328_v32  ;;  %v10554_v3 = vld [vmem:[#allocation7 + $0xba8] sm:$0xf0] }
 0x448   : > { %16286 = vst [vmem:[#allocation94_spill] sm:$0xff] %v13461_v6  ;;  %3746 = vmatmul.bf16.gmra.mxu3 %v12640_v4  ;;  %v10585_v11 = vor.u32 %v11650_v49, %v10584_v27  ;;  %v16293_v49 = vld [vmem:[#allocation99_spill] sm:$0xff] }
 0x449   : > { %4790 = vmatpush.bf16.msrb.mxu0 %v10329_v45 }
 0x44a   : > { %v3502_v50 = vpop.f32.mrf.mxu2  ;;  %4839 = vmatpush.bf16.msrb.mxu1 %v10585_v11  ;;  %v11574_v11 = vld [vmem:[#allocation7 + $0x98c] sm:$0xf] }
 0x44b   : > { %v3503_v35 = vadd.f32 %v3502_v50, %v12994_v34  ;;  %v3551_v9 = vpop.f32.mrf.mxu3  ;;  %v3406_v55 = vpop.f32.mrf.mxu0 }
 0x44c   : > { %v3407_v12 = vadd.f32 %v3406_v55, %v12996_v40  ;;  %v3455_v5 = vpop.f32.mrf.mxu1  ;;  %v16290_v40 = vld [vmem:[#allocation98_spill] sm:$0xff] }
 0x44d   : > { %v13469_v18 = vadd.f32 %v3551_v9, %v3503_v35 }
 0x44e   : > { %v13471_v6 = vadd.f32 %v3455_v5, %v3407_v12  ;;  %v10298_v12 = vld [vmem:[#allocation7 + $0x9a8] sm:$0xf0] }
 0x44f   : > { %16287 = vst [vmem:[#allocation95_spill] sm:$0xff] %v13469_v18  ;;  %v11638_v5 = vld [vmem:[#allocation7 + $0xb8c] sm:$0xf]  ;;  %v10301_v32 = vor.u32 %v11574_v11, %v10298_v12  ;;  %v11642_v12 = vld [vmem:[#allocation7 + $0xba4] sm:$0xf0] }
 0x450   : > { %16288 = vst [vmem:[#allocation96_spill] sm:$0xff] %v13471_v6  ;;  %v10557_v45 = vor.u32 %v11638_v5, %v10554_v3  ;;  %v3904_v5 = vrot.slane %v12466_v24, 1  ;;  %v3905_v3 = vrot.slane %v12468_v29, 1  ;;  %v10520_v29 = vld [vmem:[#allocation7 + $0xb48] sm:$0xf] }
 0x451   : > { %4889 = vmatpush.bf16.msrb.mxu2 %v10301_v32  ;;  %v3907_v32 = vrot.slane %v12476_v38, 1  ;;  %v11570_v38 = vld [vmem:[#allocation7 + $0x964] sm:$0xf0] }
 0x452   : > { %v3504_v34 = vpop.f32.mrf.mxu2  ;;  %4938 = vmatpush.bf16.msrb.mxu3 %v10557_v45 }
 0x453   : > { %v3505_v59 = vadd.f32 %v3504_v34, %v16289_v22  ;;  %v3553_v8 = vpop.f32.mrf.mxu3  ;;  %v3409_v50 = vpop.f32.mrf.mxu0 }
 0x454   : > { %v3410_v55 = vadd.f32 %v3409_v50, %v16290_v40  ;;  %v3458_v46 = vpop.f32.mrf.mxu1 }
 0x455   : > { %v13475_v35 = vadd.f32 %v3553_v8, %v3505_v59  ;;  %v16294_v8 = vld [vmem:[#allocation100_spill] sm:$0xff] }
 0x456   : > { %v13477_v9 = vadd.f32 %v3458_v46, %v3410_v55  ;;  %3604 = vmatmul.bf16.gmra.mxu0 %v12667_v60  ;;  %v10296_v46 = vld [vmem:[#allocation7 + $0x988] sm:$0xf] }
 0x457   : > { %16291 = vst [vmem:[#allocation97_spill] sm:$0xff] %v13475_v35  ;;  %3653 = vmatmul.bf16.gmra.mxu1 %v12669_v2  ;;  %3702 = vmatmul.bf16.gmra.mxu2 %v12667_v60  ;;  %v10552_v35 = vld [vmem:[#allocation7 + $0xb88] sm:$0xf] }
 0x458   : > { %16292 = vst [vmem:[#allocation98_spill] sm:$0xff] %v13477_v9  ;;  %3751 = vmatmul.bf16.gmra.mxu3 %v12669_v2  ;;  %v11578_v9 = vld [vmem:[#allocation7 + $0x9a4] sm:$0xf0] }
 0x459   : > { %v10297_v11 = vor.u32 %v11578_v9, %v10296_v46  ;;  %v13495_v9 = vsel %vm3903_vm1, %v3904_v5, %v3905_v3  ;;  %v10266_v5 = vld [vmem:[#allocation7 + $0x968] sm:$0xf0] }
 0x45a   : > { %v3507_v27 = vpop.f32.mrf.mxu2 }
 0x45b   : > { %v3508_v34 = vadd.f32 %v3507_v27, %v16293_v49  ;;  %v3556_v22 = vpop.f32.mrf.mxu3  ;;  %v3411_v59 = vpop.f32.mrf.mxu0  ;;  %v10553_v27 = vor.u32 %v11642_v12, %v10552_v35  ;;  %v3908_v49 = vrot.slane %v12479_v42, 1  ;;  %4791 = vmatpush.bf16.msrb.mxu0 %v10297_v11  ;;  %v11566_v11 = vld [vmem:[#allocation7 + $0x94c] sm:$0xf]  ;;  %v10264_v42 = vld [vmem:[#allocation7 + $0x948] sm:$0xf] }
 0x45c   : > { %v3412_v50 = vadd.f32 %v3411_v59, %v16294_v8  ;;  %v3460_v40 = vpop.f32.mrf.mxu1 }
 0x45d   : > { %v13485_v55 = vadd.f32 %v3556_v22, %v3508_v34  ;;  %4840 = vmatpush.bf16.msrb.mxu1 %v10553_v27  ;;  %v16297_v34 = vld [vmem:[#allocation101_spill] sm:$0xff]  ;;  %v13499_v35 = vsel %vm3903_vm1, %v3907_v32, %v3908_v49  ;;  %v11630_v27 = vld [vmem:[#allocation7 + $0xb4c] sm:$0xf] }
 0x45e   : > { %v13487_v6 = vadd.f32 %v3460_v40, %v3412_v50  ;;  %v16298_v50 = vld [vmem:[#allocation102_spill] sm:$0xff] }
 0x45f   : > { %16295 = vst [vmem:[#allocation99_spill] sm:$0xff] %v13485_v55 }
 0x460   : > { %16296 = vst [vmem:[#allocation100_spill] sm:$0xff] %v13487_v6 }
 0x462   : > { %v3509_v45 = vpop.f32.mrf.mxu2 }
 0x463   : > { %v3510_v22 = vadd.f32 %v3509_v45, %v16297_v34  ;;  %v3558_v59 = vpop.f32.mrf.mxu3  ;;  %v3570_v8 = vpop.f32.mrf.mxu0  ;;  %v10269_v45 = vor.u32 %v11566_v11, %v10266_v5  ;;  %v10522_v34 = vld [vmem:[#allocation7 + $0xb68] sm:$0xf0]  ;;  %v10265_v11 = vor.u32 %v11570_v38, %v10264_v42  ;;  %v11634_v5 = vld [vmem:[#allocation7 + $0xb64] sm:$0xf0] }
 0x464   : > { %v3571_v40 = vadd.f32 %v3570_v8, %v16298_v50  ;;  %v3619_v46 = vpop.f32.mrf.mxu1  ;;  %v10525_v32 = vor.u32 %v11630_v27, %v10522_v34  ;;  %v16301_v50 = vld [vmem:[#allocation103_spill] sm:$0xff]  ;;  %v3910_v27 = vrot.slane %v12515_v20, 1  ;;  %v10521_v34 = vor.u32 %v11634_v5, %v10520_v29 }
 0x465   : > { %v13501_v12 = vadd.f32 %v3558_v59, %v3510_v22  ;;  %4890 = vmatpush.bf16.msrb.mxu2 %v10269_v45  ;;  %4792 = vmatpush.bf16.msrb.mxu0 %v10265_v11  ;;  %v10234_v11 = vld [vmem:[#allocation7 + $0x928] sm:$0xf0] }
 0x466   : > { %v13503_v6 = vadd.f32 %v3619_v46, %v3571_v40  ;;  %4602 = vmatmul.bf16.vlgmr.msra.gmra.mxu0 %v13495_v9  ;;  %v16302_v46 = vld [vmem:[#allocation104_spill] sm:$0xff]  ;;  %4939 = vmatpush.bf16.msrb.mxu3 %v10525_v32  ;;  %v11622_v5 = vld [vmem:[#allocation7 + $0xb0c] sm:$0xf] }
 0x467   : > { %16299 = vst [vmem:[#allocation101_spill] sm:$0xff] %v13501_v12  ;;  %4651 = vmatmul.bf16.vlgmr.msra.gmra.mxu1 %v13499_v35  ;;  %4700 = vmatmul.bf16.vlgmr.msra.gmra.mxu2 %v13495_v9 }
 0x468   : > { %16300 = vst [vmem:[#allocation102_spill] sm:$0xff] %v13503_v6  ;;  %4749 = vmatmul.bf16.vlgmr.msra.gmra.mxu3 %v13499_v35  ;;  %4841 = vmatpush.bf16.msrb.mxu1 %v10521_v34 }
 0x46a   : > { %v3668_v8 = vpop.f32.mrf.mxu2 }
 0x46b   : > { %v3669_v22 = vadd.f32 %v3668_v8, %v16301_v50  ;;  %v3717_v59 = vpop.f32.mrf.mxu3  ;;  %v3572_v40 = vpop.f32.mrf.mxu0  ;;  %v3912_v8 = vrot.slane %v12518_v21, 1  ;;  %v16305_v50 = vld [vmem:[#allocation105_spill] sm:$0xff]  ;;  %v10488_v21 = vld [vmem:[#allocation7 + $0xb08] sm:$0xf] }
 0x46c   : > { %v3573_v6 = vadd.f32 %v3572_v40, %v16302_v46  ;;  %v3621_v12 = vpop.f32.mrf.mxu1  ;;  %v16306_v46 = vld [vmem:[#allocation106_spill] sm:$0xff] }
 0x46d   : > { %v13511_v55 = vadd.f32 %v3717_v59, %v3669_v22  ;;  %v13519_v59 = vsel %vm3903_vm1, %v3905_v3, %v3910_v27  ;;  %v13523_v38 = vsel %vm3903_vm1, %v3908_v49, %v3912_v8  ;;  %v11558_v3 = vld [vmem:[#allocation7 + $0x90c] sm:$0xf] }
 0x46e   : > { %v13513_v24 = vadd.f32 %v3621_v12, %v3573_v6  ;;  %v10237_v34 = vor.u32 %v11558_v3, %v10234_v11  ;;  %v11626_v11 = vld [vmem:[#allocation7 + $0xb24] sm:$0xf0] }
 0x46f   : > { %16303 = vst [vmem:[#allocation103_spill] sm:$0xff] %v13511_v55  ;;  %v11562_v55 = vld [vmem:[#allocation7 + $0x924] sm:$0xf0] }
 0x470   : > { %16304 = vst [vmem:[#allocation104_spill] sm:$0xff] %v13513_v24  ;;  %4891 = vmatpush.bf16.msrb.mxu2 %v10237_v34  ;;  %v10232_v24 = vld [vmem:[#allocation7 + $0x908] sm:$0xf] }
 0x471   : > { %v10233_v3 = vor.u32 %v11562_v55, %v10232_v24 }
 0x472   : > { %v3670_v45 = vpop.f32.mrf.mxu2 }
 0x473   : > { %v3671_v40 = vadd.f32 %v3670_v45, %v16305_v50  ;;  %v3719_v32 = vpop.f32.mrf.mxu3  ;;  %v3575_v22 = vpop.f32.mrf.mxu0  ;;  %v10490_v45 = vld [vmem:[#allocation7 + $0xb28] sm:$0xf0]  ;;  %4793 = vmatpush.bf16.msrb.mxu0 %v10233_v3 }
 0x474   : > { %v3576_v6 = vadd.f32 %v3575_v22, %v16306_v46  ;;  %v3624_v12 = vpop.f32.mrf.mxu1  ;;  %v10493_v49 = vor.u32 %v11622_v5, %v10490_v45  ;;  %v16309_v22 = vld [vmem:[#allocation107_spill] sm:$0xff]  ;;  %v3914_v5 = vrot.slane %v12547_v58, 1  ;;  %v10489_v45 = vor.u32 %v11626_v11, %v10488_v21 }
 0x475   : > { %v13525_v42 = vadd.f32 %v3719_v32, %v3671_v40  ;;  %v10202_v3 = vld [vmem:[#allocation7 + $0x8e8] sm:$0xf0] }
 0x476   : > { %v13527_v29 = vadd.f32 %v3624_v12, %v3576_v6  ;;  %4607 = vmatmul.bf16.gmra.mxu0 %v13519_v59  ;;  %v16310_v6 = vld [vmem:[#allocation108_spill] sm:$0xff]  ;;  %4940 = vmatpush.bf16.msrb.mxu3 %v10493_v49  ;;  %v11614_v11 = vld [vmem:[#allocation7 + $0xacc] sm:$0xf] }
 0x477   : > { %16307 = vst [vmem:[#allocation105_spill] sm:$0xff] %v13525_v42  ;;  %4656 = vmatmul.bf16.gmra.mxu1 %v13523_v38  ;;  %4705 = vmatmul.bf16.gmra.mxu2 %v13519_v59 }
 0x478   : > { %16308 = vst [vmem:[#allocation106_spill] sm:$0xff] %v13527_v29  ;;  %4754 = vmatmul.bf16.gmra.mxu3 %v13523_v38  ;;  %4842 = vmatpush.bf16.msrb.mxu1 %v10489_v45 }
 0x47a   : > { %v3673_v50 = vpop.f32.mrf.mxu2 }
 0x47b   : > { %v3674_v40 = vadd.f32 %v3673_v50, %v16309_v22  ;;  %v3722_v32 = vpop.f32.mrf.mxu3  ;;  %v3577_v46 = vpop.f32.mrf.mxu0  ;;  %v3916_v50 = vrot.slane %v12550_v61, 1  ;;  %v16313_v22 = vld [vmem:[#allocation109_spill] sm:$0xff]  ;;  %v10456_v61 = vld [vmem:[#allocation7 + $0xac8] sm:$0xf] }
 0x47c   : > { %v3578_v12 = vadd.f32 %v3577_v46, %v16310_v6  ;;  %v3626_v29 = vpop.f32.mrf.mxu1  ;;  %v16314_v6 = vld [vmem:[#allocation110_spill] sm:$0xff] }
 0x47d   : > { %v13535_v42 = vadd.f32 %v3722_v32, %v3674_v40  ;;  %v13543_v32 = vsel %vm3903_vm1, %v3910_v27, %v3914_v5  ;;  %v13547_v24 = vsel %vm3903_vm1, %v3912_v8, %v3916_v50  ;;  %v11550_v27 = vld [vmem:[#allocation7 + $0x8cc] sm:$0xf] }
 0x47e   : > { %v13537_v20 = vadd.f32 %v3626_v29, %v3578_v12  ;;  %v10205_v45 = vor.u32 %v11550_v27, %v10202_v3  ;;  %v11618_v3 = vld [vmem:[#allocation7 + $0xae4] sm:$0xf0] }
 0x47f   : > { %16311 = vst [vmem:[#allocation107_spill] sm:$0xff] %v13535_v42  ;;  %v11554_v42 = vld [vmem:[#allocation7 + $0x8e4] sm:$0xf0] }
 0x480   : > { %16312 = vst [vmem:[#allocation108_spill] sm:$0xff] %v13537_v20  ;;  %4892 = vmatpush.bf16.msrb.mxu2 %v10205_v45  ;;  %v10200_v20 = vld [vmem:[#allocation7 + $0x8c8] sm:$0xf] }
 0x481   : > { %v10201_v27 = vor.u32 %v11554_v42, %v10200_v20 }
 0x482   : > { %v3675_v34 = vpop.f32.mrf.mxu2 }
 0x483   : > { %v3676_v46 = vadd.f32 %v3675_v34, %v16313_v22  ;;  %v3724_v49 = vpop.f32.mrf.mxu3  ;;  %v3580_v40 = vpop.f32.mrf.mxu0  ;;  %v10458_v34 = vld [vmem:[#allocation7 + $0xae8] sm:$0xf0]  ;;  %4794 = vmatpush.bf16.msrb.mxu0 %v10201_v27 }
 0x484   : > { %v3581_v29 = vadd.f32 %v3580_v40, %v16314_v6  ;;  %v3629_v12 = vpop.f32.mrf.mxu1  ;;  %v10461_v8 = vor.u32 %v11614_v11, %v10458_v34  ;;  %v16317_v40 = vld [vmem:[#allocation111_spill] sm:$0xff]  ;;  %v3918_v11 = vrot.slane %v12577_v30, 1  ;;  %v10457_v34 = vor.u32 %v11618_v3, %v10456_v61 }
 0x485   : > { %v13549_v55 = vadd.f32 %v3724_v49, %v3676_v46  ;;  %v10170_v27 = vld [vmem:[#allocation7 + $0x8a8] sm:$0xf0] }
 0x486   : > { %v13551_v21 = vadd.f32 %v3629_v12, %v3581_v29  ;;  %4612 = vmatmul.bf16.gmra.mxu0 %v13543_v32  ;;  %v16318_v29 = vld [vmem:[#allocation112_spill] sm:$0xff]  ;;  %4941 = vmatpush.bf16.msrb.mxu3 %v10461_v8  ;;  %v11606_v3 = vld [vmem:[#allocation7 + $0xa8c] sm:$0xf] }
 0x487   : > { %16315 = vst [vmem:[#allocation109_spill] sm:$0xff] %v13549_v55  ;;  %4661 = vmatmul.bf16.gmra.mxu1 %v13547_v24  ;;  %4710 = vmatmul.bf16.gmra.mxu2 %v13543_v32 }
 0x488   : > { %16316 = vst [vmem:[#allocation110_spill] sm:$0xff] %v13551_v21  ;;  %4759 = vmatmul.bf16.gmra.mxu3 %v13547_v24  ;;  %4843 = vmatpush.bf16.msrb.mxu1 %v10457_v34 }
 0x48a   : > { %v3678_v22 = vpop.f32.mrf.mxu2 }
 0x48b   : > { %v3679_v46 = vadd.f32 %v3678_v22, %v16317_v40  ;;  %v3727_v49 = vpop.f32.mrf.mxu3  ;;  %v3582_v6 = vpop.f32.mrf.mxu0  ;;  %v3920_v22 = vrot.slane %v12580_v31, 1  ;;  %v16321_v40 = vld [vmem:[#allocation113_spill] sm:$0xff]  ;;  %v10424_v31 = vld [vmem:[#allocation7 + $0xa88] sm:$0xf] }
 0x48c   : > { %v3583_v12 = vadd.f32 %v3582_v6, %v16318_v29  ;;  %v3631_v21 = vpop.f32.mrf.mxu1  ;;  %v16322_v29 = vld [vmem:[#allocation114_spill] sm:$0xff] }
 0x48d   : > { %v13559_v55 = vadd.f32 %v3727_v49, %v3679_v46  ;;  %v13567_v49 = vsel %vm3903_vm1, %v3914_v5, %v3918_v11  ;;  %v13571_v20 = vsel %vm3903_vm1, %v3916_v50, %v3920_v22  ;;  %v11542_v5 = vld [vmem:[#allocation7 + $0x88c] sm:$0xf] }
 0x48e   : > { %v13561_v58 = vadd.f32 %v3631_v21, %v3583_v12  ;;  %v10173_v34 = vor.u32 %v11542_v5, %v10170_v27  ;;  %v11610_v27 = vld [vmem:[#allocation7 + $0xaa4] sm:$0xf0] }
 0x48f   : > { %16319 = vst [vmem:[#allocation111_spill] sm:$0xff] %v13559_v55  ;;  %v11546_v55 = vld [vmem:[#allocation7 + $0x8a4] sm:$0xf0] }
 0x490   : > { %16320 = vst [vmem:[#allocation112_spill] sm:$0xff] %v13561_v58  ;;  %4893 = vmatpush.bf16.msrb.mxu2 %v10173_v34  ;;  %v10168_v58 = vld [vmem:[#allocation7 + $0x888] sm:$0xf] }
 0x491   : > { %v10169_v5 = vor.u32 %v11546_v55, %v10168_v58 }
 0x492   : > { %v3680_v45 = vpop.f32.mrf.mxu2 }
 0x493   : > { %v3681_v6 = vadd.f32 %v3680_v45, %v16321_v40  ;;  %v3729_v8 = vpop.f32.mrf.mxu3  ;;  %v3585_v46 = vpop.f32.mrf.mxu0  ;;  %v10426_v45 = vld [vmem:[#allocation7 + $0xaa8] sm:$0xf0]  ;;  %4795 = vmatpush.bf16.msrb.mxu0 %v10169_v5 }
 0x494   : > { %v3586_v21 = vadd.f32 %v3585_v46, %v16322_v29  ;;  %v3634_v12 = vpop.f32.mrf.mxu1  ;;  %v10429_v50 = vor.u32 %v11606_v3, %v10426_v45  ;;  %v16325_v46 = vld [vmem:[#allocation115_spill] sm:$0xff]  ;;  %v3922_v3 = vrot.slane %v12607_v16, 1  ;;  %v10425_v45 = vor.u32 %v11610_v27, %v10424_v31 }
 0x495   : > { %v13573_v42 = vadd.f32 %v3729_v8, %v3681_v6  ;;  %v10138_v5 = vld [vmem:[#allocation7 + $0x868] sm:$0xf0] }
 0x496   : > { %v13575_v61 = vadd.f32 %v3634_v12, %v3586_v21  ;;  %4617 = vmatmul.bf16.gmra.mxu0 %v13567_v49  ;;  %v16326_v21 = vld [vmem:[#allocation116_spill] sm:$0xff]  ;;  %4942 = vmatpush.bf16.msrb.mxu3 %v10429_v50  ;;  %v11598_v27 = vld [vmem:[#allocation7 + $0xa4c] sm:$0xf] }
 0x497   : > { %16323 = vst [vmem:[#allocation113_spill] sm:$0xff] %v13573_v42  ;;  %4666 = vmatmul.bf16.gmra.mxu1 %v13571_v20  ;;  %4715 = vmatmul.bf16.gmra.mxu2 %v13567_v49 }
 0x498   : > { %16324 = vst [vmem:[#allocation114_spill] sm:$0xff] %v13575_v61  ;;  %4764 = vmatmul.bf16.gmra.mxu3 %v13571_v20  ;;  %4844 = vmatpush.bf16.msrb.mxu1 %v10425_v45 }
 0x49a   : > { %v3683_v40 = vpop.f32.mrf.mxu2 }
 0x49b   : > { %v3684_v6 = vadd.f32 %v3683_v40, %v16325_v46  ;;  %v3732_v8 = vpop.f32.mrf.mxu3  ;;  %v3587_v29 = vpop.f32.mrf.mxu0  ;;  %v3924_v40 = vrot.slane %v12610_v17, 1  ;;  %v16329_v46 = vld [vmem:[#allocation117_spill] sm:$0xff]  ;;  %v10392_v17 = vld [vmem:[#allocation7 + $0xa48] sm:$0xf] }
 0x49c   : > { %v3588_v12 = vadd.f32 %v3587_v29, %v16326_v21  ;;  %v3636_v61 = vpop.f32.mrf.mxu1  ;;  %v16330_v21 = vld [vmem:[#allocation118_spill] sm:$0xff] }
 0x49d   : > { %v13583_v42 = vadd.f32 %v3732_v8, %v3684_v6  ;;  %v13591_v8 = vsel %vm3903_vm1, %v3918_v11, %v3922_v3  ;;  %v13595_v58 = vsel %vm3903_vm1, %v3920_v22, %v3924_v40  ;;  %v11534_v11 = vld [vmem:[#allocation7 + $0x84c] sm:$0xf] }
 0x49e   : > { %v13585_v30 = vadd.f32 %v3636_v61, %v3588_v12  ;;  %v10141_v45 = vor.u32 %v11534_v11, %v10138_v5  ;;  %v11602_v5 = vld [vmem:[#allocation7 + $0xa64] sm:$0xf0] }
 0x49f   : > { %16327 = vst [vmem:[#allocation115_spill] sm:$0xff] %v13583_v42  ;;  %v11538_v42 = vld [vmem:[#allocation7 + $0x864] sm:$0xf0] }
 0x4a0   : > { %16328 = vst [vmem:[#allocation116_spill] sm:$0xff] %v13585_v30  ;;  %4894 = vmatpush.bf16.msrb.mxu2 %v10141_v45  ;;  %v10136_v30 = vld [vmem:[#allocation7 + $0x848] sm:$0xf] }
 0x4a1   : > { %v10137_v11 = vor.u32 %v11538_v42, %v10136_v30 }
 0x4a2   : > { %v3685_v34 = vpop.f32.mrf.mxu2 }
 0x4a3   : > { %v3686_v29 = vadd.f32 %v3685_v34, %v16329_v46  ;;  %v3734_v50 = vpop.f32.mrf.mxu3  ;;  %v3590_v6 = vpop.f32.mrf.mxu0  ;;  %v10394_v34 = vld [vmem:[#allocation7 + $0xa68] sm:$0xf0]  ;;  %4796 = vmatpush.bf16.msrb.mxu0 %v10137_v11 }
 0x4a4   : > { %v3591_v61 = vadd.f32 %v3590_v6, %v16330_v21  ;;  %v3639_v12 = vpop.f32.mrf.mxu1  ;;  %v10397_v22 = vor.u32 %v11598_v27, %v10394_v34  ;;  %v16333_v6 = vld [vmem:[#allocation119_spill] sm:$0xff]  ;;  %v3926_v27 = vrot.slane %v12637_v1, 1  ;;  %v10393_v34 = vor.u32 %v11602_v5, %v10392_v17 }
 0x4a5   : > { %v13597_v55 = vadd.f32 %v3734_v50, %v3686_v29  ;;  %v10106_v11 = vld [vmem:[#allocation7 + $0x828] sm:$0xf0] }
 0x4a6   : > { %v13599_v31 = vadd.f32 %v3639_v12, %v3591_v61  ;;  %4622 = vmatmul.bf16.gmra.mxu0 %v13591_v8  ;;  %v16334_v61 = vld [vmem:[#allocation120_spill] sm:$0xff]  ;;  %4943 = vmatpush.bf16.msrb.mxu3 %v10397_v22  ;;  %v11590_v5 = vld [vmem:[#allocation7 + $0xa0c] sm:$0xf] }
 0x4a7   : > { %16331 = vst [vmem:[#allocation117_spill] sm:$0xff] %v13597_v55  ;;  %4671 = vmatmul.bf16.gmra.mxu1 %v13595_v58  ;;  %4720 = vmatmul.bf16.gmra.mxu2 %v13591_v8 }
 0x4a8   : > { %16332 = vst [vmem:[#allocation118_spill] sm:$0xff] %v13599_v31  ;;  %4769 = vmatmul.bf16.gmra.mxu3 %v13595_v58  ;;  %4845 = vmatpush.bf16.msrb.mxu1 %v10393_v34 }
 0x4aa   : > { %v3688_v46 = vpop.f32.mrf.mxu2 }
 0x4ab   : > { %v3689_v29 = vadd.f32 %v3688_v46, %v16333_v6  ;;  %v3737_v50 = vpop.f32.mrf.mxu3  ;;  %v3592_v21 = vpop.f32.mrf.mxu0  ;;  %v3928_v46 = vrot.slane %v12640_v4, 1  ;;  %v16337_v6 = vld [vmem:[#allocation121_spill] sm:$0xff]  ;;  %v10360_v4 = vld [vmem:[#allocation7 + $0xa08] sm:$0xf] }
 0x4ac   : > { %v3593_v12 = vadd.f32 %v3592_v21, %v16334_v61  ;;  %v3641_v31 = vpop.f32.mrf.mxu1  ;;  %v16338_v61 = vld [vmem:[#allocation122_spill] sm:$0xff] }
 0x4ad   : > { %v13607_v55 = vadd.f32 %v3737_v50, %v3689_v29  ;;  %v13615_v50 = vsel %vm3903_vm1, %v3922_v3, %v3926_v27  ;;  %v13619_v30 = vsel %vm3903_vm1, %v3924_v40, %v3928_v46  ;;  %v11526_v3 = vld [vmem:[#allocation7 + $0x80c] sm:$0xf] }
 0x4ae   : > { %v13609_v16 = vadd.f32 %v3641_v31, %v3593_v12  ;;  %v10109_v34 = vor.u32 %v11526_v3, %v10106_v11  ;;  %v11594_v11 = vld [vmem:[#allocation7 + $0xa24] sm:$0xf0] }
 0x4af   : > { %16335 = vst [vmem:[#allocation119_spill] sm:$0xff] %v13607_v55  ;;  %v11530_v55 = vld [vmem:[#allocation7 + $0x824] sm:$0xf0] }
 0x4b0   : > { %16336 = vst [vmem:[#allocation120_spill] sm:$0xff] %v13609_v16  ;;  %4895 = vmatpush.bf16.msrb.mxu2 %v10109_v34  ;;  %v10104_v16 = vld [vmem:[#allocation7 + $0x808] sm:$0xf] }
 0x4b1   : > { %v10105_v3 = vor.u32 %v11530_v55, %v10104_v16 }
 0x4b2   : > { %v3690_v45 = vpop.f32.mrf.mxu2 }
 0x4b3   : > { %v3691_v21 = vadd.f32 %v3690_v45, %v16337_v6  ;;  %v3739_v22 = vpop.f32.mrf.mxu3  ;;  %v3595_v29 = vpop.f32.mrf.mxu0  ;;  %v10362_v45 = vld [vmem:[#allocation7 + $0xa28] sm:$0xf0]  ;;  %4797 = vmatpush.bf16.msrb.mxu0 %v10105_v3  ;;  %v10338_v3 = vld [vmem:[#allocation7 + $0x9f0] sm:$0xf0] }
 0x4b4   : > { %v3596_v31 = vadd.f32 %v3595_v29, %v16338_v61  ;;  %v3644_v12 = vpop.f32.mrf.mxu1  ;;  %v10365_v40 = vor.u32 %v11590_v5, %v10362_v45  ;;  %v16341_v29 = vld [vmem:[#allocation123_spill] sm:$0xff]  ;;  %v3930_v5 = vrot.slane %v12667_v60, 1  ;;  %v10361_v45 = vor.u32 %v11594_v11, %v10360_v4  ;;  %v11647_v11 = vld [vmem:[#allocation7 + $0xbd4] sm:$0xf]  ;;  %v10592_v60 = vld [vmem:[#allocation7 + $0xbd0] sm:$0xf] }
 0x4b5   : > { %v13621_v42 = vadd.f32 %v3739_v22, %v3691_v21 }
 0x4b6   : > { %v13623_v17 = vadd.f32 %v3644_v12, %v3596_v31  ;;  %4627 = vmatmul.bf16.gmra.mxu0 %v13615_v50  ;;  %v16342_v31 = vld [vmem:[#allocation124_spill] sm:$0xff]  ;;  %4944 = vmatpush.bf16.msrb.mxu3 %v10365_v40 }
 0x4b7   : > { %16339 = vst [vmem:[#allocation121_spill] sm:$0xff] %v13621_v42  ;;  %4676 = vmatmul.bf16.gmra.mxu1 %v13619_v30  ;;  %4725 = vmatmul.bf16.gmra.mxu2 %v13615_v50 }
 0x4b8   : > { %16340 = vst [vmem:[#allocation122_spill] sm:$0xff] %v13623_v17  ;;  %4774 = vmatmul.bf16.gmra.mxu3 %v13619_v30  ;;  %4846 = vmatpush.bf16.msrb.mxu1 %v10361_v45 }
 0x4ba   : > { %v3693_v6 = vpop.f32.mrf.mxu2 }
 0x4bb   : > { %v3694_v21 = vadd.f32 %v3693_v6, %v16341_v29  ;;  %v3742_v22 = vpop.f32.mrf.mxu3  ;;  %v3597_v61 = vpop.f32.mrf.mxu0  ;;  %v3932_v6 = vrot.slane %v12669_v2, 1  ;;  %v16345_v29 = vld [vmem:[#allocation125_spill] sm:$0xff]  ;;  %v11587_v2 = vld [vmem:[#allocation7 + $0x9ec] sm:$0xf0] }
 0x4bc   : > { %v3598_v12 = vadd.f32 %v3597_v61, %v16342_v31  ;;  %v3646_v17 = vpop.f32.mrf.mxu1  ;;  %v16346_v31 = vld [vmem:[#allocation126_spill] sm:$0xff] }
 0x4bd   : > { %v13631_v42 = vadd.f32 %v3742_v22, %v3694_v21  ;;  %v13639_v22 = vsel %vm3903_vm1, %v3926_v27, %v3930_v5  ;;  %v13643_v16 = vsel %vm3903_vm1, %v3928_v46, %v3932_v6  ;;  %v11583_v27 = vld [vmem:[#allocation7 + $0x9d4] sm:$0xf] }
 0x4be   : > { %v13633_v1 = vadd.f32 %v3646_v17, %v3598_v12  ;;  %v10341_v45 = vor.u32 %v11583_v27, %v10338_v3  ;;  %v16353_v27 = vld [vmem:[#allocation34_spill] sm:$0xff] }
 0x4bf   : > { %16343 = vst [vmem:[#allocation123_spill] sm:$0xff] %v13631_v42  ;;  %v10336_v42 = vld [vmem:[#allocation7 + $0x9d0] sm:$0xf]  ;;  %v3934_v3 = vrot.slane %v16353_v27, 1 }
 0x4c0   : > { %16344 = vst [vmem:[#allocation124_spill] sm:$0xff] %v13633_v1  ;;  %5084 = vmatpush.bf16.msra.mxu2 %v10341_v45  ;;  %v10337_v18 = vor.u32 %v11587_v2, %v10336_v42 }
 0x4c2   : > { %v3695_v34 = vpop.f32.mrf.mxu2  ;;  %4986 = vmatpush.bf16.msra.mxu0 %v10337_v18  ;;  %v10306_v18 = vld [vmem:[#allocation7 + $0x9b0] sm:$0xf0] }
 0x4c3   : > { %v3696_v61 = vadd.f32 %v3695_v34, %v16345_v29  ;;  %v3744_v40 = vpop.f32.mrf.mxu3  ;;  %v3600_v21 = vpop.f32.mrf.mxu0  ;;  %v10594_v34 = vld [vmem:[#allocation7 + $0xbf0] sm:$0xf0] }
 0x4c4   : > { %v3601_v17 = vadd.f32 %v3600_v21, %v16346_v31  ;;  %v3649_v12 = vpop.f32.mrf.mxu1  ;;  %v10597_v46 = vor.u32 %v11647_v11, %v10594_v34  ;;  %v16349_v21 = vld [vmem:[#allocation127_spill] sm:$0xff]  ;;  %v11651_v11 = vld [vmem:[#allocation7 + $0xbec] sm:$0xf0] }
 0x4c5   : > { %v13645_v55 = vadd.f32 %v3744_v40, %v3696_v61  ;;  %v16354_v34 = vld [vmem:[#allocation35_spill] sm:$0xff] }
 0x4c6   : > { %v13647_v4 = vadd.f32 %v3649_v12, %v3601_v17  ;;  %4632 = vmatmul.bf16.gmra.mxu0 %v13639_v22  ;;  %v16350_v17 = vld [vmem:[#allocation128_spill] sm:$0xff]  ;;  %5133 = vmatpush.bf16.msra.mxu3 %v10597_v46 }
 0x4c7   : > { %16347 = vst [vmem:[#allocation125_spill] sm:$0xff] %v13645_v55  ;;  %4681 = vmatmul.bf16.gmra.mxu1 %v13643_v16  ;;  %4730 = vmatmul.bf16.gmra.mxu2 %v13639_v22 }
 0x4c8   : > { %16348 = vst [vmem:[#allocation126_spill] sm:$0xff] %v13647_v4  ;;  %4779 = vmatmul.bf16.gmra.mxu3 %v13643_v16 }
 0x4ca   : > { %v3698_v29 = vpop.f32.mrf.mxu2 }
 0x4cb   : > { %v3699_v61 = vadd.f32 %v3698_v29, %v16349_v21  ;;  %v3747_v40 = vpop.f32.mrf.mxu3  ;;  %v3602_v31 = vpop.f32.mrf.mxu0  ;;  %v3936_v29 = vrot.slane %v16354_v34, 1  ;;  %v10593_v21 = vor.u32 %v11651_v11, %v10592_v60  ;;  %v11575_v60 = vld [vmem:[#allocation7 + $0x994] sm:$0xf] }
 0x4cc   : > { %v3603_v12 = vadd.f32 %v3602_v31, %v16350_v17  ;;  %v3651_v4 = vpop.f32.mrf.mxu1  ;;  %v16355_v31 = vld [vmem:[#allocation129_spill] sm:$0xff]  ;;  %v10562_v11 = vld [vmem:[#allocation7 + $0xbb0] sm:$0xf0] }
 0x4cd   : > { %v13655_v55 = vadd.f32 %v3747_v40, %v3699_v61  ;;  %5035 = vmatpush.bf16.msra.mxu1 %v10593_v21  ;;  %v16356_v40 = vld [vmem:[#allocation130_spill] sm:$0xff] }
 0x4ce   : > { %v13657_v1 = vadd.f32 %v3651_v4, %v3603_v12  ;;  %v13663_v4 = vsel %vm3903_vm1, %v3930_v5, %v3934_v3  ;;  %v11639_v5 = vld [vmem:[#allocation7 + $0xb94] sm:$0xf]  ;;  %v10309_v3 = vor.u32 %v11575_v60, %v10306_v18  ;;  %v11643_v18 = vld [vmem:[#allocation7 + $0xbac] sm:$0xf0] }
 0x4cf   : > { %16351 = vst [vmem:[#allocation127_spill] sm:$0xff] %v13655_v55  ;;  %v13667_v55 = vsel %vm3903_vm1, %v3932_v6, %v3936_v29  ;;  %v10565_v6 = vor.u32 %v11639_v5, %v10562_v11 }
 0x4d0   : > { %16352 = vst [vmem:[#allocation128_spill] sm:$0xff] %v13657_v1  ;;  %5085 = vmatpush.bf16.msra.mxu2 %v10309_v3 }
 0x4d1   : > { %5134 = vmatpush.bf16.msra.mxu3 %v10565_v6 }
 0x4d2   : > { %v3700_v45 = vpop.f32.mrf.mxu2 }
 0x4d3   : > { %v3701_v17 = vadd.f32 %v3700_v45, %v16355_v31  ;;  %v3749_v46 = vpop.f32.mrf.mxu3  ;;  %v3605_v61 = vpop.f32.mrf.mxu0  ;;  %v16359_v31 = vld [vmem:[#allocation131_spill] sm:$0xff] }
 0x4d4   : > { %v3606_v12 = vadd.f32 %v3605_v61, %v16356_v40  ;;  %v3654_v1 = vpop.f32.mrf.mxu1 }
 0x4d5   : > { %v13669_v2 = vadd.f32 %v3749_v46, %v3701_v17 }
 0x4d6   : > { %v13671_v42 = vadd.f32 %v3654_v1, %v3606_v12  ;;  %4637 = vmatmul.bf16.gmra.mxu0 %v13663_v4  ;;  %v10304_v12 = vld [vmem:[#allocation7 + $0x990] sm:$0xf] }
 0x4d7   : > { %16357 = vst [vmem:[#allocation34_spill] sm:$0xff] %v13669_v2  ;;  %4686 = vmatmul.bf16.gmra.mxu1 %v13667_v55  ;;  %4735 = vmatmul.bf16.gmra.mxu2 %v13663_v4  ;;  %v10560_v2 = vld [vmem:[#allocation7 + $0xb90] sm:$0xf] }
 0x4d8   : > { %16358 = vst [vmem:[#allocation129_spill] sm:$0xff] %v13671_v42  ;;  %4784 = vmatmul.bf16.gmra.mxu3 %v13667_v55  ;;  %v11579_v42 = vld [vmem:[#allocation7 + $0x9ac] sm:$0xf0]  ;;  %v10561_v34 = vor.u32 %v11643_v18, %v10560_v2  ;;  %v10274_v2 = vld [vmem:[#allocation7 + $0x970] sm:$0xf0] }
 0x4d9   : > { %v10305_v60 = vor.u32 %v11579_v42, %v10304_v12  ;;  %v11631_v42 = vld [vmem:[#allocation7 + $0xb54] sm:$0xf] }
 0x4da   : > { %v3703_v21 = vpop.f32.mrf.mxu2  ;;  %5036 = vmatpush.bf16.msra.mxu1 %v10561_v34  ;;  %v11567_v34 = vld [vmem:[#allocation7 + $0x954] sm:$0xf] }
 0x4db   : > { %v3704_v29 = vadd.f32 %v3703_v21, %v13102_v47  ;;  %v3752_v45 = vpop.f32.mrf.mxu3  ;;  %v3607_v1 = vpop.f32.mrf.mxu0  ;;  %4987 = vmatpush.bf16.msra.mxu0 %v10305_v60  ;;  %v16360_v47 = vld [vmem:[#allocation132_spill] sm:$0xff] }
 0x4dc   : > { %v3608_v17 = vadd.f32 %v3607_v1, %v16359_v31  ;;  %v3656_v46 = vpop.f32.mrf.mxu1 }
 0x4dd   : > { %v13679_v61 = vadd.f32 %v3752_v45, %v3704_v29  ;;  %v16362_v29 = vld [vmem:[#allocation133_spill] sm:$0xff] }
 0x4de   : > { %v13681_v40 = vadd.f32 %v3656_v46, %v3608_v17  ;;  %v10277_v17 = vor.u32 %v11567_v34, %v10274_v2  ;;  %v10530_v46 = vld [vmem:[#allocation7 + $0xb70] sm:$0xf0]  ;;  %v11635_v2 = vld [vmem:[#allocation7 + $0xb6c] sm:$0xf0] }
 0x4df   : > { %v10533_v60 = vor.u32 %v11631_v42, %v10530_v46 }
 0x4e0   : > { %5086 = vmatpush.bf16.msra.mxu2 %v10277_v17 }
 0x4e1   : > { %5135 = vmatpush.bf16.msra.mxu3 %v10533_v60 }
 0x4e2   : > { %v3705_v5 = vpop.f32.mrf.mxu2 }
 0x4e3   : > { %v3706_v11 = vadd.f32 %v3705_v5, %v16360_v47  ;;  %v3754_v3 = vpop.f32.mrf.mxu3  ;;  %v4603_v21 = vpop.f32.mrf.mxu0 }
 0x4e4   : > { %v4652_v1 = vpop.f32.mrf.mxu1 }
 0x4e5   : > { %v13684_v31 = vadd.f32 %v3754_v3, %v3706_v11  ;;  %v4653_v6 = vadd.f32 %v4652_v1, %v4603_v21  ;;  %v10272_v1 = vld [vmem:[#allocation7 + $0x950] sm:$0xf] }
 0x4e6   : > { %4798 = vmatmul.bf16.vlgmr.msrb.gmra.mxu0 %v13495_v9 }
 0x4e7   : > { %16361 = vst [vmem:[#allocation130_spill] sm:$0xff] %v13684_v31  ;;  %v13688_v45 = vadd.f32 %v4653_v6, %v16362_v29  ;;  %4847 = vmatmul.bf16.vlgmr.msrb.gmra.mxu1 %v13499_v35  ;;  %4896 = vmatmul.bf16.vlgmr.msrb.gmra.mxu2 %v13495_v9  ;;  %v11571_v6 = vld [vmem:[#allocation7 + $0x96c] sm:$0xf0] }
 0x4e8   : > { %4945 = vmatmul.bf16.vlgmr.msrb.gmra.mxu3 %v13499_v35  ;;  %v10528_v29 = vld [vmem:[#allocation7 + $0xb50] sm:$0xf]  ;;  %v10273_v34 = vor.u32 %v11571_v6, %v10272_v1 }
 0x4e9   : > { %16363 = vst [vmem:[#allocation131_spill] sm:$0xff] %v13688_v45  ;;  %v10529_v31 = vor.u32 %v11635_v2, %v10528_v29 }
 0x4ea   : > { %v4701_v12 = vpop.f32.mrf.mxu2  ;;  %4988 = vmatpush.bf16.msra.mxu0 %v10273_v34 }
 0x4eb   : > { %v4750_v18 = vpop.f32.mrf.mxu3  ;;  %v4605_v5 = vpop.f32.mrf.mxu0  ;;  %5037 = vmatpush.bf16.msra.mxu1 %v10529_v31  ;;  %v10242_v31 = vld [vmem:[#allocation7 + $0x930] sm:$0xf0] }
 0x4ec   : > { %v4751_v47 = vadd.f32 %v4750_v18, %v4701_v12  ;;  %v4654_v11 = vpop.f32.mrf.mxu1 }
 0x4ed   : > { %v4655_v3 = vadd.f32 %v4654_v11, %v4605_v5 }
 0x4ee   : > { %v13694_v21 = vadd.f32 %v4751_v47, %v13117_v39  ;;  %v11623_v47 = vld [vmem:[#allocation7 + $0xb14] sm:$0xf] }
 0x4ef   : > { %v13697_v45 = vadd.f32 %v4655_v3, %v13119_v48  ;;  %v11559_v48 = vld [vmem:[#allocation7 + $0x914] sm:$0xf] }
 0x4f0   : > { %v10245_v11 = vor.u32 %v11559_v48, %v10242_v31  ;;  %v10498_v3 = vld [vmem:[#allocation7 + $0xb30] sm:$0xf0]  ;;  %v11627_v48 = vld [vmem:[#allocation7 + $0xb2c] sm:$0xf0] }
 0x4f1   : > { %v10501_v6 = vor.u32 %v11623_v47, %v10498_v3 }
 0x4f2   : > { %v4703_v42 = vpop.f32.mrf.mxu2  ;;  %5087 = vmatpush.bf16.msra.mxu2 %v10245_v11 }
 0x4f3   : > { %v4752_v17 = vpop.f32.mrf.mxu3  ;;  %v4608_v46 = vpop.f32.mrf.mxu0  ;;  %5136 = vmatpush.bf16.msra.mxu3 %v10501_v6 }
 0x4f4   : > { %v4753_v12 = vadd.f32 %v4752_v17, %v4703_v42  ;;  %v4657_v60 = vpop.f32.mrf.mxu1  ;;  %v10240_v17 = vld [vmem:[#allocation7 + $0x910] sm:$0xf] }
 0x4f5   : > { %v4658_v18 = vadd.f32 %v4657_v60, %v4608_v46  ;;  %v11563_v46 = vld [vmem:[#allocation7 + $0x92c] sm:$0xf0] }
 0x4f6   : > { %v13700_v39 = vadd.f32 %v4753_v12, %v13123_v19  ;;  %4803 = vmatmul.bf16.gmra.mxu0 %v13519_v59  ;;  %v10496_v12 = vld [vmem:[#allocation7 + $0xb10] sm:$0xf] }
 0x4f7   : > { %v13704_v5 = vadd.f32 %v4658_v18, %v13125_v25  ;;  %4852 = vmatmul.bf16.gmra.mxu1 %v13523_v38  ;;  %4901 = vmatmul.bf16.gmra.mxu2 %v13519_v59  ;;  %v10241_v18 = vor.u32 %v11563_v46, %v10240_v17  ;;  %v10497_v31 = vor.u32 %v11627_v48, %v10496_v12  ;;  %v10466_v17 = vld [vmem:[#allocation7 + $0xaf0] sm:$0xf0] }
 0x4f8   : > { %4950 = vmatmul.bf16.gmra.mxu3 %v13523_v38 }
 0x4f9   : > { %4989 = vmatpush.bf16.msra.mxu0 %v10241_v18  ;;  %5038 = vmatpush.bf16.msra.mxu1 %v10497_v31 }
 0x4fa   : > { %v4706_v1 = vpop.f32.mrf.mxu2 }
 0x4fb   : > { %v4755_v19 = vpop.f32.mrf.mxu3  ;;  %v4610_v29 = vpop.f32.mrf.mxu0 }
 0x4fc   : > { %v4756_v34 = vadd.f32 %v4755_v19, %v4706_v1  ;;  %v4659_v2 = vpop.f32.mrf.mxu1 }
 0x4fd   : > { %v4660_v25 = vadd.f32 %v4659_v2, %v4610_v29  ;;  %v11615_v2 = vld [vmem:[#allocation7 + $0xad4] sm:$0xf] }
 0x4fe   : > { %v13710_v42 = vadd.f32 %v4756_v34, %v13133_v63  ;;  %v10210_v34 = vld [vmem:[#allocation7 + $0x8f0] sm:$0xf0]  ;;  %v10469_v12 = vor.u32 %v11615_v2, %v10466_v17 }
 0x4ff   : > { %v13713_v60 = vadd.f32 %v4660_v25, %v13135_v15  ;;  %v11551_v15 = vld [vmem:[#allocation7 + $0x8d4] sm:$0xf] }
 0x500   : > { %v10213_v25 = vor.u32 %v11551_v15, %v10210_v34  ;;  %5137 = vmatpush.bf16.msra.mxu3 %v10469_v12  ;;  %v11619_v15 = vld [vmem:[#allocation7 + $0xaec] sm:$0xf0] }
 0x502   : > { %v4708_v47 = vpop.f32.mrf.mxu2  ;;  %5088 = vmatpush.bf16.msra.mxu2 %v10213_v25 }
 0x503   : > { %v4757_v11 = vpop.f32.mrf.mxu3  ;;  %v4613_v3 = vpop.f32.mrf.mxu0 }
 0x504   : > { %v4758_v1 = vadd.f32 %v4757_v11, %v4708_v47  ;;  %v4662_v6 = vpop.f32.mrf.mxu1  ;;  %v10208_v11 = vld [vmem:[#allocation7 + $0x8d0] sm:$0xf] }
 0x505   : > { %v4663_v19 = vadd.f32 %v4662_v6, %v4613_v3  ;;  %v11555_v3 = vld [vmem:[#allocation7 + $0x8ec] sm:$0xf0] }
 0x506   : > { %v13716_v63 = vadd.f32 %v4758_v1, %v13139_v62  ;;  %4808 = vmatmul.bf16.gmra.mxu0 %v13543_v32  ;;  %v10464_v1 = vld [vmem:[#allocation7 + $0xad0] sm:$0xf] }
 0x507   : > { %v13720_v29 = vadd.f32 %v4663_v19, %v13141_v41  ;;  %4857 = vmatmul.bf16.gmra.mxu1 %v13547_v24  ;;  %4906 = vmatmul.bf16.gmra.mxu2 %v13543_v32  ;;  %v10209_v19 = vor.u32 %v11555_v3, %v10208_v11  ;;  %v10465_v34 = vor.u32 %v11619_v15, %v10464_v1  ;;  %v10434_v3 = vld [vmem:[#allocation7 + $0xab0] sm:$0xf0] }
 0x508   : > { %4955 = vmatmul.bf16.gmra.mxu3 %v13547_v24 }
 0x509   : > { %4990 = vmatpush.bf16.msra.mxu0 %v10209_v19  ;;  %5039 = vmatpush.bf16.msra.mxu1 %v10465_v34 }
 0x50a   : > { %v4711_v46 = vpop.f32.mrf.mxu2 }
 0x50b   : > { %v4760_v62 = vpop.f32.mrf.mxu3  ;;  %v4615_v18 = vpop.f32.mrf.mxu0 }
 0x50c   : > { %v4761_v48 = vadd.f32 %v4760_v62, %v4711_v46  ;;  %v4664_v31 = vpop.f32.mrf.mxu1 }
 0x50d   : > { %v4665_v41 = vadd.f32 %v4664_v31, %v4615_v18  ;;  %v16366_v18 = vld [vmem:[#allocation134_spill] sm:$0xff]  ;;  %v10178_v31 = vld [vmem:[#allocation7 + $0x8b0] sm:$0xf0] }
 0x50e   : > { %v13726_v47 = vadd.f32 %v4761_v48, %v13149_v57 }
 0x50f   : > { %v13729_v6 = vadd.f32 %v4665_v41, %v13151_v14  ;;  %v11543_v14 = vld [vmem:[#allocation7 + $0x894] sm:$0xf] }
 0x510   : > { %v11607_v41 = vld [vmem:[#allocation7 + $0xa94] sm:$0xf]  ;;  %v10181_v11 = vor.u32 %v11543_v14, %v10178_v31  ;;  %v11611_v31 = vld [vmem:[#allocation7 + $0xaac] sm:$0xf0] }
 0x511   : > { %16364 = vst [vmem:[#allocation132_spill] sm:$0xff] %v13729_v6  ;;  %v10437_v19 = vor.u32 %v11607_v41, %v10434_v3 }
 0x512   : > { %v4713_v2 = vpop.f32.mrf.mxu2  ;;  %5089 = vmatpush.bf16.msra.mxu2 %v10181_v11 }
 0x513   : > { %v4762_v25 = vpop.f32.mrf.mxu3  ;;  %v4618_v17 = vpop.f32.mrf.mxu0  ;;  %5138 = vmatpush.bf16.msra.mxu3 %v10437_v19 }
 0x514   : > { %v4763_v46 = vadd.f32 %v4762_v25, %v4713_v2  ;;  %v4667_v12 = vpop.f32.mrf.mxu1 }
 0x515   : > { %v4668_v62 = vadd.f32 %v4667_v12, %v4618_v17  ;;  %v16368_v17 = vld [vmem:[#allocation36_spill] sm:$0xff] }
 0x516   : > { %v13732_v57 = vadd.f32 %v4763_v46, %v13155_v53  ;;  %4813 = vmatmul.bf16.gmra.mxu0 %v13567_v49  ;;  %v10176_v12 = vld [vmem:[#allocation7 + $0x890] sm:$0xf] }
 0x517   : > { %v13736_v48 = vadd.f32 %v4668_v62, %v16366_v18  ;;  %4862 = vmatmul.bf16.gmra.mxu1 %v13571_v20  ;;  %4911 = vmatmul.bf16.gmra.mxu2 %v13567_v49  ;;  %v11547_v62 = vld [vmem:[#allocation7 + $0x8ac] sm:$0xf0] }
 0x518   : > { %16365 = vst [vmem:[#allocation133_spill] sm:$0xff] %v13732_v57  ;;  %4960 = vmatmul.bf16.gmra.mxu3 %v13571_v20  ;;  %v10432_v18 = vld [vmem:[#allocation7 + $0xa90] sm:$0xf]  ;;  %v10177_v14 = vor.u32 %v11547_v62, %v10176_v12  ;;  %v10402_v62 = vld [vmem:[#allocation7 + $0xa70] sm:$0xf0] }
 0x519   : > { %16367 = vst [vmem:[#allocation134_spill] sm:$0xff] %v13736_v48  ;;  %v16370_v48 = vld [vmem:[#allocation135_spill] sm:$0xff]  ;;  %v10433_v6 = vor.u32 %v11611_v31, %v10432_v18 }
 0x51a   : > { %v4716_v1 = vpop.f32.mrf.mxu2  ;;  %4991 = vmatpush.bf16.msra.mxu0 %v10177_v14 }
 0x51b   : > { %v4765_v53 = vpop.f32.mrf.mxu3  ;;  %v4620_v15 = vpop.f32.mrf.mxu0  ;;  %5040 = vmatpush.bf16.msra.mxu1 %v10433_v6  ;;  %v11535_v6 = vld [vmem:[#allocation7 + $0x854] sm:$0xf] }
 0x51c   : > { %v4766_v34 = vadd.f32 %v4765_v53, %v4716_v1  ;;  %v4669_v2 = vpop.f32.mrf.mxu1 }
 0x51d   : > { %v4670_v25 = vadd.f32 %v4669_v2, %v4620_v15  ;;  %v16372_v15 = vld [vmem:[#allocation37_spill] sm:$0xff]  ;;  %v16374_v2 = vld [vmem:[#allocation38_spill] sm:$0xff] }
 0x51e   : > { %v13742_v46 = vadd.f32 %v4766_v34, %v16368_v17 }
 0x51f   : > { %v13745_v57 = vadd.f32 %v4670_v25, %v16370_v48  ;;  %v10146_v48 = vld [vmem:[#allocation7 + $0x870] sm:$0xf0] }
 0x520   : > { %16369 = vst [vmem:[#allocation36_spill] sm:$0xff] %v13742_v46  ;;  %v11599_v25 = vld [vmem:[#allocation7 + $0xa54] sm:$0xf]  ;;  %v10149_v12 = vor.u32 %v11535_v6, %v10146_v48  ;;  %v11603_v48 = vld [vmem:[#allocation7 + $0xa6c] sm:$0xf0] }
 0x521   : > { %16371 = vst [vmem:[#allocation135_spill] sm:$0xff] %v13745_v57  ;;  %v10405_v14 = vor.u32 %v11599_v25, %v10402_v62 }
 0x522   : > { %v4718_v41 = vpop.f32.mrf.mxu2  ;;  %5090 = vmatpush.bf16.msra.mxu2 %v10149_v12 }
 0x523   : > { %v4767_v11 = vpop.f32.mrf.mxu3  ;;  %v4623_v3 = vpop.f32.mrf.mxu0  ;;  %5139 = vmatpush.bf16.msra.mxu3 %v10405_v14 }
 0x524   : > { %v4768_v1 = vadd.f32 %v4767_v11, %v4718_v41  ;;  %v4672_v19 = vpop.f32.mrf.mxu1 }
 0x525   : > { %v4673_v53 = vadd.f32 %v4672_v19, %v4623_v3  ;;  %v16376_v19 = vld [vmem:[#allocation39_spill] sm:$0xff] }
 0x526   : > { %v13748_v34 = vadd.f32 %v4768_v1, %v16372_v15  ;;  %4818 = vmatmul.bf16.gmra.mxu0 %v13591_v8  ;;  %v10144_v15 = vld [vmem:[#allocation7 + $0x850] sm:$0xf] }
 0x527   : > { %v13752_v17 = vadd.f32 %v4673_v53, %v16374_v2  ;;  %4867 = vmatmul.bf16.gmra.mxu1 %v13595_v58  ;;  %4916 = vmatmul.bf16.gmra.mxu2 %v13591_v8  ;;  %v11539_v2 = vld [vmem:[#allocation7 + $0x86c] sm:$0xf0] }
 0x528   : > { %16373 = vst [vmem:[#allocation37_spill] sm:$0xff] %v13748_v34  ;;  %4965 = vmatmul.bf16.gmra.mxu3 %v13595_v58  ;;  %v16378_v34 = vld [vmem:[#allocation40_spill] sm:$0xff]  ;;  %v10145_v6 = vor.u32 %v11539_v2, %v10144_v15 }
 0x529   : > { %16375 = vst [vmem:[#allocation38_spill] sm:$0xff] %v13752_v17  ;;  %v10400_v17 = vld [vmem:[#allocation7 + $0xa50] sm:$0xf]  ;;  %v10370_v15 = vld [vmem:[#allocation7 + $0xa30] sm:$0xf0] }
 0x52a   : > { %v4721_v18 = vpop.f32.mrf.mxu2  ;;  %v10401_v46 = vor.u32 %v11603_v48, %v10400_v17  ;;  %4992 = vmatpush.bf16.msra.mxu0 %v10145_v6  ;;  %v11591_v17 = vld [vmem:[#allocation7 + $0xa14] sm:$0xf] }
 0x52b   : > { %v4770_v31 = vpop.f32.mrf.mxu3  ;;  %v4625_v41 = vpop.f32.mrf.mxu0  ;;  %v10373_v6 = vor.u32 %v11591_v17, %v10370_v15 }
 0x52c   : > { %v4771_v11 = vadd.f32 %v4770_v31, %v4721_v18  ;;  %v4674_v3 = vpop.f32.mrf.mxu1  ;;  %5041 = vmatpush.bf16.msra.mxu1 %v10401_v46  ;;  %v11527_v46 = vld [vmem:[#allocation7 + $0x814] sm:$0xf] }
 0x52d   : > { %v4675_v1 = vadd.f32 %v4674_v3, %v4625_v41  ;;  %v16380_v41 = vld [vmem:[#allocation41_spill] sm:$0xff]  ;;  %v16382_v3 = vld [vmem:[#allocation42_spill] sm:$0xff]  ;;  %5140 = vmatpush.bf16.msra.mxu3 %v10373_v6 }
 0x52e   : > { %v13758_v53 = vadd.f32 %v4771_v11, %v16376_v19 }
 0x52f   : > { %v13761_v57 = vadd.f32 %v4675_v1, %v16378_v34  ;;  %v10114_v34 = vld [vmem:[#allocation7 + $0x830] sm:$0xf0] }
 0x530   : > { %16377 = vst [vmem:[#allocation39_spill] sm:$0xff] %v13758_v53  ;;  %v10117_v1 = vor.u32 %v11527_v46, %v10114_v34  ;;  %v11595_v34 = vld [vmem:[#allocation7 + $0xa2c] sm:$0xf0] }
 0x531   : > { %16379 = vst [vmem:[#allocation40_spill] sm:$0xff] %v13761_v57 }
 0x532   : > { %v4723_v25 = vpop.f32.mrf.mxu2  ;;  %5091 = vmatpush.bf16.msra.mxu2 %v10117_v1 }
 0x533   : > { %v4772_v12 = vpop.f32.mrf.mxu3  ;;  %v4628_v62 = vpop.f32.mrf.mxu0 }
 0x534   : > { %v4773_v18 = vadd.f32 %v4772_v12, %v4723_v25  ;;  %v4677_v14 = vpop.f32.mrf.mxu1 }
 0x535   : > { %v4678_v31 = vadd.f32 %v4677_v14, %v4628_v62  ;;  %v16384_v14 = vld [vmem:[#allocation43_spill] sm:$0xff] }
 0x536   : > { %v13764_v11 = vadd.f32 %v4773_v18, %v16380_v41  ;;  %4823 = vmatmul.bf16.gmra.mxu0 %v13615_v50  ;;  %v10112_v41 = vld [vmem:[#allocation7 + $0x810] sm:$0xf] }
 0x537   : > { %v13768_v19 = vadd.f32 %v4678_v31, %v16382_v3  ;;  %4872 = vmatmul.bf16.gmra.mxu1 %v13619_v30  ;;  %4921 = vmatmul.bf16.gmra.mxu2 %v13615_v50  ;;  %v11531_v3 = vld [vmem:[#allocation7 + $0x82c] sm:$0xf0] }
 0x538   : > { %16381 = vst [vmem:[#allocation41_spill] sm:$0xff] %v13764_v11  ;;  %4970 = vmatmul.bf16.gmra.mxu3 %v13619_v30  ;;  %v16386_v11 = vld [vmem:[#allocation44_spill] sm:$0xff]  ;;  %v10113_v46 = vor.u32 %v11531_v3, %v10112_v41  ;;  %v10602_v41 = vld [vmem:[#allocation7 + $0xbf8] sm:$0xf0] }
 0x539   : > { %16383 = vst [vmem:[#allocation42_spill] sm:$0xff] %v13768_v19  ;;  %v10368_v19 = vld [vmem:[#allocation7 + $0xa10] sm:$0xf] }
 0x53a   : > { %v4726_v2 = vpop.f32.mrf.mxu2  ;;  %v10369_v53 = vor.u32 %v11595_v34, %v10368_v19  ;;  %4993 = vmatpush.bf16.msra.mxu0 %v10113_v46  ;;  %v11648_v19 = vld [vmem:[#allocation7 + $0xbdc] sm:$0xf] }
 0x53b   : > { %v4775_v48 = vpop.f32.mrf.mxu3  ;;  %v4630_v25 = vpop.f32.mrf.mxu0  ;;  %v10605_v46 = vor.u32 %v11648_v19, %v10602_v41 }
 0x53c   : > { %v4776_v12 = vadd.f32 %v4775_v48, %v4726_v2  ;;  %v4679_v62 = vpop.f32.mrf.mxu1  ;;  %5042 = vmatpush.bf16.msra.mxu1 %v10369_v53  ;;  %v11584_v53 = vld [vmem:[#allocation7 + $0x9dc] sm:$0xf] }
 0x53d   : > { %v4680_v18 = vadd.f32 %v4679_v62, %v4630_v25  ;;  %v16388_v25 = vld [vmem:[#allocation45_spill] sm:$0xff]  ;;  %v16390_v62 = vld [vmem:[#allocation46_spill] sm:$0xff]  ;;  %5329 = vmatpush.bf16.msrb.mxu3 %v10605_v46 }
 0x53e   : > { %v13774_v31 = vadd.f32 %v4776_v12, %v16384_v14 }
 0x53f   : > { %v13777_v57 = vadd.f32 %v4680_v18, %v16386_v11  ;;  %v10346_v11 = vld [vmem:[#allocation7 + $0x9f8] sm:$0xf0] }
 0x540   : > { %16385 = vst [vmem:[#allocation43_spill] sm:$0xff] %v13774_v31  ;;  %v10349_v18 = vor.u32 %v11584_v53, %v10346_v11  ;;  %v11652_v11 = vld [vmem:[#allocation7 + $0xbf4] sm:$0xf0] }
 0x541   : > { %16387 = vst [vmem:[#allocation44_spill] sm:$0xff] %v13777_v57 }
 0x542   : > { %v4728_v17 = vpop.f32.mrf.mxu2  ;;  %5280 = vmatpush.bf16.msrb.mxu2 %v10349_v18 }
 0x543   : > { %v4777_v1 = vpop.f32.mrf.mxu3  ;;  %v4633_v15 = vpop.f32.mrf.mxu0 }
 0x544   : > { %v4778_v2 = vadd.f32 %v4777_v1, %v4728_v17  ;;  %v4682_v6 = vpop.f32.mrf.mxu1 }
 0x545   : > { %v4683_v48 = vadd.f32 %v4682_v6, %v4633_v15  ;;  %v16392_v6 = vld [vmem:[#allocation47_spill] sm:$0xff] }
 0x546   : > { %v13780_v12 = vadd.f32 %v4778_v2, %v16388_v25  ;;  %4828 = vmatmul.bf16.gmra.mxu0 %v13639_v22  ;;  %v10344_v25 = vld [vmem:[#allocation7 + $0x9d8] sm:$0xf] }
 0x547   : > { %v13784_v14 = vadd.f32 %v4683_v48, %v16390_v62  ;;  %4877 = vmatmul.bf16.gmra.mxu1 %v13643_v16  ;;  %4926 = vmatmul.bf16.gmra.mxu2 %v13639_v22  ;;  %v11588_v62 = vld [vmem:[#allocation7 + $0x9f4] sm:$0xf0] }
 0x548   : > { %16389 = vst [vmem:[#allocation45_spill] sm:$0xff] %v13780_v12  ;;  %4975 = vmatmul.bf16.gmra.mxu3 %v13643_v16  ;;  %v16394_v12 = vld [vmem:[#allocation48_spill] sm:$0xff]  ;;  %v10345_v53 = vor.u32 %v11588_v62, %v10344_v25  ;;  %v10570_v25 = vld [vmem:[#allocation7 + $0xbb8] sm:$0xf0] }
 0x549   : > { %16391 = vst [vmem:[#allocation46_spill] sm:$0xff] %v13784_v14  ;;  %v10600_v14 = vld [vmem:[#allocation7 + $0xbd8] sm:$0xf] }
 0x54a   : > { %v4731_v3 = vpop.f32.mrf.mxu2  ;;  %v10601_v31 = vor.u32 %v11652_v11, %v10600_v14  ;;  %5182 = vmatpush.bf16.msrb.mxu0 %v10345_v53  ;;  %v11640_v14 = vld [vmem:[#allocation7 + $0xb9c] sm:$0xf] }
 0x54b   : > { %v4780_v34 = vpop.f32.mrf.mxu3  ;;  %v4635_v17 = vpop.f32.mrf.mxu0  ;;  %v10573_v53 = vor.u32 %v11640_v14, %v10570_v25 }
 0x54c   : > { %v4781_v1 = vadd.f32 %v4780_v34, %v4731_v3  ;;  %v4684_v15 = vpop.f32.mrf.mxu1  ;;  %5231 = vmatpush.bf16.msrb.mxu1 %v10601_v31  ;;  %v11576_v31 = vld [vmem:[#allocation7 + $0x99c] sm:$0xf] }
 0x54d   : > { %v4685_v2 = vadd.f32 %v4684_v15, %v4635_v17  ;;  %v16396_v17 = vld [vmem:[#allocation49_spill] sm:$0xff]  ;;  %v16398_v15 = vld [vmem:[#allocation50_spill] sm:$0xff]  ;;  %5330 = vmatpush.bf16.msrb.mxu3 %v10573_v53 }
 0x54e   : > { %v13790_v48 = vadd.f32 %v4781_v1, %v16392_v6 }
 0x54f   : > { %v13793_v57 = vadd.f32 %v4685_v2, %v16394_v12  ;;  %v10314_v12 = vld [vmem:[#allocation7 + $0x9b8] sm:$0xf0] }
 0x550   : > { %16393 = vst [vmem:[#allocation47_spill] sm:$0xff] %v13790_v48  ;;  %v10317_v2 = vor.u32 %v11576_v31, %v10314_v12  ;;  %v11644_v12 = vld [vmem:[#allocation7 + $0xbb4] sm:$0xf0] }
 0x551   : > { %16395 = vst [vmem:[#allocation48_spill] sm:$0xff] %v13793_v57 }
 0x552   : > { %v4733_v19 = vpop.f32.mrf.mxu2  ;;  %5281 = vmatpush.bf16.msrb.mxu2 %v10317_v2 }
 0x553   : > { %v4782_v18 = vpop.f32.mrf.mxu3  ;;  %v4638_v41 = vpop.f32.mrf.mxu0 }
 0x554   : > { %v4783_v3 = vadd.f32 %v4782_v18, %v4733_v19  ;;  %v4687_v46 = vpop.f32.mrf.mxu1 }
 0x555   : > { %v4688_v34 = vadd.f32 %v4687_v46, %v4638_v41  ;;  %v16400_v46 = vld [vmem:[#allocation51_spill] sm:$0xff] }
 0x556   : > { %v13796_v1 = vadd.f32 %v4783_v3, %v16396_v17  ;;  %4833 = vmatmul.bf16.gmra.mxu0 %v13663_v4  ;;  %v10312_v17 = vld [vmem:[#allocation7 + $0x998] sm:$0xf] }
 0x557   : > { %v13800_v6 = vadd.f32 %v4688_v34, %v16398_v15  ;;  %4882 = vmatmul.bf16.gmra.mxu1 %v13667_v55  ;;  %4931 = vmatmul.bf16.gmra.mxu2 %v13663_v4  ;;  %v11580_v15 = vld [vmem:[#allocation7 + $0x9b4] sm:$0xf0] }
 0x558   : > { %16397 = vst [vmem:[#allocation49_spill] sm:$0xff] %v13796_v1  ;;  %4980 = vmatmul.bf16.gmra.mxu3 %v13667_v55  ;;  %v16402_v1 = vld [vmem:[#allocation52_spill] sm:$0xff]  ;;  %v10313_v31 = vor.u32 %v11580_v15, %v10312_v17  ;;  %v10538_v17 = vld [vmem:[#allocation7 + $0xb78] sm:$0xf0] }
 0x559   : > { %16399 = vst [vmem:[#allocation50_spill] sm:$0xff] %v13800_v6  ;;  %v10568_v6 = vld [vmem:[#allocation7 + $0xb98] sm:$0xf] }
 0x55a   : > { %v4736_v62 = vpop.f32.mrf.mxu2  ;;  %v10569_v48 = vor.u32 %v11644_v12, %v10568_v6  ;;  %5183 = vmatpush.bf16.msrb.mxu0 %v10313_v31  ;;  %v11632_v6 = vld [vmem:[#allocation7 + $0xb5c] sm:$0xf] }
 0x55b   : > { %v4785_v11 = vpop.f32.mrf.mxu3  ;;  %v4640_v19 = vpop.f32.mrf.mxu0  ;;  %v10541_v31 = vor.u32 %v11632_v6, %v10538_v17 }
 0x55c   : > { %v4786_v18 = vadd.f32 %v4785_v11, %v4736_v62  ;;  %v4689_v41 = vpop.f32.mrf.mxu1  ;;  %5232 = vmatpush.bf16.msrb.mxu1 %v10569_v48  ;;  %v11568_v48 = vld [vmem:[#allocation7 + $0x95c] sm:$0xf] }
 0x55d   : > { %v4690_v3 = vadd.f32 %v4689_v41, %v4640_v19  ;;  %v16404_v19 = vld [vmem:[#allocation53_spill] sm:$0xff]  ;;  %v16406_v41 = vld [vmem:[#allocation54_spill] sm:$0xff]  ;;  %5331 = vmatpush.bf16.msrb.mxu3 %v10541_v31 }
 0x55e   : > { %v13806_v34 = vadd.f32 %v4786_v18, %v16400_v46 }
 0x55f   : > { %v13809_v57 = vadd.f32 %v4690_v3, %v16402_v1  ;;  %v10282_v1 = vld [vmem:[#allocation7 + $0x978] sm:$0xf0] }
 0x560   : > { %16401 = vst [vmem:[#allocation51_spill] sm:$0xff] %v13806_v34  ;;  %v10285_v3 = vor.u32 %v11568_v48, %v10282_v1  ;;  %v11636_v1 = vld [vmem:[#allocation7 + $0xb74] sm:$0xf0] }
 0x561   : > { %16403 = vst [vmem:[#allocation52_spill] sm:$0xff] %v13809_v57 }
 0x562   : > { %v4738_v14 = vpop.f32.mrf.mxu2  ;;  %5282 = vmatpush.bf16.msrb.mxu2 %v10285_v3 }
 0x563   : > { %v4787_v2 = vpop.f32.mrf.mxu3  ;;  %v4799_v25 = vpop.f32.mrf.mxu0 }
 0x564   : > { %v4788_v62 = vadd.f32 %v4787_v2, %v4738_v14  ;;  %v4848_v53 = vpop.f32.mrf.mxu1 }
 0x565   : > { %v4849_v11 = vadd.f32 %v4848_v53, %v4799_v25  ;;  %v16408_v53 = vld [vmem:[#allocation55_spill] sm:$0xff] }
 0x566   : > { %v13812_v18 = vadd.f32 %v4788_v62, %v16404_v19  ;;  %4994 = vmatmul.bf16.vlgmr.msra.gmra.mxu0 %v13495_v9  ;;  %v10280_v19 = vld [vmem:[#allocation7 + $0x958] sm:$0xf] }
 0x567   : > { %v13816_v46 = vadd.f32 %v4849_v11, %v16406_v41  ;;  %5043 = vmatmul.bf16.vlgmr.msra.gmra.mxu1 %v13499_v35  ;;  %5092 = vmatmul.bf16.vlgmr.msra.gmra.mxu2 %v13495_v9  ;;  %v11572_v41 = vld [vmem:[#allocation7 + $0x974] sm:$0xf0] }
 0x568   : > { %16405 = vst [vmem:[#allocation53_spill] sm:$0xff] %v13812_v18  ;;  %5141 = vmatmul.bf16.vlgmr.msra.gmra.mxu3 %v13499_v35  ;;  %v16410_v18 = vld [vmem:[#allocation56_spill] sm:$0xff]  ;;  %v10281_v48 = vor.u32 %v11572_v41, %v10280_v19  ;;  %v10506_v19 = vld [vmem:[#allocation7 + $0xb38] sm:$0xf0] }
 0x569   : > { %16407 = vst [vmem:[#allocation54_spill] sm:$0xff] %v13816_v46  ;;  %v10536_v46 = vld [vmem:[#allocation7 + $0xb58] sm:$0xf] }
 0x56a   : > { %v4897_v15 = vpop.f32.mrf.mxu2  ;;  %v10537_v34 = vor.u32 %v11636_v1, %v10536_v46  ;;  %5184 = vmatpush.bf16.msrb.mxu0 %v10281_v48  ;;  %v11624_v46 = vld [vmem:[#allocation7 + $0xb1c] sm:$0xf] }
 0x56b   : > { %v4946_v12 = vpop.f32.mrf.mxu3  ;;  %v4801_v14 = vpop.f32.mrf.mxu0  ;;  %v10509_v48 = vor.u32 %v11624_v46, %v10506_v19 }
 0x56c   : > { %v4947_v2 = vadd.f32 %v4946_v12, %v4897_v15  ;;  %v4850_v25 = vpop.f32.mrf.mxu1  ;;  %5233 = vmatpush.bf16.msrb.mxu1 %v10537_v34  ;;  %v11560_v34 = vld [vmem:[#allocation7 + $0x91c] sm:$0xf] }
 0x56d   : > { %v4851_v62 = vadd.f32 %v4850_v25, %v4801_v14  ;;  %v16412_v14 = vld [vmem:[#allocation57_spill] sm:$0xff]  ;;  %v16414_v25 = vld [vmem:[#allocation58_spill] sm:$0xff]  ;;  %5332 = vmatpush.bf16.msrb.mxu3 %v10509_v48 }
 0x56e   : > { %v13822_v11 = vadd.f32 %v4947_v2, %v16408_v53 }
 0x56f   : > { %v13825_v57 = vadd.f32 %v4851_v62, %v16410_v18  ;;  %v10250_v18 = vld [vmem:[#allocation7 + $0x938] sm:$0xf0] }
 0x570   : > { %16409 = vst [vmem:[#allocation55_spill] sm:$0xff] %v13822_v11  ;;  %v10253_v62 = vor.u32 %v11560_v34, %v10250_v18  ;;  %v11628_v18 = vld [vmem:[#allocation7 + $0xb34] sm:$0xf0] }
 0x571   : > { %16411 = vst [vmem:[#allocation56_spill] sm:$0xff] %v13825_v57 }
 0x572   : > { %v4899_v6 = vpop.f32.mrf.mxu2  ;;  %5283 = vmatpush.bf16.msrb.mxu2 %v10253_v62 }
 0x573   : > { %v4948_v3 = vpop.f32.mrf.mxu3  ;;  %v4804_v17 = vpop.f32.mrf.mxu0 }
 0x574   : > { %v4949_v15 = vadd.f32 %v4948_v3, %v4899_v6  ;;  %v4853_v31 = vpop.f32.mrf.mxu1 }
 0x575   : > { %v4854_v12 = vadd.f32 %v4853_v31, %v4804_v17  ;;  %v16416_v31 = vld [vmem:[#allocation59_spill] sm:$0xff] }
 0x576   : > { %v13828_v2 = vadd.f32 %v4949_v15, %v16412_v14  ;;  %4999 = vmatmul.bf16.gmra.mxu0 %v13519_v59  ;;  %v10248_v14 = vld [vmem:[#allocation7 + $0x918] sm:$0xf] }
 0x577   : > { %v13832_v53 = vadd.f32 %v4854_v12, %v16414_v25  ;;  %5048 = vmatmul.bf16.gmra.mxu1 %v13523_v38  ;;  %5097 = vmatmul.bf16.gmra.mxu2 %v13519_v59  ;;  %v11564_v25 = vld [vmem:[#allocation7 + $0x934] sm:$0xf0] }
 0x578   : > { %16413 = vst [vmem:[#allocation57_spill] sm:$0xff] %v13828_v2  ;;  %5146 = vmatmul.bf16.gmra.mxu3 %v13523_v38  ;;  %v16418_v2 = vld [vmem:[#allocation60_spill] sm:$0xff]  ;;  %v10249_v34 = vor.u32 %v11564_v25, %v10248_v14  ;;  %v10474_v14 = vld [vmem:[#allocation7 + $0xaf8] sm:$0xf0] }
 0x579   : > { %16415 = vst [vmem:[#allocation58_spill] sm:$0xff] %v13832_v53  ;;  %v10504_v53 = vld [vmem:[#allocation7 + $0xb18] sm:$0xf] }
 0x57a   : > { %v4902_v41 = vpop.f32.mrf.mxu2  ;;  %v10505_v11 = vor.u32 %v11628_v18, %v10504_v53  ;;  %5185 = vmatpush.bf16.msrb.mxu0 %v10249_v34  ;;  %v11616_v53 = vld [vmem:[#allocation7 + $0xadc] sm:$0xf] }
 0x57b   : > { %v4951_v1 = vpop.f32.mrf.mxu3  ;;  %v4806_v6 = vpop.f32.mrf.mxu0  ;;  %v10477_v34 = vor.u32 %v11616_v53, %v10474_v14 }
 0x57c   : > { %v4952_v3 = vadd.f32 %v4951_v1, %v4902_v41  ;;  %v4855_v17 = vpop.f32.mrf.mxu1  ;;  %5234 = vmatpush.bf16.msrb.mxu1 %v10505_v11  ;;  %v11552_v11 = vld [vmem:[#allocation7 + $0x8dc] sm:$0xf] }
 0x57d   : > { %v4856_v15 = vadd.f32 %v4855_v17, %v4806_v6  ;;  %v16420_v6 = vld [vmem:[#allocation61_spill] sm:$0xff]  ;;  %v16422_v17 = vld [vmem:[#allocation62_spill] sm:$0xff]  ;;  %5333 = vmatpush.bf16.msrb.mxu3 %v10477_v34 }
 0x57e   : > { %v13838_v12 = vadd.f32 %v4952_v3, %v16416_v31 }
 0x57f   : > { %v13841_v57 = vadd.f32 %v4856_v15, %v16418_v2  ;;  %v10218_v2 = vld [vmem:[#allocation7 + $0x8f8] sm:$0xf0] }
 0x580   : > { %16417 = vst [vmem:[#allocation59_spill] sm:$0xff] %v13838_v12  ;;  %v10221_v15 = vor.u32 %v11552_v11, %v10218_v2  ;;  %v11620_v2 = vld [vmem:[#allocation7 + $0xaf4] sm:$0xf0] }
 0x581   : > { %16419 = vst [vmem:[#allocation60_spill] sm:$0xff] %v13841_v57 }
 0x582   : > { %v4904_v46 = vpop.f32.mrf.mxu2  ;;  %5284 = vmatpush.bf16.msrb.mxu2 %v10221_v15 }
 0x583   : > { %v4953_v62 = vpop.f32.mrf.mxu3  ;;  %v4809_v19 = vpop.f32.mrf.mxu0 }
 0x584   : > { %v4954_v41 = vadd.f32 %v4953_v62, %v4904_v46  ;;  %v4858_v48 = vpop.f32.mrf.mxu1 }
 0x585   : > { %v4859_v1 = vadd.f32 %v4858_v48, %v4809_v19  ;;  %v16424_v48 = vld [vmem:[#allocation63_spill] sm:$0xff] }
 0x586   : > { %v13844_v3 = vadd.f32 %v4954_v41, %v16420_v6  ;;  %5004 = vmatmul.bf16.gmra.mxu0 %v13543_v32  ;;  %v10216_v6 = vld [vmem:[#allocation7 + $0x8d8] sm:$0xf] }
 0x587   : > { %v13848_v31 = vadd.f32 %v4859_v1, %v16422_v17  ;;  %5053 = vmatmul.bf16.gmra.mxu1 %v13547_v24  ;;  %5102 = vmatmul.bf16.gmra.mxu2 %v13543_v32  ;;  %v11556_v17 = vld [vmem:[#allocation7 + $0x8f4] sm:$0xf0] }
 0x588   : > { %16421 = vst [vmem:[#allocation61_spill] sm:$0xff] %v13844_v3  ;;  %5151 = vmatmul.bf16.gmra.mxu3 %v13547_v24  ;;  %v16426_v3 = vld [vmem:[#allocation64_spill] sm:$0xff]  ;;  %v10217_v11 = vor.u32 %v11556_v17, %v10216_v6  ;;  %v10442_v6 = vld [vmem:[#allocation7 + $0xab8] sm:$0xf0] }
 0x589   : > { %16423 = vst [vmem:[#allocation62_spill] sm:$0xff] %v13848_v31  ;;  %v10472_v31 = vld [vmem:[#allocation7 + $0xad8] sm:$0xf] }
 0x58a   : > { %v4907_v25 = vpop.f32.mrf.mxu2  ;;  %v10473_v12 = vor.u32 %v11620_v2, %v10472_v31  ;;  %5186 = vmatpush.bf16.msrb.mxu0 %v10217_v11  ;;  %v11608_v31 = vld [vmem:[#allocation7 + $0xa9c] sm:$0xf] }
 0x58b   : > { %v4956_v18 = vpop.f32.mrf.mxu3  ;;  %v4811_v46 = vpop.f32.mrf.mxu0  ;;  %v10445_v11 = vor.u32 %v11608_v31, %v10442_v6 }
 0x58c   : > { %v4957_v62 = vadd.f32 %v4956_v18, %v4907_v25  ;;  %v4860_v19 = vpop.f32.mrf.mxu1  ;;  %5235 = vmatpush.bf16.msrb.mxu1 %v10473_v12  ;;  %v11544_v12 = vld [vmem:[#allocation7 + $0x89c] sm:$0xf] }
 0x58d   : > { %v4861_v41 = vadd.f32 %v4860_v19, %v4811_v46  ;;  %v16428_v46 = vld [vmem:[#allocation65_spill] sm:$0xff]  ;;  %v16430_v19 = vld [vmem:[#allocation66_spill] sm:$0xff]  ;;  %5334 = vmatpush.bf16.msrb.mxu3 %v10445_v11 }
 0x58e   : > { %v13854_v1 = vadd.f32 %v4957_v62, %v16424_v48 }
 0x58f   : > { %v13857_v57 = vadd.f32 %v4861_v41, %v16426_v3  ;;  %v10186_v3 = vld [vmem:[#allocation7 + $0x8b8] sm:$0xf0] }
 0x590   : > { %16425 = vst [vmem:[#allocation63_spill] sm:$0xff] %v13854_v1  ;;  %v10189_v41 = vor.u32 %v11544_v12, %v10186_v3  ;;  %v11612_v3 = vld [vmem:[#allocation7 + $0xab4] sm:$0xf0] }
 0x591   : > { %16427 = vst [vmem:[#allocation64_spill] sm:$0xff] %v13857_v57 }
 0x592   : > { %v4909_v53 = vpop.f32.mrf.mxu2  ;;  %5285 = vmatpush.bf16.msrb.mxu2 %v10189_v41 }
 0x593   : > { %v4958_v15 = vpop.f32.mrf.mxu3  ;;  %v4814_v14 = vpop.f32.mrf.mxu0 }
 0x594   : > { %v4959_v25 = vadd.f32 %v4958_v15, %v4909_v53  ;;  %v4863_v34 = vpop.f32.mrf.mxu1 }
 0x595   : > { %v4864_v18 = vadd.f32 %v4863_v34, %v4814_v14  ;;  %v16432_v34 = vld [vmem:[#allocation67_spill] sm:$0xff] }
 0x596   : > { %v13860_v62 = vadd.f32 %v4959_v25, %v16428_v46  ;;  %5009 = vmatmul.bf16.gmra.mxu0 %v13567_v49  ;;  %v10184_v46 = vld [vmem:[#allocation7 + $0x898] sm:$0xf] }
 0x597   : > { %v13864_v48 = vadd.f32 %v4864_v18, %v16430_v19  ;;  %5058 = vmatmul.bf16.gmra.mxu1 %v13571_v20  ;;  %5107 = vmatmul.bf16.gmra.mxu2 %v13567_v49  ;;  %v11548_v19 = vld [vmem:[#allocation7 + $0x8b4] sm:$0xf0] }
 0x598   : > { %16429 = vst [vmem:[#allocation65_spill] sm:$0xff] %v13860_v62  ;;  %5156 = vmatmul.bf16.gmra.mxu3 %v13571_v20  ;;  %v16434_v62 = vld [vmem:[#allocation68_spill] sm:$0xff]  ;;  %v10185_v12 = vor.u32 %v11548_v19, %v10184_v46  ;;  %v10410_v46 = vld [vmem:[#allocation7 + $0xa78] sm:$0xf0] }
 0x599   : > { %16431 = vst [vmem:[#allocation66_spill] sm:$0xff] %v13864_v48  ;;  %v10440_v48 = vld [vmem:[#allocation7 + $0xa98] sm:$0xf] }
 0x59a   : > { %v4912_v17 = vpop.f32.mrf.mxu2  ;;  %v10441_v1 = vor.u32 %v11612_v3, %v10440_v48  ;;  %5187 = vmatpush.bf16.msrb.mxu0 %v10185_v12  ;;  %v11600_v48 = vld [vmem:[#allocation7 + $0xa5c] sm:$0xf] }
 0x59b   : > { %v4961_v2 = vpop.f32.mrf.mxu3  ;;  %v4816_v53 = vpop.f32.mrf.mxu0  ;;  %v10413_v12 = vor.u32 %v11600_v48, %v10410_v46 }
 0x59c   : > { %v4962_v15 = vadd.f32 %v4961_v2, %v4912_v17  ;;  %v4865_v14 = vpop.f32.mrf.mxu1  ;;  %5236 = vmatpush.bf16.msrb.mxu1 %v10441_v1  ;;  %v11536_v1 = vld [vmem:[#allocation7 + $0x85c] sm:$0xf] }
 0x59d   : > { %v4866_v25 = vadd.f32 %v4865_v14, %v4816_v53  ;;  %v16436_v53 = vld [vmem:[#allocation69_spill] sm:$0xff]  ;;  %v16438_v14 = vld [vmem:[#allocation70_spill] sm:$0xff]  ;;  %5335 = vmatpush.bf16.msrb.mxu3 %v10413_v12 }
 0x59e   : > { %v13870_v18 = vadd.f32 %v4962_v15, %v16432_v34 }
 0x59f   : > { %v13873_v57 = vadd.f32 %v4866_v25, %v16434_v62  ;;  %v10154_v62 = vld [vmem:[#allocation7 + $0x878] sm:$0xf0] }
 0x5a0   : > { %16433 = vst [vmem:[#allocation67_spill] sm:$0xff] %v13870_v18  ;;  %v10157_v25 = vor.u32 %v11536_v1, %v10154_v62  ;;  %v11604_v62 = vld [vmem:[#allocation7 + $0xa74] sm:$0xf0] }
 0x5a1   : > { %16435 = vst [vmem:[#allocation68_spill] sm:$0xff] %v13873_v57 }
 0x5a2   : > { %v4914_v31 = vpop.f32.mrf.mxu2  ;;  %5286 = vmatpush.bf16.msrb.mxu2 %v10157_v25 }
 0x5a3   : > { %v4963_v41 = vpop.f32.mrf.mxu3  ;;  %v4819_v6 = vpop.f32.mrf.mxu0 }
 0x5a4   : > { %v4964_v17 = vadd.f32 %v4963_v41, %v4914_v31  ;;  %v4868_v11 = vpop.f32.mrf.mxu1 }
 0x5a5   : > { %v4869_v2 = vadd.f32 %v4868_v11, %v4819_v6  ;;  %v16440_v11 = vld [vmem:[#allocation71_spill] sm:$0xff] }
 0x5a6   : > { %v13876_v15 = vadd.f32 %v4964_v17, %v16436_v53  ;;  %5014 = vmatmul.bf16.gmra.mxu0 %v13591_v8  ;;  %v10152_v53 = vld [vmem:[#allocation7 + $0x858] sm:$0xf] }
 0x5a7   : > { %v13880_v34 = vadd.f32 %v4869_v2, %v16438_v14  ;;  %5063 = vmatmul.bf16.gmra.mxu1 %v13595_v58  ;;  %5112 = vmatmul.bf16.gmra.mxu2 %v13591_v8  ;;  %v11540_v14 = vld [vmem:[#allocation7 + $0x874] sm:$0xf0] }
 0x5a8   : > { %16437 = vst [vmem:[#allocation69_spill] sm:$0xff] %v13876_v15  ;;  %5161 = vmatmul.bf16.gmra.mxu3 %v13595_v58  ;;  %v16442_v15 = vld [vmem:[#allocation72_spill] sm:$0xff]  ;;  %v10153_v1 = vor.u32 %v11540_v14, %v10152_v53  ;;  %v10378_v53 = vld [vmem:[#allocation7 + $0xa38] sm:$0xf0] }
 0x5a9   : > { %16439 = vst [vmem:[#allocation70_spill] sm:$0xff] %v13880_v34  ;;  %v10408_v34 = vld [vmem:[#allocation7 + $0xa58] sm:$0xf] }
 0x5aa   : > { %v4917_v19 = vpop.f32.mrf.mxu2  ;;  %v10409_v18 = vor.u32 %v11604_v62, %v10408_v34  ;;  %5188 = vmatpush.bf16.msrb.mxu0 %v10153_v1  ;;  %v11592_v34 = vld [vmem:[#allocation7 + $0xa1c] sm:$0xf] }
 0x5ab   : > { %v4966_v3 = vpop.f32.mrf.mxu3  ;;  %v4821_v31 = vpop.f32.mrf.mxu0  ;;  %v10381_v1 = vor.u32 %v11592_v34, %v10378_v53 }
 0x5ac   : > { %v4967_v41 = vadd.f32 %v4966_v3, %v4917_v19  ;;  %v4870_v6 = vpop.f32.mrf.mxu1  ;;  %5237 = vmatpush.bf16.msrb.mxu1 %v10409_v18  ;;  %v11528_v18 = vld [vmem:[#allocation7 + $0x81c] sm:$0xf] }
 0x5ad   : > { %v4871_v17 = vadd.f32 %v4870_v6, %v4821_v31  ;;  %v16444_v31 = vld [vmem:[#allocation73_spill] sm:$0xff]  ;;  %v16446_v6 = vld [vmem:[#allocation74_spill] sm:$0xff]  ;;  %5336 = vmatpush.bf16.msrb.mxu3 %v10381_v1 }
 0x5ae   : > { %v13886_v2 = vadd.f32 %v4967_v41, %v16440_v11 }
 0x5af   : > { %v13889_v57 = vadd.f32 %v4871_v17, %v16442_v15  ;;  %v10122_v15 = vld [vmem:[#allocation7 + $0x838] sm:$0xf0] }
 0x5b0   : > { %16441 = vst [vmem:[#allocation71_spill] sm:$0xff] %v13886_v2  ;;  %v10125_v17 = vor.u32 %v11528_v18, %v10122_v15  ;;  %v11596_v15 = vld [vmem:[#allocation7 + $0xa34] sm:$0xf0] }
 0x5b1   : > { %16443 = vst [vmem:[#allocation72_spill] sm:$0xff] %v13889_v57 }
 0x5b2   : > { %v4919_v48 = vpop.f32.mrf.mxu2  ;;  %5287 = vmatpush.bf16.msrb.mxu2 %v10125_v17 }
 0x5b3   : > { %v4968_v25 = vpop.f32.mrf.mxu3  ;;  %v4824_v46 = vpop.f32.mrf.mxu0 }
 0x5b4   : > { %v4969_v19 = vadd.f32 %v4968_v25, %v4919_v48  ;;  %v4873_v12 = vpop.f32.mrf.mxu1 }
 0x5b5   : > { %v4874_v3 = vadd.f32 %v4873_v12, %v4824_v46  ;;  %v16448_v12 = vld [vmem:[#allocation75_spill] sm:$0xff] }
 0x5b6   : > { %v13892_v41 = vadd.f32 %v4969_v19, %v16444_v31  ;;  %5019 = vmatmul.bf16.gmra.mxu0 %v13615_v50  ;;  %v10120_v31 = vld [vmem:[#allocation7 + $0x818] sm:$0xf] }
 0x5b7   : > { %v13896_v11 = vadd.f32 %v4874_v3, %v16446_v6  ;;  %5068 = vmatmul.bf16.gmra.mxu1 %v13619_v30  ;;  %5117 = vmatmul.bf16.gmra.mxu2 %v13615_v50  ;;  %v11532_v6 = vld [vmem:[#allocation7 + $0x834] sm:$0xf0] }
 0x5b8   : > { %16445 = vst [vmem:[#allocation73_spill] sm:$0xff] %v13892_v41  ;;  %5166 = vmatmul.bf16.gmra.mxu3 %v13619_v30  ;;  %v16449_v41 = vld [vmem:[#allocation76_spill] sm:$0xff]  ;;  %v10121_v18 = vor.u32 %v11532_v6, %v10120_v31  ;;  %v11090_v31 = vld [vmem:[#allocation7 + $0xfe0] sm:$0xf0] }
 0x5b9   : > { %16447 = vst [vmem:[#allocation74_spill] sm:$0xff] %v13896_v11  ;;  %v10376_v11 = vld [vmem:[#allocation7 + $0xa18] sm:$0xf] }
 0x5ba   : > { %v4922_v14 = vpop.f32.mrf.mxu2  ;;  %v10377_v2 = vor.u32 %v11596_v15, %v10376_v11  ;;  %5189 = vmatpush.bf16.msrb.mxu0 %v10121_v18  ;;  %v11773_v11 = vld [vmem:[#allocation7 + $0xfc4] sm:$0xf] }
 0x5bb   : > { %v4971_v62 = vpop.f32.mrf.mxu3  ;;  %v4826_v48 = vpop.f32.mrf.mxu0  ;;  %v11093_v18 = vor.u32 %v11773_v11, %v11090_v31 }
 0x5bc   : > { %v4972_v25 = vadd.f32 %v4971_v62, %v4922_v14  ;;  %v4875_v46 = vpop.f32.mrf.mxu1  ;;  %5238 = vmatpush.bf16.msrb.mxu1 %v10377_v2  ;;  %v11709_v2 = vld [vmem:[#allocation7 + $0xdc4] sm:$0xf] }
 0x5bd   : > { %v4876_v19 = vadd.f32 %v4875_v46, %v4826_v48  ;;  %v16450_v48 = vld [vmem:[#allocation77_spill] sm:$0xff]  ;;  %v16452_v46 = vld [vmem:[#allocation78_spill] sm:$0xff]  ;;  %6512 = vmatpush.bf16.msra.mxu3 %v11093_v18 }
 0x5be   : > { %v13902_v3 = vadd.f32 %v4972_v25, %v16448_v12 }
 0x5bf   : > { %v13905_v57 = vadd.f32 %v4876_v19, %v16449_v41  ;;  %v10834_v41 = vld [vmem:[#allocation7 + $0xde0] sm:$0xf0] }
 0x5c0   : > { %v10837_v19 = vor.u32 %v11709_v2, %v10834_v41  ;;  %v11777_v41 = vld [vmem:[#allocation7 + $0xfdc] sm:$0xf0] }
 0x5c2   : > { %v4924_v34 = vpop.f32.mrf.mxu2  ;;  %6463 = vmatpush.bf16.msra.mxu2 %v10837_v19 }
 0x5c3   : > { %v4973_v17 = vpop.f32.mrf.mxu3  ;;  %v4829_v53 = vpop.f32.mrf.mxu0 }
 0x5c4   : > { %v4974_v14 = vadd.f32 %v4973_v17, %v4924_v34  ;;  %v4878_v1 = vpop.f32.mrf.mxu1 }
 0x5c5   : > { %v4879_v62 = vadd.f32 %v4878_v1, %v4829_v53 }
 0x5c6   : > { %v13908_v25 = vadd.f32 %v4974_v14, %v16450_v48  ;;  %5024 = vmatmul.bf16.gmra.mxu0 %v13639_v22  ;;  %v11713_v48 = vld [vmem:[#allocation7 + $0xddc] sm:$0xf0] }
 0x5c7   : > { %v13912_v12 = vadd.f32 %v4879_v62, %v16452_v46  ;;  %5073 = vmatmul.bf16.gmra.mxu1 %v13643_v16  ;;  %5122 = vmatmul.bf16.gmra.mxu2 %v13639_v22  ;;  %v10832_v62 = vld [vmem:[#allocation7 + $0xdc0] sm:$0xf] }
 0x5c8   : > { %16451 = vst [vmem:[#allocation75_spill] sm:$0xff] %v13908_v25  ;;  %5171 = vmatmul.bf16.gmra.mxu3 %v13643_v16  ;;  %v11088_v46 = vld [vmem:[#allocation7 + $0xfc0] sm:$0xf]  ;;  %v10833_v2 = vor.u32 %v11713_v48, %v10832_v62  ;;  %v11058_v48 = vld [vmem:[#allocation7 + $0xfa0] sm:$0xf0] }
 0x5c9   : > { %16453 = vst [vmem:[#allocation76_spill] sm:$0xff] %v13912_v12  ;;  %v11089_v25 = vor.u32 %v11777_v41, %v11088_v46 }
 0x5ca   : > { %v4927_v6 = vpop.f32.mrf.mxu2  ;;  %6365 = vmatpush.bf16.msra.mxu0 %v10833_v2 }
 0x5cb   : > { %v4976_v15 = vpop.f32.mrf.mxu3  ;;  %v4831_v34 = vpop.f32.mrf.mxu0  ;;  %6414 = vmatpush.bf16.msra.mxu1 %v11089_v25  ;;  %v10802_v25 = vld [vmem:[#allocation7 + $0xda0] sm:$0xf0] }
 0x5cc   : > { %v4977_v17 = vadd.f32 %v4976_v15, %v4927_v6  ;;  %v4880_v53 = vpop.f32.mrf.mxu1 }
 0x5cd   : > { %v4881_v14 = vadd.f32 %v4880_v53, %v4831_v34  ;;  %v16454_v34 = vld [vmem:[#allocation79_spill] sm:$0xff] }
 0x5ce   : > { %v13918_v1 = vadd.f32 %v4977_v17, %v13341_v26  ;;  %v16456_v17 = vld [vmem:[#allocation80_spill] sm:$0xff] }
 0x5cf   : > { %v13921_v12 = vadd.f32 %v4881_v14, %v13343_v0  ;;  %v11701_v0 = vld [vmem:[#allocation7 + $0xd84] sm:$0xf] }
 0x5d0   : > { %v11765_v14 = vld [vmem:[#allocation7 + $0xf84] sm:$0xf]  ;;  %v10805_v62 = vor.u32 %v11701_v0, %v10802_v25  ;;  %v11769_v25 = vld [vmem:[#allocation7 + $0xf9c] sm:$0xf0] }
 0x5d1   : > { %v11061_v2 = vor.u32 %v11765_v14, %v11058_v48 }
 0x5d2   : > { %v4929_v11 = vpop.f32.mrf.mxu2  ;;  %6464 = vmatpush.bf16.msra.mxu2 %v10805_v62 }
 0x5d3   : > { %v4978_v19 = vpop.f32.mrf.mxu3  ;;  %v4834_v31 = vpop.f32.mrf.mxu0  ;;  %6513 = vmatpush.bf16.msra.mxu3 %v11061_v2 }
 0x5d4   : > { %v4979_v6 = vadd.f32 %v4978_v19, %v4929_v11  ;;  %v4883_v18 = vpop.f32.mrf.mxu1 }
 0x5d5   : > { %v4884_v15 = vadd.f32 %v4883_v18, %v4834_v31 }
 0x5d6   : > { %v13924_v26 = vadd.f32 %v4979_v6, %v16454_v34  ;;  %5029 = vmatmul.bf16.gmra.mxu0 %v13663_v4  ;;  %v11705_v34 = vld [vmem:[#allocation7 + $0xd9c] sm:$0xf0] }
 0x5d7   : > { %v13928_v53 = vadd.f32 %v4884_v15, %v16456_v17  ;;  %5078 = vmatmul.bf16.gmra.mxu1 %v13667_v55  ;;  %5127 = vmatmul.bf16.gmra.mxu2 %v13663_v4  ;;  %v10800_v15 = vld [vmem:[#allocation7 + $0xd80] sm:$0xf] }
 0x5d8   : > { %16455 = vst [vmem:[#allocation77_spill] sm:$0xff] %v13924_v26  ;;  %5176 = vmatmul.bf16.gmra.mxu3 %v13667_v55  ;;  %v11056_v17 = vld [vmem:[#allocation7 + $0xf80] sm:$0xf]  ;;  %v10801_v0 = vor.u32 %v11705_v34, %v10800_v15  ;;  %v11026_v34 = vld [vmem:[#allocation7 + $0xf60] sm:$0xf0] }
 0x5d9   : > { %16457 = vst [vmem:[#allocation78_spill] sm:$0xff] %v13928_v53  ;;  %v11057_v26 = vor.u32 %v11769_v25, %v11056_v17 }
 0x5da   : > { %v4932_v46 = vpop.f32.mrf.mxu2  ;;  %6366 = vmatpush.bf16.msra.mxu0 %v10801_v0 }
 0x5db   : > { %v4981_v41 = vpop.f32.mrf.mxu3  ;;  %v4836_v11 = vpop.f32.mrf.mxu0  ;;  %6415 = vmatpush.bf16.msra.mxu1 %v11057_v26  ;;  %v10770_v26 = vld [vmem:[#allocation7 + $0xd60] sm:$0xf0] }
 0x5dc   : > { %v4982_v19 = vadd.f32 %v4981_v41, %v4932_v46  ;;  %v4885_v31 = vpop.f32.mrf.mxu1 }
 0x5dd   : > { %v4886_v6 = vadd.f32 %v4885_v31, %v4836_v11  ;;  %v16458_v11 = vld [vmem:[#allocation81_spill] sm:$0xff] }
 0x5de   : > { %v13934_v18 = vadd.f32 %v4982_v19, %v13357_v43  ;;  %v16459_v19 = vld [vmem:[#allocation82_spill] sm:$0xff] }
 0x5df   : > { %v13937_v53 = vadd.f32 %v4886_v6, %v13359_v36  ;;  %v11693_v36 = vld [vmem:[#allocation7 + $0xd44] sm:$0xf] }
 0x5e0   : > { %v11757_v6 = vld [vmem:[#allocation7 + $0xf44] sm:$0xf]  ;;  %v10773_v15 = vor.u32 %v11693_v36, %v10770_v26  ;;  %v11761_v36 = vld [vmem:[#allocation7 + $0xf5c] sm:$0xf0] }
 0x5e1   : > { %v11029_v0 = vor.u32 %v11757_v6, %v11026_v34 }
 0x5e2   : > { %v4934_v14 = vpop.f32.mrf.mxu2  ;;  %6465 = vmatpush.bf16.msra.mxu2 %v10773_v15 }
 0x5e3   : > { %v4983_v62 = vpop.f32.mrf.mxu3  ;;  %v4995_v48 = vpop.f32.mrf.mxu0  ;;  %6514 = vmatpush.bf16.msra.mxu3 %v11029_v0 }
 0x5e4   : > { %v4984_v46 = vadd.f32 %v4983_v62, %v4934_v14  ;;  %v5044_v2 = vpop.f32.mrf.mxu1 }
 0x5e5   : > { %v5045_v41 = vadd.f32 %v5044_v2, %v4995_v48 }
 0x5e6   : > { %v13940_v43 = vadd.f32 %v4984_v46, %v16458_v11  ;;  %5190 = vmatmul.bf16.vlgmr.msrb.gmra.mxu0 %v13495_v9 }
 0x5e7   : > { %v13944_v31 = vadd.f32 %v5045_v41, %v16459_v19  ;;  %5239 = vmatmul.bf16.vlgmr.msrb.gmra.mxu1 %v13499_v35  ;;  %5288 = vmatmul.bf16.vlgmr.msrb.gmra.mxu2 %v13495_v9  ;;  %v10768_v9 = vld [vmem:[#allocation7 + $0xd40] sm:$0xf] }
 0x5e8   : > { %5337 = vmatmul.bf16.vlgmr.msrb.gmra.mxu3 %v13499_v35  ;;  %v11697_v41 = vld [vmem:[#allocation7 + $0xd5c] sm:$0xf0] }
 0x5e9   : > { %v11024_v35 = vld [vmem:[#allocation7 + $0xf40] sm:$0xf]  ;;  %v10769_v19 = vor.u32 %v11697_v41, %v10768_v9  ;;  %v11749_v9 = vld [vmem:[#allocation7 + $0xf04] sm:$0xf] }
 0x5ea   : > { %v5093_v17 = vpop.f32.mrf.mxu2  ;;  %v11025_v26 = vor.u32 %v11761_v36, %v11024_v35  ;;  %v10994_v35 = vld [vmem:[#allocation7 + $0xf20] sm:$0xf0] }
 0x5eb   : > { %v5142_v25 = vpop.f32.mrf.mxu3  ;;  %v4997_v14 = vpop.f32.mrf.mxu0  ;;  %6367 = vmatpush.bf16.msra.mxu0 %v10769_v19  ;;  %v10997_v36 = vor.u32 %v11749_v9, %v10994_v35 }
 0x5ec   : > { %v5143_v62 = vadd.f32 %v5142_v25, %v5093_v17  ;;  %v5046_v48 = vpop.f32.mrf.mxu1  ;;  %6416 = vmatpush.bf16.msra.mxu1 %v11025_v26 }
 0x5ed   : > { %v5047_v46 = vadd.f32 %v5046_v48, %v4997_v14  ;;  %v16460_v14 = vld [vmem:[#allocation83_spill] sm:$0xff]  ;;  %6515 = vmatpush.bf16.msra.mxu3 %v10997_v36 }
 0x5ee   : > { %v13950_v2 = vadd.f32 %v5143_v62, %v13373_v13  ;;  %v16462_v62 = vld [vmem:[#allocation84_spill] sm:$0xff] }
 0x5ef   : > { %v13953_v11 = vadd.f32 %v5047_v46, %v13375_v33  ;;  %v11685_v33 = vld [vmem:[#allocation7 + $0xd04] sm:$0xf] }
 0x5f0   : > { %v10738_v46 = vld [vmem:[#allocation7 + $0xd20] sm:$0xf0] }
 0x5f1   : > { %v10741_v41 = vor.u32 %v11685_v33, %v10738_v46  ;;  %v11753_v33 = vld [vmem:[#allocation7 + $0xf1c] sm:$0xf0] }
 0x5f2   : > { %v5095_v6 = vpop.f32.mrf.mxu2 }
 0x5f3   : > { %v5144_v15 = vpop.f32.mrf.mxu3  ;;  %v5000_v34 = vpop.f32.mrf.mxu0  ;;  %6466 = vmatpush.bf16.msra.mxu2 %v10741_v41 }
 0x5f4   : > { %v5145_v17 = vadd.f32 %v5144_v15, %v5095_v6  ;;  %v5049_v0 = vpop.f32.mrf.mxu1 }
 0x5f5   : > { %v5050_v25 = vadd.f32 %v5049_v0, %v5000_v34 }
 0x5f6   : > { %v13956_v13 = vadd.f32 %v5145_v17, %v16460_v14  ;;  %5195 = vmatmul.bf16.gmra.mxu0 %v13519_v59 }
 0x5f7   : > { %v13960_v48 = vadd.f32 %v5050_v25, %v16462_v62  ;;  %5244 = vmatmul.bf16.gmra.mxu1 %v13523_v38  ;;  %5293 = vmatmul.bf16.gmra.mxu2 %v13519_v59  ;;  %v10736_v59 = vld [vmem:[#allocation7 + $0xd00] sm:$0xf] }
 0x5f8   : > { %16461 = vst [vmem:[#allocation79_spill] sm:$0xff] %v13956_v13  ;;  %5342 = vmatmul.bf16.gmra.mxu3 %v13523_v38  ;;  %v11689_v25 = vld [vmem:[#allocation7 + $0xd1c] sm:$0xf0] }
 0x5f9   : > { %16463 = vst [vmem:[#allocation80_spill] sm:$0xff] %v13960_v48  ;;  %v10992_v38 = vld [vmem:[#allocation7 + $0xf00] sm:$0xf]  ;;  %v10737_v62 = vor.u32 %v11689_v25, %v10736_v59  ;;  %v11741_v59 = vld [vmem:[#allocation7 + $0xec4] sm:$0xf] }
 0x5fa   : > { %v5098_v19 = vpop.f32.mrf.mxu2  ;;  %v10993_v46 = vor.u32 %v11753_v33, %v10992_v38  ;;  %v10962_v38 = vld [vmem:[#allocation7 + $0xee0] sm:$0xf0] }
 0x5fb   : > { %v5147_v26 = vpop.f32.mrf.mxu3  ;;  %v5002_v6 = vpop.f32.mrf.mxu0  ;;  %6368 = vmatpush.bf16.msra.mxu0 %v10737_v62  ;;  %v10965_v33 = vor.u32 %v11741_v59, %v10962_v38 }
 0x5fc   : > { %v5148_v15 = vadd.f32 %v5147_v26, %v5098_v19  ;;  %v5051_v34 = vpop.f32.mrf.mxu1  ;;  %6417 = vmatpush.bf16.msra.mxu1 %v10993_v46 }
 0x5fd   : > { %v5052_v17 = vadd.f32 %v5051_v34, %v5002_v6  ;;  %v16466_v6 = vld [vmem:[#allocation85_spill] sm:$0xff]  ;;  %6516 = vmatpush.bf16.msra.mxu3 %v10965_v33 }
 0x5fe   : > { %v13966_v0 = vadd.f32 %v5148_v15, %v13389_v44  ;;  %v16468_v15 = vld [vmem:[#allocation86_spill] sm:$0xff] }
 0x5ff   : > { %v13969_v14 = vadd.f32 %v5052_v17, %v13391_v37  ;;  %v11677_v37 = vld [vmem:[#allocation7 + $0xcc4] sm:$0xf] }
 0x600   : > { %16464 = vst [vmem:[#allocation81_spill] sm:$0xff] %v13966_v0  ;;  %v10706_v17 = vld [vmem:[#allocation7 + $0xce0] sm:$0xf0] }
 0x601   : > { %16465 = vst [vmem:[#allocation82_spill] sm:$0xff] %v13969_v14  ;;  %v10709_v25 = vor.u32 %v11677_v37, %v10706_v17  ;;  %v11745_v37 = vld [vmem:[#allocation7 + $0xedc] sm:$0xf0] }
 0x602   : > { %v5100_v9 = vpop.f32.mrf.mxu2 }
 0x603   : > { %v5149_v41 = vpop.f32.mrf.mxu3  ;;  %v5005_v35 = vpop.f32.mrf.mxu0  ;;  %6467 = vmatpush.bf16.msra.mxu2 %v10709_v25 }
 0x604   : > { %v5150_v19 = vadd.f32 %v5149_v41, %v5100_v9  ;;  %v5054_v36 = vpop.f32.mrf.mxu1 }
 0x605   : > { %v5055_v26 = vadd.f32 %v5054_v36, %v5005_v35 }
 0x606   : > { %v13972_v44 = vadd.f32 %v5150_v19, %v16466_v6  ;;  %5200 = vmatmul.bf16.gmra.mxu0 %v13543_v32 }
 0x607   : > { %v13976_v34 = vadd.f32 %v5055_v26, %v16468_v15  ;;  %5249 = vmatmul.bf16.gmra.mxu1 %v13547_v24  ;;  %5298 = vmatmul.bf16.gmra.mxu2 %v13543_v32  ;;  %v10704_v32 = vld [vmem:[#allocation7 + $0xcc0] sm:$0xf] }
 0x608   : > { %16467 = vst [vmem:[#allocation83_spill] sm:$0xff] %v13972_v44  ;;  %5347 = vmatmul.bf16.gmra.mxu3 %v13547_v24  ;;  %v11681_v26 = vld [vmem:[#allocation7 + $0xcdc] sm:$0xf0] }
 0x609   : > { %16469 = vst [vmem:[#allocation84_spill] sm:$0xff] %v13976_v34  ;;  %v10960_v24 = vld [vmem:[#allocation7 + $0xec0] sm:$0xf]  ;;  %v10705_v15 = vor.u32 %v11681_v26, %v10704_v32  ;;  %v11733_v32 = vld [vmem:[#allocation7 + $0xe84] sm:$0xf]  ;;  %v16600_v34 = vld [vmem:[#allocation124_spill] sm:$0xff] }
 0x60a   : > { %v5103_v62 = vpop.f32.mrf.mxu2  ;;  %v10961_v17 = vor.u32 %v11745_v37, %v10960_v24  ;;  %v10930_v24 = vld [vmem:[#allocation7 + $0xea0] sm:$0xf0] }
 0x60b   : > { %v5152_v46 = vpop.f32.mrf.mxu3  ;;  %v5007_v9 = vpop.f32.mrf.mxu0  ;;  %6369 = vmatpush.bf16.msra.mxu0 %v10705_v15  ;;  %v10933_v37 = vor.u32 %v11733_v32, %v10930_v24 }
 0x60c   : > { %v5153_v41 = vadd.f32 %v5152_v46, %v5103_v62  ;;  %v5056_v35 = vpop.f32.mrf.mxu1  ;;  %6418 = vmatpush.bf16.msra.mxu1 %v10961_v17 }
 0x60d   : > { %v5057_v19 = vadd.f32 %v5056_v35, %v5007_v9  ;;  %v16472_v9 = vld [vmem:[#allocation87_spill] sm:$0xff]  ;;  %6517 = vmatpush.bf16.msra.mxu3 %v10933_v37 }
 0x60e   : > { %v13982_v36 = vadd.f32 %v5153_v41, %v13405_v10  ;;  %v16474_v41 = vld [vmem:[#allocation88_spill] sm:$0xff] }
 0x60f   : > { %v13985_v6 = vadd.f32 %v5057_v19, %v13407_v51  ;;  %v11669_v51 = vld [vmem:[#allocation7 + $0xc84] sm:$0xf] }
 0x610   : > { %16470 = vst [vmem:[#allocation85_spill] sm:$0xff] %v13982_v36  ;;  %v10674_v19 = vld [vmem:[#allocation7 + $0xca0] sm:$0xf0] }
 0x611   : > { %16471 = vst [vmem:[#allocation86_spill] sm:$0xff] %v13985_v6  ;;  %v10677_v26 = vor.u32 %v11669_v51, %v10674_v19  ;;  %v11737_v51 = vld [vmem:[#allocation7 + $0xe9c] sm:$0xf0]  ;;  %v16586_v6 = vld [vmem:[#allocation120_spill] sm:$0xff] }
 0x612   : > { %v5105_v59 = vpop.f32.mrf.mxu2 }
 0x613   : > { %v5154_v25 = vpop.f32.mrf.mxu3  ;;  %v5010_v38 = vpop.f32.mrf.mxu0  ;;  %6468 = vmatpush.bf16.msra.mxu2 %v10677_v26 }
 0x614   : > { %v5155_v62 = vadd.f32 %v5154_v25, %v5105_v59  ;;  %v5059_v33 = vpop.f32.mrf.mxu1 }
 0x615   : > { %v5060_v46 = vadd.f32 %v5059_v33, %v5010_v38 }
 0x616   : > { %v13988_v10 = vadd.f32 %v5155_v62, %v16472_v9  ;;  %5205 = vmatmul.bf16.gmra.mxu0 %v13567_v49 }
 0x617   : > { %v13992_v35 = vadd.f32 %v5060_v46, %v16474_v41  ;;  %5254 = vmatmul.bf16.gmra.mxu1 %v13571_v20  ;;  %5303 = vmatmul.bf16.gmra.mxu2 %v13567_v49  ;;  %v10672_v49 = vld [vmem:[#allocation7 + $0xc80] sm:$0xf] }
 0x618   : > { %16473 = vst [vmem:[#allocation87_spill] sm:$0xff] %v13988_v10  ;;  %5352 = vmatmul.bf16.gmra.mxu3 %v13571_v20  ;;  %v11673_v46 = vld [vmem:[#allocation7 + $0xc9c] sm:$0xf0] }
 0x619   : > { %16475 = vst [vmem:[#allocation88_spill] sm:$0xff] %v13992_v35  ;;  %v10928_v20 = vld [vmem:[#allocation7 + $0xe80] sm:$0xf]  ;;  %v10673_v41 = vor.u32 %v11673_v46, %v10672_v49  ;;  %v11725_v49 = vld [vmem:[#allocation7 + $0xe44] sm:$0xf]  ;;  %v16572_v35 = vld [vmem:[#allocation116_spill] sm:$0xff] }
 0x61a   : > { %v5108_v15 = vpop.f32.mrf.mxu2  ;;  %v10929_v19 = vor.u32 %v11737_v51, %v10928_v20  ;;  %v10898_v20 = vld [vmem:[#allocation7 + $0xe60] sm:$0xf0] }
 0x61b   : > { %v5157_v17 = vpop.f32.mrf.mxu3  ;;  %v5012_v59 = vpop.f32.mrf.mxu0  ;;  %6370 = vmatpush.bf16.msra.mxu0 %v10673_v41  ;;  %v10901_v51 = vor.u32 %v11725_v49, %v10898_v20 }
 0x61c   : > { %v5158_v25 = vadd.f32 %v5157_v17, %v5108_v15  ;;  %v5061_v38 = vpop.f32.mrf.mxu1  ;;  %6419 = vmatpush.bf16.msra.mxu1 %v10929_v19 }
 0x61d   : > { %v5062_v62 = vadd.f32 %v5061_v38, %v5012_v59  ;;  %v16478_v59 = vld [vmem:[#allocation89_spill] sm:$0xff]  ;;  %6518 = vmatpush.bf16.msra.mxu3 %v10901_v51 }
 0x61e   : > { %v13998_v33 = vadd.f32 %v5158_v25, %v13421_v54  ;;  %v16480_v25 = vld [vmem:[#allocation90_spill] sm:$0xff] }
 0x61f   : > { %v14001_v9 = vadd.f32 %v5062_v62, %v13423_v7  ;;  %v11661_v7 = vld [vmem:[#allocation7 + $0xc44] sm:$0xf] }
 0x620   : > { %16476 = vst [vmem:[#allocation136_spill] sm:$0xff] %v13998_v33  ;;  %v10642_v62 = vld [vmem:[#allocation7 + $0xc60] sm:$0xf0] }
 0x621   : > { %16477 = vst [vmem:[#allocation137_spill] sm:$0xff] %v14001_v9  ;;  %v10645_v46 = vor.u32 %v11661_v7, %v10642_v62  ;;  %v11729_v7 = vld [vmem:[#allocation7 + $0xe5c] sm:$0xf0]  ;;  %v16558_v9 = vld [vmem:[#allocation112_spill] sm:$0xff] }
 0x622   : > { %v5110_v32 = vpop.f32.mrf.mxu2 }
 0x623   : > { %v5159_v26 = vpop.f32.mrf.mxu3  ;;  %v5015_v24 = vpop.f32.mrf.mxu0  ;;  %6469 = vmatpush.bf16.msra.mxu2 %v10645_v46 }
 0x624   : > { %v5160_v15 = vadd.f32 %v5159_v26, %v5110_v32  ;;  %v5064_v37 = vpop.f32.mrf.mxu1 }
 0x625   : > { %v5065_v17 = vadd.f32 %v5064_v37, %v5015_v24 }
 0x626   : > { %v14004_v54 = vadd.f32 %v5160_v15, %v16478_v59  ;;  %5210 = vmatmul.bf16.gmra.mxu0 %v13591_v8 }
 0x627   : > { %v14008_v38 = vadd.f32 %v5065_v17, %v16480_v25  ;;  %5259 = vmatmul.bf16.gmra.mxu1 %v13595_v58  ;;  %5308 = vmatmul.bf16.gmra.mxu2 %v13591_v8  ;;  %v10640_v8 = vld [vmem:[#allocation7 + $0xc40] sm:$0xf] }
 0x628   : > { %16479 = vst [vmem:[#allocation89_spill] sm:$0xff] %v14004_v54  ;;  %5357 = vmatmul.bf16.gmra.mxu3 %v13595_v58  ;;  %v11665_v17 = vld [vmem:[#allocation7 + $0xc5c] sm:$0xf0] }
 0x629   : > { %16481 = vst [vmem:[#allocation90_spill] sm:$0xff] %v14008_v38  ;;  %v10896_v58 = vld [vmem:[#allocation7 + $0xe40] sm:$0xf]  ;;  %v10641_v25 = vor.u32 %v11665_v17, %v10640_v8  ;;  %v11717_v8 = vld [vmem:[#allocation7 + $0xe04] sm:$0xf]  ;;  %v16544_v38 = vld [vmem:[#allocation108_spill] sm:$0xff] }
 0x62a   : > { %v5113_v41 = vpop.f32.mrf.mxu2  ;;  %v10897_v62 = vor.u32 %v11729_v7, %v10896_v58  ;;  %v10866_v58 = vld [vmem:[#allocation7 + $0xe20] sm:$0xf0] }
 0x62b   : > { %v5162_v19 = vpop.f32.mrf.mxu3  ;;  %v5017_v32 = vpop.f32.mrf.mxu0  ;;  %6371 = vmatpush.bf16.msra.mxu0 %v10641_v25  ;;  %v10869_v7 = vor.u32 %v11717_v8, %v10866_v58 }
 0x62c   : > { %v5163_v26 = vadd.f32 %v5162_v19, %v5113_v41  ;;  %v5066_v24 = vpop.f32.mrf.mxu1  ;;  %6420 = vmatpush.bf16.msra.mxu1 %v10897_v62 }
 0x62d   : > { %v5067_v15 = vadd.f32 %v5066_v24, %v5017_v32  ;;  %v16484_v32 = vld [vmem:[#allocation91_spill] sm:$0xff]  ;;  %6519 = vmatpush.bf16.msra.mxu3 %v10869_v7 }
 0x62e   : > { %v14014_v37 = vadd.f32 %v5163_v26, %v13437_v52  ;;  %v16486_v26 = vld [vmem:[#allocation92_spill] sm:$0xff] }
 0x62f   : > { %v14017_v59 = vadd.f32 %v5067_v15, %v13439_v56  ;;  %v11653_v56 = vld [vmem:[#allocation7 + $0xc04] sm:$0xf] }
 0x630   : > { %16482 = vst [vmem:[#allocation138_spill] sm:$0xff] %v14014_v37  ;;  %v10610_v15 = vld [vmem:[#allocation7 + $0xc20] sm:$0xf0] }
 0x631   : > { %16483 = vst [vmem:[#allocation139_spill] sm:$0xff] %v14017_v59  ;;  %v10613_v17 = vor.u32 %v11653_v56, %v10610_v15  ;;  %v11721_v56 = vld [vmem:[#allocation7 + $0xe1c] sm:$0xf0]  ;;  %v11770_v59 = vld [vmem:[#allocation7 + $0xfa4] sm:$0xf0] }
 0x632   : > { %v5115_v49 = vpop.f32.mrf.mxu2 }
 0x633   : > { %v5164_v46 = vpop.f32.mrf.mxu3  ;;  %v5020_v20 = vpop.f32.mrf.mxu0  ;;  %6470 = vmatpush.bf16.msra.mxu2 %v10613_v17 }
 0x634   : > { %v5165_v41 = vadd.f32 %v5164_v46, %v5115_v49  ;;  %v5069_v51 = vpop.f32.mrf.mxu1 }
 0x635   : > { %v5070_v19 = vadd.f32 %v5069_v51, %v5020_v20 }
 0x636   : > { %v14020_v52 = vadd.f32 %v5165_v41, %v16484_v32  ;;  %5215 = vmatmul.bf16.gmra.mxu0 %v13615_v50 }
 0x637   : > { %v14024_v24 = vadd.f32 %v5070_v19, %v16486_v26  ;;  %5264 = vmatmul.bf16.gmra.mxu1 %v13619_v30  ;;  %5313 = vmatmul.bf16.gmra.mxu2 %v13615_v50  ;;  %v10608_v50 = vld [vmem:[#allocation7 + $0xc00] sm:$0xf] }
 0x638   : > { %16485 = vst [vmem:[#allocation91_spill] sm:$0xff] %v14020_v52  ;;  %5362 = vmatmul.bf16.gmra.mxu3 %v13619_v30  ;;  %v11657_v19 = vld [vmem:[#allocation7 + $0xc1c] sm:$0xf0]  ;;  %v11706_v52 = vld [vmem:[#allocation7 + $0xda4] sm:$0xf0] }
 0x639   : > { %16487 = vst [vmem:[#allocation92_spill] sm:$0xff] %v14024_v24  ;;  %v10864_v30 = vld [vmem:[#allocation7 + $0xe00] sm:$0xf]  ;;  %v10609_v26 = vor.u32 %v11657_v19, %v10608_v50  ;;  %v11774_v50 = vld [vmem:[#allocation7 + $0xfcc] sm:$0xf] }
 0x63a   : > { %v5118_v25 = vpop.f32.mrf.mxu2  ;;  %v10865_v15 = vor.u32 %v11721_v56, %v10864_v30  ;;  %v11098_v30 = vld [vmem:[#allocation7 + $0xfe8] sm:$0xf0] }
 0x63b   : > { %v5167_v62 = vpop.f32.mrf.mxu3  ;;  %v5022_v49 = vpop.f32.mrf.mxu0  ;;  %6372 = vmatpush.bf16.msra.mxu0 %v10609_v26  ;;  %v11101_v56 = vor.u32 %v11774_v50, %v11098_v30  ;;  %v16514_v24 = vld [vmem:[#allocation99_spill] sm:$0xff] }
 0x63c   : > { %v5168_v46 = vadd.f32 %v5167_v62, %v5118_v25  ;;  %v5071_v20 = vpop.f32.mrf.mxu1  ;;  %6421 = vmatpush.bf16.msra.mxu1 %v10865_v15 }
 0x63d   : > { %v5072_v41 = vadd.f32 %v5071_v20, %v5022_v49  ;;  %v16490_v49 = vld [vmem:[#allocation93_spill] sm:$0xff]  ;;  %6708 = vmatpush.bf16.msrb.mxu3 %v11101_v56 }
 0x63e   : > { %v14030_v51 = vadd.f32 %v5168_v46, %v13453_v28  ;;  %v16492_v46 = vld [vmem:[#allocation94_spill] sm:$0xff] }
 0x63f   : > { %v14033_v32 = vadd.f32 %v5072_v41, %v13455_v23  ;;  %v11710_v23 = vld [vmem:[#allocation7 + $0xdcc] sm:$0xf] }
 0x640   : > { %16488 = vst [vmem:[#allocation140_spill] sm:$0xff] %v14030_v51  ;;  %v10842_v41 = vld [vmem:[#allocation7 + $0xde8] sm:$0xf0] }
 0x641   : > { %16489 = vst [vmem:[#allocation141_spill] sm:$0xff] %v14033_v32  ;;  %v10845_v19 = vor.u32 %v11710_v23, %v10842_v41  ;;  %v11778_v41 = vld [vmem:[#allocation7 + $0xfe4] sm:$0xf0] }
 0x642   : > { %v5120_v8 = vpop.f32.mrf.mxu2 }
 0x643   : > { %v5169_v17 = vpop.f32.mrf.mxu3  ;;  %v5025_v58 = vpop.f32.mrf.mxu0  ;;  %6659 = vmatpush.bf16.msrb.mxu2 %v10845_v19 }
 0x644   : > { %v5170_v25 = vadd.f32 %v5169_v17, %v5120_v8  ;;  %v5074_v7 = vpop.f32.mrf.mxu1 }
 0x645   : > { %v5075_v62 = vadd.f32 %v5074_v7, %v5025_v58  ;;  %v16494_v7 = vld [vmem:[#allocation95_spill] sm:$0xff] }
 0x646   : > { %v14036_v28 = vadd.f32 %v5170_v25, %v16490_v49  ;;  %5220 = vmatmul.bf16.gmra.mxu0 %v13639_v22  ;;  %v11714_v49 = vld [vmem:[#allocation7 + $0xde4] sm:$0xf0] }
 0x647   : > { %v14040_v20 = vadd.f32 %v5075_v62, %v16492_v46  ;;  %5269 = vmatmul.bf16.gmra.mxu1 %v13643_v16  ;;  %5318 = vmatmul.bf16.gmra.mxu2 %v13639_v22  ;;  %v10840_v22 = vld [vmem:[#allocation7 + $0xdc8] sm:$0xf]  ;;  %v16496_v46 = vld [vmem:[#allocation96_spill] sm:$0xff] }
 0x648   : > { %16491 = vst [vmem:[#allocation93_spill] sm:$0xff] %v14036_v28  ;;  %5367 = vmatmul.bf16.gmra.mxu3 %v13643_v16  ;;  %v11096_v16 = vld [vmem:[#allocation7 + $0xfc8] sm:$0xf]  ;;  %v10841_v23 = vor.u32 %v11714_v49, %v10840_v22  ;;  %v11766_v22 = vld [vmem:[#allocation7 + $0xf8c] sm:$0xf] }
 0x649   : > { %16493 = vst [vmem:[#allocation94_spill] sm:$0xff] %v14040_v20  ;;  %v11097_v28 = vor.u32 %v11778_v41, %v11096_v16  ;;  %v11066_v16 = vld [vmem:[#allocation7 + $0xfa8] sm:$0xf0] }
 0x64a   : > { %v5123_v26 = vpop.f32.mrf.mxu2  ;;  %6561 = vmatpush.bf16.msrb.mxu0 %v10841_v23  ;;  %v16502_v23 = vld [vmem:[#allocation18_spill] sm:$0xff] }
 0x64b   : > { %v5172_v15 = vpop.f32.mrf.mxu3  ;;  %v5027_v8 = vpop.f32.mrf.mxu0  ;;  %6610 = vmatpush.bf16.msrb.mxu1 %v11097_v28  ;;  %v11702_v28 = vld [vmem:[#allocation7 + $0xd8c] sm:$0xf]  ;;  %v16503_v41 = vshrl.u32 %v16502_v23, 16 }
 0x64c   : > { %v5173_v17 = vadd.f32 %v5172_v15, %v5123_v26  ;;  %v5076_v58 = vpop.f32.mrf.mxu1 }
 0x64d   : > { %v5077_v25 = vadd.f32 %v5076_v58, %v5027_v8  ;;  %v16498_v8 = vld [vmem:[#allocation97_spill] sm:$0xff]  ;;  %v16500_v58 = vld [vmem:[#allocation98_spill] sm:$0xff] }
 0x64e   : > { %v14046_v62 = vadd.f32 %v5173_v17, %v16494_v7 }
 0x64f   : > { %v14049_v20 = vadd.f32 %v5077_v25, %v16496_v46  ;;  %v10810_v25 = vld [vmem:[#allocation7 + $0xda8] sm:$0xf0] }
 0x650   : > { %16495 = vst [vmem:[#allocation95_spill] sm:$0xff] %v14046_v62  ;;  %v10813_v49 = vor.u32 %v11702_v28, %v10810_v25 }
 0x651   : > { %16497 = vst [vmem:[#allocation96_spill] sm:$0xff] %v14049_v20 }
 0x652   : > { %v5125_v50 = vpop.f32.mrf.mxu2  ;;  %6660 = vmatpush.bf16.msrb.mxu2 %v10813_v49  ;;  %v16516_v49 = vld [vmem:[#allocation100_spill] sm:$0xff] }
 0x653   : > { %v5174_v19 = vpop.f32.mrf.mxu3  ;;  %v5030_v30 = vpop.f32.mrf.mxu0 }
 0x654   : > { %v5175_v26 = vadd.f32 %v5174_v19, %v5125_v50  ;;  %v5079_v56 = vpop.f32.mrf.mxu1  ;;  %v5635_v50 = vrot.slane %v16503_v41, 1  ;;  %v11069_v19 = vor.u32 %v11766_v22, %v11066_v16  ;;  %v16511_v16 = vld [vmem:[#allocation21_spill] sm:$0xff] }
 0x655   : > { %v5080_v15 = vadd.f32 %v5079_v56, %v5030_v30  ;;  %v16504_v56 = vshll.u32 %v16502_v23, 16  ;;  %v16512_v32 = vshrl.u32 %v16511_v16, 16  ;;  %v16513_v23 = vshll.u32 %v16511_v16, 16 }
 0x656   : > { %v14052_v17 = vadd.f32 %v5175_v26, %v16498_v8  ;;  %5225 = vmatmul.bf16.gmra.mxu0 %v13663_v4  ;;  %v16505_v8 = vld [vmem:[#allocation19_spill] sm:$0xff]  ;;  %6709 = vmatpush.bf16.msrb.mxu3 %v11069_v19 }
 0x657   : > { %v14056_v7 = vadd.f32 %v5080_v15, %v16500_v58  ;;  %5274 = vmatmul.bf16.gmra.mxu1 %v13667_v55  ;;  %5323 = vmatmul.bf16.gmra.mxu2 %v13663_v4  ;;  %v5636_v15 = vrot.slane %v16504_v56, 2  ;;  %v16506_v58 = vshrl.u32 %v16505_v8, 16  ;;  %v5645_v51 = vrot.slane %v16512_v32, 1 }
 0x658   : > { %16499 = vst [vmem:[#allocation97_spill] sm:$0xff] %v14052_v17  ;;  %5372 = vmatmul.bf16.gmra.mxu3 %v13667_v55  ;;  %v16507_v55 = vshll.u32 %v16505_v8, 16  ;;  %v16508_v17 = vld [vmem:[#allocation20_spill] sm:$0xff]  ;;  %v5646_v56 = vrot.slane %v16513_v23, 2 }
 0x659   : > { %16501 = vst [vmem:[#allocation98_spill] sm:$0xff] %v14056_v7  ;;  %v5638_v4 = vrot.slane %v16506_v58, 1  ;;  %v16509_v20 = vshrl.u32 %v16508_v17, 16  ;;  %v16510_v41 = vshll.u32 %v16508_v17, 16 }
 0x65a   : > { %v5128_v46 = vpop.f32.mrf.mxu2  ;;  %v5639_v7 = vrot.slane %v16507_v55, 2  ;;  %v10808_v55 = vld [vmem:[#allocation7 + $0xd88] sm:$0xf]  ;;  %v5647_v37 = vor.u32 %v5646_v56, %v5645_v51  ;;  %v11034_v56 = vld [vmem:[#allocation7 + $0xf68] sm:$0xf0] }
 0x65b   : > { %v5177_v30 = vpop.f32.mrf.mxu3  ;;  %v5032_v26 = vpop.f32.mrf.mxu0  ;;  %v5642_v28 = vrot.slane %v16509_v20, 1  ;;  %v5643_v22 = vrot.slane %v16510_v41, 2  ;;  %v11064_v20 = vld [vmem:[#allocation7 + $0xf88] sm:$0xf]  ;;  %v10809_v41 = vor.u32 %v11706_v52, %v10808_v55  ;;  %v16518_v52 = vld [vmem:[#allocation101_spill] sm:$0xff] }
 0x65c   : > { %v5178_v25 = vadd.f32 %v5177_v30, %v5128_v46  ;;  %v5081_v62 = vpop.f32.mrf.mxu1  ;;  %v5637_v30 = vor.u32 %v5636_v15, %v5635_v50  ;;  %v5640_v17 = vor.u32 %v5639_v7, %v5638_v4  ;;  %v11065_v16 = vor.u32 %v11770_v59, %v11064_v20  ;;  %v16520_v59 = vld [vmem:[#allocation102_spill] sm:$0xff]  ;;  %v11694_v15 = vld [vmem:[#allocation7 + $0xd4c] sm:$0xf] }
 0x65d   : > { %v5082_v58 = vadd.f32 %v5081_v62, %v5032_v26  ;;  %v5644_v32 = vor.u32 %v5643_v22, %v5642_v28  ;;  %6562 = vmatpush.bf16.msrb.mxu0 %v10809_v41  ;;  %v10778_v4 = vld [vmem:[#allocation7 + $0xd68] sm:$0xf0]  ;;  %v16522_v41 = vld [vmem:[#allocation22_spill] sm:$0xff] }
 0x65e   : > { %v14078_v8 = vadd.f32 %v5178_v25, %v16514_v24  ;;  %6611 = vmatpush.bf16.msrb.mxu1 %v11065_v16  ;;  %v14084_v26 = vsel %vm5634_vm2, %v5637_v30, %v5640_v17  ;;  %v11758_v28 = vld [vmem:[#allocation7 + $0xf4c] sm:$0xf]  ;;  %v10781_v22 = vor.u32 %v11694_v15, %v10778_v4 }
 0x65f   : > { %v14081_v46 = vadd.f32 %v5082_v58, %v16516_v49  ;;  %v14087_v58 = vsel %vm5634_vm2, %v5644_v32, %v5647_v37  ;;  %v11037_v20 = vor.u32 %v11758_v28, %v11034_v56  ;;  %v16523_v32 = vshrl.u32 %v16522_v41, 16  ;;  %v16528_v28 = vld [vmem:[#allocation103_spill] sm:$0xff] }
 0x660   : > { %16515 = vst [vmem:[#allocation18_spill] sm:$0xff] %v14078_v8  ;;  %6661 = vmatpush.bf16.msrb.mxu2 %v10781_v22 }
 0x661   : > { %16517 = vst [vmem:[#allocation19_spill] sm:$0xff] %v14081_v46  ;;  %v5649_v16 = vrot.slane %v16523_v32, 1  ;;  %6710 = vmatpush.bf16.msrb.mxu3 %v11037_v20  ;;  %v11032_v32 = vld [vmem:[#allocation7 + $0xf48] sm:$0xf]  ;;  %v16530_v46 = vld [vmem:[#allocation104_spill] sm:$0xff] }
 0x662   : > { %v5130_v19 = vpop.f32.mrf.mxu2 }
 0x663   : > { %v5179_v62 = vpop.f32.mrf.mxu3  ;;  %v5191_v24 = vpop.f32.mrf.mxu0 }
 0x664   : > { %v5180_v25 = vadd.f32 %v5179_v62, %v5130_v19  ;;  %v5240_v23 = vpop.f32.mrf.mxu1  ;;  %v16524_v19 = vshll.u32 %v16522_v41, 16 }
 0x665   : > { %v5241_v7 = vadd.f32 %v5240_v23, %v5191_v24  ;;  %v16525_v23 = vld [vmem:[#allocation23_spill] sm:$0xff] }
 0x666   : > { %v14090_v50 = vadd.f32 %v5180_v25, %v16518_v52  ;;  %6373 = vmatmul.bf16.vlgmr.msra.gmra.mxu0 %v14084_v26  ;;  %v5650_v62 = vrot.slane %v16524_v19, 2 }
 0x667   : > { %v14094_v51 = vadd.f32 %v5241_v7, %v16520_v59  ;;  %6422 = vmatmul.bf16.vlgmr.msra.gmra.mxu1 %v14087_v58  ;;  %6471 = vmatmul.bf16.vlgmr.msra.gmra.mxu2 %v14084_v26  ;;  %v16526_v7 = vshrl.u32 %v16525_v23, 16  ;;  %v16527_v59 = vshll.u32 %v16525_v23, 16 }
 0x668   : > { %16519 = vst [vmem:[#allocation20_spill] sm:$0xff] %v14090_v50  ;;  %6520 = vmatmul.bf16.vlgmr.msra.gmra.mxu3 %v14087_v58  ;;  %v11698_v50 = vld [vmem:[#allocation7 + $0xd64] sm:$0xf0]  ;;  %v5651_v22 = vor.u32 %v5650_v62, %v5649_v16  ;;  %v11750_v62 = vld [vmem:[#allocation7 + $0xf0c] sm:$0xf] }
 0x669   : > { %16521 = vst [vmem:[#allocation21_spill] sm:$0xff] %v14094_v51  ;;  %v5653_v52 = vrot.slane %v16526_v7, 1  ;;  %v5654_v15 = vrot.slane %v16527_v59, 2  ;;  %v10776_v51 = vld [vmem:[#allocation7 + $0xd48] sm:$0xf] }
 0x66a   : > { %v5289_v55 = vpop.f32.mrf.mxu2 }
 0x66b   : > { %v5338_v49 = vpop.f32.mrf.mxu3  ;;  %v5193_v30 = vpop.f32.mrf.mxu0  ;;  %v5655_v19 = vor.u32 %v5654_v15, %v5653_v52  ;;  %v11002_v52 = vld [vmem:[#allocation7 + $0xf28] sm:$0xf0] }
 0x66c   : > { %v5339_v24 = vadd.f32 %v5338_v49, %v5289_v55  ;;  %v5242_v25 = vpop.f32.mrf.mxu1  ;;  %v10777_v55 = vor.u32 %v11698_v50, %v10776_v51  ;;  %v11762_v49 = vld [vmem:[#allocation7 + $0xf64] sm:$0xf0]  ;;  %v16534_v50 = vld [vmem:[#allocation106_spill] sm:$0xff] }
 0x66d   : > { %v5243_v4 = vadd.f32 %v5242_v25, %v5193_v30  ;;  %v11033_v8 = vor.u32 %v11762_v49, %v11032_v32  ;;  %v14114_v30 = vsel %vm5634_vm2, %v5640_v17, %v5651_v22  ;;  %v14117_v59 = vsel %vm5634_vm2, %v5647_v37, %v5655_v19  ;;  %v10746_v17 = vld [vmem:[#allocation7 + $0xd28] sm:$0xf0]  ;;  %v16536_v49 = vld [vmem:[#allocation24_spill] sm:$0xff] }
 0x66e   : > { %v14108_v56 = vadd.f32 %v5339_v24, %v16528_v28  ;;  %6563 = vmatpush.bf16.msrb.mxu0 %v10777_v55  ;;  %v11005_v28 = vor.u32 %v11750_v62, %v11002_v52  ;;  %v16542_v62 = vld [vmem:[#allocation107_spill] sm:$0xff] }
 0x66f   : > { %v14111_v41 = vadd.f32 %v5243_v4, %v16530_v46  ;;  %6612 = vmatpush.bf16.msrb.mxu1 %v11033_v8  ;;  %v16532_v4 = vld [vmem:[#allocation105_spill] sm:$0xff]  ;;  %v11686_v8 = vld [vmem:[#allocation7 + $0xd0c] sm:$0xf] }
 0x670   : > { %16529 = vst [vmem:[#allocation99_spill] sm:$0xff] %v14108_v56  ;;  %v10749_v37 = vor.u32 %v11686_v8, %v10746_v17  ;;  %6711 = vmatpush.bf16.msrb.mxu3 %v11005_v28  ;;  %v11690_v56 = vld [vmem:[#allocation7 + $0xd24] sm:$0xf0] }
 0x671   : > { %16531 = vst [vmem:[#allocation100_spill] sm:$0xff] %v14111_v41  ;;  %v10744_v41 = vld [vmem:[#allocation7 + $0xd08] sm:$0xf] }
 0x672   : > { %v5291_v7 = vpop.f32.mrf.mxu2  ;;  %6662 = vmatpush.bf16.msrb.mxu2 %v10749_v37 }
 0x673   : > { %v5340_v23 = vpop.f32.mrf.mxu3  ;;  %v5196_v20 = vpop.f32.mrf.mxu0 }
 0x674   : > { %v5341_v24 = vadd.f32 %v5340_v23, %v5291_v7  ;;  %v5245_v25 = vpop.f32.mrf.mxu1  ;;  %v16537_v7 = vshrl.u32 %v16536_v49, 16 }
 0x675   : > { %v5246_v46 = vadd.f32 %v5245_v25, %v5196_v20  ;;  %v16538_v20 = vshll.u32 %v16536_v49, 16 }
 0x676   : > { %v14120_v16 = vadd.f32 %v5341_v24, %v16532_v4  ;;  %6378 = vmatmul.bf16.gmra.mxu0 %v14114_v30  ;;  %v5657_v23 = vrot.slane %v16537_v7, 1  ;;  %v16539_v4 = vld [vmem:[#allocation25_spill] sm:$0xff]  ;;  %v11000_v7 = vld [vmem:[#allocation7 + $0xf08] sm:$0xf] }
 0x677   : > { %v14124_v51 = vadd.f32 %v5246_v46, %v16534_v50  ;;  %6427 = vmatmul.bf16.gmra.mxu1 %v14117_v59  ;;  %6476 = vmatmul.bf16.gmra.mxu2 %v14114_v30  ;;  %v5658_v24 = vrot.slane %v16538_v20, 2  ;;  %v16540_v50 = vshrl.u32 %v16539_v4, 16 }
 0x678   : > { %16533 = vst [vmem:[#allocation101_spill] sm:$0xff] %v14120_v16  ;;  %6525 = vmatmul.bf16.gmra.mxu3 %v14117_v59  ;;  %v16541_v16 = vshll.u32 %v16539_v4, 16 }
 0x679   : > { %16535 = vst [vmem:[#allocation102_spill] sm:$0xff] %v14124_v51  ;;  %v5661_v51 = vrot.slane %v16540_v50, 1  ;;  %v5659_v37 = vor.u32 %v5658_v24, %v5657_v23  ;;  %v10970_v24 = vld [vmem:[#allocation7 + $0xee8] sm:$0xf0] }
 0x67a   : > { %v5294_v15 = vpop.f32.mrf.mxu2  ;;  %v5662_v8 = vrot.slane %v16541_v16, 2 }
 0x67b   : > { %v5343_v32 = vpop.f32.mrf.mxu3  ;;  %v5198_v55 = vpop.f32.mrf.mxu0 }
 0x67c   : > { %v5344_v25 = vadd.f32 %v5343_v32, %v5294_v15  ;;  %v5247_v46 = vpop.f32.mrf.mxu1  ;;  %v10745_v15 = vor.u32 %v11690_v56, %v10744_v41  ;;  %v11754_v32 = vld [vmem:[#allocation7 + $0xf24] sm:$0xf0]  ;;  %v5663_v20 = vor.u32 %v5662_v8, %v5661_v51  ;;  %v16548_v56 = vld [vmem:[#allocation110_spill] sm:$0xff]  ;;  %v11742_v51 = vld [vmem:[#allocation7 + $0xecc] sm:$0xf] }
 0x67d   : > { %v5248_v17 = vadd.f32 %v5247_v46, %v5198_v55  ;;  %v11001_v54 = vor.u32 %v11754_v32, %v11000_v7  ;;  %v14144_v55 = vsel %vm5634_vm2, %v5651_v22, %v5659_v37  ;;  %v10714_v22 = vld [vmem:[#allocation7 + $0xce8] sm:$0xf0]  ;;  %v16550_v32 = vld [vmem:[#allocation26_spill] sm:$0xff] }
 0x67e   : > { %v14138_v52 = vadd.f32 %v5344_v25, %v16542_v62  ;;  %6564 = vmatpush.bf16.msrb.mxu0 %v10745_v15  ;;  %v14147_v4 = vsel %vm5634_vm2, %v5655_v19, %v5663_v20  ;;  %v10973_v62 = vor.u32 %v11742_v51, %v10970_v24  ;;  %v16556_v51 = vld [vmem:[#allocation111_spill] sm:$0xff] }
 0x67f   : > { %v14141_v49 = vadd.f32 %v5248_v17, %v16544_v38  ;;  %6613 = vmatpush.bf16.msrb.mxu1 %v11001_v54  ;;  %v16546_v17 = vld [vmem:[#allocation109_spill] sm:$0xff]  ;;  %v11678_v54 = vld [vmem:[#allocation7 + $0xccc] sm:$0xf] }
 0x680   : > { %16543 = vst [vmem:[#allocation22_spill] sm:$0xff] %v14138_v52  ;;  %v10717_v19 = vor.u32 %v11678_v54, %v10714_v22  ;;  %6712 = vmatpush.bf16.msrb.mxu3 %v10973_v62  ;;  %v11682_v52 = vld [vmem:[#allocation7 + $0xce4] sm:$0xf0] }
 0x681   : > { %16545 = vst [vmem:[#allocation23_spill] sm:$0xff] %v14141_v49  ;;  %v10712_v49 = vld [vmem:[#allocation7 + $0xcc8] sm:$0xf] }
 0x682   : > { %v5296_v50 = vpop.f32.mrf.mxu2  ;;  %6663 = vmatpush.bf16.msrb.mxu2 %v10717_v19 }
 0x683   : > { %v5345_v16 = vpop.f32.mrf.mxu3  ;;  %v5201_v28 = vpop.f32.mrf.mxu0 }
 0x684   : > { %v5346_v25 = vadd.f32 %v5345_v16, %v5296_v50  ;;  %v5250_v46 = vpop.f32.mrf.mxu1  ;;  %v16551_v50 = vshrl.u32 %v16550_v32, 16 }
 0x685   : > { %v5251_v38 = vadd.f32 %v5250_v46, %v5201_v28  ;;  %v16552_v28 = vshll.u32 %v16550_v32, 16 }
 0x686   : > { %v14150_v23 = vadd.f32 %v5346_v25, %v16546_v17  ;;  %6383 = vmatmul.bf16.gmra.mxu0 %v14144_v55  ;;  %v5665_v16 = vrot.slane %v16551_v50, 1  ;;  %v16553_v17 = vld [vmem:[#allocation27_spill] sm:$0xff] }
 0x687   : > { %v14154_v41 = vadd.f32 %v5251_v38, %v16548_v56  ;;  %6432 = vmatmul.bf16.gmra.mxu1 %v14147_v4  ;;  %6481 = vmatmul.bf16.gmra.mxu2 %v14144_v55  ;;  %v5666_v25 = vrot.slane %v16552_v28, 2  ;;  %v16554_v56 = vshrl.u32 %v16553_v17, 16  ;;  %v10968_v50 = vld [vmem:[#allocation7 + $0xec8] sm:$0xf] }
 0x688   : > { %16547 = vst [vmem:[#allocation103_spill] sm:$0xff] %v14150_v23  ;;  %6530 = vmatmul.bf16.gmra.mxu3 %v14147_v4  ;;  %v16555_v23 = vshll.u32 %v16553_v17, 16 }
 0x689   : > { %16549 = vst [vmem:[#allocation104_spill] sm:$0xff] %v14154_v41  ;;  %v5669_v41 = vrot.slane %v16554_v56, 1  ;;  %v5667_v19 = vor.u32 %v5666_v25, %v5665_v16  ;;  %v10938_v25 = vld [vmem:[#allocation7 + $0xea8] sm:$0xf0] }
 0x68a   : > { %v5299_v8 = vpop.f32.mrf.mxu2  ;;  %v5670_v54 = vrot.slane %v16555_v23, 2 }
 0x68b   : > { %v5348_v7 = vpop.f32.mrf.mxu3  ;;  %v5203_v15 = vpop.f32.mrf.mxu0 }
 0x68c   : > { %v5349_v46 = vadd.f32 %v5348_v7, %v5299_v8  ;;  %v5252_v38 = vpop.f32.mrf.mxu1  ;;  %v10713_v8 = vor.u32 %v11682_v52, %v10712_v49  ;;  %v11746_v7 = vld [vmem:[#allocation7 + $0xee4] sm:$0xf0]  ;;  %v5671_v28 = vor.u32 %v5670_v54, %v5669_v41  ;;  %v16562_v52 = vld [vmem:[#allocation114_spill] sm:$0xff]  ;;  %v11734_v41 = vld [vmem:[#allocation7 + $0xe8c] sm:$0xf] }
 0x68d   : > { %v5253_v22 = vadd.f32 %v5252_v38, %v5203_v15  ;;  %v10969_v33 = vor.u32 %v11746_v7, %v10968_v50  ;;  %v14174_v15 = vsel %vm5634_vm2, %v5659_v37, %v5667_v19  ;;  %v10682_v37 = vld [vmem:[#allocation7 + $0xca8] sm:$0xf0]  ;;  %v16564_v7 = vld [vmem:[#allocation28_spill] sm:$0xff] }
 0x68e   : > { %v14168_v24 = vadd.f32 %v5349_v46, %v16556_v51  ;;  %6565 = vmatpush.bf16.msrb.mxu0 %v10713_v8  ;;  %v14177_v17 = vsel %vm5634_vm2, %v5663_v20, %v5671_v28  ;;  %v10941_v51 = vor.u32 %v11734_v41, %v10938_v25  ;;  %v16570_v41 = vld [vmem:[#allocation115_spill] sm:$0xff] }
 0x68f   : > { %v14171_v32 = vadd.f32 %v5253_v22, %v16558_v9  ;;  %6614 = vmatpush.bf16.msrb.mxu1 %v10969_v33  ;;  %v16560_v22 = vld [vmem:[#allocation113_spill] sm:$0xff]  ;;  %v11670_v33 = vld [vmem:[#allocation7 + $0xc8c] sm:$0xf] }
 0x690   : > { %16557 = vst [vmem:[#allocation105_spill] sm:$0xff] %v14168_v24  ;;  %v10685_v20 = vor.u32 %v11670_v33, %v10682_v37  ;;  %6713 = vmatpush.bf16.msrb.mxu3 %v10941_v51  ;;  %v11674_v24 = vld [vmem:[#allocation7 + $0xca4] sm:$0xf0] }
 0x691   : > { %16559 = vst [vmem:[#allocation106_spill] sm:$0xff] %v14171_v32  ;;  %v10680_v32 = vld [vmem:[#allocation7 + $0xc88] sm:$0xf] }
 0x692   : > { %v5301_v56 = vpop.f32.mrf.mxu2  ;;  %6664 = vmatpush.bf16.msrb.mxu2 %v10685_v20 }
 0x693   : > { %v5350_v23 = vpop.f32.mrf.mxu3  ;;  %v5206_v62 = vpop.f32.mrf.mxu0 }
 0x694   : > { %v5351_v46 = vadd.f32 %v5350_v23, %v5301_v56  ;;  %v5255_v38 = vpop.f32.mrf.mxu1  ;;  %v16565_v56 = vshrl.u32 %v16564_v7, 16 }
 0x695   : > { %v5256_v9 = vadd.f32 %v5255_v38, %v5206_v62  ;;  %v16566_v62 = vshll.u32 %v16564_v7, 16 }
 0x696   : > { %v14180_v16 = vadd.f32 %v5351_v46, %v16560_v22  ;;  %6388 = vmatmul.bf16.gmra.mxu0 %v14174_v15  ;;  %v5673_v23 = vrot.slane %v16565_v56, 1  ;;  %v16567_v22 = vld [vmem:[#allocation29_spill] sm:$0xff]  ;;  %v10936_v56 = vld [vmem:[#allocation7 + $0xe88] sm:$0xf] }
 0x697   : > { %v14184_v49 = vadd.f32 %v5256_v9, %v16562_v52  ;;  %6437 = vmatmul.bf16.gmra.mxu1 %v14177_v17  ;;  %6486 = vmatmul.bf16.gmra.mxu2 %v14174_v15  ;;  %v5674_v46 = vrot.slane %v16566_v62, 2  ;;  %v16568_v52 = vshrl.u32 %v16567_v22, 16 }
 0x698   : > { %16561 = vst [vmem:[#allocation24_spill] sm:$0xff] %v14180_v16  ;;  %6535 = vmatmul.bf16.gmra.mxu3 %v14177_v17  ;;  %v16569_v16 = vshll.u32 %v16567_v22, 16 }
 0x699   : > { %16563 = vst [vmem:[#allocation25_spill] sm:$0xff] %v14184_v49  ;;  %v5677_v49 = vrot.slane %v16568_v52, 1  ;;  %v5675_v20 = vor.u32 %v5674_v46, %v5673_v23  ;;  %v10906_v46 = vld [vmem:[#allocation7 + $0xe68] sm:$0xf0] }
 0x69a   : > { %v5304_v54 = vpop.f32.mrf.mxu2  ;;  %v5678_v33 = vrot.slane %v16569_v16, 2 }
 0x69b   : > { %v5353_v50 = vpop.f32.mrf.mxu3  ;;  %v5208_v8 = vpop.f32.mrf.mxu0 }
 0x69c   : > { %v5354_v38 = vadd.f32 %v5353_v50, %v5304_v54  ;;  %v5257_v9 = vpop.f32.mrf.mxu1  ;;  %v10681_v54 = vor.u32 %v11674_v24, %v10680_v32  ;;  %v11738_v50 = vld [vmem:[#allocation7 + $0xea4] sm:$0xf0]  ;;  %v5679_v62 = vor.u32 %v5678_v33, %v5677_v49  ;;  %v16576_v24 = vld [vmem:[#allocation118_spill] sm:$0xff]  ;;  %v11726_v49 = vld [vmem:[#allocation7 + $0xe4c] sm:$0xf] }
 0x69d   : > { %v5258_v37 = vadd.f32 %v5257_v9, %v5208_v8  ;;  %v10937_v10 = vor.u32 %v11738_v50, %v10936_v56  ;;  %v14204_v8 = vsel %vm5634_vm2, %v5667_v19, %v5675_v20  ;;  %v10650_v19 = vld [vmem:[#allocation7 + $0xc68] sm:$0xf0]  ;;  %v16578_v50 = vld [vmem:[#allocation30_spill] sm:$0xff] }
 0x69e   : > { %v14198_v25 = vadd.f32 %v5354_v38, %v16570_v41  ;;  %6566 = vmatpush.bf16.msrb.mxu0 %v10681_v54  ;;  %v14207_v22 = vsel %vm5634_vm2, %v5671_v28, %v5679_v62  ;;  %v10909_v41 = vor.u32 %v11726_v49, %v10906_v46  ;;  %v16584_v49 = vld [vmem:[#allocation119_spill] sm:$0xff] }
 0x69f   : > { %v14201_v7 = vadd.f32 %v5258_v37, %v16572_v35  ;;  %6615 = vmatpush.bf16.msrb.mxu1 %v10937_v10  ;;  %v16574_v37 = vld [vmem:[#allocation117_spill] sm:$0xff]  ;;  %v11662_v10 = vld [vmem:[#allocation7 + $0xc4c] sm:$0xf] }
 0x6a0   : > { %16571 = vst [vmem:[#allocation107_spill] sm:$0xff] %v14198_v25  ;;  %v10653_v28 = vor.u32 %v11662_v10, %v10650_v19  ;;  %6714 = vmatpush.bf16.msrb.mxu3 %v10909_v41  ;;  %v11666_v25 = vld [vmem:[#allocation7 + $0xc64] sm:$0xf0] }
 0x6a1   : > { %16573 = vst [vmem:[#allocation108_spill] sm:$0xff] %v14201_v7  ;;  %v10648_v7 = vld [vmem:[#allocation7 + $0xc48] sm:$0xf] }
 0x6a2   : > { %v5306_v52 = vpop.f32.mrf.mxu2  ;;  %6665 = vmatpush.bf16.msrb.mxu2 %v10653_v28 }
 0x6a3   : > { %v5355_v16 = vpop.f32.mrf.mxu3  ;;  %v5211_v51 = vpop.f32.mrf.mxu0 }
 0x6a4   : > { %v5356_v38 = vadd.f32 %v5355_v16, %v5306_v52  ;;  %v5260_v9 = vpop.f32.mrf.mxu1  ;;  %v16579_v52 = vshrl.u32 %v16578_v50, 16 }
 0x6a5   : > { %v5261_v35 = vadd.f32 %v5260_v9, %v5211_v51  ;;  %v16580_v51 = vshll.u32 %v16578_v50, 16 }
 0x6a6   : > { %v14210_v23 = vadd.f32 %v5356_v38, %v16574_v37  ;;  %6393 = vmatmul.bf16.gmra.mxu0 %v14204_v8  ;;  %v5681_v16 = vrot.slane %v16579_v52, 1  ;;  %v16581_v37 = vld [vmem:[#allocation31_spill] sm:$0xff] }
 0x6a7   : > { %v14214_v32 = vadd.f32 %v5261_v35, %v16576_v24  ;;  %6442 = vmatmul.bf16.gmra.mxu1 %v14207_v22  ;;  %6491 = vmatmul.bf16.gmra.mxu2 %v14204_v8  ;;  %v5682_v38 = vrot.slane %v16580_v51, 2  ;;  %v16582_v24 = vshrl.u32 %v16581_v37, 16  ;;  %v10904_v52 = vld [vmem:[#allocation7 + $0xe48] sm:$0xf] }
 0x6a8   : > { %16575 = vst [vmem:[#allocation109_spill] sm:$0xff] %v14210_v23  ;;  %6540 = vmatmul.bf16.gmra.mxu3 %v14207_v22  ;;  %v16583_v23 = vshll.u32 %v16581_v37, 16 }
 0x6a9   : > { %16577 = vst [vmem:[#allocation110_spill] sm:$0xff] %v14214_v32  ;;  %v5685_v32 = vrot.slane %v16582_v24, 1  ;;  %v5683_v28 = vor.u32 %v5682_v38, %v5681_v16  ;;  %v10874_v38 = vld [vmem:[#allocation7 + $0xe28] sm:$0xf0] }
 0x6aa   : > { %v5309_v33 = vpop.f32.mrf.mxu2  ;;  %v5686_v10 = vrot.slane %v16583_v23, 2 }
 0x6ab   : > { %v5358_v56 = vpop.f32.mrf.mxu3  ;;  %v5213_v54 = vpop.f32.mrf.mxu0 }
 0x6ac   : > { %v5359_v9 = vadd.f32 %v5358_v56, %v5309_v33  ;;  %v5262_v35 = vpop.f32.mrf.mxu1  ;;  %v10649_v33 = vor.u32 %v11666_v25, %v10648_v7  ;;  %v11730_v56 = vld [vmem:[#allocation7 + $0xe64] sm:$0xf0]  ;;  %v5687_v51 = vor.u32 %v5686_v10, %v5685_v32  ;;  %v16590_v25 = vld [vmem:[#allocation122_spill] sm:$0xff]  ;;  %v11718_v32 = vld [vmem:[#allocation7 + $0xe0c] sm:$0xf] }
 0x6ad   : > { %v5263_v19 = vadd.f32 %v5262_v35, %v5213_v54  ;;  %v10905_v36 = vor.u32 %v11730_v56, %v10904_v52  ;;  %v14234_v54 = vsel %vm5634_vm2, %v5675_v20, %v5683_v28  ;;  %v10618_v20 = vld [vmem:[#allocation7 + $0xc28] sm:$0xf0]  ;;  %v16592_v56 = vld [vmem:[#allocation32_spill] sm:$0xff] }
 0x6ae   : > { %v14228_v46 = vadd.f32 %v5359_v9, %v16584_v49  ;;  %6567 = vmatpush.bf16.msrb.mxu0 %v10649_v33  ;;  %v14237_v37 = vsel %vm5634_vm2, %v5679_v62, %v5687_v51  ;;  %v10877_v49 = vor.u32 %v11718_v32, %v10874_v38  ;;  %v16598_v32 = vld [vmem:[#allocation123_spill] sm:$0xff] }
 0x6af   : > { %v14231_v50 = vadd.f32 %v5263_v19, %v16586_v6  ;;  %6616 = vmatpush.bf16.msrb.mxu1 %v10905_v36  ;;  %v16588_v19 = vld [vmem:[#allocation121_spill] sm:$0xff]  ;;  %v11654_v36 = vld [vmem:[#allocation7 + $0xc0c] sm:$0xf] }
 0x6b0   : > { %16585 = vst [vmem:[#allocation26_spill] sm:$0xff] %v14228_v46  ;;  %v10621_v62 = vor.u32 %v11654_v36, %v10618_v20  ;;  %6715 = vmatpush.bf16.msrb.mxu3 %v10877_v49  ;;  %v11658_v46 = vld [vmem:[#allocation7 + $0xc24] sm:$0xf0] }
 0x6b1   : > { %16587 = vst [vmem:[#allocation27_spill] sm:$0xff] %v14231_v50  ;;  %v10616_v50 = vld [vmem:[#allocation7 + $0xc08] sm:$0xf] }
 0x6b2   : > { %v5311_v24 = vpop.f32.mrf.mxu2  ;;  %6666 = vmatpush.bf16.msrb.mxu2 %v10621_v62 }
 0x6b3   : > { %v5360_v23 = vpop.f32.mrf.mxu3  ;;  %v5216_v41 = vpop.f32.mrf.mxu0 }
 0x6b4   : > { %v5361_v9 = vadd.f32 %v5360_v23, %v5311_v24  ;;  %v5265_v35 = vpop.f32.mrf.mxu1  ;;  %v16593_v24 = vshrl.u32 %v16592_v56, 16 }
 0x6b5   : > { %v5266_v6 = vadd.f32 %v5265_v35, %v5216_v41  ;;  %v16594_v41 = vshll.u32 %v16592_v56, 16 }
 0x6b6   : > { %v14240_v16 = vadd.f32 %v5361_v9, %v16588_v19  ;;  %6398 = vmatmul.bf16.gmra.mxu0 %v14234_v54  ;;  %v5689_v23 = vrot.slane %v16593_v24, 1  ;;  %v16595_v19 = vld [vmem:[#allocation33_spill] sm:$0xff]  ;;  %v10872_v24 = vld [vmem:[#allocation7 + $0xe08] sm:$0xf] }
 0x6b7   : > { %v14244_v7 = vadd.f32 %v5266_v6, %v16590_v25  ;;  %6447 = vmatmul.bf16.gmra.mxu1 %v14237_v37  ;;  %6496 = vmatmul.bf16.gmra.mxu2 %v14234_v54  ;;  %v5690_v9 = vrot.slane %v16594_v41, 2  ;;  %v16596_v25 = vshrl.u32 %v16595_v19, 16 }
 0x6b8   : > { %16589 = vst [vmem:[#allocation111_spill] sm:$0xff] %v14240_v16  ;;  %6545 = vmatmul.bf16.gmra.mxu3 %v14237_v37  ;;  %v16597_v16 = vshll.u32 %v16595_v19, 16 }
 0x6b9   : > { %16591 = vst [vmem:[#allocation112_spill] sm:$0xff] %v14244_v7  ;;  %v5693_v7 = vrot.slane %v16596_v25, 1  ;;  %v5691_v62 = vor.u32 %v5690_v9, %v5689_v23  ;;  %v10850_v9 = vld [vmem:[#allocation7 + $0xdf0] sm:$0xf0] }
 0x6ba   : > { %v5314_v10 = vpop.f32.mrf.mxu2  ;;  %v5694_v36 = vrot.slane %v16597_v16, 2 }
 0x6bb   : > { %v5363_v52 = vpop.f32.mrf.mxu3  ;;  %v5218_v33 = vpop.f32.mrf.mxu0 }
 0x6bc   : > { %v5364_v35 = vadd.f32 %v5363_v52, %v5314_v10  ;;  %v5267_v6 = vpop.f32.mrf.mxu1  ;;  %v10617_v10 = vor.u32 %v11658_v46, %v10616_v50  ;;  %v11722_v52 = vld [vmem:[#allocation7 + $0xe24] sm:$0xf0]  ;;  %v5695_v41 = vor.u32 %v5694_v36, %v5693_v7  ;;  %v16604_v46 = vld [vmem:[#allocation126_spill] sm:$0xff]  ;;  %v11711_v7 = vld [vmem:[#allocation7 + $0xdd4] sm:$0xf] }
 0x6bd   : > { %v5268_v20 = vadd.f32 %v5267_v6, %v5218_v33  ;;  %v10873_v44 = vor.u32 %v11722_v52, %v10872_v24  ;;  %v14264_v33 = vsel %vm5634_vm2, %v5683_v28, %v5691_v62  ;;  %v16606_v28 = vld [vmem:[#allocation35_spill] sm:$0xff]  ;;  %v11775_v36 = vld [vmem:[#allocation7 + $0xfd4] sm:$0xf]  ;;  %v10853_v24 = vor.u32 %v11711_v7, %v10850_v9 }
 0x6be   : > { %v14258_v38 = vadd.f32 %v5364_v35, %v16598_v32  ;;  %6568 = vmatpush.bf16.msrb.mxu0 %v10617_v10  ;;  %v14267_v19 = vsel %vm5634_vm2, %v5687_v51, %v5695_v41  ;;  %v5703_v51 = vshrl.u32 %v16606_v28, 16  ;;  %v11106_v10 = vld [vmem:[#allocation7 + $0xff0] sm:$0xf0] }
 0x6bf   : > { %v14261_v56 = vadd.f32 %v5268_v20, %v16600_v34  ;;  %6617 = vmatpush.bf16.msrb.mxu1 %v10873_v44  ;;  %v16602_v20 = vld [vmem:[#allocation125_spill] sm:$0xff]  ;;  %v5697_v44 = vshrl.u32 %v16353_v27, 16  ;;  %6855 = vmatpush.bf16.msra.mxu2 %v10853_v24  ;;  %v16611_v7 = vld [vmem:[#allocation128_spill] sm:$0xff] }
 0x6c0   : > { %16599 = vst [vmem:[#allocation113_spill] sm:$0xff] %v14258_v38  ;;  %v16609_v38 = vld [vmem:[#allocation127_spill] sm:$0xff] }
 0x6c1   : > { %16601 = vst [vmem:[#allocation114_spill] sm:$0xff] %v14261_v56 }
 0x6c2   : > { %v5316_v25 = vpop.f32.mrf.mxu2 }
 0x6c3   : > { %v5365_v16 = vpop.f32.mrf.mxu3  ;;  %v5221_v49 = vpop.f32.mrf.mxu0 }
 0x6c4   : > { %v5366_v35 = vadd.f32 %v5365_v16, %v5316_v25  ;;  %v5270_v6 = vpop.f32.mrf.mxu1  ;;  %v5699_v16 = vrot.slane %v5697_v44, 1 }
 0x6c5   : > { %v5271_v34 = vadd.f32 %v5270_v6, %v5221_v49  ;;  %v16607_v49 = vshll.u32 %v16353_v27, 16  ;;  %v11109_v6 = vor.u32 %v11775_v36, %v11106_v10  ;;  %v10848_v27 = vld [vmem:[#allocation7 + $0xdd0] sm:$0xf] }
 0x6c6   : > { %v14270_v23 = vadd.f32 %v5366_v35, %v16602_v20  ;;  %6403 = vmatmul.bf16.gmra.mxu0 %v14264_v33  ;;  %v11104_v36 = vld [vmem:[#allocation7 + $0xfd0] sm:$0xf] }
 0x6c7   : > { %v14274_v50 = vadd.f32 %v5271_v34, %v16604_v46  ;;  %6452 = vmatmul.bf16.gmra.mxu1 %v14267_v19  ;;  %6501 = vmatmul.bf16.gmra.mxu2 %v14264_v33  ;;  %v5700_v35 = vrot.slane %v16607_v49, 2  ;;  %v5705_v46 = vrot.slane %v5703_v51, 1  ;;  %v11715_v49 = vld [vmem:[#allocation7 + $0xdec] sm:$0xf0] }
 0x6c8   : > { %16603 = vst [vmem:[#allocation28_spill] sm:$0xff] %v14270_v23  ;;  %6550 = vmatmul.bf16.gmra.mxu3 %v14267_v19  ;;  %v11779_v10 = vld [vmem:[#allocation7 + $0xfec] sm:$0xf0] }
 0x6c9   : > { %16605 = vst [vmem:[#allocation29_spill] sm:$0xff] %v14274_v50  ;;  %v16608_v50 = vshll.u32 %v16606_v28, 16  ;;  %6904 = vmatpush.bf16.msra.mxu3 %v11109_v6  ;;  %v5701_v44 = vor.u32 %v5700_v35, %v5699_v16  ;;  %v16613_v16 = vld [vmem:[#allocation34_spill] sm:$0xff]  ;;  %v16615_v6 = vld [vmem:[#allocation129_spill] sm:$0xff] }
 0x6ca   : > { %v5319_v32 = vpop.f32.mrf.mxu2 }
 0x6cb   : > { %v5368_v52 = vpop.f32.mrf.mxu3  ;;  %v5223_v25 = vpop.f32.mrf.mxu0  ;;  %v5706_v23 = vrot.slane %v16608_v50, 2  ;;  %v14292_v24 = vsel %vm5634_vm2, %v5691_v62, %v5701_v44  ;;  %v11703_v62 = vld [vmem:[#allocation7 + $0xd94] sm:$0xf] }
 0x6cc   : > { %v5369_v34 = vadd.f32 %v5368_v52, %v5319_v32  ;;  %v5272_v20 = vpop.f32.mrf.mxu1  ;;  %v10849_v32 = vor.u32 %v11715_v49, %v10848_v27  ;;  %v11105_v52 = vor.u32 %v11779_v10, %v11104_v36 }
 0x6cd   : > { %v5273_v56 = vadd.f32 %v5272_v20, %v5223_v25  ;;  %v5707_v0 = vor.u32 %v5706_v23, %v5705_v46  ;;  %v10818_v20 = vld [vmem:[#allocation7 + $0xdb0] sm:$0xf0] }
 0x6ce   : > { %v14286_v14 = vadd.f32 %v5369_v34, %v16609_v38  ;;  %6757 = vmatpush.bf16.msra.mxu0 %v10849_v32  ;;  %6806 = vmatpush.bf16.msra.mxu1 %v11105_v52  ;;  %v10821_v46 = vor.u32 %v11703_v62, %v10818_v20 }
 0x6cf   : > { %v14289_v9 = vadd.f32 %v5273_v56, %v16611_v7  ;;  %v14295_v56 = vsel %vm5634_vm2, %v5695_v41, %v5707_v0  ;;  %v11767_v0 = vld [vmem:[#allocation7 + $0xf94] sm:$0xf] }
 0x6d0   : > { %16610 = vst [vmem:[#allocation115_spill] sm:$0xff] %v14286_v14  ;;  %v11074_v7 = vld [vmem:[#allocation7 + $0xfb0] sm:$0xf0]  ;;  %6856 = vmatpush.bf16.msra.mxu2 %v10821_v46  ;;  %v10912_v14 = vld [vmem:[#allocation7 + $0xe50] sm:$0xf] }
 0x6d1   : > { %16612 = vst [vmem:[#allocation116_spill] sm:$0xff] %v14289_v9  ;;  %v11077_v49 = vor.u32 %v11767_v0, %v11074_v7  ;;  %v16619_v7 = vld [vmem:[#allocation130_spill] sm:$0xff] }
 0x6d2   : > { %v5321_v51 = vpop.f32.mrf.mxu2 }
 0x6d3   : > { %v5370_v28 = vpop.f32.mrf.mxu3  ;;  %v5226_v50 = vpop.f32.mrf.mxu0  ;;  %6905 = vmatpush.bf16.msra.mxu3 %v11077_v49  ;;  %v10786_v49 = vld [vmem:[#allocation7 + $0xd70] sm:$0xf0] }
 0x6d4   : > { %v5371_v38 = vadd.f32 %v5370_v28, %v5321_v51  ;;  %v5275_v25 = vpop.f32.mrf.mxu1  ;;  %v10816_v28 = vld [vmem:[#allocation7 + $0xd90] sm:$0xf] }
 0x6d5   : > { %v5276_v23 = vadd.f32 %v5275_v25, %v5226_v50  ;;  %v11707_v50 = vld [vmem:[#allocation7 + $0xdac] sm:$0xf0] }
 0x6d6   : > { %v14298_v35 = vadd.f32 %v5371_v38, %v16613_v16  ;;  %6408 = vmatmul.bf16.gmra.mxu0 %v14292_v24  ;;  %v11072_v38 = vld [vmem:[#allocation7 + $0xf90] sm:$0xf]  ;;  %v10817_v25 = vor.u32 %v11707_v50, %v10816_v28  ;;  %v11042_v28 = vld [vmem:[#allocation7 + $0xf70] sm:$0xf0] }
 0x6d7   : > { %v14302_v34 = vadd.f32 %v5276_v23, %v16615_v6  ;;  %6457 = vmatmul.bf16.gmra.mxu1 %v14295_v56  ;;  %6506 = vmatmul.bf16.gmra.mxu2 %v14292_v24  ;;  %v11771_v23 = vld [vmem:[#allocation7 + $0xfac] sm:$0xf0] }
 0x6d8   : > { %16614 = vst [vmem:[#allocation117_spill] sm:$0xff] %v14298_v35  ;;  %6555 = vmatmul.bf16.gmra.mxu3 %v14295_v56  ;;  %v11073_v6 = vor.u32 %v11771_v23, %v11072_v38  ;;  %6758 = vmatpush.bf16.msra.mxu0 %v10817_v25 }
 0x6d9   : > { %16616 = vst [vmem:[#allocation118_spill] sm:$0xff] %v14302_v34 }
 0x6da   : > { %v5324_v41 = vpop.f32.mrf.mxu2  ;;  %6807 = vmatpush.bf16.msra.mxu1 %v11073_v6 }
 0x6db   : > { %v5373_v44 = vpop.f32.mrf.mxu3  ;;  %v5228_v27 = vpop.f32.mrf.mxu0 }
 0x6dc   : > { %v5374_v36 = vadd.f32 %v5373_v44, %v5324_v41  ;;  %v5277_v32 = vpop.f32.mrf.mxu1 }
 0x6dd   : > { %v5278_v10 = vadd.f32 %v5277_v32, %v5228_v27  ;;  %v11695_v27 = vld [vmem:[#allocation7 + $0xd54] sm:$0xf] }
 0x6de   : > { %v14308_v51 = vadd.f32 %v5374_v36, %v13679_v61  ;;  %v11759_v36 = vld [vmem:[#allocation7 + $0xf54] sm:$0xf] }
 0x6df   : > { %v14311_v52 = vadd.f32 %v5278_v10, %v13681_v40  ;;  %v16621_v40 = vld [vmem:[#allocation131_spill] sm:$0xff]  ;;  %v10789_v10 = vor.u32 %v11695_v27, %v10786_v49  ;;  %v11045_v25 = vor.u32 %v11759_v36, %v11042_v28 }
 0x6e0   : > { %16617 = vst [vmem:[#allocation30_spill] sm:$0xff] %v14308_v51  ;;  %v10944_v51 = vld [vmem:[#allocation7 + $0xe90] sm:$0xf] }
 0x6e1   : > { %16618 = vst [vmem:[#allocation31_spill] sm:$0xff] %v14311_v52  ;;  %6857 = vmatpush.bf16.msra.mxu2 %v10789_v10  ;;  %6906 = vmatpush.bf16.msra.mxu3 %v11045_v25 }
 0x6e2   : > { %v5326_v16 = vpop.f32.mrf.mxu2 }
 0x6e3   : > { %v5375_v62 = vpop.f32.mrf.mxu3  ;;  %v6374_v20 = vpop.f32.mrf.mxu0 }
 0x6e4   : > { %v5376_v0 = vadd.f32 %v5375_v62, %v5326_v16  ;;  %v6423_v41 = vpop.f32.mrf.mxu1 }
 0x6e5   : > { %v6424_v46 = vadd.f32 %v6423_v41, %v6374_v20  ;;  %v11699_v41 = vld [vmem:[#allocation7 + $0xd6c] sm:$0xf0] }
 0x6e6   : > { %v14314_v61 = vadd.f32 %v5376_v0, %v16619_v7  ;;  %6569 = vmatmul.bf16.vlgmr.msrb.gmra.mxu0 %v14084_v26  ;;  %v10784_v0 = vld [vmem:[#allocation7 + $0xd50] sm:$0xf] }
 0x6e7   : > { %v14318_v44 = vadd.f32 %v6424_v46, %v16621_v40  ;;  %6618 = vmatmul.bf16.vlgmr.msrb.gmra.mxu1 %v14087_v58  ;;  %6667 = vmatmul.bf16.vlgmr.msrb.gmra.mxu2 %v14084_v26  ;;  %v11040_v46 = vld [vmem:[#allocation7 + $0xf50] sm:$0xf]  ;;  %v10785_v7 = vor.u32 %v11699_v41, %v10784_v0 }
 0x6e8   : > { %16620 = vst [vmem:[#allocation119_spill] sm:$0xff] %v14314_v61  ;;  %6716 = vmatmul.bf16.vlgmr.msrb.gmra.mxu3 %v14087_v58  ;;  %v11763_v40 = vld [vmem:[#allocation7 + $0xf6c] sm:$0xf0] }
 0x6e9   : > { %v11041_v49 = vor.u32 %v11763_v40, %v11040_v46  ;;  %6759 = vmatpush.bf16.msra.mxu0 %v10785_v7 }
 0x6ea   : > { %v6472_v32 = vpop.f32.mrf.mxu2 }
 0x6eb   : > { %v6521_v50 = vpop.f32.mrf.mxu3  ;;  %v6376_v38 = vpop.f32.mrf.mxu0  ;;  %6808 = vmatpush.bf16.msra.mxu1 %v11041_v49  ;;  %v11691_v49 = vld [vmem:[#allocation7 + $0xd2c] sm:$0xf0] }
 0x6ec   : > { %v6522_v23 = vadd.f32 %v6521_v50, %v6472_v32  ;;  %v6425_v16 = vpop.f32.mrf.mxu1  ;;  %v11687_v50 = vld [vmem:[#allocation7 + $0xd14] sm:$0xf] }
 0x6ed   : > { %v6426_v6 = vadd.f32 %v6425_v16, %v6376_v38  ;;  %v10754_v38 = vld [vmem:[#allocation7 + $0xd30] sm:$0xf0] }
 0x6ee   : > { %v14324_v62 = vadd.f32 %v6522_v23, %v13694_v21  ;;  %v10757_v23 = vor.u32 %v11687_v50, %v10754_v38  ;;  %v11010_v16 = vld [vmem:[#allocation7 + $0xf30] sm:$0xf0] }
 0x6ef   : > { %v14327_v20 = vadd.f32 %v6426_v6, %v13697_v45 }
 0x6f0   : > { %6858 = vmatpush.bf16.msra.mxu2 %v10757_v23 }
 0x6f2   : > { %v6474_v27 = vpop.f32.mrf.mxu2 }
 0x6f3   : > { %v6523_v61 = vpop.f32.mrf.mxu3  ;;  %v6379_v36 = vpop.f32.mrf.mxu0 }
 0x6f4   : > { %v6524_v32 = vadd.f32 %v6523_v61, %v6474_v27  ;;  %v6428_v10 = vpop.f32.mrf.mxu1  ;;  %v11751_v61 = vld [vmem:[#allocation7 + $0xf14] sm:$0xf]  ;;  %v10752_v27 = vld [vmem:[#allocation7 + $0xd10] sm:$0xf] }
 0x6f5   : > { %v6429_v28 = vadd.f32 %v6428_v10, %v6379_v36  ;;  %v11013_v0 = vor.u32 %v11751_v61, %v11010_v16  ;;  %v11008_v36 = vld [vmem:[#allocation7 + $0xf10] sm:$0xf] }
 0x6f6   : > { %v14330_v21 = vadd.f32 %v6524_v32, %v13700_v39  ;;  %6574 = vmatmul.bf16.gmra.mxu0 %v14114_v30  ;;  %v10753_v32 = vor.u32 %v11691_v49, %v10752_v27  ;;  %v11755_v10 = vld [vmem:[#allocation7 + $0xf2c] sm:$0xf0] }
 0x6f7   : > { %v14334_v45 = vadd.f32 %v6429_v28, %v13704_v5  ;;  %6623 = vmatmul.bf16.gmra.mxu1 %v14117_v59  ;;  %6672 = vmatmul.bf16.gmra.mxu2 %v14114_v30  ;;  %v11009_v50 = vor.u32 %v11755_v10, %v11008_v36 }
 0x6f8   : > { %6721 = vmatmul.bf16.gmra.mxu3 %v14117_v59  ;;  %6760 = vmatpush.bf16.msra.mxu0 %v10753_v32 }
 0x6f9   : > { %6907 = vmatpush.bf16.msra.mxu3 %v11013_v0  ;;  %6809 = vmatpush.bf16.msra.mxu1 %v11009_v50  ;;  %v11743_v0 = vld [vmem:[#allocation7 + $0xed4] sm:$0xf] }
 0x6fa   : > { %v6477_v25 = vpop.f32.mrf.mxu2 }
 0x6fb   : > { %v6526_v6 = vpop.f32.mrf.mxu3  ;;  %v6381_v39 = vpop.f32.mrf.mxu0 }
 0x6fc   : > { %v6527_v41 = vadd.f32 %v6526_v6, %v6477_v25  ;;  %v6430_v46 = vpop.f32.mrf.mxu1  ;;  %v11679_v6 = vld [vmem:[#allocation7 + $0xcd4] sm:$0xf] }
 0x6fd   : > { %v6431_v5 = vadd.f32 %v6430_v46, %v6381_v39  ;;  %v10722_v39 = vld [vmem:[#allocation7 + $0xcf0] sm:$0xf0] }
 0x6fe   : > { %v14340_v7 = vadd.f32 %v6527_v41, %v13710_v42  ;;  %v10725_v46 = vor.u32 %v11679_v6, %v10722_v39 }
 0x6ff   : > { %v14343_v40 = vadd.f32 %v6431_v5, %v13713_v60  ;;  %v10978_v5 = vld [vmem:[#allocation7 + $0xef0] sm:$0xf0] }
 0x700   : > { %v10981_v49 = vor.u32 %v11743_v0, %v10978_v5  ;;  %6859 = vmatpush.bf16.msra.mxu2 %v10725_v46 }
 0x702   : > { %v6479_v28 = vpop.f32.mrf.mxu2  ;;  %6908 = vmatpush.bf16.msra.mxu3 %v10981_v49 }
 0x703   : > { %v6528_v38 = vpop.f32.mrf.mxu3  ;;  %v6384_v61 = vpop.f32.mrf.mxu0 }
 0x704   : > { %v6529_v25 = vadd.f32 %v6528_v38, %v6479_v28  ;;  %v6433_v23 = vpop.f32.mrf.mxu1  ;;  %v16622_v28 = vld [vmem:[#allocation132_spill] sm:$0xff] }
 0x705   : > { %v6434_v16 = vadd.f32 %v6433_v23, %v6384_v61  ;;  %v10720_v38 = vld [vmem:[#allocation7 + $0xcd0] sm:$0xf] }
 0x706   : > { %v14346_v42 = vadd.f32 %v6529_v25, %v13716_v63  ;;  %6579 = vmatmul.bf16.gmra.mxu0 %v14144_v55  ;;  %v11683_v61 = vld [vmem:[#allocation7 + $0xcec] sm:$0xf0] }
 0x707   : > { %v14350_v60 = vadd.f32 %v6434_v16, %v13720_v29  ;;  %6628 = vmatmul.bf16.gmra.mxu1 %v14147_v4  ;;  %6677 = vmatmul.bf16.gmra.mxu2 %v14144_v55  ;;  %v10976_v25 = vld [vmem:[#allocation7 + $0xed0] sm:$0xf]  ;;  %v10721_v23 = vor.u32 %v11683_v61, %v10720_v38  ;;  %v10946_v38 = vld [vmem:[#allocation7 + $0xeb0] sm:$0xf0] }
 0x708   : > { %6726 = vmatmul.bf16.gmra.mxu3 %v14147_v4  ;;  %v11747_v16 = vld [vmem:[#allocation7 + $0xeec] sm:$0xf0] }
 0x709   : > { %v10977_v39 = vor.u32 %v11747_v16, %v10976_v25  ;;  %6761 = vmatpush.bf16.msra.mxu0 %v10721_v23 }
 0x70a   : > { %v6482_v41 = vpop.f32.mrf.mxu2 }
 0x70b   : > { %v6531_v27 = vpop.f32.mrf.mxu3  ;;  %v6386_v63 = vpop.f32.mrf.mxu0  ;;  %6810 = vmatpush.bf16.msra.mxu1 %v10977_v39 }
 0x70c   : > { %v6532_v36 = vadd.f32 %v6531_v27, %v6482_v41  ;;  %v6435_v32 = vpop.f32.mrf.mxu1  ;;  %v16623_v27 = vld [vmem:[#allocation133_spill] sm:$0xff] }
 0x70d   : > { %v6436_v29 = vadd.f32 %v6435_v32, %v6386_v63  ;;  %v16624_v63 = vld [vmem:[#allocation134_spill] sm:$0xff]  ;;  %v10690_v32 = vld [vmem:[#allocation7 + $0xcb0] sm:$0xf0] }
 0x70e   : > { %v14356_v10 = vadd.f32 %v6532_v36, %v13726_v47  ;;  %v11671_v36 = vld [vmem:[#allocation7 + $0xc94] sm:$0xf] }
 0x70f   : > { %v14359_v50 = vadd.f32 %v6436_v29, %v16622_v28  ;;  %v10693_v28 = vor.u32 %v11671_v36, %v10690_v32  ;;  %v11739_v36 = vld [vmem:[#allocation7 + $0xeac] sm:$0xf0] }
 0x710   : > { %v10945_v35 = vor.u32 %v11739_v36, %v10944_v51  ;;  %v11663_v51 = vld [vmem:[#allocation7 + $0xc54] sm:$0xf] }
 0x711   : > { %6860 = vmatpush.bf16.msra.mxu2 %v10693_v28 }
 0x712   : > { %v6484_v6 = vpop.f32.mrf.mxu2  ;;  %6811 = vmatpush.bf16.msra.mxu1 %v10945_v35 }
 0x713   : > { %v6533_v52 = vpop.f32.mrf.mxu3  ;;  %v6389_v0 = vpop.f32.mrf.mxu0 }
 0x714   : > { %v6534_v41 = vadd.f32 %v6533_v52, %v6484_v6  ;;  %v6438_v46 = vpop.f32.mrf.mxu1  ;;  %v11735_v52 = vld [vmem:[#allocation7 + $0xe94] sm:$0xf] }
 0x715   : > { %v6439_v5 = vadd.f32 %v6438_v46, %v6389_v0  ;;  %v10949_v23 = vor.u32 %v11735_v52, %v10946_v38  ;;  %v16625_v0 = vld [vmem:[#allocation36_spill] sm:$0xff]  ;;  %v16626_v46 = vld [vmem:[#allocation135_spill] sm:$0xff] }
 0x716   : > { %v14362_v47 = vadd.f32 %v6534_v41, %v16623_v27  ;;  %6584 = vmatmul.bf16.gmra.mxu0 %v14174_v15  ;;  %v10688_v27 = vld [vmem:[#allocation7 + $0xc90] sm:$0xf] }
 0x717   : > { %v14366_v49 = vadd.f32 %v6439_v5, %v16624_v63  ;;  %6633 = vmatmul.bf16.gmra.mxu1 %v14177_v17  ;;  %6682 = vmatmul.bf16.gmra.mxu2 %v14174_v15  ;;  %v11675_v63 = vld [vmem:[#allocation7 + $0xcac] sm:$0xf0] }
 0x718   : > { %6731 = vmatmul.bf16.gmra.mxu3 %v14177_v17  ;;  %v10689_v34 = vor.u32 %v11675_v63, %v10688_v27 }
 0x719   : > { %6909 = vmatpush.bf16.msra.mxu3 %v10949_v23  ;;  %v16628_v23 = vld [vmem:[#allocation38_spill] sm:$0xff] }
 0x71a   : > { %v6487_v29 = vpop.f32.mrf.mxu2  ;;  %6762 = vmatpush.bf16.msra.mxu0 %v10689_v34  ;;  %v10658_v34 = vld [vmem:[#allocation7 + $0xc70] sm:$0xf0] }
 0x71b   : > { %v6536_v61 = vpop.f32.mrf.mxu3  ;;  %v6391_v25 = vpop.f32.mrf.mxu0  ;;  %v10661_v35 = vor.u32 %v11663_v51, %v10658_v34  ;;  %v11731_v51 = vld [vmem:[#allocation7 + $0xe6c] sm:$0xf0] }
 0x71c   : > { %v6537_v16 = vadd.f32 %v6536_v61, %v6487_v29  ;;  %v6440_v6 = vpop.f32.mrf.mxu1  ;;  %v16627_v61 = vld [vmem:[#allocation37_spill] sm:$0xff]  ;;  %v10913_v13 = vor.u32 %v11731_v51, %v10912_v14  ;;  %v11655_v14 = vld [vmem:[#allocation7 + $0xc14] sm:$0xf] }
 0x71d   : > { %v6441_v39 = vadd.f32 %v6440_v6, %v6391_v25  ;;  %6861 = vmatpush.bf16.msra.mxu2 %v10661_v35 }
 0x71e   : > { %v14372_v41 = vadd.f32 %v6537_v16, %v16625_v0  ;;  %6812 = vmatpush.bf16.msra.mxu1 %v10913_v13 }
 0x71f   : > { %v14375_v5 = vadd.f32 %v6441_v39, %v16626_v46  ;;  %v10914_v39 = vld [vmem:[#allocation7 + $0xe70] sm:$0xf0] }
 0x722   : > { %v6489_v32 = vpop.f32.mrf.mxu2 }
 0x723   : > { %v6538_v9 = vpop.f32.mrf.mxu3  ;;  %v6394_v52 = vpop.f32.mrf.mxu0 }
 0x724   : > { %v6539_v29 = vadd.f32 %v6538_v9, %v6489_v32  ;;  %v6443_v28 = vpop.f32.mrf.mxu1  ;;  %v11727_v9 = vld [vmem:[#allocation7 + $0xe54] sm:$0xf] }
 0x725   : > { %v6444_v38 = vadd.f32 %v6443_v28, %v6394_v52  ;;  %v10917_v27 = vor.u32 %v11727_v9, %v10914_v39  ;;  %v16630_v52 = vld [vmem:[#allocation39_spill] sm:$0xff]  ;;  %v16632_v28 = vld [vmem:[#allocation40_spill] sm:$0xff] }
 0x726   : > { %v14378_v25 = vadd.f32 %v6539_v29, %v16627_v61  ;;  %6589 = vmatmul.bf16.gmra.mxu0 %v14204_v8  ;;  %v10656_v61 = vld [vmem:[#allocation7 + $0xc50] sm:$0xf] }
 0x727   : > { %v14382_v16 = vadd.f32 %v6444_v38, %v16628_v23  ;;  %6638 = vmatmul.bf16.gmra.mxu1 %v14207_v22  ;;  %6687 = vmatmul.bf16.gmra.mxu2 %v14204_v8  ;;  %v11667_v23 = vld [vmem:[#allocation7 + $0xc6c] sm:$0xf0] }
 0x728   : > { %6736 = vmatmul.bf16.gmra.mxu3 %v14207_v22  ;;  %v10657_v48 = vor.u32 %v11667_v23, %v10656_v61 }
 0x729   : > { %16629 = vst [vmem:[#allocation120_spill] sm:$0xff] %v14382_v16  ;;  %6910 = vmatpush.bf16.msra.mxu3 %v10917_v27  ;;  %v16636_v27 = vld [vmem:[#allocation42_spill] sm:$0xff] }
 0x72a   : > { %v6492_v6 = vpop.f32.mrf.mxu2  ;;  %6763 = vmatpush.bf16.msra.mxu0 %v10657_v48  ;;  %v10626_v48 = vld [vmem:[#allocation7 + $0xc30] sm:$0xf0] }
 0x72b   : > { %v6541_v0 = vpop.f32.mrf.mxu3  ;;  %v6396_v46 = vpop.f32.mrf.mxu0  ;;  %v10629_v13 = vor.u32 %v11655_v14, %v10626_v48  ;;  %v11723_v14 = vld [vmem:[#allocation7 + $0xe2c] sm:$0xf0] }
 0x72c   : > { %v6542_v63 = vadd.f32 %v6541_v0, %v6492_v6  ;;  %v6445_v36 = vpop.f32.mrf.mxu1  ;;  %v16634_v0 = vld [vmem:[#allocation41_spill] sm:$0xff] }
 0x72d   : > { %v6446_v32 = vadd.f32 %v6445_v36, %v6396_v46  ;;  %6862 = vmatpush.bf16.msra.mxu2 %v10629_v13 }
 0x72e   : > { %v14388_v29 = vadd.f32 %v6542_v63, %v16630_v52 }
 0x72f   : > { %v14391_v38 = vadd.f32 %v6446_v32, %v16632_v28  ;;  %v10882_v32 = vld [vmem:[#allocation7 + $0xe30] sm:$0xf0] }
 0x730   : > { %16631 = vst [vmem:[#allocation121_spill] sm:$0xff] %v14388_v29 }
 0x731   : > { %16633 = vst [vmem:[#allocation122_spill] sm:$0xff] %v14391_v38 }
 0x732   : > { %v6494_v34 = vpop.f32.mrf.mxu2 }
 0x733   : > { %v6543_v16 = vpop.f32.mrf.mxu3  ;;  %v6399_v9 = vpop.f32.mrf.mxu0 }
 0x734   : > { %v6544_v6 = vadd.f32 %v6543_v16, %v6494_v34  ;;  %v6448_v35 = vpop.f32.mrf.mxu1  ;;  %v11719_v16 = vld [vmem:[#allocation7 + $0xe14] sm:$0xf] }
 0x735   : > { %v6449_v39 = vadd.f32 %v6448_v35, %v6399_v9  ;;  %v10885_v61 = vor.u32 %v11719_v16, %v10882_v32  ;;  %v16638_v9 = vld [vmem:[#allocation43_spill] sm:$0xff]  ;;  %v16640_v35 = vld [vmem:[#allocation44_spill] sm:$0xff] }
 0x736   : > { %v14394_v46 = vadd.f32 %v6544_v6, %v16634_v0  ;;  %6594 = vmatmul.bf16.gmra.mxu0 %v14234_v54  ;;  %v10624_v0 = vld [vmem:[#allocation7 + $0xc10] sm:$0xf] }
 0x737   : > { %v14398_v63 = vadd.f32 %v6449_v39, %v16636_v27  ;;  %6643 = vmatmul.bf16.gmra.mxu1 %v14237_v37  ;;  %6692 = vmatmul.bf16.gmra.mxu2 %v14234_v54  ;;  %v11659_v27 = vld [vmem:[#allocation7 + $0xc2c] sm:$0xf0] }
 0x738   : > { %16635 = vst [vmem:[#allocation32_spill] sm:$0xff] %v14394_v46  ;;  %6741 = vmatmul.bf16.gmra.mxu3 %v14237_v37  ;;  %v10625_v46 = vor.u32 %v11659_v27, %v10624_v0 }
 0x739   : > { %16637 = vst [vmem:[#allocation33_spill] sm:$0xff] %v14398_v63  ;;  %6911 = vmatpush.bf16.msra.mxu3 %v10885_v61  ;;  %v10880_v63 = vld [vmem:[#allocation7 + $0xe10] sm:$0xf]  ;;  %v16644_v61 = vld [vmem:[#allocation46_spill] sm:$0xff] }
 0x73a   : > { %v6497_v36 = vpop.f32.mrf.mxu2  ;;  %v10881_v38 = vor.u32 %v11723_v14, %v10880_v63  ;;  %6764 = vmatpush.bf16.msra.mxu0 %v10625_v46  ;;  %v11712_v63 = vld [vmem:[#allocation7 + $0xddc] sm:$0xf] }
 0x73b   : > { %v6546_v52 = vpop.f32.mrf.mxu3  ;;  %v6401_v28 = vpop.f32.mrf.mxu0  ;;  %v10858_v46 = vld [vmem:[#allocation7 + $0xdf8] sm:$0xf0] }
 0x73c   : > { %v6547_v23 = vadd.f32 %v6546_v52, %v6497_v36  ;;  %v6450_v51 = vpop.f32.mrf.mxu1  ;;  %6813 = vmatpush.bf16.msra.mxu1 %v10881_v38  ;;  %v16642_v52 = vld [vmem:[#allocation45_spill] sm:$0xff]  ;;  %v10861_v38 = vor.u32 %v11712_v63, %v10858_v46 }
 0x73d   : > { %v6451_v34 = vadd.f32 %v6450_v51, %v6401_v28  ;;  %v11780_v63 = vld [vmem:[#allocation7 + $0xff4] sm:$0xf0] }
 0x73e   : > { %v14404_v6 = vadd.f32 %v6547_v23, %v16638_v9  ;;  %7051 = vmatpush.bf16.msrb.mxu2 %v10861_v38 }
 0x73f   : > { %v14407_v39 = vadd.f32 %v6451_v34, %v16640_v35  ;;  %v11114_v34 = vld [vmem:[#allocation7 + $0xff8] sm:$0xf0] }
 0x740   : > { %16639 = vst [vmem:[#allocation123_spill] sm:$0xff] %v14404_v6 }
 0x741   : > { %16641 = vst [vmem:[#allocation124_spill] sm:$0xff] %v14407_v39 }
 0x742   : > { %v6499_v48 = vpop.f32.mrf.mxu2 }
 0x743   : > { %v6548_v29 = vpop.f32.mrf.mxu3  ;;  %v6404_v16 = vpop.f32.mrf.mxu0 }
 0x744   : > { %v6549_v36 = vadd.f32 %v6548_v29, %v6499_v48  ;;  %v6453_v13 = vpop.f32.mrf.mxu1  ;;  %v11776_v29 = vld [vmem:[#allocation7 + $0xfdc] sm:$0xf] }
 0x745   : > { %v6454_v32 = vadd.f32 %v6453_v13, %v6404_v16  ;;  %v11117_v0 = vor.u32 %v11776_v29, %v11114_v34  ;;  %v16646_v16 = vld [vmem:[#allocation47_spill] sm:$0xff]  ;;  %v16648_v13 = vld [vmem:[#allocation48_spill] sm:$0xff] }
 0x746   : > { %v14410_v28 = vadd.f32 %v6549_v36, %v16642_v52  ;;  %6599 = vmatmul.bf16.gmra.mxu0 %v14264_v33  ;;  %v10856_v52 = vld [vmem:[#allocation7 + $0xdd8] sm:$0xf] }
 0x747   : > { %v14414_v23 = vadd.f32 %v6454_v32, %v16644_v61  ;;  %6648 = vmatmul.bf16.gmra.mxu1 %v14267_v19  ;;  %6697 = vmatmul.bf16.gmra.mxu2 %v14264_v33  ;;  %v11716_v61 = vld [vmem:[#allocation7 + $0xdf4] sm:$0xf0] }
 0x748   : > { %16643 = vst [vmem:[#allocation125_spill] sm:$0xff] %v14410_v28  ;;  %6746 = vmatmul.bf16.gmra.mxu3 %v14267_v19  ;;  %v10857_v28 = vor.u32 %v11716_v61, %v10856_v52 }
 0x749   : > { %16645 = vst [vmem:[#allocation126_spill] sm:$0xff] %v14414_v23  ;;  %7100 = vmatpush.bf16.msrb.mxu3 %v11117_v0  ;;  %v11112_v23 = vld [vmem:[#allocation7 + $0xfd8] sm:$0xf]  ;;  %v16652_v0 = vld [vmem:[#allocation50_spill] sm:$0xff] }
 0x74a   : > { %v6502_v51 = vpop.f32.mrf.mxu2  ;;  %v11113_v39 = vor.u32 %v11780_v63, %v11112_v23  ;;  %6953 = vmatpush.bf16.msrb.mxu0 %v10857_v28  ;;  %v11704_v23 = vld [vmem:[#allocation7 + $0xd9c] sm:$0xf] }
 0x74b   : > { %v6551_v9 = vpop.f32.mrf.mxu3  ;;  %v6406_v35 = vpop.f32.mrf.mxu0  ;;  %v10826_v28 = vld [vmem:[#allocation7 + $0xdb8] sm:$0xf0] }
 0x74c   : > { %v6552_v27 = vadd.f32 %v6551_v9, %v6502_v51  ;;  %v6455_v14 = vpop.f32.mrf.mxu1  ;;  %7002 = vmatpush.bf16.msrb.mxu1 %v11113_v39  ;;  %v16650_v9 = vld [vmem:[#allocation49_spill] sm:$0xff]  ;;  %v10829_v39 = vor.u32 %v11704_v23, %v10826_v28 }
 0x74d   : > { %v6456_v48 = vadd.f32 %v6455_v14, %v6406_v35  ;;  %v11772_v23 = vld [vmem:[#allocation7 + $0xfb4] sm:$0xf0] }
 0x74e   : > { %v14420_v36 = vadd.f32 %v6552_v27, %v16646_v16  ;;  %7052 = vmatpush.bf16.msrb.mxu2 %v10829_v39 }
 0x74f   : > { %v14423_v32 = vadd.f32 %v6456_v48, %v16648_v13  ;;  %v11082_v48 = vld [vmem:[#allocation7 + $0xfb8] sm:$0xf0] }
 0x750   : > { %16647 = vst [vmem:[#allocation35_spill] sm:$0xff] %v14420_v36 }
 0x751   : > { %16649 = vst [vmem:[#allocation127_spill] sm:$0xff] %v14423_v32 }
 0x752   : > { %v6504_v46 = vpop.f32.mrf.mxu2 }
 0x753   : > { %v6553_v6 = vpop.f32.mrf.mxu3  ;;  %v6409_v29 = vpop.f32.mrf.mxu0 }
 0x754   : > { %v6554_v51 = vadd.f32 %v6553_v6, %v6504_v46  ;;  %v6458_v38 = vpop.f32.mrf.mxu1  ;;  %v11768_v6 = vld [vmem:[#allocation7 + $0xf9c] sm:$0xf] }
 0x755   : > { %v6459_v34 = vadd.f32 %v6458_v38, %v6409_v29  ;;  %v11085_v52 = vor.u32 %v11768_v6, %v11082_v48  ;;  %v16654_v29 = vld [vmem:[#allocation51_spill] sm:$0xff]  ;;  %v16656_v38 = vld [vmem:[#allocation52_spill] sm:$0xff] }
 0x756   : > { %v14426_v35 = vadd.f32 %v6554_v51, %v16650_v9  ;;  %6604 = vmatmul.bf16.gmra.mxu0 %v14292_v24  ;;  %v10824_v9 = vld [vmem:[#allocation7 + $0xd98] sm:$0xf] }
 0x757   : > { %v14430_v27 = vadd.f32 %v6459_v34, %v16652_v0  ;;  %6653 = vmatmul.bf16.gmra.mxu1 %v14295_v56  ;;  %6702 = vmatmul.bf16.gmra.mxu2 %v14292_v24  ;;  %v11708_v0 = vld [vmem:[#allocation7 + $0xdb4] sm:$0xf0] }
 0x758   : > { %16651 = vst [vmem:[#allocation128_spill] sm:$0xff] %v14426_v35  ;;  %6751 = vmatmul.bf16.gmra.mxu3 %v14295_v56  ;;  %v10825_v35 = vor.u32 %v11708_v0, %v10824_v9 }
 0x759   : > { %16653 = vst [vmem:[#allocation34_spill] sm:$0xff] %v14430_v27  ;;  %7101 = vmatpush.bf16.msrb.mxu3 %v11085_v52  ;;  %v11080_v27 = vld [vmem:[#allocation7 + $0xf98] sm:$0xf]  ;;  %v16660_v52 = vld [vmem:[#allocation54_spill] sm:$0xff] }
 0x75a   : > { %v6507_v14 = vpop.f32.mrf.mxu2  ;;  %v11081_v32 = vor.u32 %v11772_v23, %v11080_v27  ;;  %6954 = vmatpush.bf16.msrb.mxu0 %v10825_v35  ;;  %v11696_v27 = vld [vmem:[#allocation7 + $0xd5c] sm:$0xf] }
 0x75b   : > { %v6556_v16 = vpop.f32.mrf.mxu3  ;;  %v6411_v13 = vpop.f32.mrf.mxu0  ;;  %v10794_v35 = vld [vmem:[#allocation7 + $0xd78] sm:$0xf0] }
 0x75c   : > { %v6557_v61 = vadd.f32 %v6556_v16, %v6507_v14  ;;  %v6460_v63 = vpop.f32.mrf.mxu1  ;;  %7003 = vmatpush.bf16.msrb.mxu1 %v11081_v32  ;;  %v16658_v16 = vld [vmem:[#allocation53_spill] sm:$0xff]  ;;  %v10797_v32 = vor.u32 %v11696_v27, %v10794_v35 }
 0x75d   : > { %v6461_v46 = vadd.f32 %v6460_v63, %v6411_v13  ;;  %v11764_v27 = vld [vmem:[#allocation7 + $0xf74] sm:$0xf0] }
 0x75e   : > { %v14436_v51 = vadd.f32 %v6557_v61, %v16654_v29  ;;  %7053 = vmatpush.bf16.msrb.mxu2 %v10797_v32 }
 0x75f   : > { %v14439_v34 = vadd.f32 %v6461_v46, %v16656_v38  ;;  %v11050_v46 = vld [vmem:[#allocation7 + $0xf78] sm:$0xf0] }
 0x760   : > { %16655 = vst [vmem:[#allocation129_spill] sm:$0xff] %v14436_v51 }
 0x761   : > { %16657 = vst [vmem:[#allocation130_spill] sm:$0xff] %v14439_v34 }
 0x762   : > { %v6509_v28 = vpop.f32.mrf.mxu2 }
 0x763   : > { %v6558_v36 = vpop.f32.mrf.mxu3  ;;  %v6570_v6 = vpop.f32.mrf.mxu0 }
 0x764   : > { %v6559_v14 = vadd.f32 %v6558_v36, %v6509_v28  ;;  %v6619_v39 = vpop.f32.mrf.mxu1  ;;  %v11760_v36 = vld [vmem:[#allocation7 + $0xf5c] sm:$0xf] }
 0x765   : > { %v6620_v48 = vadd.f32 %v6619_v39, %v6570_v6  ;;  %v11053_v9 = vor.u32 %v11760_v36, %v11050_v46  ;;  %v16662_v6 = vld [vmem:[#allocation55_spill] sm:$0xff]  ;;  %v16664_v39 = vld [vmem:[#allocation56_spill] sm:$0xff] }
 0x766   : > { %v14442_v13 = vadd.f32 %v6559_v14, %v16658_v16  ;;  %6765 = vmatmul.bf16.vlgmr.msra.gmra.mxu0 %v14084_v26  ;;  %v10792_v16 = vld [vmem:[#allocation7 + $0xd58] sm:$0xf] }
 0x767   : > { %v14446_v61 = vadd.f32 %v6620_v48, %v16660_v52  ;;  %6814 = vmatmul.bf16.vlgmr.msra.gmra.mxu1 %v14087_v58  ;;  %6863 = vmatmul.bf16.vlgmr.msra.gmra.mxu2 %v14084_v26  ;;  %v11700_v52 = vld [vmem:[#allocation7 + $0xd74] sm:$0xf0] }
 0x768   : > { %16659 = vst [vmem:[#allocation131_spill] sm:$0xff] %v14442_v13  ;;  %6912 = vmatmul.bf16.vlgmr.msra.gmra.mxu3 %v14087_v58  ;;  %v10793_v13 = vor.u32 %v11700_v52, %v10792_v16 }
 0x769   : > { %16661 = vst [vmem:[#allocation132_spill] sm:$0xff] %v14446_v61  ;;  %7102 = vmatpush.bf16.msrb.mxu3 %v11053_v9  ;;  %v11048_v61 = vld [vmem:[#allocation7 + $0xf58] sm:$0xf]  ;;  %v16668_v9 = vld [vmem:[#allocation58_spill] sm:$0xff] }
 0x76a   : > { %v6668_v63 = vpop.f32.mrf.mxu2  ;;  %v11049_v34 = vor.u32 %v11764_v27, %v11048_v61  ;;  %6955 = vmatpush.bf16.msrb.mxu0 %v10793_v13  ;;  %v11688_v61 = vld [vmem:[#allocation7 + $0xd1c] sm:$0xf] }
 0x76b   : > { %v6717_v29 = vpop.f32.mrf.mxu3  ;;  %v6572_v38 = vpop.f32.mrf.mxu0  ;;  %v10762_v13 = vld [vmem:[#allocation7 + $0xd38] sm:$0xf0] }
 0x76c   : > { %v6718_v0 = vadd.f32 %v6717_v29, %v6668_v63  ;;  %v6621_v23 = vpop.f32.mrf.mxu1  ;;  %7004 = vmatpush.bf16.msrb.mxu1 %v11049_v34  ;;  %v16666_v29 = vld [vmem:[#allocation57_spill] sm:$0xff]  ;;  %v10765_v34 = vor.u32 %v11688_v61, %v10762_v13 }
 0x76d   : > { %v6622_v28 = vadd.f32 %v6621_v23, %v6572_v38  ;;  %v11756_v61 = vld [vmem:[#allocation7 + $0xf34] sm:$0xf0] }
 0x76e   : > { %v14452_v14 = vadd.f32 %v6718_v0, %v16662_v6  ;;  %7054 = vmatpush.bf16.msrb.mxu2 %v10765_v34 }
 0x76f   : > { %v14455_v48 = vadd.f32 %v6622_v28, %v16664_v39  ;;  %v11018_v28 = vld [vmem:[#allocation7 + $0xf38] sm:$0xf0] }
 0x770   : > { %16663 = vst [vmem:[#allocation133_spill] sm:$0xff] %v14452_v14 }
 0x771   : > { %16665 = vst [vmem:[#allocation134_spill] sm:$0xff] %v14455_v48 }
 0x772   : > { %v6670_v35 = vpop.f32.mrf.mxu2 }
 0x773   : > { %v6719_v51 = vpop.f32.mrf.mxu3  ;;  %v6575_v36 = vpop.f32.mrf.mxu0 }
 0x774   : > { %v6720_v63 = vadd.f32 %v6719_v51, %v6670_v35  ;;  %v6624_v32 = vpop.f32.mrf.mxu1  ;;  %v11752_v51 = vld [vmem:[#allocation7 + $0xf1c] sm:$0xf] }
 0x775   : > { %v6625_v46 = vadd.f32 %v6624_v32, %v6575_v36  ;;  %v11021_v16 = vor.u32 %v11752_v51, %v11018_v28  ;;  %v16670_v36 = vld [vmem:[#allocation59_spill] sm:$0xff]  ;;  %v16672_v32 = vld [vmem:[#allocation60_spill] sm:$0xff] }
 0x776   : > { %v14458_v38 = vadd.f32 %v6720_v63, %v16666_v29  ;;  %6770 = vmatmul.bf16.gmra.mxu0 %v14114_v30  ;;  %v10760_v29 = vld [vmem:[#allocation7 + $0xd18] sm:$0xf] }
 0x777   : > { %v14462_v0 = vadd.f32 %v6625_v46, %v16668_v9  ;;  %6819 = vmatmul.bf16.gmra.mxu1 %v14117_v59  ;;  %6868 = vmatmul.bf16.gmra.mxu2 %v14114_v30  ;;  %v11692_v9 = vld [vmem:[#allocation7 + $0xd34] sm:$0xf0] }
 0x778   : > { %16667 = vst [vmem:[#allocation36_spill] sm:$0xff] %v14458_v38  ;;  %6917 = vmatmul.bf16.gmra.mxu3 %v14117_v59  ;;  %v10761_v38 = vor.u32 %v11692_v9, %v10760_v29 }
 0x779   : > { %16669 = vst [vmem:[#allocation135_spill] sm:$0xff] %v14462_v0  ;;  %7103 = vmatpush.bf16.msrb.mxu3 %v11021_v16  ;;  %v11016_v0 = vld [vmem:[#allocation7 + $0xf18] sm:$0xf]  ;;  %v16676_v16 = vld [vmem:[#allocation62_spill] sm:$0xff] }
 0x77a   : > { %v6673_v23 = vpop.f32.mrf.mxu2  ;;  %v11017_v48 = vor.u32 %v11756_v61, %v11016_v0  ;;  %6956 = vmatpush.bf16.msrb.mxu0 %v10761_v38  ;;  %v11680_v0 = vld [vmem:[#allocation7 + $0xcdc] sm:$0xf] }
 0x77b   : > { %v6722_v6 = vpop.f32.mrf.mxu3  ;;  %v6577_v39 = vpop.f32.mrf.mxu0  ;;  %v10730_v38 = vld [vmem:[#allocation7 + $0xcf8] sm:$0xf0] }
 0x77c   : > { %v6723_v52 = vadd.f32 %v6722_v6, %v6673_v23  ;;  %v6626_v27 = vpop.f32.mrf.mxu1  ;;  %7005 = vmatpush.bf16.msrb.mxu1 %v11017_v48  ;;  %v16674_v6 = vld [vmem:[#allocation61_spill] sm:$0xff]  ;;  %v10733_v48 = vor.u32 %v11680_v0, %v10730_v38 }
 0x77d   : > { %v6627_v35 = vadd.f32 %v6626_v27, %v6577_v39  ;;  %v11748_v0 = vld [vmem:[#allocation7 + $0xef4] sm:$0xf0] }
 0x77e   : > { %v14468_v63 = vadd.f32 %v6723_v52, %v16670_v36  ;;  %7055 = vmatpush.bf16.msrb.mxu2 %v10733_v48 }
 0x77f   : > { %v14471_v46 = vadd.f32 %v6627_v35, %v16672_v32  ;;  %v10986_v35 = vld [vmem:[#allocation7 + $0xef8] sm:$0xf0] }
 0x780   : > { %16671 = vst [vmem:[#allocation37_spill] sm:$0xff] %v14468_v63 }
 0x781   : > { %16673 = vst [vmem:[#allocation38_spill] sm:$0xff] %v14471_v46 }
 0x782   : > { %v6675_v13 = vpop.f32.mrf.mxu2 }
 0x783   : > { %v6724_v14 = vpop.f32.mrf.mxu3  ;;  %v6580_v51 = vpop.f32.mrf.mxu0 }
 0x784   : > { %v6725_v23 = vadd.f32 %v6724_v14, %v6675_v13  ;;  %v6629_v34 = vpop.f32.mrf.mxu1  ;;  %v11744_v14 = vld [vmem:[#allocation7 + $0xedc] sm:$0xf] }
 0x785   : > { %v6630_v28 = vadd.f32 %v6629_v34, %v6580_v51  ;;  %v10989_v29 = vor.u32 %v11744_v14, %v10986_v35  ;;  %v16678_v51 = vld [vmem:[#allocation63_spill] sm:$0xff]  ;;  %v16680_v34 = vld [vmem:[#allocation64_spill] sm:$0xff] }
 0x786   : > { %v14474_v39 = vadd.f32 %v6725_v23, %v16674_v6  ;;  %6775 = vmatmul.bf16.gmra.mxu0 %v14144_v55  ;;  %v10728_v6 = vld [vmem:[#allocation7 + $0xcd8] sm:$0xf] }
 0x787   : > { %v14478_v52 = vadd.f32 %v6630_v28, %v16676_v16  ;;  %6824 = vmatmul.bf16.gmra.mxu1 %v14147_v4  ;;  %6873 = vmatmul.bf16.gmra.mxu2 %v14144_v55  ;;  %v11684_v16 = vld [vmem:[#allocation7 + $0xcf4] sm:$0xf0] }
 0x788   : > { %16675 = vst [vmem:[#allocation39_spill] sm:$0xff] %v14474_v39  ;;  %6922 = vmatmul.bf16.gmra.mxu3 %v14147_v4  ;;  %v10729_v39 = vor.u32 %v11684_v16, %v10728_v6 }
 0x789   : > { %16677 = vst [vmem:[#allocation40_spill] sm:$0xff] %v14478_v52  ;;  %7104 = vmatpush.bf16.msrb.mxu3 %v10989_v29  ;;  %v10984_v52 = vld [vmem:[#allocation7 + $0xed8] sm:$0xf]  ;;  %v16684_v29 = vld [vmem:[#allocation66_spill] sm:$0xff] }
 0x78a   : > { %v6678_v27 = vpop.f32.mrf.mxu2  ;;  %v10985_v46 = vor.u32 %v11748_v0, %v10984_v52  ;;  %6957 = vmatpush.bf16.msrb.mxu0 %v10729_v39  ;;  %v11672_v52 = vld [vmem:[#allocation7 + $0xc9c] sm:$0xf] }
 0x78b   : > { %v6727_v36 = vpop.f32.mrf.mxu3  ;;  %v6582_v32 = vpop.f32.mrf.mxu0  ;;  %v10698_v39 = vld [vmem:[#allocation7 + $0xcb8] sm:$0xf0] }
 0x78c   : > { %v6728_v9 = vadd.f32 %v6727_v36, %v6678_v27  ;;  %v6631_v61 = vpop.f32.mrf.mxu1  ;;  %7006 = vmatpush.bf16.msrb.mxu1 %v10985_v46  ;;  %v16682_v36 = vld [vmem:[#allocation65_spill] sm:$0xff]  ;;  %v10701_v46 = vor.u32 %v11672_v52, %v10698_v39 }
 0x78d   : > { %v6632_v13 = vadd.f32 %v6631_v61, %v6582_v32  ;;  %v11740_v52 = vld [vmem:[#allocation7 + $0xeb4] sm:$0xf0] }
 0x78e   : > { %v14484_v23 = vadd.f32 %v6728_v9, %v16678_v51  ;;  %7056 = vmatpush.bf16.msrb.mxu2 %v10701_v46 }
 0x78f   : > { %v14487_v28 = vadd.f32 %v6632_v13, %v16680_v34  ;;  %v10954_v13 = vld [vmem:[#allocation7 + $0xeb8] sm:$0xf0] }
 0x790   : > { %16679 = vst [vmem:[#allocation41_spill] sm:$0xff] %v14484_v23 }
 0x791   : > { %16681 = vst [vmem:[#allocation42_spill] sm:$0xff] %v14487_v28 }
 0x792   : > { %v6680_v38 = vpop.f32.mrf.mxu2 }
 0x793   : > { %v6729_v63 = vpop.f32.mrf.mxu3  ;;  %v6585_v14 = vpop.f32.mrf.mxu0 }
 0x794   : > { %v6730_v27 = vadd.f32 %v6729_v63, %v6680_v38  ;;  %v6634_v48 = vpop.f32.mrf.mxu1  ;;  %v11736_v63 = vld [vmem:[#allocation7 + $0xe9c] sm:$0xf] }
 0x795   : > { %v6635_v35 = vadd.f32 %v6634_v48, %v6585_v14  ;;  %v10957_v6 = vor.u32 %v11736_v63, %v10954_v13  ;;  %v16686_v14 = vld [vmem:[#allocation67_spill] sm:$0xff]  ;;  %v16688_v48 = vld [vmem:[#allocation68_spill] sm:$0xff] }
 0x796   : > { %v14490_v32 = vadd.f32 %v6730_v27, %v16682_v36  ;;  %6780 = vmatmul.bf16.gmra.mxu0 %v14174_v15  ;;  %v10696_v36 = vld [vmem:[#allocation7 + $0xc98] sm:$0xf] }
 0x797   : > { %v14494_v9 = vadd.f32 %v6635_v35, %v16684_v29  ;;  %6829 = vmatmul.bf16.gmra.mxu1 %v14177_v17  ;;  %6878 = vmatmul.bf16.gmra.mxu2 %v14174_v15  ;;  %v11676_v29 = vld [vmem:[#allocation7 + $0xcb4] sm:$0xf0] }
 0x798   : > { %16683 = vst [vmem:[#allocation43_spill] sm:$0xff] %v14490_v32  ;;  %6927 = vmatmul.bf16.gmra.mxu3 %v14177_v17  ;;  %v10697_v32 = vor.u32 %v11676_v29, %v10696_v36 }
 0x799   : > { %16685 = vst [vmem:[#allocation44_spill] sm:$0xff] %v14494_v9  ;;  %7105 = vmatpush.bf16.msrb.mxu3 %v10957_v6  ;;  %v10952_v9 = vld [vmem:[#allocation7 + $0xe98] sm:$0xf]  ;;  %v16692_v6 = vld [vmem:[#allocation70_spill] sm:$0xff] }
 0x79a   : > { %v6683_v61 = vpop.f32.mrf.mxu2  ;;  %v10953_v28 = vor.u32 %v11740_v52, %v10952_v9  ;;  %6958 = vmatpush.bf16.msrb.mxu0 %v10697_v32  ;;  %v11664_v9 = vld [vmem:[#allocation7 + $0xc5c] sm:$0xf] }
 0x79b   : > { %v6732_v51 = vpop.f32.mrf.mxu3  ;;  %v6587_v34 = vpop.f32.mrf.mxu0  ;;  %v10666_v32 = vld [vmem:[#allocation7 + $0xc78] sm:$0xf0] }
 0x79c   : > { %v6733_v16 = vadd.f32 %v6732_v51, %v6683_v61  ;;  %v6636_v0 = vpop.f32.mrf.mxu1  ;;  %7007 = vmatpush.bf16.msrb.mxu1 %v10953_v28  ;;  %v16690_v51 = vld [vmem:[#allocation69_spill] sm:$0xff]  ;;  %v10669_v28 = vor.u32 %v11664_v9, %v10666_v32 }
 0x79d   : > { %v6637_v38 = vadd.f32 %v6636_v0, %v6587_v34  ;;  %v11732_v9 = vld [vmem:[#allocation7 + $0xe74] sm:$0xf0] }
 0x79e   : > { %v14500_v27 = vadd.f32 %v6733_v16, %v16686_v14  ;;  %7057 = vmatpush.bf16.msrb.mxu2 %v10669_v28 }
 0x79f   : > { %v14503_v35 = vadd.f32 %v6637_v38, %v16688_v48  ;;  %v10922_v38 = vld [vmem:[#allocation7 + $0xe78] sm:$0xf0] }
 0x7a0   : > { %16687 = vst [vmem:[#allocation45_spill] sm:$0xff] %v14500_v27 }
 0x7a1   : > { %16689 = vst [vmem:[#allocation46_spill] sm:$0xff] %v14503_v35 }
 0x7a2   : > { %v6685_v39 = vpop.f32.mrf.mxu2 }
 0x7a3   : > { %v6734_v23 = vpop.f32.mrf.mxu3  ;;  %v6590_v63 = vpop.f32.mrf.mxu0 }
 0x7a4   : > { %v6735_v61 = vadd.f32 %v6734_v23, %v6685_v39  ;;  %v6639_v46 = vpop.f32.mrf.mxu1  ;;  %v11728_v23 = vld [vmem:[#allocation7 + $0xe5c] sm:$0xf] }
 0x7a5   : > { %v6640_v13 = vadd.f32 %v6639_v46, %v6590_v63  ;;  %v10925_v36 = vor.u32 %v11728_v23, %v10922_v38  ;;  %v16694_v63 = vld [vmem:[#allocation71_spill] sm:$0xff]  ;;  %v16696_v46 = vld [vmem:[#allocation72_spill] sm:$0xff] }
 0x7a6   : > { %v14506_v34 = vadd.f32 %v6735_v61, %v16690_v51  ;;  %6785 = vmatmul.bf16.gmra.mxu0 %v14204_v8  ;;  %v10664_v51 = vld [vmem:[#allocation7 + $0xc58] sm:$0xf] }
 0x7a7   : > { %v14510_v16 = vadd.f32 %v6640_v13, %v16692_v6  ;;  %6834 = vmatmul.bf16.gmra.mxu1 %v14207_v22  ;;  %6883 = vmatmul.bf16.gmra.mxu2 %v14204_v8  ;;  %v11668_v6 = vld [vmem:[#allocation7 + $0xc74] sm:$0xf0] }
 0x7a8   : > { %16691 = vst [vmem:[#allocation47_spill] sm:$0xff] %v14506_v34  ;;  %6932 = vmatmul.bf16.gmra.mxu3 %v14207_v22  ;;  %v10665_v34 = vor.u32 %v11668_v6, %v10664_v51 }
 0x7a9   : > { %16693 = vst [vmem:[#allocation48_spill] sm:$0xff] %v14510_v16  ;;  %7106 = vmatpush.bf16.msrb.mxu3 %v10925_v36  ;;  %v10920_v16 = vld [vmem:[#allocation7 + $0xe58] sm:$0xf]  ;;  %v16700_v36 = vld [vmem:[#allocation74_spill] sm:$0xff] }
 0x7aa   : > { %v6688_v0 = vpop.f32.mrf.mxu2  ;;  %v10921_v35 = vor.u32 %v11732_v9, %v10920_v16  ;;  %6959 = vmatpush.bf16.msrb.mxu0 %v10665_v34  ;;  %v11656_v16 = vld [vmem:[#allocation7 + $0xc1c] sm:$0xf] }
 0x7ab   : > { %v6737_v14 = vpop.f32.mrf.mxu3  ;;  %v6592_v48 = vpop.f32.mrf.mxu0  ;;  %v10634_v34 = vld [vmem:[#allocation7 + $0xc38] sm:$0xf0] }
 0x7ac   : > { %v6738_v29 = vadd.f32 %v6737_v14, %v6688_v0  ;;  %v6641_v52 = vpop.f32.mrf.mxu1  ;;  %7008 = vmatpush.bf16.msrb.mxu1 %v10921_v35  ;;  %v16698_v14 = vld [vmem:[#allocation73_spill] sm:$0xff]  ;;  %v10637_v35 = vor.u32 %v11656_v16, %v10634_v34 }
 0x7ad   : > { %v6642_v39 = vadd.f32 %v6641_v52, %v6592_v48  ;;  %v11724_v16 = vld [vmem:[#allocation7 + $0xe34] sm:$0xf0] }
 0x7ae   : > { %v14516_v61 = vadd.f32 %v6738_v29, %v16694_v63  ;;  %7058 = vmatpush.bf16.msrb.mxu2 %v10637_v35 }
 0x7af   : > { %v14519_v13 = vadd.f32 %v6642_v39, %v16696_v46  ;;  %v10890_v39 = vld [vmem:[#allocation7 + $0xe38] sm:$0xf0] }
 0x7b0   : > { %16695 = vst [vmem:[#allocation49_spill] sm:$0xff] %v14516_v61  ;;  %v16741_v61 = vld [vmem:[#allocation133_spill] sm:$0xff] }
 0x7b1   : > { %16697 = vst [vmem:[#allocation50_spill] sm:$0xff] %v14519_v13 }
 0x7b2   : > { %v6690_v32 = vpop.f32.mrf.mxu2 }
 0x7b3   : > { %v6739_v27 = vpop.f32.mrf.mxu3  ;;  %v6595_v23 = vpop.f32.mrf.mxu0 }
 0x7b4   : > { %v6740_v0 = vadd.f32 %v6739_v27, %v6690_v32  ;;  %v6644_v28 = vpop.f32.mrf.mxu1  ;;  %v11720_v27 = vld [vmem:[#allocation7 + $0xe1c] sm:$0xf] }
 0x7b5   : > { %v6645_v38 = vadd.f32 %v6644_v28, %v6595_v23  ;;  %v10893_v51 = vor.u32 %v11720_v27, %v10890_v39  ;;  %v10632_v28 = vld [vmem:[#allocation7 + $0xc18] sm:$0xf] }
 0x7b6   : > { %v14522_v48 = vadd.f32 %v6740_v0, %v16698_v14  ;;  %6790 = vmatmul.bf16.gmra.mxu0 %v14234_v54  ;;  %v10888_v14 = vld [vmem:[#allocation7 + $0xe18] sm:$0xf] }
 0x7b7   : > { %v14526_v29 = vadd.f32 %v6645_v38, %v16700_v36  ;;  %6839 = vmatmul.bf16.gmra.mxu1 %v14237_v37  ;;  %6888 = vmatmul.bf16.gmra.mxu2 %v14234_v54  ;;  %v11660_v38 = vld [vmem:[#allocation7 + $0xc34] sm:$0xf0] }
 0x7b8   : > { %16699 = vst [vmem:[#allocation51_spill] sm:$0xff] %v14522_v48  ;;  %6937 = vmatmul.bf16.gmra.mxu3 %v14237_v37  ;;  %v10633_v36 = vor.u32 %v11660_v38, %v10632_v28 }
 0x7b9   : > { %16701 = vst [vmem:[#allocation52_spill] sm:$0xff] %v14526_v29  ;;  %7107 = vmatpush.bf16.msrb.mxu3 %v10893_v51  ;;  %v10889_v29 = vor.u32 %v11724_v16, %v10888_v14 }
 0x7ba   : > { %v6693_v52 = vpop.f32.mrf.mxu2  ;;  %6960 = vmatpush.bf16.msrb.mxu0 %v10633_v36 }
 0x7bb   : > { %v6742_v63 = vpop.f32.mrf.mxu3  ;;  %v6597_v46 = vpop.f32.mrf.mxu0  ;;  %7009 = vmatpush.bf16.msrb.mxu1 %v10889_v29 }
 0x7bc   : > { %v6743_v6 = vadd.f32 %v6742_v63, %v6693_v52  ;;  %v6646_v9 = vpop.f32.mrf.mxu1  ;;  %v16704_v63 = vld [vmem:[#allocation75_spill] sm:$0xff] }
 0x7bd   : > { %v6647_v32 = vadd.f32 %v6646_v9, %v6597_v46 }
 0x7be   : > { %v14532_v23 = vadd.f32 %v6743_v6, %v13902_v3 }
 0x7bf   : > { %v14535_v0 = vadd.f32 %v6647_v32, %v13905_v57  ;;  %v16706_v57 = vld [vmem:[#allocation76_spill] sm:$0xff] }
 0x7c0   : > { %16702 = vst [vmem:[#allocation53_spill] sm:$0xff] %v14532_v23  ;;  %v16739_v23 = vld [vmem:[#allocation132_spill] sm:$0xff] }
 0x7c1   : > { %16703 = vst [vmem:[#allocation54_spill] sm:$0xff] %v14535_v0 }
 0x7c2   : > { %v6695_v34 = vpop.f32.mrf.mxu2 }
 0x7c3   : > { %v6744_v48 = vpop.f32.mrf.mxu3  ;;  %v6600_v27 = vpop.f32.mrf.mxu0 }
 0x7c4   : > { %v6745_v52 = vadd.f32 %v6744_v48, %v6695_v34  ;;  %v6649_v35 = vpop.f32.mrf.mxu1 }
 0x7c5   : > { %v6650_v39 = vadd.f32 %v6649_v35, %v6600_v27  ;;  %v16710_v35 = vld [vmem:[#allocation77_spill] sm:$0xff] }
 0x7c6   : > { %v14538_v3 = vadd.f32 %v6745_v52, %v16704_v63  ;;  %6795 = vmatmul.bf16.gmra.mxu0 %v14264_v33  ;;  %v16712_v63 = vld [vmem:[#allocation78_spill] sm:$0xff] }
 0x7c7   : > { %v14542_v46 = vadd.f32 %v6650_v39, %v16706_v57  ;;  %6844 = vmatmul.bf16.gmra.mxu1 %v14267_v19  ;;  %6893 = vmatmul.bf16.gmra.mxu2 %v14264_v33 }
 0x7c8   : > { %16705 = vst [vmem:[#allocation55_spill] sm:$0xff] %v14538_v3  ;;  %6942 = vmatmul.bf16.gmra.mxu3 %v14267_v19  ;;  %v11796_v3 = vld [vmem:[#allocation8 + $0x78] sm:$0xff] }
 0x7c9   : > { %16707 = vst [vmem:[#allocation56_spill] sm:$0xff] %v14542_v46  ;;  %8574 = vmatpush.bf16.msra.mxu1 %v11796_v3 }
 0x7ca   : > { %v6698_v51 = vpop.f32.mrf.mxu2 }
 0x7cb   : > { %v6747_v6 = vpop.f32.mrf.mxu3  ;;  %v6602_v48 = vpop.f32.mrf.mxu0 }
 0x7cc   : > { %v6748_v9 = vadd.f32 %v6747_v6, %v6698_v51  ;;  %v6651_v29 = vpop.f32.mrf.mxu1 }
 0x7cd   : > { %v6652_v32 = vadd.f32 %v6651_v29, %v6602_v48 }
 0x7ce   : > { %v14548_v28 = vadd.f32 %v6748_v9, %v13918_v1 }
 0x7cf   : > { %v14551_v38 = vadd.f32 %v6652_v32, %v13921_v12 }
 0x7d0   : > { %16708 = vst [vmem:[#allocation57_spill] sm:$0xff] %v14548_v28 }
 0x7d1   : > { %16709 = vst [vmem:[#allocation58_spill] sm:$0xff] %v14551_v38 }
 0x7d2   : > { %v6700_v14 = vpop.f32.mrf.mxu2 }
 0x7d3   : > { %v6749_v36 = vpop.f32.mrf.mxu3  ;;  %v6605_v16 = vpop.f32.mrf.mxu0 }
 0x7d4   : > { %v6750_v34 = vadd.f32 %v6749_v36, %v6700_v14  ;;  %v6654_v27 = vpop.f32.mrf.mxu1 }
 0x7d5   : > { %v6655_v52 = vadd.f32 %v6654_v27, %v6605_v16 }
 0x7d6   : > { %v14554_v39 = vadd.f32 %v6750_v34, %v16710_v35  ;;  %6800 = vmatmul.bf16.gmra.mxu0 %v14292_v24 }
 0x7d7   : > { %v14558_v57 = vadd.f32 %v6655_v52, %v16712_v63  ;;  %6849 = vmatmul.bf16.gmra.mxu1 %v14295_v56  ;;  %6898 = vmatmul.bf16.gmra.mxu2 %v14292_v24 }
 0x7d8   : > { %16711 = vst [vmem:[#allocation59_spill] sm:$0xff] %v14554_v39  ;;  %6947 = vmatmul.bf16.gmra.mxu3 %v14295_v56  ;;  %v16733_v39 = vld [vmem:[#allocation129_spill] sm:$0xff] }
 0x7d9   : > { %16713 = vst [vmem:[#allocation60_spill] sm:$0xff] %v14558_v57 }
 0x7da   : > { %v6703_v12 = vpop.f32.mrf.mxu2 }
 0x7db   : > { %v6752_v1 = vpop.f32.mrf.mxu3  ;;  %v6607_v51 = vpop.f32.mrf.mxu0 }
 0x7dc   : > { %v6753_v6 = vadd.f32 %v6752_v1, %v6703_v12  ;;  %v6656_v48 = vpop.f32.mrf.mxu1 }
 0x7dd   : > { %v6657_v9 = vadd.f32 %v6656_v48, %v6607_v51 }
 0x7de   : > { %v14564_v29 = vadd.f32 %v6753_v6, %v13934_v18 }
 0x7df   : > { %v14567_v32 = vadd.f32 %v6657_v9, %v13937_v53  ;;  %v7277_v53 = vmul.f32 %v14318_v44, %v14318_v44 }
 0x7e0   : > { %16714 = vst [vmem:[#allocation61_spill] sm:$0xff] %v14564_v29  ;;  %v11812_v29 = vld [vmem:[#allocation8 + $0xf8] sm:$0xff] }
 0x7e1   : > { %16715 = vst [vmem:[#allocation62_spill] sm:$0xff] %v14567_v32  ;;  %8672 = vmatpush.bf16.msra.mxu3 %v11812_v29  ;;  %v16743_v29 = vld [vmem:[#allocation134_spill] sm:$0xff] }
 0x7e2   : > { %v6705_v14 = vpop.f32.mrf.mxu2 }
 0x7e3   : > { %v6754_v36 = vpop.f32.mrf.mxu3  ;;  %v6766_v16 = vpop.f32.mrf.mxu0 }
 0x7e4   : > { %v6755_v34 = vadd.f32 %v6754_v36, %v6705_v14  ;;  %v6815_v27 = vpop.f32.mrf.mxu1  ;;  %v7282_v14 = vmul.f32 %v14330_v21, %v14330_v21  ;;  %v7285_v36 = vmul.f32 %v14334_v45, %v14334_v45  ;;  %v14610_v21 = vmul.f32 %v14356_v10, %v14356_v10 }
 0x7e5   : > { %v6816_v52 = vadd.f32 %v6815_v27, %v6766_v16  ;;  %v14594_v16 = vmul.f32 %v14340_v7, %v14340_v7  ;;  %v14614_v45 = vmul.f32 %v14359_v50, %v14359_v50  ;;  %v14618_v7 = vmul.f32 %v14362_v47, %v14362_v47 }
 0x7e6   : > { %v14570_v35 = vadd.f32 %v6755_v34, %v13940_v43  ;;  %6961 = vmatmul.bf16.vlgmr.msrb.gmra.mxu0 %v14084_v26  ;;  %v14630_v10 = vmul.f32 %v14372_v41, %v14372_v41  ;;  %v14634_v50 = vmul.f32 %v14375_v5, %v14375_v5 }
 0x7e7   : > { %v7153_v63 = vadd.f32 %v6816_v52, %v13944_v31  ;;  %7010 = vmatmul.bf16.vlgmr.msrb.gmra.mxu1 %v14087_v58  ;;  %7059 = vmatmul.bf16.vlgmr.msrb.gmra.mxu2 %v14084_v26  ;;  %v7278_v26 = vmul.f32 %v14324_v62, %v14324_v62  ;;  %v14602_v62 = vmul.f32 %v14346_v42, %v14346_v42 }
 0x7e8   : > { %16716 = vst [vmem:[#allocation63_spill] sm:$0xff] %v14570_v35  ;;  %7108 = vmatmul.bf16.vlgmr.msrb.gmra.mxu3 %v14087_v58  ;;  %v7281_v58 = vmul.f32 %v14327_v20, %v14327_v20 }
 0x7e9   : > { %v7341_v18 = vmul.f32 %v7153_v63, %v7153_v63 }
 0x7ea   : > { %v6864_v12 = vpop.f32.mrf.mxu2 }
 0x7eb   : > { %v14579_v1 = vadd.f32 %v7341_v18, %v7277_v53  ;;  %v6913_v51 = vpop.f32.mrf.mxu3  ;;  %v6768_v43 = vpop.f32.mrf.mxu0  ;;  %v11804_v53 = vld [vmem:[#allocation8 + $0xb8] sm:$0xff]  ;;  %v14640_v18 = vmul.f32 %v14378_v25, %v14378_v25  ;;  %v16719_v25 = vld [vmem:[#allocation122_spill] sm:$0xff] }
 0x7ec   : > { %v6914_v6 = vadd.f32 %v6913_v51, %v6864_v12  ;;  %v6817_v48 = vpop.f32.mrf.mxu1  ;;  %v16717_v51 = vld [vmem:[#allocation120_spill] sm:$0xff]  ;;  %8623 = vmatpush.bf16.msra.mxu2 %v11804_v53 }
 0x7ed   : > { %11911 = vrsqrt.f32 %v14579_v1  ;;  %v6818_v31 = vadd.f32 %v6817_v48, %v6768_v43  ;;  %v14647_v5 = vmul.f32 %v16717_v51, %v16717_v51  ;;  %v16718_v43 = vld [vmem:[#allocation121_spill] sm:$0xff]  ;;  %v16724_v53 = vld [vmem:[#allocation80_spill] sm:$0xff]  ;;  %vm7476_vm3 = vcmp.eq.f32.partialorder %v14579_v1, inf }
 0x7ee   : > { %v7154_v9 = vadd.f32 %v6914_v6, %v13950_v2  ;;  %v14598_v2 = vmul.f32 %v14343_v40, %v14343_v40  ;;  %v14651_v6 = vmul.f32 %v16718_v43, %v16718_v43  ;;  %v16725_v51 = vld [vmem:[#allocation124_spill] sm:$0xff]  ;;  %v16726_v43 = vld [vmem:[#allocation125_spill] sm:$0xff]  ;;  %vm7478_vm4 = vcmp.eq.f32.partialorder %v14579_v1, 0.0 }
 0x7ef   : > { %v7161_v44 = vadd.f32 %v6818_v31, %v13953_v11  ;;  %v14606_v11 = vmul.f32 %v14350_v60, %v14350_v60  ;;  %v14626_v60 = vmul.f32 %v14366_v49, %v14366_v49  ;;  %v14656_v31 = vmul.f32 %v16719_v25, %v16719_v25 }
 0x7f0   : > { %v7342_v34 = vmul.f32 %v7154_v9, %v7154_v9  ;;  %v16720_v9 = vld [vmem:[#allocation32_spill] sm:$0xff] }
 0x7f1   : > { %v7345_v20 = vmul.f32 %v7161_v44, %v7161_v44 }
 0x7f2   : > { %v14620_v40 = vadd.f32 %v7342_v34, %v7278_v26  ;;  %v6866_v42 = vpop.f32.mrf.mxu2  ;;  %v14660_v26 = vmul.f32 %v16720_v9, %v16720_v9 }
 0x7f3   : > { %v14622_v27 = vpop.eup %11911  ;;  %v14636_v52 = vadd.f32 %v7345_v20, %v7281_v58  ;;  %v6915_v47 = vpop.f32.mrf.mxu3  ;;  %v16721_v58 = vld [vmem:[#allocation79_spill] sm:$0xff]  ;;  %v16722_v20 = vld [vmem:[#allocation33_spill] sm:$0xff] }
 0x7f4   : > { %v6771_v63 = vpop.f32.mrf.mxu0  ;;  %11913 = vrsqrt.f32 %v14620_v40  ;;  %v6916_v49 = vadd.f32 %v6915_v47, %v6866_v42  ;;  %v6820_v12 = vpop.f32.mrf.mxu1  ;;  %v7470_v41 = vmul.f32 %v14622_v27, %v14579_v1  ;;  %v14667_v42 = vmul.f32 %v16722_v20, %v16722_v20  ;;  %v16723_v47 = vld [vmem:[#allocation123_spill] sm:$0xff] }
 0x7f5   : > { %11915 = vrsqrt.f32 %v14636_v52  ;;  %v6821_v48 = vadd.f32 %v6820_v12, %v6771_v63  ;;  %v14671_v63 = vmul.f32 %v16723_v47, %v16723_v47  ;;  %vm7488_vm5 = vcmp.eq.f32.partialorder %v14620_v40, inf }
 0x7f6   : > { %v7162_v44 = vadd.f32 %v6916_v49, %v16721_v58  ;;  %6966 = vmatmul.bf16.gmra.mxu0 %v14114_v30  ;;  %v7471_v34 = vmul.f32 %v14622_v27, %v7470_v41  ;;  %v14678_v49 = vmul.f32 %v16725_v51, %v16725_v51  ;;  %v14682_v41 = vmul.f32 %v16726_v43, %v16726_v43  ;;  %v16727_v58 = vld [vmem:[#allocation126_spill] sm:$0xff]  ;;  %v16730_v43 = vld [vmem:[#allocation128_spill] sm:$0xff] }
 0x7f7   : > { %v7169_v12 = vadd.f32 %v6821_v48, %v16724_v53  ;;  %7015 = vmatmul.bf16.gmra.mxu1 %v14117_v59  ;;  %7064 = vmatmul.bf16.gmra.mxu2 %v14114_v30  ;;  %v14687_v20 = vmul.f32 %v16727_v58, %v16727_v58  ;;  %v16728_v48 = vld [vmem:[#allocation35_spill] sm:$0xff]  ;;  %vm7524_vm6 = vcmp.eq.f32.partialorder %v14636_v52, inf  ;;  %vm7526_vm7 = vcmp.eq.f32.partialorder %v14636_v52, 0.0 }
 0x7f8   : > { %v7346_v25 = vmul.f32 %v7162_v44, %v7162_v44  ;;  %7113 = vmatmul.bf16.gmra.mxu3 %v14117_v59  ;;  %v7472_v9 = vmul.f32 0.5, %v7471_v34  ;;  %v14691_v47 = vmul.f32 %v16728_v48, %v16728_v48  ;;  %v16729_v30 = vld [vmem:[#allocation127_spill] sm:$0xff]  ;;  %v14699_v44 = vmul.f32 %v16730_v43, %v16730_v43  ;;  %v16731_v59 = vld [vmem:[#allocation34_spill] sm:$0xff] }
 0x7f9   : > { %v14695_v53 = vmul.f32 %v16729_v30, %v16729_v30  ;;  %v7349_v51 = vmul.f32 %v7169_v12, %v7169_v12  ;;  %v14703_v34 = vmul.f32 %v16731_v59, %v16731_v59  ;;  %v14709_v30 = vmul.f32 %v16733_v39, %v16733_v39  ;;  %v16735_v12 = vld [vmem:[#allocation130_spill] sm:$0xff]  ;;  %v11788_v59 = vld [vmem:[#allocation8 + $0x38] sm:$0xff] }
 0x7fa   : > { %v11914_v35 = vpop.eup %11913  ;;  %v14705_v58 = vadd.f32 %v7346_v25, %v7282_v14  ;;  %v6869_v32 = vpop.f32.mrf.mxu2  ;;  %v7473_v48 = vsub.f32 1.5, %v7472_v9  ;;  %v14713_v38 = vmul.f32 %v16735_v12, %v16735_v12  ;;  %v16737_v25 = vld [vmem:[#allocation131_spill] sm:$0xff]  ;;  %8525 = vmatpush.bf16.msra.mxu0 %v11788_v59  ;;  %vm7490_vm8 = vcmp.eq.f32.partialorder %v14620_v40, 0.0 }
 0x7fb   : > { %16732 = vst [vmem:[#allocation64_spill] sm:$0xff] %v14703_v34  ;;  %v11916_v57 = vpop.eup %11915  ;;  %v14715_v43 = vadd.f32 %v7349_v51, %v7285_v36  ;;  %v6918_v28 = vpop.f32.mrf.mxu3  ;;  %v7482_v14 = vmul.f32 %v11914_v35, %v14620_v40  ;;  %v14720_v9 = vmul.f32 %v16737_v25, %v16737_v25  ;;  %v14726_v36 = vmul.f32 %v16739_v23, %v16739_v23  ;;  %v16742_v25 = vld [vmem:[#allocation81_spill] sm:$0xff]  ;;  %v16745_v34 = vld [vmem:[#allocation82_spill] sm:$0xff] }
 0x7fc   : > { %16734 = vst [vmem:[#allocation65_spill] sm:$0xff] %v14709_v30  ;;  %v6773_v46 = vpop.f32.mrf.mxu0  ;;  %11917 = vrsqrt.f32 %v14705_v58  ;;  %v6919_v39 = vadd.f32 %v6918_v28, %v6869_v32  ;;  %v6822_v0 = vpop.f32.mrf.mxu1  ;;  %v7518_v12 = vmul.f32 %v11916_v57, %v14636_v52  ;;  %v7474_v28 = vmul.f32 %v14622_v27, %v7473_v48 }
 0x7fd   : > { %16736 = vst [vmem:[#allocation66_spill] sm:$0xff] %v14713_v38  ;;  %v6823_v51 = vadd.f32 %v6822_v0, %v6773_v46  ;;  %v7483_v13 = vmul.f32 %v11914_v35, %v7482_v14  ;;  %v14730_v38 = vmul.f32 %v16741_v61, %v16741_v61  ;;  %v14736_v30 = vmul.f32 %v16743_v29, %v16743_v29  ;;  %v16746_v0 = vld [vmem:[#allocation36_spill] sm:$0xff] }
 0x7fe   : > { %16738 = vst [vmem:[#allocation67_spill] sm:$0xff] %v14720_v9  ;;  %v7170_v9 = vadd.f32 %v6919_v39, %v16742_v25  ;;  %v7519_v32 = vmul.f32 %v11916_v57, %v7518_v12  ;;  %11919 = vrsqrt.f32 %v14715_v43  ;;  %v14742_v3 = vmul.f32 %v16746_v0, %v16746_v0 }
 0x7ff   : > { %16740 = vst [vmem:[#allocation68_spill] sm:$0xff] %v14726_v36  ;;  %v7177_v23 = vadd.f32 %v6823_v51, %v16745_v34  ;;  %v7484_v36 = vmul.f32 0.5, %v7483_v13  ;;  %v7479_v27 = vand.u32 2147483648, %v14579_v1  ;;  %v7475_v39 = vmul.f32 %v7474_v28, %v14579_v1 }
 0x800   : > { %16744 = vst [vmem:[#allocation69_spill] sm:$0xff] %v14736_v30  ;;  %v7350_v61 = vmul.f32 %v7170_v9, %v7170_v9  ;;  %v7520_v46 = vmul.f32 0.5, %v7519_v32  ;;  %v11803_v32 = vld [vmem:[#allocation8 + $0xb0] sm:$0xff]  ;;  %vm7536_vm9 = vcmp.eq.f32.partialorder %v14705_v58, inf  ;;  %vm7538_vm10 = vcmp.eq.f32.partialorder %v14705_v58, 0.0 }
 0x801   : > { %16747 = vst [vmem:[#allocation70_spill] sm:$0xff] %v14742_v3  ;;  %v7353_v59 = vmul.f32 %v7177_v23, %v7177_v23  ;;  %v7485_v48 = vsub.f32 1.5, %v7484_v36  ;;  %8624 = vmatpush.bf16.msra.mxu2 %v11803_v32  ;;  %vm7572_vm11 = vcmp.eq.f32.partialorder %v14715_v43, inf  ;;  %vm7574_vm12 = vcmp.eq.f32.partialorder %v14715_v43, 0.0 }
 0x802   : > { %v11918_v14 = vpop.eup %11917  ;;  %v14748_v34 = vadd.f32 %v7350_v61, %v14594_v16  ;;  %v6871_v13 = vpop.f32.mrf.mxu2  ;;  %v7521_v12 = vsub.f32 1.5, %v7520_v46 }
 0x803   : > { %v14753_v9 = vadd.f32 %v7353_v59, %v14598_v2  ;;  %v6920_v51 = vpop.f32.mrf.mxu3  ;;  %v7486_v29 = vmul.f32 %v11914_v35, %v7485_v48  ;;  %v7530_v36 = vmul.f32 %v11918_v14, %v14705_v58  ;;  %v7527_v2 = vand.u32 2147483648, %v14636_v52  ;;  %v16748_v59 = vld [vmem:[#allocation83_spill] sm:$0xff] }
 0x804   : > { %v6776_v25 = vpop.f32.mrf.mxu0  ;;  %v6921_v23 = vadd.f32 %v6920_v51, %v6871_v13  ;;  %v6825_v16 = vpop.f32.mrf.mxu1  ;;  %v7522_v0 = vmul.f32 %v11916_v57, %v7521_v12  ;;  %11921 = vrsqrt.f32 %v14748_v34  ;;  %v7477_v57 = vsel %vm7476_vm3, %v14579_v1, %v7475_v39  ;;  %v16749_v13 = vld [vmem:[#allocation84_spill] sm:$0xff] }
 0x805   : > { %v11920_v28 = vpop.eup %11919  ;;  %v6826_v61 = vadd.f32 %v6825_v16, %v6776_v25  ;;  %v7531_v46 = vmul.f32 %v11918_v14, %v7530_v36  ;;  %11923 = vrsqrt.f32 %v14753_v9  ;;  %v7487_v51 = vmul.f32 %v7486_v29, %v14620_v40 }
 0x806   : > { %v7178_v3 = vadd.f32 %v6921_v23, %v16748_v59  ;;  %6971 = vmatmul.bf16.gmra.mxu0 %v14144_v55  ;;  %v7523_v35 = vmul.f32 %v7522_v0, %v14636_v52  ;;  %v7566_v48 = vmul.f32 %v11920_v28, %v14715_v43  ;;  %v7491_v36 = vand.u32 2147483648, %v14620_v40 }
 0x807   : > { %v7185_v12 = vadd.f32 %v6826_v61, %v16749_v13  ;;  %7020 = vmatmul.bf16.gmra.mxu1 %v14147_v4  ;;  %7069 = vmatmul.bf16.gmra.mxu2 %v14144_v55  ;;  %v7532_v25 = vmul.f32 0.5, %v7531_v46  ;;  %v14780_v0 = vsel %vm7478_vm4, %v7479_v27, %v7477_v57  ;;  %v11811_v46 = vld [vmem:[#allocation8 + $0xf0] sm:$0xff]  ;;  %vm7620_vm13 = vcmp.eq.f32.partialorder %v14753_v9, inf }
 0x808   : > { %v7354_v32 = vmul.f32 %v7178_v3, %v7178_v3  ;;  %7118 = vmatmul.bf16.gmra.mxu3 %v14147_v4  ;;  %v7525_v39 = vsel %vm7524_vm6, %v14636_v52, %v7523_v35  ;;  %v7567_v23 = vmul.f32 %v11920_v28, %v7566_v48  ;;  %v11787_v57 = vld [vmem:[#allocation8 + $0x30] sm:$0xff]  ;;  %vm7584_vm14 = vcmp.eq.f32.partialorder %v14748_v34, inf }
 0x809   : > { %v7357_v16 = vmul.f32 %v7185_v12, %v7185_v12  ;;  %v14784_v55 = vsel %vm7526_vm7, %v7527_v2, %v7525_v39  ;;  %v7533_v29 = vsub.f32 1.5, %v7532_v25  ;;  %v11795_v48 = vld [vmem:[#allocation8 + $0x70] sm:$0xff]  ;;  %8673 = vmatpush.bf16.msra.mxu3 %v11811_v46  ;;  %8526 = vmatpush.bf16.msra.mxu0 %v11787_v57  ;;  %v16751_v46 = vld [vmem:[#allocation86_spill] sm:$0xff]  ;;  %vm7622_vm15 = vcmp.eq.f32.partialorder %v14753_v9, 0.0 }
 0x80a   : > { %v11922_v3 = vpop.eup %11921  ;;  %v14787_v4 = vadd.f32 %v7354_v32, %v14602_v62  ;;  %v6874_v61 = vpop.f32.mrf.mxu2  ;;  %v7568_v35 = vmul.f32 0.5, %v7567_v23  ;;  %v7489_v62 = vsel %vm7488_vm5, %v14620_v40, %v7487_v51  ;;  %8575 = vmatpush.bf16.msra.mxu1 %v11795_v48  ;;  %v16750_v51 = vld [vmem:[#allocation85_spill] sm:$0xff]  ;;  %vm7586_vm0 = vcmp.eq.f32.partialorder %v14748_v34, 0.0 }
 0x80b   : > { %v11924_v1 = vpop.eup %11923  ;;  %v14793_v27 = vadd.f32 %v7357_v16, %v14606_v11  ;;  %v6923_v52 = vpop.f32.mrf.mxu3  ;;  %v7534_v13 = vmul.f32 %v11918_v14, %v7533_v29  ;;  %v7578_v12 = vmul.f32 %v11922_v3, %v14748_v34  ;;  %v7539_v29 = vand.u32 2147483648, %v14705_v58 }
 0x80c   : > { %v6778_v2 = vpop.f32.mrf.mxu0  ;;  %v6924_v25 = vadd.f32 %v6923_v52, %v6874_v61  ;;  %v6827_v32 = vpop.f32.mrf.mxu1  ;;  %v7569_v39 = vsub.f32 1.5, %v7568_v35  ;;  %v7614_v23 = vmul.f32 %v11924_v1, %v14753_v9  ;;  %11925 = vrsqrt.f32 %v14787_v4 }
 0x80d   : > { %v6828_v11 = vadd.f32 %v6827_v32, %v6778_v2  ;;  %v7535_v16 = vmul.f32 %v7534_v13, %v14705_v58  ;;  %v7579_v59 = vmul.f32 %v11922_v3, %v7578_v12  ;;  %v14808_v30 = vsel %vm7490_vm8, %v7491_v36, %v7489_v62 }
 0x80e   : > { %v7186_v14 = vadd.f32 %v6924_v25, %v16750_v51  ;;  %v7570_v61 = vmul.f32 %v11920_v28, %v7569_v39  ;;  %v7615_v52 = vmul.f32 %v11924_v1, %v7614_v23  ;;  %11927 = vrsqrt.f32 %v14793_v27 }
 0x80f   : > { %v7193_v35 = vadd.f32 %v6828_v11, %v16751_v46  ;;  %v7537_v2 = vsel %vm7536_vm9, %v14705_v58, %v7535_v16  ;;  %v7580_v57 = vmul.f32 0.5, %v7579_v59  ;;  %v11802_v16 = vld [vmem:[#allocation8 + $0xa8] sm:$0xff]  ;;  %v7575_v51 = vand.u32 2147483648, %v14715_v43 }
 0x810   : > { %v7358_v48 = vmul.f32 %v7186_v14, %v7186_v14  ;;  %v14813_v13 = vsel %vm7538_vm10, %v7539_v29, %v7537_v2  ;;  %v7571_v12 = vmul.f32 %v7570_v61, %v14715_v43  ;;  %v7616_v25 = vmul.f32 0.5, %v7615_v52  ;;  %8625 = vmatpush.bf16.msra.mxu2 %v11802_v16  ;;  %v16752_v2 = vld [vmem:[#allocation87_spill] sm:$0xff] }
 0x811   : > { %v7361_v32 = vmul.f32 %v7193_v35, %v7193_v35  ;;  %v8238_v28 = vpack.c.bf16 %v14813_v13, %v14808_v30  ;;  %v7581_v39 = vsub.f32 1.5, %v7580_v57  ;;  %vm7632_vm1 = vcmp.eq.f32.partialorder %v14787_v4, inf  ;;  %v16784_v13 = vld [vmem:[#allocation67_spill] sm:$0xff] }
 0x812   : > { %v11926_v40 = vpop.eup %11925  ;;  %v14820_v36 = vadd.f32 %v7358_v48, %v14610_v21  ;;  %v6876_v62 = vpop.f32.mrf.mxu2  ;;  %v7617_v58 = vsub.f32 1.5, %v7616_v25  ;;  %v16753_v25 = vld [vmem:[#allocation88_spill] sm:$0xff]  ;;  %vm7634_vm2 = vcmp.eq.f32.partialorder %v14787_v4, 0.0  ;;  %vm7668_vm3 = vcmp.eq.f32.partialorder %v14793_v27, inf }
 0x813   : > { %v14825_v59 = vadd.f32 %v7361_v32, %v14614_v45  ;;  %v6925_v23 = vpop.f32.mrf.mxu3  ;;  %v7582_v14 = vmul.f32 %v11922_v3, %v7581_v39  ;;  %v7626_v29 = vmul.f32 %v11926_v40, %v14787_v4  ;;  %v7573_v45 = vsel %vm7572_vm11, %v14715_v43, %v7571_v12 }
 0x814   : > { %v6781_v11 = vpop.f32.mrf.mxu0  ;;  %v6926_v61 = vadd.f32 %v6925_v23, %v6876_v62  ;;  %v6830_v21 = vpop.f32.mrf.mxu1  ;;  %v7618_v52 = vmul.f32 %v11924_v1, %v7617_v58  ;;  %v7623_v1 = vand.u32 2147483648, %v14753_v9  ;;  %v14848_v58 = vsel %vm7574_vm12, %v7575_v51, %v7573_v45 }
 0x815   : > { %v6831_v46 = vadd.f32 %v6830_v21, %v6781_v11  ;;  %v7627_v35 = vmul.f32 %v11926_v40, %v7626_v29  ;;  %11929 = vrsqrt.f32 %v14825_v59  ;;  %v11928_v48 = vpop.eup %11927  ;;  %v7583_v12 = vmul.f32 %v7582_v14, %v14748_v34 }
 0x816   : > { %v7194_v3 = vadd.f32 %v6926_v61, %v16752_v2  ;;  %6976 = vmatmul.bf16.gmra.mxu0 %v14174_v15  ;;  %v7619_v57 = vmul.f32 %v7618_v52, %v14753_v9  ;;  %v7662_v11 = vmul.f32 %v11928_v48, %v14793_v27  ;;  %11931 = vrsqrt.f32 %v14820_v36  ;;  %v11810_v61 = vld [vmem:[#allocation8 + $0xe8] sm:$0xff] }
 0x817   : > { %v7201_v32 = vadd.f32 %v6831_v46, %v16753_v25  ;;  %7025 = vmatmul.bf16.gmra.mxu1 %v14177_v17  ;;  %7074 = vmatmul.bf16.gmra.mxu2 %v14174_v15  ;;  %v7628_v39 = vmul.f32 0.5, %v7627_v35  ;;  %v7587_v51 = vand.u32 2147483648, %v14748_v34  ;;  %v11786_v35 = vld [vmem:[#allocation8 + $0x28] sm:$0xff]  ;;  %vm7670_vm4 = vcmp.eq.f32.partialorder %v14793_v27, 0.0 }
 0x818   : > { %v7362_v62 = vmul.f32 %v7194_v3, %v7194_v3  ;;  %7123 = vmatmul.bf16.gmra.mxu3 %v14177_v17  ;;  %v7621_v23 = vsel %vm7620_vm13, %v14753_v9, %v7619_v57  ;;  %v7663_v21 = vmul.f32 %v11928_v48, %v7662_v11  ;;  %v11794_v2 = vld [vmem:[#allocation8 + $0x68] sm:$0xff]  ;;  %8527 = vmatpush.bf16.msra.mxu0 %v11786_v35  ;;  %vm7716_vm5 = vcmp.eq.f32.partialorder %v14825_v59, inf }
 0x819   : > { %v7365_v16 = vmul.f32 %v7201_v32, %v7201_v32  ;;  %v14854_v15 = vsel %vm7622_vm15, %v7623_v1, %v7621_v23  ;;  %v7629_v14 = vsub.f32 1.5, %v7628_v39  ;;  %8674 = vmatpush.bf16.msra.mxu3 %v11810_v61  ;;  %8576 = vmatpush.bf16.msra.mxu1 %v11794_v2  ;;  %vm7718_vm6 = vcmp.eq.f32.partialorder %v14825_v59, 0.0 }
 0x81a   : > { %v14858_v29 = vadd.f32 %v7362_v62, %v14618_v7  ;;  %v6879_v17 = vpop.f32.mrf.mxu2  ;;  %v7585_v7 = vsel %vm7584_vm14, %v14748_v34, %v7583_v12  ;;  %v7664_v25 = vmul.f32 0.5, %v7663_v21  ;;  %v7635_v12 = vand.u32 2147483648, %v14787_v4 }
 0x81b   : > { %v11930_v9 = vpop.eup %11929  ;;  %v14864_v52 = vadd.f32 %v7365_v16, %v14626_v60  ;;  %v6928_v46 = vpop.f32.mrf.mxu3  ;;  %v7630_v3 = vmul.f32 %v11926_v40, %v7629_v14  ;;  %v16754_v40 = vld [vmem:[#allocation136_spill] sm:$0xff]  ;;  %v16755_v14 = vld [vmem:[#allocation137_spill] sm:$0xff]  ;;  %v14880_v61 = vsel %vm7586_vm0, %v7587_v51, %v7585_v7  ;;  %v7671_v34 = vand.u32 2147483648, %v14793_v27 }
 0x81c   : > { %v6783_v45 = vpop.f32.mrf.mxu0  ;;  %v6929_v57 = vadd.f32 %v6928_v46, %v6879_v17  ;;  %v6832_v1 = vpop.f32.mrf.mxu1  ;;  %v7710_v32 = vmul.f32 %v11930_v9, %v14825_v59  ;;  %11933 = vrsqrt.f32 %v14858_v29  ;;  %v7665_v23 = vsub.f32 1.5, %v7664_v25 }
 0x81d   : > { %v6833_v60 = vadd.f32 %v6832_v1, %v6783_v45  ;;  %v7631_v39 = vmul.f32 %v7630_v3, %v14787_v4  ;;  %v11932_v16 = vpop.eup %11931  ;;  %11935 = vrsqrt.f32 %v14864_v52  ;;  %vm7680_vm7 = vcmp.eq.f32.partialorder %v14820_v36, inf }
 0x81e   : > { %v7202_v62 = vadd.f32 %v6929_v57, %v16754_v40  ;;  %v7711_v11 = vmul.f32 %v11930_v9, %v7710_v32  ;;  %v7666_v35 = vmul.f32 %v11928_v48, %v7665_v23  ;;  %v7674_v51 = vmul.f32 %v11932_v16, %v14820_v36 }
 0x81f   : > { %v7209_v17 = vadd.f32 %v6833_v60, %v16755_v14  ;;  %v7633_v21 = vsel %vm7632_vm1, %v14787_v4, %v7631_v39  ;;  %v7719_v14 = vand.u32 2147483648, %v14825_v59  ;;  %vm7682_vm8 = vcmp.eq.f32.partialorder %v14820_v36, 0.0 }
 0x820   : > { %v7366_v46 = vmul.f32 %v7202_v62, %v7202_v62  ;;  %v14887_v45 = vsel %vm7634_vm2, %v7635_v12, %v7633_v21  ;;  %v7712_v2 = vmul.f32 0.5, %v7711_v11  ;;  %v7667_v25 = vmul.f32 %v7666_v35, %v14793_v27  ;;  %v11801_v12 = vld [vmem:[#allocation8 + $0xa0] sm:$0xff] }
 0x821   : > { %v7369_v3 = vmul.f32 %v7209_v17, %v7209_v17  ;;  %v7675_v40 = vmul.f32 %v11932_v16, %v7674_v51  ;;  %8626 = vmatpush.bf16.msra.mxu2 %v11801_v12  ;;  %vm7728_vm9 = vcmp.eq.f32.partialorder %v14858_v29, inf  ;;  %vm7730_vm10 = vcmp.eq.f32.partialorder %v14858_v29, 0.0 }
 0x822   : > { %v11934_v7 = vpop.eup %11933  ;;  %v14894_v4 = vadd.f32 %v7366_v46, %v14630_v10  ;;  %v6881_v1 = vpop.f32.mrf.mxu2  ;;  %v7713_v32 = vsub.f32 1.5, %v7712_v2  ;;  %v16756_v2 = vld [vmem:[#allocation89_spill] sm:$0xff]  ;;  %vm7764_vm11 = vcmp.eq.f32.partialorder %v14864_v52, inf  ;;  %vm7766_vm12 = vcmp.eq.f32.partialorder %v14864_v52, 0.0 }
 0x823   : > { %v14899_v48 = vadd.f32 %v7369_v3, %v14634_v50  ;;  %v6930_v60 = vpop.f32.mrf.mxu3  ;;  %v7722_v62 = vmul.f32 %v11934_v7, %v14858_v29  ;;  %v11936_v17 = vpop.eup %11935  ;;  %v7669_v50 = vsel %vm7668_vm3, %v14793_v27, %v7667_v25  ;;  %v7676_v46 = vmul.f32 0.5, %v7675_v40 }
 0x824   : > { %v6786_v39 = vpop.f32.mrf.mxu0  ;;  %v6931_v23 = vadd.f32 %v6930_v60, %v6881_v1  ;;  %v6835_v10 = vpop.f32.mrf.mxu1  ;;  %v7714_v11 = vmul.f32 %v11930_v9, %v7713_v32  ;;  %11937 = vrsqrt.f32 %v14894_v4  ;;  %v7758_v9 = vmul.f32 %v11936_v17, %v14864_v52  ;;  %v16757_v1 = vld [vmem:[#allocation90_spill] sm:$0xff] }
 0x825   : > { %v6836_v21 = vadd.f32 %v6835_v10, %v6786_v39  ;;  %v7723_v35 = vmul.f32 %v11934_v7, %v7722_v62  ;;  %11939 = vrsqrt.f32 %v14899_v48  ;;  %v7677_v60 = vsub.f32 1.5, %v7676_v46 }
 0x826   : > { %v7210_v3 = vadd.f32 %v6931_v23, %v16756_v2  ;;  %6981 = vmatmul.bf16.gmra.mxu0 %v14204_v8  ;;  %v7715_v51 = vmul.f32 %v7714_v11, %v14825_v59  ;;  %v14920_v12 = vsel %vm7670_vm4, %v7671_v34, %v7669_v50  ;;  %v7759_v62 = vmul.f32 %v11936_v17, %v7758_v9  ;;  %v11809_v34 = vld [vmem:[#allocation8 + $0xe0] sm:$0xff] }
 0x827   : > { %v7217_v32 = vadd.f32 %v6836_v21, %v16757_v1  ;;  %7030 = vmatmul.bf16.gmra.mxu1 %v14207_v22  ;;  %7079 = vmatmul.bf16.gmra.mxu2 %v14204_v8  ;;  %v7724_v25 = vmul.f32 0.5, %v7723_v35  ;;  %v7678_v10 = vmul.f32 %v11932_v16, %v7677_v60  ;;  %v11785_v16 = vld [vmem:[#allocation8 + $0x20] sm:$0xff]  ;;  %v7683_v60 = vand.u32 2147483648, %v14820_v36 }
 0x828   : > { %v7370_v39 = vmul.f32 %v7210_v3, %v7210_v3  ;;  %7128 = vmatmul.bf16.gmra.mxu3 %v14207_v22  ;;  %v7717_v40 = vsel %vm7716_vm5, %v14825_v59, %v7715_v51  ;;  %v7760_v46 = vmul.f32 0.5, %v7759_v62  ;;  %v11793_v2 = vld [vmem:[#allocation8 + $0x60] sm:$0xff]  ;;  %8528 = vmatpush.bf16.msra.mxu0 %v11785_v16  ;;  %vm7812_vm13 = vcmp.eq.f32.partialorder %v14899_v48, inf }
 0x829   : > { %v7373_v23 = vmul.f32 %v7217_v32, %v7217_v32  ;;  %v14927_v8 = vsel %vm7718_vm6, %v7719_v14, %v7717_v40  ;;  %v7725_v11 = vsub.f32 1.5, %v7724_v25  ;;  %v7679_v3 = vmul.f32 %v7678_v10, %v14820_v36  ;;  %8675 = vmatpush.bf16.msra.mxu3 %v11809_v34  ;;  %8577 = vmatpush.bf16.msra.mxu1 %v11793_v2  ;;  %v16758_v40 = vld [vmem:[#allocation138_spill] sm:$0xff] }
 0x82a   : > { %v14929_v21 = vpop.eup %11937  ;;  %v14932_v22 = vadd.f32 %v7370_v39, %v14640_v18  ;;  %v6884_v27 = vpop.f32.mrf.mxu2  ;;  %vm7814_vm14 = vcmp.eq.f32.partialorder %v14899_v48, 0.0  ;;  %vm7776_vm15 = vcmp.eq.f32.partialorder %v14894_v4, inf  ;;  %vm7778_vm0 = vcmp.eq.f32.partialorder %v14894_v4, 0.0 }
 0x82b   : > { %v14938_v35 = vadd.f32 %v7373_v23, %v14647_v5  ;;  %v6933_v59 = vpop.f32.mrf.mxu3  ;;  %v7726_v51 = vmul.f32 %v11934_v7, %v7725_v11  ;;  %v7770_v18 = vmul.f32 %v14929_v21, %v14894_v4  ;;  %v11940_v9 = vpop.eup %11939  ;;  %v7761_v5 = vsub.f32 1.5, %v7760_v46 }
 0x82c   : > { %v6788_v14 = vpop.f32.mrf.mxu0  ;;  %v6934_v1 = vadd.f32 %v6933_v59, %v6884_v27  ;;  %v6837_v32 = vpop.f32.mrf.mxu1  ;;  %v7681_v39 = vsel %vm7680_vm7, %v14820_v36, %v7679_v3  ;;  %v7731_v23 = vand.u32 2147483648, %v14858_v29  ;;  %v7806_v11 = vmul.f32 %v11940_v9, %v14899_v48  ;;  %v16759_v27 = vld [vmem:[#allocation139_spill] sm:$0xff] }
 0x82d   : > { %v6838_v25 = vadd.f32 %v6837_v32, %v6788_v14  ;;  %v7727_v7 = vmul.f32 %v7726_v51, %v14858_v29  ;;  %v7762_v10 = vmul.f32 %v11936_v17, %v7761_v5  ;;  %v7771_v59 = vmul.f32 %v14929_v21, %v7770_v18  ;;  %v16760_v51 = vld [vmem:[#allocation135_spill] sm:$0xff]  ;;  %v16761_v18 = vld [vmem:[#allocation37_spill] sm:$0xff] }
 0x82e   : > { %v7218_v62 = vadd.f32 %v6934_v1, %v16758_v40  ;;  %11941 = vrsqrt.f32 %v14932_v22  ;;  %v14959_v16 = vsel %vm7682_vm8, %v7683_v60, %v7681_v39  ;;  %v7807_v3 = vmul.f32 %v11940_v9, %v7806_v11  ;;  %v11800_v11 = vld [vmem:[#allocation8 + $0x98] sm:$0xff] }
 0x82f   : > { %v7225_v34 = vadd.f32 %v6838_v25, %v16759_v27  ;;  %v7729_v46 = vsel %vm7728_vm9, %v14858_v29, %v7727_v7  ;;  %v14965_v17 = vmul.f32 %v16760_v51, %v16760_v51  ;;  %v7772_v32 = vmul.f32 0.5, %v7771_v59  ;;  %v16762_v25 = vld [vmem:[#allocation38_spill] sm:$0xff]  ;;  %8627 = vmatpush.bf16.msra.mxu2 %v11800_v11  ;;  %v11782_v29 = vld [vmem:[#allocation8 + $0x8] sm:$0xff] }
 0x830   : > { %v7374_v14 = vmul.f32 %v7218_v62, %v7218_v62  ;;  %v14961_v2 = vsel %vm7730_vm10, %v7731_v23, %v7729_v46  ;;  %v14971_v5 = vmul.f32 %v16761_v18, %v16761_v18  ;;  %v14975_v36 = vmul.f32 %v16762_v25, %v16762_v25  ;;  %v16764_v18 = vld [vmem:[#allocation92_spill] sm:$0xff] }
 0x831   : > { %v7377_v1 = vmul.f32 %v7225_v34, %v7225_v34  ;;  %v7808_v7 = vmul.f32 0.5, %v7807_v3  ;;  %v7763_v27 = vmul.f32 %v7762_v10, %v14864_v52  ;;  %v7773_v34 = vsub.f32 1.5, %v7772_v32  ;;  %v16763_v10 = vld [vmem:[#allocation91_spill] sm:$0xff] }
 0x832   : > { %v14978_v60 = vadd.f32 %v7374_v14, %v14651_v6  ;;  %v6886_v39 = vpop.f32.mrf.mxu2  ;;  %11943 = vrsqrt.f32 %v14938_v35  ;;  %vm7824_vm1 = vcmp.eq.f32.partialorder %v14932_v22, inf  ;;  %vm7826_vm2 = vcmp.eq.f32.partialorder %v14932_v22, 0.0 }
 0x833   : > { %v14981_v40 = vadd.f32 %v7377_v1, %v14656_v31  ;;  %v6935_v62 = vpop.f32.mrf.mxu3  ;;  %v7809_v51 = vsub.f32 1.5, %v7808_v7  ;;  %v7767_v31 = vand.u32 2147483648, %v14864_v52  ;;  %v11792_v7 = vld [vmem:[#allocation8 + $0x58] sm:$0xff]  ;;  %vm7860_vm3 = vcmp.eq.f32.partialorder %v14938_v35, inf }
 0x834   : > { %v6791_v23 = vpop.f32.mrf.mxu0  ;;  %v6936_v46 = vadd.f32 %v6935_v62, %v6886_v39  ;;  %v6840_v59 = vpop.f32.mrf.mxu1  ;;  %v11784_v39 = vld [vmem:[#allocation8 + $0x18] sm:$0xff]  ;;  %v7765_v62 = vsel %vm7764_vm11, %v14864_v52, %v7763_v27  ;;  %8578 = vmatpush.bf16.msra.mxu1 %v11792_v7  ;;  %vm7862_vm4 = vcmp.eq.f32.partialorder %v14938_v35, 0.0  ;;  %vm7872_vm7 = vcmp.eq.f32.partialorder %v14978_v60, inf }
 0x835   : > { %v11942_v6 = vpop.eup %11941  ;;  %v6841_v14 = vadd.f32 %v6840_v59, %v6791_v23  ;;  %v7810_v1 = vmul.f32 %v11940_v9, %v7809_v51  ;;  %11945 = vrsqrt.f32 %v14981_v40  ;;  %v7815_v23 = vand.u32 2147483648, %v14899_v48  ;;  %8529 = vmatpush.bf16.msra.mxu0 %v11784_v39 }
 0x836   : > { %v7226_v3 = vadd.f32 %v6936_v46, %v16763_v10  ;;  %6986 = vmatmul.bf16.gmra.mxu0 %v14234_v54  ;;  %v7818_v32 = vmul.f32 %v11942_v6, %v14932_v22  ;;  %v7774_v9 = vmul.f32 %v14929_v21, %v7773_v34  ;;  %11947 = vrsqrt.f32 %v14978_v60  ;;  %v11808_v34 = vld [vmem:[#allocation8 + $0xd8] sm:$0xff] }
 0x837   : > { %v7233_v25 = vadd.f32 %v6841_v14, %v16764_v18  ;;  %7035 = vmatmul.bf16.gmra.mxu1 %v14237_v37  ;;  %7084 = vmatmul.bf16.gmra.mxu2 %v14234_v54  ;;  %v7811_v46 = vmul.f32 %v7810_v1, %v14899_v48  ;;  %v7779_v54 = vand.u32 2147483648, %v14894_v4  ;;  %v15016_v14 = vsel %vm7766_vm12, %v7767_v31, %v7765_v62 }
 0x838   : > { %v7378_v11 = vmul.f32 %v7226_v3, %v7226_v3  ;;  %7133 = vmatmul.bf16.gmra.mxu3 %v14237_v37  ;;  %v7819_v59 = vmul.f32 %v11942_v6, %v7818_v32  ;;  %v15009_v21 = vpop.eup %11943  ;;  %v7775_v52 = vmul.f32 %v7774_v9, %v14894_v4  ;;  %v16765_v9 = vld [vmem:[#allocation140_spill] sm:$0xff]  ;;  %vm7908_vm5 = vcmp.eq.f32.partialorder %v14981_v40, inf }
 0x839   : > { %v7381_v51 = vmul.f32 %v7233_v25, %v7233_v25  ;;  %v7813_v10 = vsel %vm7812_vm13, %v14899_v48, %v7811_v46  ;;  %v11791_v25 = vld [vmem:[#allocation8 + $0x50] sm:$0xff]  ;;  %v7854_v31 = vmul.f32 %v15009_v21, %v14938_v35  ;;  %8676 = vmatpush.bf16.msra.mxu3 %v11808_v34  ;;  %v7863_v34 = vand.u32 2147483648, %v14938_v35 }
 0x83a   : > { %v15012_v37 = vadd.f32 %v7378_v11, %v14660_v26  ;;  %v6889_v27 = vpop.f32.mrf.mxu2  ;;  %v7820_v3 = vmul.f32 0.5, %v7819_v59  ;;  %v11783_v26 = vld [vmem:[#allocation8 + $0x10] sm:$0xff]  ;;  %v15027_v39 = vsel %vm7814_vm14, %v7815_v23, %v7813_v10  ;;  %v7827_v59 = vand.u32 2147483648, %v14932_v22  ;;  %8579 = vmatpush.bf16.msra.mxu1 %v11791_v25 }
 0x83b   : > { %v15023_v1 = vadd.f32 %v7381_v51, %v14667_v42  ;;  %v6938_v32 = vpop.f32.mrf.mxu3  ;;  %v11946_v7 = vpop.eup %11945  ;;  %8530 = vmatpush.bf16.msra.mxu0 %v11783_v26  ;;  %v7855_v48 = vmul.f32 %v15009_v21, %v7854_v31  ;;  %v7777_v26 = vsel %vm7776_vm15, %v14894_v4, %v7775_v52  ;;  %vm7910_vm6 = vcmp.eq.f32.partialorder %v14981_v40, 0.0 }
 0x83c   : > { %v6793_v18 = vpop.f32.mrf.mxu0  ;;  %v6939_v62 = vadd.f32 %v6938_v32, %v6889_v27  ;;  %v6842_v11 = vpop.f32.mrf.mxu1  ;;  %v7821_v46 = vsub.f32 1.5, %v7820_v3  ;;  %v7902_v23 = vmul.f32 %v11946_v7, %v14981_v40  ;;  %11949 = vrsqrt.f32 %v15012_v37  ;;  %v16766_v3 = vld [vmem:[#allocation141_spill] sm:$0xff] }
 0x83d   : > { %v6843_v51 = vadd.f32 %v6842_v11, %v6793_v18  ;;  %v11948_v32 = vpop.eup %11947  ;;  %v11790_v18 = vld [vmem:[#allocation8 + $0x48] sm:$0xff]  ;;  %v7856_v25 = vmul.f32 0.5, %v7855_v48  ;;  %11951 = vrsqrt.f32 %v15023_v1  ;;  %vm7874_vm8 = vcmp.eq.f32.partialorder %v14978_v60, 0.0 }
 0x83e   : > { %v7234_v10 = vadd.f32 %v6939_v62, %v16765_v9  ;;  %v7822_v27 = vmul.f32 %v11942_v6, %v7821_v46  ;;  %v7903_v31 = vmul.f32 %v11946_v7, %v7902_v23  ;;  %v7866_v6 = vmul.f32 %v11948_v32, %v14978_v60  ;;  %8580 = vmatpush.bf16.msra.mxu1 %v11790_v18  ;;  %v11799_v18 = vld [vmem:[#allocation8 + $0x90] sm:$0xff] }
 0x83f   : > { %v7241_v42 = vadd.f32 %v6843_v51, %v16766_v3  ;;  %8531 = vmatpush.bf16.msra.mxu0 %v11782_v29  ;;  %v7857_v46 = vsub.f32 1.5, %v7856_v25  ;;  %v15055_v23 = vsel %vm7778_vm0, %v7779_v54, %v7777_v26  ;;  %v11781_v25 = vld [vmem:[#allocation8] sm:$0xff]  ;;  %8628 = vmatpush.bf16.msra.mxu2 %v11799_v18  ;;  %vm7920_vm9 = vcmp.eq.f32.partialorder %v15012_v37, inf }
 0x840   : > { %v7382_v11 = vmul.f32 %v7234_v10, %v7234_v10  ;;  %v7823_v50 = vmul.f32 %v7822_v27, %v14932_v22  ;;  %v7904_v51 = vmul.f32 0.5, %v7903_v31  ;;  %v7867_v10 = vmul.f32 %v11948_v32, %v7866_v6 }
 0x841   : > { %v7385_v62 = vmul.f32 %v7241_v42, %v7241_v42  ;;  %v7858_v4 = vmul.f32 %v15009_v21, %v7857_v46  ;;  %vm7922_vm10 = vcmp.eq.f32.partialorder %v15012_v37, 0.0  ;;  %vm7956_vm11 = vcmp.eq.f32.partialorder %v15023_v1, inf }
 0x842   : > { %v15051_v52 = vadd.f32 %v7382_v11, %v14671_v63  ;;  %v6891_v48 = vpop.f32.mrf.mxu2  ;;  %v7825_v9 = vsel %vm7824_vm1, %v14932_v22, %v7823_v50  ;;  %v11950_v42 = vpop.eup %11949  ;;  %v11789_v63 = vld [vmem:[#allocation8 + $0x40] sm:$0xff]  ;;  %v7905_v54 = vsub.f32 1.5, %v7904_v51  ;;  %v7868_v6 = vmul.f32 0.5, %v7867_v10 }
 0x843   : > { %v15061_v29 = vadd.f32 %v7385_v62, %v14678_v49  ;;  %v6940_v27 = vpop.f32.mrf.mxu3  ;;  %v15065_v31 = vsel %vm7826_vm2, %v7827_v59, %v7825_v9  ;;  %v7914_v49 = vmul.f32 %v11950_v42, %v15012_v37  ;;  %8532 = vmatpush.bf16.msra.mxu0 %v11781_v25  ;;  %v7859_v57 = vmul.f32 %v7858_v4, %v14938_v35  ;;  %v11952_v22 = vpop.eup %11951  ;;  %v16767_v59 = vld [vmem:[#allocation93_spill] sm:$0xff] }
 0x844   : > { %v6796_v3 = vpop.f32.mrf.mxu0  ;;  %v6941_v26 = vadd.f32 %v6940_v27, %v6891_v48  ;;  %v6845_v11 = vpop.f32.mrf.mxu1  ;;  %v7906_v43 = vmul.f32 %v11946_v7, %v7905_v54  ;;  %8581 = vmatpush.bf16.msra.mxu1 %v11789_v63  ;;  %v7869_v46 = vsub.f32 1.5, %v7868_v6  ;;  %v16768_v48 = vld [vmem:[#allocation94_spill] sm:$0xff]  ;;  %v7911_v27 = vand.u32 2147483648, %v14981_v40 }
 0x845   : > { %v6846_v62 = vadd.f32 %v6845_v11, %v6796_v3  ;;  %v7915_v51 = vmul.f32 %v11950_v42, %v7914_v49  ;;  %11953 = vrsqrt.f32 %v15061_v29  ;;  %v7861_v7 = vsel %vm7860_vm3, %v14938_v35, %v7859_v57 }
 0x846   : > { %v7242_v21 = vadd.f32 %v6941_v26, %v16767_v59  ;;  %6991 = vmatmul.bf16.gmra.mxu0 %v14264_v33  ;;  %v7907_v10 = vmul.f32 %v7906_v43, %v14981_v40  ;;  %v7870_v18 = vmul.f32 %v11948_v32, %v7869_v46  ;;  %v7950_v57 = vmul.f32 %v11952_v22, %v15023_v1  ;;  %v11807_v32 = vld [vmem:[#allocation8 + $0xd0] sm:$0xff] }
 0x847   : > { %v7249_v9 = vadd.f32 %v6846_v62, %v16768_v48  ;;  %7040 = vmatmul.bf16.gmra.mxu1 %v14267_v19  ;;  %7089 = vmatmul.bf16.gmra.mxu2 %v14264_v33  ;;  %v7916_v25 = vmul.f32 0.5, %v7915_v51  ;;  %v15090_v33 = vsel %vm7862_vm4, %v7863_v34, %v7861_v7  ;;  %11955 = vrsqrt.f32 %v15051_v52  ;;  %v16769_v7 = vld [vmem:[#allocation95_spill] sm:$0xff] }
 0x848   : > { %v7386_v3 = vmul.f32 %v7242_v21, %v7242_v21  ;;  %7138 = vmatmul.bf16.gmra.mxu3 %v14267_v19  ;;  %v7909_v43 = vsel %vm7908_vm5, %v14981_v40, %v7907_v10  ;;  %v7871_v26 = vmul.f32 %v7870_v18, %v14978_v60  ;;  %v7875_v40 = vand.u32 2147483648, %v14978_v60 }
 0x849   : > { %v7389_v63 = vmul.f32 %v7249_v9, %v7249_v9  ;;  %v15101_v54 = vsel %vm7910_vm6, %v7911_v27, %v7909_v43  ;;  %v7917_v35 = vsub.f32 1.5, %v7916_v25  ;;  %8677 = vmatpush.bf16.msra.mxu3 %v11807_v32  ;;  %v7923_v18 = vand.u32 2147483648, %v15012_v37 }
 0x84a   : > { %v15097_v4 = vadd.f32 %v7386_v3, %v14682_v41  ;;  %v6894_v19 = vpop.f32.mrf.mxu2  ;;  %v7951_v41 = vmul.f32 %v11952_v22, %v7950_v57  ;;  %v16770_v3 = vld [vmem:[#allocation96_spill] sm:$0xff]  ;;  %vm7958_vm12 = vcmp.eq.f32.partialorder %v15023_v1, 0.0  ;;  %vm8004_vm13 = vcmp.eq.f32.partialorder %v15061_v29, inf }
 0x84b   : > { %v15105_v34 = vadd.f32 %v7389_v63, %v14687_v20  ;;  %v6943_v11 = vpop.f32.mrf.mxu3  ;;  %v11954_v62 = vpop.eup %11953  ;;  %v7918_v46 = vmul.f32 %v11950_v42, %v7917_v35  ;;  %v7873_v20 = vsel %vm7872_vm7, %v14978_v60, %v7871_v26  ;;  %vm8006_vm14 = vcmp.eq.f32.partialorder %v15061_v29, 0.0 }
 0x84c   : > { %v6798_v6 = vpop.f32.mrf.mxu0  ;;  %v6944_v59 = vadd.f32 %v6943_v11, %v6894_v19  ;;  %v6847_v21 = vpop.f32.mrf.mxu1  ;;  %v7952_v48 = vmul.f32 0.5, %v7951_v41  ;;  %v7998_v9 = vmul.f32 %v11954_v62, %v15061_v29  ;;  %v15124_v57 = vsel %vm7874_vm8, %v7875_v40, %v7873_v20  ;;  %v16771_v41 = vld [vmem:[#allocation39_spill] sm:$0xff] }
 0x84d   : > { %v6848_v51 = vadd.f32 %v6847_v21, %v6798_v6  ;;  %v7919_v27 = vmul.f32 %v7918_v46, %v15012_v37  ;;  %11957 = vrsqrt.f32 %v15097_v4  ;;  %v11956_v6 = vpop.eup %11955  ;;  %v16772_v21 = vld [vmem:[#allocation40_spill] sm:$0xff]  ;;  %vm7968_vm15 = vcmp.eq.f32.partialorder %v15051_v52, inf }
 0x84e   : > { %v7250_v10 = vadd.f32 %v6944_v59, %v16769_v7  ;;  %v7953_v25 = vsub.f32 1.5, %v7952_v48  ;;  %v7999_v63 = vmul.f32 %v11954_v62, %v7998_v9  ;;  %v15132_v59 = vmul.f32 %v16771_v41, %v16771_v41 }
 0x84f   : > { %v7257_v42 = vadd.f32 %v6848_v51, %v16770_v3  ;;  %v7921_v19 = vsel %vm7920_vm9, %v15012_v37, %v7919_v27  ;;  %v15136_v46 = vmul.f32 %v16772_v21, %v16772_v21  ;;  %v7962_v7 = vmul.f32 %v11956_v6, %v15051_v52  ;;  %v11798_v3 = vld [vmem:[#allocation8 + $0x88] sm:$0xff] }
 0x850   : > { %v7390_v43 = vmul.f32 %v7250_v10, %v7250_v10  ;;  %v15128_v26 = vsel %vm7922_vm10, %v7923_v18, %v7921_v19  ;;  %v7954_v35 = vmul.f32 %v11952_v22, %v7953_v25  ;;  %v8000_v11 = vmul.f32 0.5, %v7999_v63  ;;  %v16773_v63 = vld [vmem:[#allocation97_spill] sm:$0xff]  ;;  %8629 = vmatpush.bf16.msra.mxu2 %v11798_v3 }
 0x851   : > { %v7393_v32 = vmul.f32 %v7257_v42, %v7257_v42  ;;  %11959 = vrsqrt.f32 %v15105_v34  ;;  %v7963_v18 = vmul.f32 %v11956_v6, %v7962_v7  ;;  %vm7970_vm0 = vcmp.eq.f32.partialorder %v15051_v52, 0.0 }
 0x852   : > { %v15139_v60 = vadd.f32 %v7390_v43, %v14691_v47  ;;  %v6896_v37 = vpop.f32.mrf.mxu2  ;;  %v7955_v48 = vmul.f32 %v7954_v35, %v15023_v1  ;;  %v8001_v9 = vsub.f32 1.5, %v8000_v11  ;;  %vm8016_vm1 = vcmp.eq.f32.partialorder %v15097_v4, inf }
 0x853   : > { %v15144_v51 = vadd.f32 %v7393_v32, %v14695_v53  ;;  %v6945_v22 = vpop.f32.mrf.mxu3  ;;  %v7959_v53 = vand.u32 2147483648, %v15023_v1  ;;  %v11958_v25 = vpop.eup %11957  ;;  %v16774_v32 = vld [vmem:[#allocation98_spill] sm:$0xff]  ;;  %v7964_v11 = vmul.f32 0.5, %v7963_v18  ;;  %vm8018_vm2 = vcmp.eq.f32.partialorder %v15097_v4, 0.0 }
 0x854   : > { %v6801_v20 = vpop.f32.mrf.mxu0  ;;  %v6946_v10 = vadd.f32 %v6945_v22, %v6896_v37  ;;  %v6850_v27 = vpop.f32.mrf.mxu1  ;;  %v8002_v42 = vmul.f32 %v11954_v62, %v8001_v9  ;;  %v7957_v19 = vsel %vm7956_vm11, %v15023_v1, %v7955_v48  ;;  %v8010_v41 = vmul.f32 %v11958_v25, %v15097_v4  ;;  %v11806_v1 = vld [vmem:[#allocation8 + $0xc8] sm:$0xff] }
 0x855   : > { %v6851_v47 = vadd.f32 %v6850_v27, %v6801_v20  ;;  %11961 = vrsqrt.f32 %v15144_v51  ;;  %v8007_v37 = vand.u32 2147483648, %v15061_v29  ;;  %v7965_v48 = vsub.f32 1.5, %v7964_v11  ;;  %8678 = vmatpush.bf16.msra.mxu3 %v11806_v1 }
 0x856   : > { %v7258_v43 = vadd.f32 %v6946_v10, %v16773_v63  ;;  %6996 = vmatmul.bf16.gmra.mxu0 %v14292_v24  ;;  %v8003_v62 = vmul.f32 %v8002_v42, %v15061_v29  ;;  %11963 = vrsqrt.f32 %v15139_v60  ;;  %vm8052_vm3 = vcmp.eq.f32.partialorder %v15105_v34, inf }
 0x857   : > { %v7265_v35 = vadd.f32 %v6851_v47, %v16774_v32  ;;  %7045 = vmatmul.bf16.gmra.mxu1 %v14295_v56  ;;  %7094 = vmatmul.bf16.gmra.mxu2 %v14292_v24  ;;  %v8011_v24 = vmul.f32 %v11958_v25, %v8010_v41  ;;  %v11960_v9 = vpop.eup %11959  ;;  %v16775_v47 = vld [vmem:[#allocation64_spill] sm:$0xff]  ;;  %v7966_v63 = vmul.f32 %v11956_v6, %v7965_v48  ;;  %vm8100_vm4 = vcmp.eq.f32.partialorder %v15144_v51, inf }
 0x858   : > { %v7394_v21 = vmul.f32 %v7258_v43, %v7258_v43  ;;  %7143 = vmatmul.bf16.gmra.mxu3 %v14295_v56  ;;  %v8005_v20 = vsel %vm8004_vm13, %v15061_v29, %v8003_v62  ;;  %v15172_v56 = vsel %vm7958_vm12, %v7959_v53, %v7957_v19  ;;  %v7971_v53 = vand.u32 2147483648, %v15051_v52 }
 0x859   : > { %v7397_v22 = vmul.f32 %v7265_v35, %v7265_v35  ;;  %v15174_v27 = vsel %vm8006_vm14, %v8007_v37, %v8005_v20  ;;  %v8046_v19 = vmul.f32 %v11960_v9, %v15105_v34  ;;  %v7967_v11 = vmul.f32 %v7966_v63, %v15051_v52  ;;  %v16776_v37 = vld [vmem:[#allocation18_spill] sm:$0xff]  ;;  %v16777_v20 = vld [vmem:[#allocation19_spill] sm:$0xff] }
 0x85a   : > { %v15168_v7 = vadd.f32 %v7394_v21, %v14699_v44  ;;  %v6899_v10 = vpop.f32.mrf.mxu2  ;;  %v8012_v44 = vmul.f32 0.5, %v8011_v24  ;;  %v8019_v63 = vand.u32 2147483648, %v15097_v4  ;;  %vm8054_vm5 = vcmp.eq.f32.partialorder %v15105_v34, 0.0 }
 0x85b   : > { %v15178_v3 = vadd.f32 %v7397_v22, %v16775_v47  ;;  %v6948_v42 = vpop.f32.mrf.mxu3  ;;  %v11962_v43 = vpop.eup %11961  ;;  %v8047_v6 = vmul.f32 %v11960_v9, %v8046_v19  ;;  %v7969_v24 = vsel %vm7968_vm15, %v15051_v52, %v7967_v11  ;;  %vm8102_vm6 = vcmp.eq.f32.partialorder %v15144_v51, 0.0 }
 0x85c   : > { %v6803_v29 = vpop.f32.mrf.mxu0  ;;  %v6949_v32 = vadd.f32 %v6948_v42, %v6899_v10  ;;  %v6852_v35 = vpop.f32.mrf.mxu1  ;;  %v8013_v41 = vsub.f32 1.5, %v8012_v44  ;;  %v8094_v21 = vmul.f32 %v11962_v43, %v15144_v51  ;;  %11965 = vrsqrt.f32 %v15168_v7 }
 0x85d   : > { %v6853_v62 = vadd.f32 %v6852_v35, %v6803_v29  ;;  %v11964_v42 = vpop.eup %11963  ;;  %v8048_v44 = vmul.f32 0.5, %v8047_v6  ;;  %11967 = vrsqrt.f32 %v15178_v3  ;;  %vm8112_vm7 = vcmp.eq.f32.partialorder %v15168_v7, inf }
 0x85e   : > { %v7266_v22 = vadd.f32 %v6949_v32, %v16776_v37  ;;  %v8014_v10 = vmul.f32 %v11958_v25, %v8013_v41  ;;  %v8095_v47 = vmul.f32 %v11962_v43, %v8094_v21  ;;  %v8058_v19 = vmul.f32 %v11964_v42, %v15139_v60  ;;  %v16780_v41 = vld [vmem:[#allocation66_spill] sm:$0xff] }
 0x85f   : > { %v7273_v48 = vadd.f32 %v6853_v62, %v16777_v20  ;;  %v16778_v62 = vld [vmem:[#allocation65_spill] sm:$0xff]  ;;  %v15203_v25 = vsel %vm7970_vm0, %v7971_v53, %v7969_v24  ;;  %v8049_v11 = vsub.f32 1.5, %v8048_v44  ;;  %vm8064_vm8 = vcmp.eq.f32.partialorder %v15139_v60, inf }
 0x860   : > { %v7398_v29 = vmul.f32 %v7266_v22, %v7266_v22  ;;  %v8015_v35 = vmul.f32 %v8014_v10, %v15097_v4  ;;  %v8096_v1 = vmul.f32 0.5, %v8095_v47  ;;  %vm8114_vm9 = vcmp.eq.f32.partialorder %v15168_v7, 0.0 }
 0x861   : > { %v7401_v32 = vmul.f32 %v7273_v48, %v7273_v48  ;;  %v11797_v48 = vld [vmem:[#allocation8 + $0x80] sm:$0xff]  ;;  %v8050_v24 = vmul.f32 %v11960_v9, %v8049_v11  ;;  %vm8066_vm10 = vcmp.eq.f32.partialorder %v15139_v60, 0.0  ;;  %vm8148_vm11 = vcmp.eq.f32.partialorder %v15178_v3, inf }
 0x862   : > { %v15199_v37 = vadd.f32 %v7398_v29, %v16778_v62  ;;  %v6901_v20 = vpop.f32.mrf.mxu2  ;;  %v8017_v10 = vsel %vm8016_vm1, %v15097_v4, %v8015_v35  ;;  %v8097_v47 = vsub.f32 1.5, %v8096_v1  ;;  %v8059_v29 = vmul.f32 %v11964_v42, %v8058_v19  ;;  %v11966_v62 = vpop.eup %11965  ;;  %8630 = vmatpush.bf16.msra.mxu2 %v11797_v48  ;;  %v16781_v35 = vld [vmem:[#allocation20_spill] sm:$0xff] }
 0x863   : > { %v15207_v21 = vadd.f32 %v7401_v32, %v16780_v41  ;;  %v6950_v22 = vpop.f32.mrf.mxu3  ;;  %v15214_v53 = vsel %vm8018_vm2, %v8019_v63, %v8017_v10  ;;  %v16782_v19 = vpack.c.bf16 %v14784_v55, %v14780_v0  ;;  %v8051_v4 = vmul.f32 %v8050_v24, %v15105_v34  ;;  %v15239_v30 = vpop.eup %11967 }
 0x864   : > { %16779 = vst [vmem:[#allocation71_spill] sm:$0xff] %v15199_v37  ;;  %v6962_v6 = vpop.f32.mrf.mxu0  ;;  %v6951_v18 = vadd.f32 %v6950_v22, %v6901_v20  ;;  %v7011_v52 = vpop.f32.mrf.mxu1  ;;  %v8098_v41 = vmul.f32 %v11962_v43, %v8097_v47  ;;  %v8060_v40 = vmul.f32 0.5, %v8059_v29  ;;  %v8055_v63 = vand.u32 2147483648, %v15105_v34  ;;  %v16783_v20 = vld [vmem:[#allocation21_spill] sm:$0xff]  ;;  %v11805_v47 = vld [vmem:[#allocation8 + $0xc0] sm:$0xff] }
 0x865   : > { %v7012_v44 = vadd.f32 %v7011_v52, %v6962_v6  ;;  %v8106_v9 = vmul.f32 %v11966_v62, %v15168_v7  ;;  %v8053_v0 = vsel %vm8052_vm3, %v15105_v34, %v8051_v4  ;;  %v8103_v55 = vand.u32 2147483648, %v15144_v51  ;;  %v16789_v34 = vld [vmem:[#allocation68_spill] sm:$0xff]  ;;  %8679 = vmatpush.bf16.msra.mxu3 %v11805_v47  ;;  %v16795_v47 = vld [vmem:[#allocation46_spill] sm:$0xff] }
 0x866   : > { %v7274_v1 = vadd.f32 %v6951_v18, %v16781_v35  ;;  %8533 = vmatmul.bf16.vlgmr.msra.gmra.mxu0 %v16782_v19  ;;  %v8099_v43 = vmul.f32 %v8098_v41, %v15144_v51  ;;  %v8061_v18 = vsub.f32 1.5, %v8060_v40  ;;  %v15244_v29 = vsel %vm8054_vm5, %v8055_v63, %v8053_v0 }
 0x867   : > { %v7155_v11 = vadd.f32 %v7012_v44, %v16783_v20  ;;  %8582 = vmatmul.bf16.vlgmr.msra.gmra.mxu1 %v8238_v28  ;;  %v8107_v6 = vmul.f32 %v11966_v62, %v8106_v9  ;;  %16786 = vst [vmem:[#allocation73_spill] sm:$0xff] %v15244_v29  ;;  %v16788_v44 = vld [vmem:[#allocation41_spill] sm:$0xff]  ;;  %v16790_v9 = vld [vmem:[#allocation42_spill] sm:$0xff]  ;;  %v16791_v20 = vld [vmem:[#allocation43_spill] sm:$0xff] }
 0x868   : > { %v7402_v22 = vmul.f32 %v7274_v1, %v7274_v1  ;;  %v8101_v10 = vsel %vm8100_vm4, %v15144_v51, %v8099_v43  ;;  %v15250_v41 = vmul.f32 %v16788_v44, %v16788_v44  ;;  %v8062_v4 = vmul.f32 %v11964_v42, %v8061_v18  ;;  %v16793_v18 = vld [vmem:[#allocation45_spill] sm:$0xff] }
 0x869   : > { %v7343_v48 = vmul.f32 %v7155_v11, %v7155_v11  ;;  %v15246_v52 = vsel %vm8102_vm6, %v8103_v55, %v8101_v10  ;;  %v8108_v24 = vmul.f32 0.5, %v8107_v6  ;;  %v15259_v63 = vmul.f32 %v16790_v9, %v16790_v9  ;;  %v16792_v55 = vld [vmem:[#allocation44_spill] sm:$0xff] }
 0x86a   : > { %v15242_v28 = vadd.f32 %v7402_v22, %v16784_v13  ;;  %v7060_v40 = vpop.f32.mrf.mxu2  ;;  %16787 = vst [vmem:[#allocation74_spill] sm:$0xff] %v15246_v52  ;;  %v15263_v11 = vmul.f32 %v16791_v20, %v16791_v20  ;;  %v15267_v6 = vmul.f32 %v16792_v55, %v16792_v55  ;;  %v8142_v42 = vmul.f32 %v15239_v30, %v15178_v3  ;;  %v16794_v13 = vld [vmem:[#allocation99_spill] sm:$0xff] }
 0x86b   : > { %v15253_v35 = vadd.f32 %v7343_v48, %v16789_v34  ;;  %v7109_v51 = vpop.f32.mrf.mxu3  ;;  %v8109_v0 = vsub.f32 1.5, %v8108_v24  ;;  %v15274_v10 = vmul.f32 %v16793_v18, %v16793_v18  ;;  %v15280_v24 = vmul.f32 %v16795_v47, %v16795_v47  ;;  %v16796_v34 = vld [vmem:[#allocation47_spill] sm:$0xff] }
 0x86c   : > { %16785 = vst [vmem:[#allocation72_spill] sm:$0xff] %v15242_v28  ;;  %v6964_v1 = vpop.f32.mrf.mxu0  ;;  %v7110_v43 = vadd.f32 %v7109_v51, %v7060_v40  ;;  %v7013_v22 = vpop.f32.mrf.mxu1  ;;  %v15284_v51 = vmul.f32 %v16796_v34, %v16796_v34  ;;  %v8063_v20 = vmul.f32 %v8062_v4, %v15139_v60  ;;  %v8143_v4 = vmul.f32 %v15239_v30, %v8142_v42 }
 0x86d   : > { %11969 = vrsqrt.f32 %v15253_v35  ;;  %v7014_v48 = vadd.f32 %v7013_v22, %v6964_v1  ;;  %v8110_v40 = vmul.f32 %v11966_v62, %v8109_v0  ;;  %v16797_v1 = vld [vmem:[#allocation100_spill] sm:$0xff]  ;;  %v8067_v42 = vand.u32 2147483648, %v15139_v60 }
 0x86e   : > { %v7156_v44 = vadd.f32 %v7110_v43, %v16794_v13  ;;  %11971 = vrsqrt.f32 %v15207_v21  ;;  %v16798_v22 = vld [vmem:[#allocation48_spill] sm:$0xff]  ;;  %v16799_v43 = vld [vmem:[#allocation49_spill] sm:$0xff]  ;;  %v16800_v13 = vld [vmem:[#allocation50_spill] sm:$0xff]  ;;  %v8065_v32 = vsel %vm8064_vm8, %v15139_v60, %v8063_v20  ;;  %v8144_v20 = vmul.f32 0.5, %v8143_v4 }
 0x86f   : > { %v7163_v9 = vadd.f32 %v7014_v48, %v16797_v1  ;;  %v15290_v55 = vmul.f32 %v16798_v22, %v16798_v22  ;;  %v15294_v62 = vmul.f32 %v16799_v43, %v16799_v43  ;;  %v8111_v18 = vmul.f32 %v8110_v40, %v15168_v7  ;;  %v16801_v43 = vld [vmem:[#allocation69_spill] sm:$0xff] }
 0x870   : > { %v7344_v0 = vmul.f32 %v7156_v44, %v7156_v44  ;;  %v15299_v47 = vmul.f32 %v16800_v13, %v16800_v13  ;;  %v8115_v44 = vand.u32 2147483648, %v15168_v7  ;;  %v15331_v52 = vsel %vm8066_vm10, %v8067_v42, %v8065_v32  ;;  %v16813_v32 = vld [vmem:[#allocation54_spill] sm:$0xff] }
 0x871   : > { %v7347_v34 = vmul.f32 %v7163_v9, %v7163_v9  ;;  %v8113_v22 = vsel %vm8112_vm7, %v15168_v7, %v8111_v18  ;;  %v16804_v7 = vld [vmem:[#allocation101_spill] sm:$0xff]  ;;  %16806 = vst [vmem:[#allocation76_spill] sm:$0xff] %v15331_v52  ;;  %v16810_v4 = vpack.c.bf16 %v14887_v45, %v14880_v61  ;;  %v15351_v42 = vmul.f32 %v16813_v32, %v16813_v32  ;;  %v16817_v45 = vld [vmem:[#allocation56_spill] sm:$0xff] }
 0x872   : > { %v15304_v48 = vadd.f32 %v7344_v0, %v14730_v38  ;;  %v7062_v1 = vpop.f32.mrf.mxu2  ;;  %v15319_v50 = vsel %vm8114_vm9, %v8115_v44, %v8113_v22  ;;  %v16807_v22 = vld [vmem:[#allocation52_spill] sm:$0xff]  ;;  %vm7500_vm12 = vcmp.eq.f32.partialorder %v15253_v35, inf  ;;  %vm7502_vm13 = vcmp.eq.f32.partialorder %v15253_v35, 0.0 }
 0x873   : > { %v11970_v40 = vpop.eup %11969  ;;  %v15310_v19 = vadd.f32 %v7347_v34, %v16801_v43  ;;  %v7111_v13 = vpop.f32.mrf.mxu3  ;;  %16802 = vst [vmem:[#allocation75_spill] sm:$0xff] %v15319_v50  ;;  %v16803_v43 = vld [vmem:[#allocation51_spill] sm:$0xff]  ;;  %v15335_v44 = vmul.f32 %v16807_v22, %v16807_v22  ;;  %v8145_v22 = vsub.f32 1.5, %v8144_v20 }
 0x874   : > { %v6967_v9 = vpop.f32.mrf.mxu0  ;;  %v15315_v38 = vpop.eup %11971  ;;  %11973 = vrsqrt.f32 %v15304_v48  ;;  %v7112_v0 = vadd.f32 %v7111_v13, %v7062_v1  ;;  %v7494_v49 = vmul.f32 %v11970_v40, %v15253_v35  ;;  %v15325_v28 = vmul.f32 %v16803_v43, %v16803_v43  ;;  %16814 = vst [vmem:[#allocation120_spill] sm:$0xff] %v15351_v42  ;;  %v16815_v43 = vld [vmem:[#allocation55_spill] sm:$0xff] }
 0x875   : > { %v7016_v18 = vpop.f32.mrf.mxu1  ;;  %11975 = vrsqrt.f32 %v15310_v19  ;;  %v16805_v1 = vpack.c.bf16 %v14854_v15, %v14848_v58  ;;  %16808 = vst [vmem:[#allocation77_spill] sm:$0xff] %v15335_v44  ;;  %v8190_v58 = vmul.f32 %v15315_v38, %v15207_v21  ;;  %v16811_v15 = vld [vmem:[#allocation53_spill] sm:$0xff]  ;;  %v15355_v61 = vmul.f32 %v16815_v43, %v16815_v43  ;;  %v16824_v50 = vld [vmem:[#allocation59_spill] sm:$0xff] }
 0x876   : > { %v7017_v34 = vadd.f32 %v7016_v18, %v6967_v9  ;;  %v7164_v29 = vadd.f32 %v7112_v0, %v16804_v7  ;;  %v7495_v13 = vmul.f32 %v11970_v40, %v7494_v49  ;;  %v16809_v9 = vld [vmem:[#allocation102_spill] sm:$0xff]  ;;  %v15347_v49 = vmul.f32 %v16811_v15, %v16811_v15 }
 0x877   : > { %8538 = vmatmul.bf16.gmra.mxu0 %v16805_v1  ;;  %8587 = vmatmul.bf16.gmra.mxu1 %v16810_v4  ;;  %16816 = vst [vmem:[#allocation121_spill] sm:$0xff] %v15355_v61  ;;  %v15359_v7 = vmul.f32 %v16817_v45, %v16817_v45  ;;  %v16819_v4 = vld [vmem:[#allocation57_spill] sm:$0xff]  ;;  %v16821_v0 = vld [vmem:[#allocation58_spill] sm:$0xff]  ;;  %v15374_v45 = vmul.f32 %v16824_v50, %v16824_v50  ;;  %vm7548_vm14 = vcmp.eq.f32.partialorder %v15310_v19, inf  ;;  %vm7550_vm15 = vcmp.eq.f32.partialorder %v15310_v19, 0.0 }
 0x878   : > { %v7171_v60 = vadd.f32 %v7017_v34, %v16809_v9  ;;  %16812 = vst [vmem:[#allocation78_spill] sm:$0xff] %v15347_v49  ;;  %v7348_v18 = vmul.f32 %v7164_v29, %v7164_v29  ;;  %v7496_v34 = vmul.f32 0.5, %v7495_v13  ;;  %v15363_v15 = vmul.f32 %v16819_v4, %v16819_v4  ;;  %v16823_v29 = vld [vmem:[#allocation70_spill] sm:$0xff]  ;;  %v16827_v49 = vld [vmem:[#allocation23_spill] sm:$0xff] }
 0x879   : > { %16818 = vst [vmem:[#allocation122_spill] sm:$0xff] %v15359_v7  ;;  %v15367_v32 = vmul.f32 %v16821_v0, %v16821_v0  ;;  %v8191_v0 = vmul.f32 %v15315_v38, %v8190_v58  ;;  %vm7512_vm0 = vcmp.eq.f32.partialorder %v15304_v48, inf  ;;  %vm7514_vm1 = vcmp.eq.f32.partialorder %v15304_v48, 0.0 }
 0x87a   : > { %v7351_v1 = vmul.f32 %v7171_v60, %v7171_v60  ;;  %v11974_v9 = vpop.eup %11973  ;;  %16820 = vst [vmem:[#allocation32_spill] sm:$0xff] %v15363_v15  ;;  %v15370_v13 = vadd.f32 %v7348_v18, %v16823_v29  ;;  %v7065_v43 = vpop.f32.mrf.mxu2  ;;  %v7497_v61 = vsub.f32 1.5, %v7496_v34 }
 0x87b   : > { %16822 = vst [vmem:[#allocation79_spill] sm:$0xff] %v15367_v32  ;;  %v11976_v52 = vpop.eup %11975  ;;  %v7114_v60 = vpop.f32.mrf.mxu3  ;;  %v7506_v15 = vmul.f32 %v11974_v9, %v15304_v48 }
 0x87c   : > { %16825 = vst [vmem:[#allocation33_spill] sm:$0xff] %v15374_v45  ;;  %v15377_v20 = vadd.f32 %v7351_v1, %v14965_v17  ;;  %v6969_v4 = vpop.f32.mrf.mxu0  ;;  %11977 = vrsqrt.f32 %v15370_v13  ;;  %v7115_v18 = vadd.f32 %v7114_v60, %v7065_v43  ;;  %v7542_v34 = vmul.f32 %v11976_v52, %v15310_v19  ;;  %v16826_v1 = vld [vmem:[#allocation22_spill] sm:$0xff] }
 0x87d   : > { %v7018_v29 = vpop.f32.mrf.mxu1  ;;  %v7507_v50 = vmul.f32 %v11974_v9, %v7506_v15  ;;  %v8146_v45 = vmul.f32 %v15239_v30, %v8145_v22  ;;  %v7498_v42 = vmul.f32 %v11970_v40, %v7497_v61  ;;  %v8192_v60 = vmul.f32 0.5, %v8191_v0 }
 0x87e   : > { %v7019_v32 = vadd.f32 %v7018_v29, %v6969_v4  ;;  %v7172_v7 = vadd.f32 %v7115_v18, %v16826_v1  ;;  %v7543_v58 = vmul.f32 %v11976_v52, %v7542_v34  ;;  %11979 = vrsqrt.f32 %v15377_v20 }
 0x87f   : > { %v7508_v43 = vmul.f32 0.5, %v7507_v50  ;;  %v7503_v15 = vand.u32 2147483648, %v15253_v35  ;;  %v8147_v61 = vmul.f32 %v8146_v45, %v15178_v3  ;;  %v7551_v18 = vand.u32 2147483648, %v15310_v19 }
 0x880   : > { %v7179_v37 = vadd.f32 %v7019_v32, %v16827_v49  ;;  %v7352_v44 = vmul.f32 %v7172_v7, %v7172_v7  ;;  %v7544_v30 = vmul.f32 0.5, %v7543_v58  ;;  %v7499_v7 = vmul.f32 %v7498_v42, %v15253_v35 }
 0x881   : > { %v7509_v40 = vsub.f32 1.5, %v7508_v43  ;;  %v8193_v1 = vsub.f32 1.5, %v8192_v60  ;;  %v7515_v43 = vand.u32 2147483648, %v15304_v48  ;;  %v16829_v60 = vpack.c.bf16 %v14927_v8, %v14920_v12 }
 0x882   : > { %v7355_v22 = vmul.f32 %v7179_v37, %v7179_v37  ;;  %v11978_v4 = vpop.eup %11977  ;;  %v15396_v49 = vadd.f32 %v7352_v44, %v14971_v5  ;;  %v7067_v32 = vpop.f32.mrf.mxu2  ;;  %v7545_v0 = vsub.f32 1.5, %v7544_v30  ;;  %vm7560_vm2 = vcmp.eq.f32.partialorder %v15370_v13, inf }
 0x883   : > { %v7116_v37 = vpop.f32.mrf.mxu3  ;;  %v7510_v50 = vmul.f32 %v11974_v9, %v7509_v40  ;;  %v7554_v45 = vmul.f32 %v11978_v4, %v15370_v13  ;;  %v16828_v9 = vld [vmem:[#allocation103_spill] sm:$0xff]  ;;  %v8194_v8 = vmul.f32 %v15315_v38, %v8193_v1  ;;  %vm7562_vm3 = vcmp.eq.f32.partialorder %v15370_v13, 0.0 }
 0x884   : > { %v15402_v29 = vadd.f32 %v7355_v22, %v14975_v36  ;;  %v6972_v34 = vpop.f32.mrf.mxu0  ;;  %v7117_v58 = vadd.f32 %v7116_v37, %v7067_v32  ;;  %v7546_v44 = vmul.f32 %v11976_v52, %v7545_v0  ;;  %11981 = vrsqrt.f32 %v15396_v49  ;;  %v11980_v42 = vpop.eup %11979  ;;  %v16830_v0 = vld [vmem:[#allocation104_spill] sm:$0xff] }
 0x885   : > { %v7021_v5 = vpop.f32.mrf.mxu1  ;;  %v7555_v17 = vmul.f32 %v11978_v4, %v7554_v45  ;;  %v15411_v36 = vsel %vm8148_vm11, %v15178_v3, %v8147_v61  ;;  %v7501_v52 = vsel %vm7500_vm12, %v15253_v35, %v7499_v7  ;;  %v7590_v32 = vmul.f32 %v11980_v42, %v15377_v20 }
 0x886   : > { %v7022_v30 = vadd.f32 %v7021_v5, %v6972_v34  ;;  %11983 = vrsqrt.f32 %v15402_v29  ;;  %v7180_v22 = vadd.f32 %v7117_v58, %v16828_v9  ;;  %v7547_v40 = vmul.f32 %v7546_v44, %v15310_v19 }
 0x887   : > { %8543 = vmatmul.bf16.gmra.mxu0 %v16829_v60  ;;  %v16831_v61 = vpack.c.bf16 %v14961_v2, %v14959_v16  ;;  %v7511_v34 = vmul.f32 %v7510_v50, %v15304_v48  ;;  %v7556_v12 = vmul.f32 0.5, %v7555_v17  ;;  %v7591_v58 = vmul.f32 %v11980_v42, %v7590_v32 }
 0x888   : > { %v7187_v37 = vadd.f32 %v7022_v30, %v16830_v0  ;;  %v7356_v45 = vmul.f32 %v7180_v22, %v7180_v22  ;;  %v7549_v7 = vsel %vm7548_vm14, %v15310_v19, %v7547_v40  ;;  %v7504_v44 = vsel %vm7502_vm13, %v7503_v15, %v7501_v52 }
 0x889   : > { %8592 = vmatmul.bf16.gmra.mxu1 %v16831_v61  ;;  %v7552_v16 = vsel %vm7550_vm15, %v7551_v18, %v7549_v7  ;;  %v7557_v2 = vsub.f32 1.5, %v7556_v12  ;;  %v7592_v30 = vmul.f32 0.5, %v7591_v58  ;;  %v7513_v19 = vsel %vm7512_vm0, %v15304_v48, %v7511_v34  ;;  %v16832_v12 = vld [vmem:[#allocation105_spill] sm:$0xff]  ;;  %v16833_v7 = vld [vmem:[#allocation106_spill] sm:$0xff] }
 0x88a   : > { %v7359_v5 = vmul.f32 %v7187_v37, %v7187_v37  ;;  %v11982_v50 = vpop.eup %11981  ;;  %v15438_v17 = vadd.f32 %v7356_v45, %v15132_v59  ;;  %v7070_v38 = vpop.f32.mrf.mxu2  ;;  %v8239_v1 = vpack.c.bf16 %v7552_v16, %v7504_v44  ;;  %v7563_v37 = vand.u32 2147483648, %v15370_v13 }
 0x88b   : > { %v7119_v60 = vpop.f32.mrf.mxu3  ;;  %v7558_v15 = vmul.f32 %v11978_v4, %v7557_v2  ;;  %v7602_v18 = vmul.f32 %v11982_v50, %v15396_v49  ;;  %v7593_v40 = vsub.f32 1.5, %v7592_v30  ;;  %vm7596_vm4 = vcmp.eq.f32.partialorder %v15377_v20, inf }
 0x88c   : > { %v11984_v9 = vpop.eup %11983  ;;  %v15442_v22 = vadd.f32 %v7359_v5, %v15136_v46  ;;  %v6974_v35 = vpop.f32.mrf.mxu0  ;;  %v7120_v59 = vadd.f32 %v7119_v60, %v7070_v38  ;;  %8631 = vmatmul.bf16.vlgmr.msra.gmra.mxu2 %v8239_v1  ;;  %11985 = vrsqrt.f32 %v15438_v17  ;;  %v7516_v5 = vsel %vm7514_vm1, %v7515_v43, %v7513_v19 }
 0x88d   : > { %v7023_v52 = vpop.f32.mrf.mxu1  ;;  %v7638_v32 = vmul.f32 %v11984_v9, %v15402_v29  ;;  %v7559_v46 = vmul.f32 %v7558_v15, %v15370_v13  ;;  %v7603_v61 = vmul.f32 %v11982_v50, %v7602_v18  ;;  %v7594_v34 = vmul.f32 %v11980_v42, %v7593_v40 }
 0x88e   : > { %v7024_v0 = vadd.f32 %v7023_v52, %v6974_v35  ;;  %v7188_v45 = vadd.f32 %v7120_v59, %v16832_v12  ;;  %11987 = vrsqrt.f32 %v15442_v22  ;;  %vm7598_vm5 = vcmp.eq.f32.partialorder %v15377_v20, 0.0 }
 0x88f   : > { %v7639_v4 = vmul.f32 %v11984_v9, %v7638_v32  ;;  %v7561_v44 = vsel %vm7560_vm2, %v15370_v13, %v7559_v46  ;;  %v7604_v16 = vmul.f32 0.5, %v7603_v61  ;;  %v7595_v1 = vmul.f32 %v7594_v34, %v15377_v20 }
 0x890   : > { %v7195_v58 = vadd.f32 %v7024_v0, %v16833_v7  ;;  %v7360_v2 = vmul.f32 %v7188_v45, %v7188_v45  ;;  %v7564_v38 = vsel %vm7562_vm3, %v7563_v37, %v7561_v44  ;;  %v7599_v19 = vand.u32 2147483648, %v15377_v20  ;;  %v16836_v7 = vld [vmem:[#allocation25_spill] sm:$0xff] }
 0x891   : > { %v7640_v42 = vmul.f32 0.5, %v7639_v4  ;;  %v8240_v60 = vpack.c.bf16 %v7564_v38, %v7516_v5  ;;  %v7605_v35 = vsub.f32 1.5, %v7604_v16  ;;  %v15474_v0 = vmul.f32 %v8194_v8, %v15207_v21 }
 0x892   : > { %v7363_v30 = vmul.f32 %v7195_v58, %v7195_v58  ;;  %v11986_v15 = vpop.eup %11985  ;;  %v15465_v48 = vadd.f32 %v7360_v2, %v15250_v41  ;;  %v7072_v43 = vpop.f32.mrf.mxu2  ;;  %vm7644_vm6 = vcmp.eq.f32.partialorder %v15402_v29, inf  ;;  %vm7608_vm7 = vcmp.eq.f32.partialorder %v15396_v49, inf }
 0x893   : > { %v7641_v18 = vsub.f32 1.5, %v7640_v42  ;;  %v7121_v59 = vpop.f32.mrf.mxu3  ;;  %8680 = vmatmul.bf16.vlgmr.msra.gmra.mxu3 %v8240_v60  ;;  %v7606_v40 = vmul.f32 %v11982_v50, %v7605_v35  ;;  %v7650_v32 = vmul.f32 %v11986_v15, %v15438_v17  ;;  %v16834_v50 = vld [vmem:[#allocation24_spill] sm:$0xff]  ;;  %v16835_v8 = vpack.c.bf16 %v15027_v39, %v15016_v14 }
 0x894   : > { %v15470_v13 = vadd.f32 %v7363_v30, %v15259_v63  ;;  %v6977_v52 = vpop.f32.mrf.mxu0  ;;  %v7122_v41 = vadd.f32 %v7121_v59, %v7072_v43  ;;  %v7597_v63 = vsel %vm7596_vm4, %v15377_v20, %v7595_v1  ;;  %vm7646_vm8 = vcmp.eq.f32.partialorder %v15402_v29, 0.0  ;;  %v11988_v4 = vpop.eup %11987 }
 0x895   : > { %v7026_v46 = vpop.f32.mrf.mxu1  ;;  %v7642_v37 = vmul.f32 %v11984_v9, %v7641_v18  ;;  %v7651_v12 = vmul.f32 %v11986_v15, %v7650_v32  ;;  %v7647_v34 = vand.u32 2147483648, %v15402_v29  ;;  %v16837_v5 = vpack.c.bf16 %v15065_v31, %v15055_v23 }
 0x896   : > { %v7027_v61 = vadd.f32 %v7026_v46, %v6977_v52  ;;  %11989 = vrsqrt.f32 %v15470_v13  ;;  %v7196_v45 = vadd.f32 %v7122_v41, %v16834_v50  ;;  %v7607_v44 = vmul.f32 %v7606_v40, %v15396_v49 }
 0x897   : > { %8548 = vmatmul.bf16.gmra.mxu0 %v16835_v8  ;;  %v7643_v9 = vmul.f32 %v7642_v37, %v15402_v29  ;;  %vm7610_vm9 = vcmp.eq.f32.partialorder %v15396_v49, 0.0  ;;  %v7652_v16 = vmul.f32 0.5, %v7651_v12  ;;  %v7600_v39 = vsel %vm7598_vm5, %v7599_v19, %v7597_v63 }
 0x898   : > { %v7203_v58 = vadd.f32 %v7027_v61, %v16836_v7  ;;  %v7364_v14 = vmul.f32 %v7196_v45, %v7196_v45  ;;  %v7686_v38 = vmul.f32 %v11988_v4, %v15442_v22  ;;  %11991 = vrsqrt.f32 %v15465_v48  ;;  %v16838_v61 = vld [vmem:[#allocation107_spill] sm:$0xff]  ;;  %v16839_v45 = vld [vmem:[#allocation108_spill] sm:$0xff] }
 0x899   : > { %8597 = vmatmul.bf16.gmra.mxu1 %v16837_v5  ;;  %v7645_v2 = vsel %vm7644_vm6, %v15402_v29, %v7643_v9  ;;  %v7653_v30 = vsub.f32 1.5, %v7652_v16  ;;  %v7611_v35 = vand.u32 2147483648, %v15396_v49  ;;  %v7609_v59 = vsel %vm7608_vm7, %v15396_v49, %v7607_v44 }
 0x89a   : > { %v7367_v1 = vmul.f32 %v7203_v58, %v7203_v58  ;;  %v7648_v42 = vsel %vm7646_vm8, %v7647_v34, %v7645_v2  ;;  %v15503_v23 = vadd.f32 %v7364_v14, %v15263_v11  ;;  %v7075_v31 = vpop.f32.mrf.mxu2  ;;  %v7687_v20 = vmul.f32 %v11988_v4, %v7686_v38 }
 0x89b   : > { %v8243_v60 = vpack.c.bf16 %v7648_v42, %v7600_v39  ;;  %v7124_v29 = vpop.f32.mrf.mxu3  ;;  %v7654_v52 = vmul.f32 %v11986_v15, %v7653_v30  ;;  %vm7656_vm10 = vcmp.eq.f32.partialorder %v15438_v17, inf  ;;  %vm7658_vm11 = vcmp.eq.f32.partialorder %v15438_v17, 0.0 }
 0x89c   : > { %v11990_v43 = vpop.eup %11989  ;;  %v15507_v19 = vadd.f32 %v7367_v1, %v15267_v6  ;;  %v6979_v18 = vpop.f32.mrf.mxu0  ;;  %v7125_v11 = vadd.f32 %v7124_v29, %v7075_v31  ;;  %v7688_v32 = vmul.f32 0.5, %v7687_v20  ;;  %11993 = vrsqrt.f32 %v15503_v23 }
 0x89d   : > { %v7028_v40 = vpop.f32.mrf.mxu1  ;;  %8636 = vmatmul.bf16.gmra.mxu2 %v8243_v60  ;;  %v7734_v41 = vmul.f32 %v11990_v43, %v15470_v13  ;;  %v7655_v6 = vmul.f32 %v7654_v52, %v15438_v17  ;;  %v7659_v37 = vand.u32 2147483648, %v15438_v17  ;;  %vm7692_vm12 = vcmp.eq.f32.partialorder %v15442_v22, inf }
 0x89e   : > { %v7029_v46 = vadd.f32 %v7028_v40, %v6979_v18  ;;  %v7204_v63 = vadd.f32 %v7125_v11, %v16838_v61  ;;  %v7689_v15 = vsub.f32 1.5, %v7688_v32  ;;  %v11992_v50 = vpop.eup %11991  ;;  %v7612_v9 = vsel %vm7610_vm9, %v7611_v35, %v7609_v59  ;;  %v16840_v32 = vld [vmem:[#allocation109_spill] sm:$0xff] }
 0x89f   : > { %v7735_v12 = vmul.f32 %v11990_v43, %v7734_v41  ;;  %v7657_v34 = vsel %vm7656_vm10, %v15438_v17, %v7655_v6  ;;  %vm7694_vm13 = vcmp.eq.f32.partialorder %v15442_v22, 0.0  ;;  %11995 = vrsqrt.f32 %v15507_v19 }
 0x8a0   : > { %v7211_v8 = vadd.f32 %v7029_v46, %v16839_v45  ;;  %v7368_v7 = vmul.f32 %v7204_v63, %v7204_v63  ;;  %v7660_v58 = vsel %vm7658_vm11, %v7659_v37, %v7657_v34  ;;  %v7690_v5 = vmul.f32 %v11988_v4, %v7689_v15  ;;  %v16842_v37 = vld [vmem:[#allocation110_spill] sm:$0xff] }
 0x8a1   : > { %v7736_v44 = vmul.f32 0.5, %v7735_v12  ;;  %v8244_v14 = vpack.c.bf16 %v7660_v58, %v7612_v9  ;;  %v7695_v39 = vand.u32 2147483648, %v15442_v22  ;;  %v7698_v2 = vmul.f32 %v11992_v50, %v15465_v48 }
 0x8a2   : > { %v7371_v16 = vmul.f32 %v7211_v8, %v7211_v8  ;;  %v11994_v49 = vpop.eup %11993  ;;  %v15531_v38 = vadd.f32 %v7368_v7, %v15274_v10  ;;  %v7077_v1 = vpop.f32.mrf.mxu2  ;;  %v7691_v17 = vmul.f32 %v7690_v5, %v15442_v22  ;;  %vm7740_vm14 = vcmp.eq.f32.partialorder %v15470_v13, inf }
 0x8a3   : > { %v7737_v42 = vsub.f32 1.5, %v7736_v44  ;;  %v7126_v4 = vpop.f32.mrf.mxu3  ;;  %8685 = vmatmul.bf16.gmra.mxu3 %v8244_v14  ;;  %vm7742_vm15 = vcmp.eq.f32.partialorder %v15470_v13, 0.0  ;;  %v7699_v60 = vmul.f32 %v11992_v50, %v7698_v2  ;;  %v7746_v35 = vmul.f32 %v11994_v49, %v15503_v23 }
 0x8a4   : > { %v15536_v30 = vadd.f32 %v7371_v16, %v15280_v24  ;;  %v6982_v31 = vpop.f32.mrf.mxu0  ;;  %v7127_v20 = vadd.f32 %v7126_v4, %v7077_v1  ;;  %v7743_v18 = vand.u32 2147483648, %v15470_v13  ;;  %11997 = vrsqrt.f32 %v15531_v38 }
 0x8a5   : > { %v7031_v10 = vpop.f32.mrf.mxu1  ;;  %v7738_v29 = vmul.f32 %v11990_v43, %v7737_v42  ;;  %v11996_v59 = vpop.eup %11995  ;;  %v7693_v24 = vsel %vm7692_vm12, %v15442_v22, %v7691_v17  ;;  %v7700_v11 = vmul.f32 0.5, %v7699_v60  ;;  %v7747_v40 = vmul.f32 %v11994_v49, %v7746_v35  ;;  %v16844_v35 = vld [vmem:[#allocation26_spill] sm:$0xff] }
 0x8a6   : > { %v7032_v52 = vadd.f32 %v7031_v10, %v6982_v31  ;;  %v7212_v41 = vadd.f32 %v7127_v20, %v16840_v32  ;;  %v16841_v46 = vpack.c.bf16 %v15101_v54, %v15090_v33  ;;  %v7782_v6 = vmul.f32 %v11996_v59, %v15507_v19 }
 0x8a7   : > { %v7739_v43 = vmul.f32 %v7738_v29, %v15470_v13  ;;  %11999 = vrsqrt.f32 %v15536_v30  ;;  %v16843_v63 = vpack.c.bf16 %v15128_v26, %v15124_v57  ;;  %v7701_v15 = vsub.f32 1.5, %v7700_v11 }
 0x8a8   : > { %8553 = vmatmul.bf16.gmra.mxu0 %v16841_v46  ;;  %v7219_v61 = vadd.f32 %v7032_v52, %v16842_v37  ;;  %vm7704_vm0 = vcmp.eq.f32.partialorder %v15465_v48, inf  ;;  %v7748_v12 = vmul.f32 0.5, %v7747_v40  ;;  %v7372_v45 = vmul.f32 %v7212_v41, %v7212_v41  ;;  %v16845_v52 = vld [vmem:[#allocation27_spill] sm:$0xff] }
 0x8a9   : > { %8602 = vmatmul.bf16.gmra.mxu1 %v16843_v63  ;;  %v7696_v33 = vsel %vm7694_vm13, %v7695_v39, %v7693_v24  ;;  %v7741_v54 = vsel %vm7740_vm14, %v15470_v13, %v7739_v43  ;;  %v7783_v8 = vmul.f32 %v11996_v59, %v7782_v6  ;;  %v7702_v7 = vmul.f32 %v11992_v50, %v7701_v15 }
 0x8aa   : > { %v7375_v9 = vmul.f32 %v7219_v61, %v7219_v61  ;;  %v7744_v34 = vsel %vm7742_vm15, %v7743_v18, %v7741_v54  ;;  %v7749_v57 = vsub.f32 1.5, %v7748_v12  ;;  %v15564_v26 = vpop.eup %11997  ;;  %v15567_v58 = vadd.f32 %v7372_v45, %v15284_v51  ;;  %v7080_v5 = vpop.f32.mrf.mxu2 }
 0x8ab   : > { %v8247_v44 = vpack.c.bf16 %v7744_v34, %v7696_v33  ;;  %vm7706_vm1 = vcmp.eq.f32.partialorder %v15465_v48, 0.0  ;;  %v7784_v22 = vmul.f32 0.5, %v7783_v8  ;;  %vm8150_vm2 = vcmp.eq.f32.partialorder %v15178_v3, 0.0  ;;  %v7129_v14 = vpop.f32.mrf.mxu3 }
 0x8ac   : > { %v15572_v16 = vadd.f32 %v7375_v9, %v15290_v55  ;;  %v6984_v13 = vpop.f32.mrf.mxu0  ;;  %v7703_v50 = vmul.f32 %v7702_v7, %v15465_v48  ;;  %v7750_v39 = vmul.f32 %v11994_v49, %v7749_v57  ;;  %v7794_v2 = vmul.f32 %v15564_v26, %v15531_v38 }
 0x8ad   : > { %v12000_v51 = vpop.eup %11999  ;;  %v7130_v1 = vadd.f32 %v7129_v14, %v7080_v5  ;;  %v7033_v17 = vpop.f32.mrf.mxu1  ;;  %8641 = vmatmul.bf16.gmra.mxu2 %v8247_v44  ;;  %v7707_v42 = vand.u32 2147483648, %v15465_v48  ;;  %vm7752_vm3 = vcmp.eq.f32.partialorder %v15503_v23, inf  ;;  %v7785_v4 = vsub.f32 1.5, %v7784_v22 }
 0x8ae   : > { %vm8196_vm4 = vcmp.eq.f32.partialorder %v15207_v21, inf  ;;  %v7034_v55 = vadd.f32 %v7033_v17, %v6984_v13  ;;  %v7705_v31 = vsel %vm7704_vm0, %v15465_v48, %v7703_v50  ;;  %v7751_v49 = vmul.f32 %v7750_v39, %v15503_v23  ;;  %v16849_v50 = vld [vmem:[#allocation112_spill] sm:$0xff] }
 0x8af   : > { %v7830_v60 = vmul.f32 %v12000_v51, %v15536_v30  ;;  %v7220_v20 = vadd.f32 %v7130_v1, %v16844_v35  ;;  %v7755_v10 = vand.u32 2147483648, %v15503_v23  ;;  %v7786_v29 = vmul.f32 %v11996_v59, %v7785_v4 }
 0x8b0   : > { %v7795_v18 = vmul.f32 %v15564_v26, %v7794_v2  ;;  %v7227_v24 = vadd.f32 %v7034_v55, %v16845_v52  ;;  %v7753_v11 = vsel %vm7752_vm3, %v15503_v23, %v7751_v49  ;;  %vm7754_vm5 = vcmp.eq.f32.partialorder %v15503_v23, 0.0 }
 0x8b1   : > { %v7831_v40 = vmul.f32 %v12000_v51, %v7830_v60  ;;  %v7376_v32 = vmul.f32 %v7220_v20, %v7220_v20  ;;  %v7708_v41 = vsel %vm7706_vm1, %v7707_v42, %v7705_v31  ;;  %v7756_v46 = vsel %vm7754_vm5, %v7755_v10, %v7753_v11  ;;  %v16851_v60 = vld [vmem:[#allocation77_spill] sm:$0xff] }
 0x8b2   : > { %v7796_v43 = vmul.f32 0.5, %v7795_v18  ;;  %v7379_v6 = vmul.f32 %v7227_v24, %v7227_v24  ;;  %v8248_v37 = vpack.c.bf16 %v7756_v46, %v7708_v41  ;;  %12001 = vrsqrt.f32 %v15567_v58  ;;  %v7082_v63 = vpop.f32.mrf.mxu2  ;;  %v16852_v41 = vld [vmem:[#allocation113_spill] sm:$0xff] }
 0x8b3   : > { %v7832_v61 = vmul.f32 0.5, %v7831_v40  ;;  %v15595_v59 = vadd.f32 %v7376_v32, %v15294_v62  ;;  %v7787_v15 = vmul.f32 %v7786_v29, %v15507_v19  ;;  %v8199_v23 = vand.u32 2147483648, %v15207_v21  ;;  %v7131_v48 = vpop.f32.mrf.mxu3 }
 0x8b4   : > { %v7797_v12 = vsub.f32 1.5, %v7796_v43  ;;  %v15600_v45 = vadd.f32 %v7379_v6, %v15299_v47  ;;  %8690 = vmatmul.bf16.gmra.mxu3 %v8248_v37  ;;  %v6987_v33 = vpop.f32.mrf.mxu0  ;;  %vm7788_vm6 = vcmp.eq.f32.partialorder %v15507_v19, inf  ;;  %v16846_v8 = vand.u32 2147483648, %v15178_v3  ;;  %v16847_v3 = vld [vmem:[#allocation111_spill] sm:$0xff] }
 0x8b5   : > { %v7833_v54 = vsub.f32 1.5, %v7832_v61  ;;  %v7132_v9 = vadd.f32 %v7131_v48, %v7082_v63  ;;  %v7036_v34 = vpop.f32.mrf.mxu1  ;;  %vm7790_vm7 = vcmp.eq.f32.partialorder %v15507_v19, 0.0  ;;  %v7791_v47 = vand.u32 2147483648, %v15507_v19  ;;  %v16853_v63 = vld [vmem:[#allocation114_spill] sm:$0xff] }
 0x8b6   : > { %v15608_v62 = vsel %vm8150_vm2, %v16846_v8, %v15411_v36  ;;  %12003 = vrsqrt.f32 %v15572_v16  ;;  %v7037_v7 = vadd.f32 %v7036_v34, %v6987_v33  ;;  %vm7836_vm8 = vcmp.eq.f32.partialorder %v15536_v30, inf }
 0x8b7   : > { %v7834_v57 = vmul.f32 %v12000_v51, %v7833_v54  ;;  %v8197_v5 = vsel %vm8196_vm4, %v15207_v21, %v15474_v0  ;;  %v7228_v36 = vadd.f32 %v7132_v9, %v16847_v3  ;;  %v16848_v44 = vpack.c.bf16 %v15174_v27, %v15172_v56  ;;  %v16854_v3 = vld [vmem:[#allocation71_spill] sm:$0xff] }
 0x8b8   : > { %v7789_v22 = vsel %vm7788_vm6, %v15507_v19, %v7787_v15  ;;  %v7798_v14 = vmul.f32 %v15564_v26, %v7797_v12  ;;  %12005 = vrsqrt.f32 %v15600_v45  ;;  %vm8198_vm9 = vcmp.eq.f32.partialorder %v15207_v21, 0.0  ;;  %v12002_v13 = vpop.eup %12001 }
 0x8b9   : > { %8558 = vmatmul.bf16.gmra.mxu0 %v16848_v44  ;;  %v7235_v39 = vadd.f32 %v7037_v7, %v16849_v50  ;;  %v16850_v0 = vpack.c.bf16 %v15214_v53, %v15203_v25  ;;  %v7835_v2 = vmul.f32 %v7834_v57, %v15536_v30  ;;  %vm7838_vm10 = vcmp.eq.f32.partialorder %v15536_v30, 0.0  ;;  %v16855_v44 = vld [vmem:[#allocation78_spill] sm:$0xff] }
 0x8ba   : > { %v7839_v56 = vand.u32 2147483648, %v15536_v30  ;;  %v7380_v27 = vmul.f32 %v7228_v36, %v7228_v36  ;;  %vm7800_vm11 = vcmp.eq.f32.partialorder %v15531_v38, inf  ;;  %v7803_v26 = vand.u32 2147483648, %v15531_v38  ;;  %v7085_v4 = vpop.f32.mrf.mxu2 }
 0x8bb   : > { %8607 = vmatmul.bf16.gmra.mxu1 %v16850_v0  ;;  %v7842_v51 = vmul.f32 %v12002_v13, %v15567_v58  ;;  %v7383_v1 = vmul.f32 %v7235_v39, %v7235_v39  ;;  %v7792_v17 = vsel %vm7790_vm7, %v7791_v47, %v7789_v22  ;;  %v7837_v25 = vsel %vm7836_vm8, %v15536_v30, %v7835_v2  ;;  %v7134_v19 = vpop.f32.mrf.mxu3 }
 0x8bc   : > { %12007 = vrsqrt.f32 %v15595_v59  ;;  %v12004_v53 = vpop.eup %12003  ;;  %v15643_v42 = vadd.f32 %v7380_v27, %v15325_v28  ;;  %v7840_v55 = vsel %vm7838_vm10, %v7839_v56, %v7837_v25  ;;  %v7799_v31 = vmul.f32 %v7798_v14, %v15531_v38  ;;  %v6989_v20 = vpop.f32.mrf.mxu0  ;;  %v16856_v14 = vld [vmem:[#allocation120_spill] sm:$0xff] }
 0x8bd   : > { %v7843_v49 = vmul.f32 %v12002_v13, %v7842_v51  ;;  %v15647_v35 = vadd.f32 %v7383_v1, %v16851_v60  ;;  %v8251_v10 = vpack.c.bf16 %v7840_v55, %v7792_v17  ;;  %vm7802_vm12 = vcmp.eq.f32.partialorder %v15531_v38, 0.0  ;;  %v7038_v18 = vpop.f32.mrf.mxu1 }
 0x8be   : > { %vm7848_vm13 = vcmp.eq.f32.partialorder %v15567_v58, inf  ;;  %v7878_v30 = vmul.f32 %v12004_v53, %v15572_v16  ;;  %v12006_v29 = vpop.eup %12005  ;;  %v7135_v28 = vadd.f32 %v7134_v19, %v7085_v4  ;;  %vm7850_vm14 = vcmp.eq.f32.partialorder %v15567_v58, 0.0 }
 0x8bf   : > { %v7844_v52 = vmul.f32 0.5, %v7843_v49  ;;  %12009 = vrsqrt.f32 %v15643_v42  ;;  %v7039_v24 = vadd.f32 %v7038_v18, %v6989_v20  ;;  %8646 = vmatmul.bf16.gmra.mxu2 %v8251_v10  ;;  %v7851_v11 = vand.u32 2147483648, %v15567_v58  ;;  %v16857_v49 = vld [vmem:[#allocation28_spill] sm:$0xff]  ;;  %v16858_v20 = vld [vmem:[#allocation74_spill] sm:$0xff]  ;;  %v16859_v10 = vld [vmem:[#allocation73_spill] sm:$0xff] }
 0x8c0   : > { %v7879_v40 = vmul.f32 %v12004_v53, %v7878_v30  ;;  %v7926_v32 = vmul.f32 %v12006_v29, %v15600_v45  ;;  %v7236_v46 = vadd.f32 %v7135_v28, %v16852_v41  ;;  %v7801_v43 = vsel %vm7800_vm11, %v15531_v38, %v7799_v31  ;;  %v16861_v18 = vld [vmem:[#allocation29_spill] sm:$0xff] }
 0x8c1   : > { %v7845_v6 = vsub.f32 1.5, %v7844_v52  ;;  %vm7884_vm15 = vcmp.eq.f32.partialorder %v15572_v16, inf  ;;  %v7887_v37 = vand.u32 2147483648, %v15572_v16  ;;  %v7243_v15 = vadd.f32 %v7039_v24, %v16853_v63  ;;  %v16862_v24 = vld [vmem:[#allocation75_spill] sm:$0xff] }
 0x8c2   : > { %v12008_v61 = vpop.eup %12007  ;;  %v7880_v12 = vmul.f32 0.5, %v7879_v40  ;;  %vm7886_vm0 = vcmp.eq.f32.partialorder %v15572_v16, 0.0  ;;  %v7927_v48 = vmul.f32 %v12006_v29, %v7926_v32  ;;  %v15668_v33 = vsel %vm8198_vm9, %v8199_v23, %v8197_v5  ;;  %v7087_v21 = vpop.f32.mrf.mxu2  ;;  %v16863_v40 = vld [vmem:[#allocation76_spill] sm:$0xff] }
 0x8c3   : > { %v7384_v54 = vmul.f32 %v7236_v46, %v7236_v46  ;;  %v7846_v8 = vmul.f32 %v12002_v13, %v7845_v6  ;;  %vm7932_vm1 = vcmp.eq.f32.partialorder %v15600_v45, inf  ;;  %v7890_v9 = vmul.f32 %v12008_v61, %v15595_v59  ;;  %v7136_v50 = vpop.f32.mrf.mxu3 }
 0x8c4   : > { %v8265_v34 = vpack.c.bf16 %v15668_v33, %v15608_v62  ;;  %v7387_v47 = vmul.f32 %v7243_v15, %v7243_v15  ;;  %v7881_v7 = vsub.f32 1.5, %v7880_v12  ;;  %v7928_v57 = vmul.f32 0.5, %v7927_v48  ;;  %v6992_v39 = vpop.f32.mrf.mxu0  ;;  %v16865_v48 = vld [vmem:[#allocation72_spill] sm:$0xff] }
 0x8c5   : > { %12011 = vrsqrt.f32 %v16854_v3  ;;  %v12010_v36 = vpop.eup %12009  ;;  %v15676_v22 = vadd.f32 %v7384_v54, %v16855_v44  ;;  %v7847_v23 = vmul.f32 %v7846_v8, %v15567_v58  ;;  %vm7934_vm2 = vcmp.eq.f32.partialorder %v15600_v45, 0.0  ;;  %v7041_v17 = vpop.f32.mrf.mxu1  ;;  %v16866_v54 = vld [vmem:[#allocation121_spill] sm:$0xff] }
 0x8c6   : > { %v7891_v5 = vmul.f32 %v12008_v61, %v7890_v9  ;;  %v15681_v13 = vadd.f32 %v7387_v47, %v16856_v14  ;;  %v7882_v0 = vmul.f32 %v12004_v53, %v7881_v7  ;;  %v7929_v2 = vsub.f32 1.5, %v7928_v57  ;;  %v16868_v57 = vld [vmem:[#allocation122_spill] sm:$0xff] }
 0x8c7   : > { %v7938_v56 = vmul.f32 %v12010_v36, %v15643_v42  ;;  %v7137_v27 = vadd.f32 %v7136_v50, %v7087_v21  ;;  %v7804_v51 = vsel %vm7802_vm12, %v7803_v26, %v7801_v43  ;;  %v7849_v1 = vsel %vm7848_vm13, %v15567_v58, %v7847_v23 }
 0x8c8   : > { %v7892_v25 = vmul.f32 0.5, %v7891_v5  ;;  %v7852_v4 = vsel %vm7850_vm14, %v7851_v11, %v7849_v1  ;;  %v7042_v55 = vadd.f32 %v7041_v17, %v6992_v39  ;;  %v7883_v53 = vmul.f32 %v7882_v0, %v15572_v16 }
 0x8c9   : > { %v7930_v31 = vmul.f32 %v12006_v29, %v7929_v2  ;;  %v7244_v60 = vadd.f32 %v7137_v27, %v16857_v49  ;;  %v8252_v19 = vpack.c.bf16 %v7852_v4, %v7804_v51  ;;  %v16860_v38 = vpack.c.bf16 %v16858_v20, %v16859_v10  ;;  %v16869_v27 = vld [vmem:[#allocation115_spill] sm:$0xff]  ;;  %v16870_v4 = vld [vmem:[#allocation116_spill] sm:$0xff] }
 0x8ca   : > { %v7893_v26 = vsub.f32 1.5, %v7892_v25  ;;  %v7939_v30 = vmul.f32 %v12010_v36, %v7938_v56  ;;  %v7251_v52 = vadd.f32 %v7042_v55, %v16861_v18  ;;  %v16864_v58 = vpack.c.bf16 %v16862_v24, %v16863_v40  ;;  %v7090_v9 = vpop.f32.mrf.mxu2  ;;  %v16872_v18 = vld [vmem:[#allocation32_spill] sm:$0xff] }
 0x8cb   : > { %8563 = vmatmul.bf16.gmra.mxu0 %v16860_v38  ;;  %v12012_v28 = vpop.eup %12011  ;;  %v7885_v29 = vsel %vm7884_vm15, %v15572_v16, %v7883_v53  ;;  %v7931_v11 = vmul.f32 %v7930_v31, %v15600_v45  ;;  %v7935_v32 = vand.u32 2147483648, %v15600_v45  ;;  %v7388_v41 = vmul.f32 %v7244_v60, %v7244_v60  ;;  %8695 = vmatmul.bf16.gmra.mxu3 %v8252_v19  ;;  %v7139_v21 = vpop.f32.mrf.mxu3 }
 0x8cc   : > { %8612 = vmatmul.bf16.gmra.mxu1 %v16864_v58  ;;  %v7888_v46 = vsel %vm7886_vm0, %v7887_v37, %v7885_v29  ;;  %v7894_v43 = vmul.f32 %v12008_v61, %v7893_v26  ;;  %v7940_v6 = vmul.f32 0.5, %v7939_v30  ;;  %v7391_v63 = vmul.f32 %v7251_v52, %v7251_v52  ;;  %v16867_v61 = vld [vmem:[#allocation60_spill] sm:$0xff]  ;;  %v6994_v23 = vpop.f32.mrf.mxu0  ;;  %v16871_v26 = vld [vmem:[#allocation61_spill] sm:$0xff]  ;;  %v16873_v58 = vld [vmem:[#allocation62_spill] sm:$0xff] }
 0x8cd   : > { %v7933_v15 = vsel %vm7932_vm1, %v15600_v45, %v7931_v11  ;;  %v8154_v12 = vmul.f32 %v12012_v28, %v16854_v3  ;;  %12013 = vrsqrt.f32 %v16865_v48  ;;  %v15715_v8 = vadd.f32 %v7388_v41, %v16866_v54  ;;  %v7043_v39 = vpop.f32.mrf.mxu1  ;;  %v16874_v11 = vld [vmem:[#allocation79_spill] sm:$0xff] }
 0x8ce   : > { %v7936_v47 = vsel %vm7934_vm2, %v7935_v32, %v7933_v15  ;;  %v7895_v16 = vmul.f32 %v7894_v43, %v15595_v59  ;;  %v7941_v37 = vsub.f32 1.5, %v7940_v6  ;;  %v15722_v7 = vmul.f32 %v16867_v61, %v16867_v61  ;;  %v16876_v61 = vld [vmem:[#allocation118_spill] sm:$0xff] }
 0x8cf   : > { %v15725_v44 = vadd.f32 %v7391_v63, %v16868_v57  ;;  %v8255_v5 = vpack.c.bf16 %v7936_v47, %v7888_v46  ;;  %v8155_v14 = vmul.f32 %v12012_v28, %v8154_v12  ;;  %v7140_v50 = vadd.f32 %v7139_v21, %v7090_v9  ;;  %v16875_v47 = vld [vmem:[#allocation117_spill] sm:$0xff] }
 0x8d0   : > { %vm7896_vm3 = vcmp.eq.f32.partialorder %v15595_v59, inf  ;;  %vm7898_vm4 = vcmp.eq.f32.partialorder %v15595_v59, 0.0  ;;  %v7942_v45 = vmul.f32 %v12010_v36, %v7941_v37  ;;  %v7044_v0 = vadd.f32 %v7043_v39, %v6994_v23 }
 0x8d1   : > { %8651 = vmatmul.bf16.gmra.mxu2 %v8255_v5  ;;  %v7899_v2 = vand.u32 2147483648, %v15595_v59  ;;  %vm7944_vm5 = vcmp.eq.f32.partialorder %v15643_v42, inf  ;;  %v8156_v56 = vmul.f32 0.5, %v8155_v14  ;;  %v7252_v51 = vadd.f32 %v7140_v50, %v16869_v27 }
 0x8d2   : > { %v7897_v1 = vsel %vm7896_vm3, %v15595_v59, %v7895_v16  ;;  %v7943_v17 = vmul.f32 %v7942_v45, %v15643_v42  ;;  %12015 = vrsqrt.f32 %v15647_v35  ;;  %v7259_v55 = vadd.f32 %v7044_v0, %v16870_v4  ;;  %v7092_v24 = vpop.f32.mrf.mxu2  ;;  %v16877_v0 = vld [vmem:[#allocation33_spill] sm:$0xff] }
 0x8d3   : > { %v12014_v25 = vpop.eup %12013  ;;  %vm7946_vm6 = vcmp.eq.f32.partialorder %v15643_v42, 0.0  ;;  %v7947_v36 = vand.u32 2147483648, %v15643_v42  ;;  %v8157_v53 = vsub.f32 1.5, %v8156_v56  ;;  %v7392_v31 = vmul.f32 %v7252_v51, %v7252_v51  ;;  %v7141_v59 = vpop.f32.mrf.mxu3 }
 0x8d4   : > { %v7945_v49 = vsel %vm7944_vm5, %v15643_v42, %v7943_v17  ;;  %v8202_v60 = vmul.f32 %v12014_v25, %v16865_v48  ;;  %12017 = vrsqrt.f32 %v15681_v13  ;;  %v7395_v19 = vmul.f32 %v7259_v55, %v7259_v55  ;;  %v6997_v41 = vpop.f32.mrf.mxu0 }
 0x8d5   : > { %v7900_v20 = vsel %vm7898_vm4, %v7899_v2, %v7897_v1  ;;  %v7948_v10 = vsel %vm7946_vm6, %v7947_v36, %v7945_v49  ;;  %v8158_v38 = vmul.f32 %v12012_v28, %v8157_v53  ;;  %v15745_v30 = vmul.f32 %v16871_v26, %v16871_v26  ;;  %v7046_v43 = vpop.f32.mrf.mxu1 }
 0x8d6   : > { %v15748_v52 = vadd.f32 %v7392_v31, %v16872_v18  ;;  %v8256_v40 = vpack.c.bf16 %v7948_v10, %v7900_v20  ;;  %v8203_v42 = vmul.f32 %v12014_v25, %v8202_v60  ;;  %v15752_v29 = vmul.f32 %v16873_v58, %v16873_v58 }
 0x8d7   : > { %v15755_v32 = vadd.f32 %v7395_v19, %v16874_v11  ;;  %vm8160_vm7 = vcmp.eq.f32.partialorder %v16854_v3, inf  ;;  %12019 = vrsqrt.f32 %v15676_v22  ;;  %v7142_v46 = vadd.f32 %v7141_v59, %v7092_v24  ;;  %v16878_v24 = vld [vmem:[#allocation30_spill] sm:$0xff]  ;;  %v16879_v11 = vld [vmem:[#allocation31_spill] sm:$0xff] }
 0x8d8   : > { %v12016_v28 = vpop.eup %12015  ;;  %v8159_v6 = vmul.f32 %v8158_v38, %v16854_v3  ;;  %vm8162_vm8 = vcmp.eq.f32.partialorder %v16854_v3, 0.0  ;;  %v8204_v63 = vmul.f32 0.5, %v8203_v42  ;;  %v7047_v15 = vadd.f32 %v7046_v43, %v6997_v41 }
 0x8d9   : > { %v8163_v12 = vand.u32 2147483648, %v16854_v3  ;;  %vm8208_vm9 = vcmp.eq.f32.partialorder %v16865_v48, inf  ;;  %v7974_v54 = vmul.f32 %v12016_v28, %v15647_v35  ;;  %v7260_v16 = vadd.f32 %v7142_v46, %v16875_v47 }
 0x8da   : > { %v12018_v9 = vpop.eup %12017  ;;  %v8205_v37 = vsub.f32 1.5, %v8204_v63  ;;  %vm8210_vm10 = vcmp.eq.f32.partialorder %v16865_v48, 0.0  ;;  %12021 = vrsqrt.f32 %v15715_v8  ;;  %v7267_v57 = vadd.f32 %v7047_v15, %v16876_v61  ;;  %v7095_v27 = vpop.f32.mrf.mxu2 }
 0x8db   : > { %8568 = vmatmul.bf16.gmra.mxu0 %v8265_v34  ;;  %v8211_v21 = vand.u32 2147483648, %v16865_v48  ;;  %v7975_v23 = vmul.f32 %v12016_v28, %v7974_v54  ;;  %v8022_v5 = vmul.f32 %v12018_v9, %v15681_v13  ;;  %v7396_v14 = vmul.f32 %v7260_v16, %v7260_v16  ;;  %8700 = vmatmul.bf16.gmra.mxu3 %v8256_v40 }
 0x8dc   : > { %v8161_v50 = vsel %vm8160_vm7, %v16854_v3, %v8159_v6  ;;  %v8206_v62 = vmul.f32 %v12014_v25, %v8205_v37  ;;  %vm7980_vm11 = vcmp.eq.f32.partialorder %v15647_v35, inf  ;;  %v7399_v34 = vmul.f32 %v7267_v57, %v7267_v57  ;;  %v7144_v25 = vpop.f32.mrf.mxu3  ;;  %v6999_v4 = vpop.f32.mrf.mxu0 }
 0x8dd   : > { %v12020_v33 = vpop.eup %12019  ;;  %v7976_v39 = vmul.f32 0.5, %v7975_v23  ;;  %v8023_v45 = vmul.f32 %v12018_v9, %v8022_v5  ;;  %12023 = vrsqrt.f32 %v15725_v44  ;;  %v15779_v2 = vadd.f32 %v7396_v14, %v16877_v0  ;;  %v7048_v19 = vpop.f32.mrf.mxu1  ;;  %v16881_v0 = vld [vmem:[#allocation119_spill] sm:$0xff] }
 0x8de   : > { %v8207_v56 = vmul.f32 %v8206_v62, %v16865_v48  ;;  %vm7982_vm12 = vcmp.eq.f32.partialorder %v15647_v35, 0.0  ;;  %v7983_v51 = vand.u32 2147483648, %v15647_v35  ;;  %v7986_v1 = vmul.f32 %v12020_v33, %v15676_v22 }
 0x8df   : > { %v15786_v17 = vadd.f32 %v7399_v34, %v15722_v7  ;;  %v7977_v55 = vsub.f32 1.5, %v7976_v39  ;;  %v8024_v36 = vmul.f32 0.5, %v8023_v45  ;;  %vm8028_vm13 = vcmp.eq.f32.partialorder %v15681_v13, inf }
 0x8e0   : > { %v12022_v53 = vpop.eup %12021  ;;  %v8164_v31 = vsel %vm8162_vm8, %v8163_v12, %v8161_v50  ;;  %v8209_v49 = vsel %vm8208_vm9, %v16865_v48, %v8207_v56  ;;  %v7145_v60 = vadd.f32 %v7144_v25, %v7095_v27  ;;  %v7987_v20 = vmul.f32 %v12020_v33, %v7986_v1 }
 0x8e1   : > { %v8212_v7 = vsel %vm8210_vm10, %v8211_v21, %v8209_v49  ;;  %v7049_v10 = vadd.f32 %v7048_v19, %v6999_v4  ;;  %v7978_v38 = vmul.f32 %v12016_v28, %v7977_v55  ;;  %v8025_v26 = vsub.f32 1.5, %v8024_v36 }
 0x8e2   : > { %v8266_v18 = vpack.c.bf16 %v8212_v7, %v8164_v31  ;;  %v7268_v40 = vadd.f32 %v7145_v60, %v16878_v24  ;;  %v7988_v42 = vmul.f32 0.5, %v7987_v20  ;;  %v8034_v3 = vmul.f32 %v12022_v53, %v15715_v8  ;;  %v7097_v47 = vpop.f32.mrf.mxu2 }
 0x8e3   : > { %v12024_v58 = vpop.eup %12023  ;;  %v7275_v59 = vadd.f32 %v7049_v10, %v16879_v11  ;;  %v7979_v41 = vmul.f32 %v7978_v38, %v15647_v35  ;;  %v8026_v46 = vmul.f32 %v12018_v9, %v8025_v26  ;;  %12025 = vrsqrt.f32 %v15755_v32 }
 0x8e4   : > { %8617 = vmatmul.bf16.gmra.mxu1 %v8266_v18  ;;  %v7400_v48 = vmul.f32 %v7268_v40, %v7268_v40  ;;  %v7989_v43 = vsub.f32 1.5, %v7988_v42  ;;  %v8035_v6 = vmul.f32 %v12022_v53, %v8034_v3  ;;  %v8070_v28 = vmul.f32 %v12024_v58, %v15725_v44  ;;  %v7146_v23 = vpop.f32.mrf.mxu3 }
 0x8e5   : > { %v7403_v63 = vmul.f32 %v7275_v59, %v7275_v59  ;;  %v7981_v15 = vsel %vm7980_vm11, %v15647_v35, %v7979_v41  ;;  %v8027_v12 = vmul.f32 %v8026_v46, %v15681_v13  ;;  %vm8030_vm14 = vcmp.eq.f32.partialorder %v15681_v13, 0.0 }
 0x8e6   : > { %v15808_v54 = vadd.f32 %v7400_v48, %v15745_v30  ;;  %v8031_v9 = vand.u32 2147483648, %v15681_v13  ;;  %v7990_v16 = vmul.f32 %v12020_v33, %v7989_v43  ;;  %v8036_v37 = vmul.f32 0.5, %v8035_v6  ;;  %v16880_v33 = vld [vmem:[#allocation63_spill] sm:$0xff] }
 0x8e7   : > { %v15812_v61 = vadd.f32 %v7403_v63, %v15752_v29  ;;  %v7984_v57 = vsel %vm7982_vm12, %v7983_v51, %v7981_v15  ;;  %v8029_v21 = vsel %vm8028_vm13, %v15681_v13, %v8027_v12  ;;  %v8071_v5 = vmul.f32 %v12024_v58, %v8070_v28 }
 0x8e8   : > { %v8032_v14 = vsel %vm8030_vm14, %v8031_v9, %v8029_v21  ;;  %v7147_v30 = vadd.f32 %v7146_v23, %v7097_v47  ;;  %v7991_v50 = vmul.f32 %v7990_v16, %v15676_v22  ;;  %v8037_v62 = vsub.f32 1.5, %v8036_v37 }
 0x8e9   : > { %v12026_v34 = vpop.eup %12025  ;;  %v7340_v39 = vmul.f32 %v16880_v33, %v16880_v33  ;;  %v8259_v29 = vpack.c.bf16 %v8032_v14, %v7984_v57  ;;  %v8072_v45 = vmul.f32 0.5, %v8071_v5  ;;  %vm7992_vm15 = vcmp.eq.f32.partialorder %v15676_v22, inf }
 0x8ea   : > { %v7276_v35 = vadd.f32 %v7147_v30, %v16881_v0  ;;  %v8038_v56 = vmul.f32 %v12022_v53, %v8037_v62  ;;  %v8118_v13 = vmul.f32 %v12026_v34, %v15755_v32  ;;  %vm7994_vm0 = vcmp.eq.f32.partialorder %v15676_v22, 0.0 }
 0x8eb   : > { %8656 = vmatmul.bf16.gmra.mxu2 %v8259_v29  ;;  %v7995_v27 = vand.u32 2147483648, %v15676_v22  ;;  %v8073_v51 = vsub.f32 1.5, %v8072_v45  ;;  %12027 = vrsqrt.f32 %v15748_v52  ;;  %v7993_v25 = vsel %vm7992_vm15, %v15676_v22, %v7991_v50 }
 0x8ec   : > { %v7404_v1 = vmul.f32 %v7276_v35, %v7276_v35  ;;  %v8039_v4 = vmul.f32 %v8038_v56, %v15715_v8  ;;  %v8119_v55 = vmul.f32 %v12026_v34, %v8118_v13  ;;  %vm8040_vm1 = vcmp.eq.f32.partialorder %v15715_v8, inf }
 0x8ed   : > { %v8043_v36 = vand.u32 2147483648, %v15715_v8  ;;  %v8074_v53 = vmul.f32 %v12024_v58, %v8073_v51  ;;  %12029 = vrsqrt.f32 %v15779_v2  ;;  %vm8042_vm2 = vcmp.eq.f32.partialorder %v15715_v8, 0.0 }
 0x8ee   : > { %v15833_v31 = vadd.f32 %v7404_v1, %v7340_v39  ;;  %v8041_v49 = vsel %vm8040_vm1, %v15715_v8, %v8039_v4  ;;  %v8120_v60 = vmul.f32 0.5, %v8119_v55  ;;  %v7996_v19 = vsel %vm7994_vm0, %v7995_v27, %v7993_v25 }
 0x8ef   : > { %v8044_v20 = vsel %vm8042_vm2, %v8043_v36, %v8041_v49  ;;  %12031 = vrsqrt.f32 %v15786_v17  ;;  %v8075_v10 = vmul.f32 %v8074_v53, %v15725_v44  ;;  %vm8076_vm3 = vcmp.eq.f32.partialorder %v15725_v44, inf  ;;  %v8534_v49 = vpop.f32.mrf.mxu0 }
 0x8f0   : > { %v8260_v7 = vpack.c.bf16 %v8044_v20, %v7996_v19  ;;  %v8121_v38 = vsub.f32 1.5, %v8120_v60  ;;  %12033 = vrsqrt.f32 %v15812_v61  ;;  %vm8078_vm4 = vcmp.eq.f32.partialorder %v15725_v44, 0.0  ;;  %v8583_v20 = vpop.f32.mrf.mxu1 }
 0x8f1   : > { %v12028_v26 = vpop.eup %12027  ;;  %v8079_v22 = vand.u32 2147483648, %v15725_v44  ;;  %12035 = vrsqrt.f32 %v15808_v54  ;;  %v8077_v8 = vsel %vm8076_vm3, %v15725_v44, %v8075_v10  ;;  %vm8124_vm5 = vcmp.eq.f32.partialorder %v15755_v32, inf }
 0x8f2   : > { %8705 = vmatmul.bf16.gmra.mxu3 %v8260_v7  ;;  %v8122_v18 = vmul.f32 %v12026_v34, %v8121_v38  ;;  %v8082_v24 = vmul.f32 %v12028_v26, %v15748_v52  ;;  %vm8126_vm6 = vcmp.eq.f32.partialorder %v15755_v32, 0.0  ;;  %v8127_v59 = vand.u32 2147483648, %v15755_v32 }
 0x8f3   : > { %v12030_v40 = vpop.eup %12029  ;;  %12037 = vrsqrt.f32 %v15833_v31  ;;  %v8080_v28 = vsel %vm8078_vm4, %v8079_v22, %v8077_v8  ;;  %vm8088_vm7 = vcmp.eq.f32.partialorder %v15748_v52, inf  ;;  %vm8090_vm8 = vcmp.eq.f32.partialorder %v15748_v52, 0.0 }
 0x8f4   : > { %v8123_v42 = vmul.f32 %v8122_v18, %v15755_v32  ;;  %v8083_v3 = vmul.f32 %v12028_v26, %v8082_v24  ;;  %v8130_v58 = vmul.f32 %v12030_v40, %v15779_v2  ;;  %v8091_v34 = vand.u32 2147483648, %v15748_v52 }
 0x8f5   : > { %v12032_v11 = vpop.eup %12031  ;;  %vm8136_vm9 = vcmp.eq.f32.partialorder %v15779_v2, inf  ;;  %v8139_v56 = vand.u32 2147483648, %v15779_v2  ;;  %vm8138_vm10 = vcmp.eq.f32.partialorder %v15779_v2, 0.0  ;;  %vm8172_vm11 = vcmp.eq.f32.partialorder %v15786_v17, inf }
 0x8f6   : > { %v8125_v41 = vsel %vm8124_vm5, %v15755_v32, %v8123_v42  ;;  %v8084_v46 = vmul.f32 0.5, %v8083_v3  ;;  %v8131_v48 = vmul.f32 %v12030_v40, %v8130_v58  ;;  %v8166_v43 = vmul.f32 %v12032_v11, %v15786_v17  ;;  %v12034_v6 = vpop.eup %12033 }
 0x8f7   : > { %v8128_v63 = vsel %vm8126_vm6, %v8127_v59, %v8125_v41  ;;  %v12036_v16 = vpop.eup %12035  ;;  %v8214_v37 = vmul.f32 %v12034_v6, %v15812_v61  ;;  %v8175_v38 = vand.u32 2147483648, %v15786_v17  ;;  %vm8220_vm12 = vcmp.eq.f32.partialorder %v15812_v61, inf }
 0x8f8   : > { %v8263_v15 = vpack.c.bf16 %v8128_v63, %v8080_v28  ;;  %v8085_v12 = vsub.f32 1.5, %v8084_v46  ;;  %v8132_v9 = vmul.f32 0.5, %v8131_v48  ;;  %v8167_v47 = vmul.f32 %v12032_v11, %v8166_v43  ;;  %v8536_v46 = vpop.f32.mrf.mxu0  ;;  %v8585_v48 = vpop.f32.mrf.mxu1 }
 0x8f9   : > { %v8178_v32 = vmul.f32 %v12036_v16, %v15808_v54  ;;  %v12038_v5 = vpop.eup %12037  ;;  %v8215_v14 = vmul.f32 %v12034_v6, %v8214_v37  ;;  %vm8174_vm13 = vcmp.eq.f32.partialorder %v15786_v17, 0.0  ;;  %vm8222_vm14 = vcmp.eq.f32.partialorder %v15812_v61, 0.0 }
 0x8fa   : > { %v8086_v57 = vmul.f32 %v12028_v26, %v8085_v12  ;;  %v8133_v21 = vsub.f32 1.5, %v8132_v9  ;;  %v8168_v23 = vmul.f32 0.5, %v8167_v47  ;;  %v8226_v39 = vmul.f32 %v12038_v5, %v15833_v31 }
 0x8fb   : > { %8661 = vmatmul.bf16.gmra.mxu2 %v8263_v15  ;;  %v8179_v62 = vmul.f32 %v12036_v16, %v8178_v32  ;;  %v8216_v33 = vmul.f32 0.5, %v8215_v14  ;;  %vm8184_vm15 = vcmp.eq.f32.partialorder %v15808_v54, inf  ;;  %v8187_v58 = vand.u32 2147483648, %v15808_v54 }
 0x8fc   : > { %v8087_v44 = vmul.f32 %v8086_v57, %v15748_v52  ;;  %v8134_v30 = vmul.f32 %v12030_v40, %v8133_v21  ;;  %v8169_v50 = vsub.f32 1.5, %v8168_v23  ;;  %v8227_v27 = vmul.f32 %v12038_v5, %v8226_v39 }
 0x8fd   : > { %v8180_v35 = vmul.f32 0.5, %v8179_v62  ;;  %v8217_v13 = vsub.f32 1.5, %v8216_v33  ;;  %vm8232_vm0 = vcmp.eq.f32.partialorder %v15833_v31, inf  ;;  %vm8186_vm1 = vcmp.eq.f32.partialorder %v15808_v54, 0.0 }
 0x8fe   : > { %v8089_v29 = vsel %vm8088_vm7, %v15748_v52, %v8087_v44  ;;  %v8135_v45 = vmul.f32 %v8134_v30, %v15779_v2  ;;  %v8170_v0 = vmul.f32 %v12032_v11, %v8169_v50  ;;  %v8228_v53 = vmul.f32 0.5, %v8227_v27 }
 0x8ff   : > { %v8181_v25 = vsub.f32 1.5, %v8180_v35  ;;  %v8092_v4 = vsel %vm8090_vm8, %v8091_v34, %v8089_v29  ;;  %v8218_v36 = vmul.f32 %v12034_v6, %v8217_v13  ;;  %v8223_v52 = vand.u32 2147483648, %v15812_v61 }
 0x900   : > { %v8137_v51 = vsel %vm8136_vm9, %v15779_v2, %v8135_v45  ;;  %v8171_v1 = vmul.f32 %v8170_v0, %v15786_v17  ;;  %v8229_v2 = vsub.f32 1.5, %v8228_v53  ;;  %vm8234_vm2 = vcmp.eq.f32.partialorder %v15833_v31, 0.0  ;;  %v8539_v6 = vpop.f32.mrf.mxu0  ;;  %v8588_v63 = vpop.f32.mrf.mxu1 }
 0x901   : > { %v8140_v55 = vsel %vm8138_vm10, %v8139_v56, %v8137_v51  ;;  %v8182_v19 = vmul.f32 %v12036_v16, %v8181_v25  ;;  %v8219_v10 = vmul.f32 %v8218_v36, %v15812_v61  ;;  %v8584_v28 = vadd.f32 %v8583_v20, %v8534_v49 }
 0x902   : > { %v8264_v60 = vpack.c.bf16 %v8140_v55, %v8092_v4  ;;  %v8173_v7 = vsel %vm8172_vm11, %v15786_v17, %v8171_v1  ;;  %v8230_v24 = vmul.f32 %v12038_v5, %v8229_v2  ;;  %v8235_v17 = vand.u32 2147483648, %v15833_v31 }
 0x903   : > { %v8183_v26 = vmul.f32 %v8182_v19, %v15808_v54  ;;  %v8221_v18 = vsel %vm8220_vm12, %v15812_v61, %v8219_v10  ;;  %v8176_v40 = vsel %vm8174_vm13, %v8175_v38, %v8173_v7  ;;  %v8586_v16 = vadd.f32 %v8585_v48, %v8536_v46 }
 0x904   : > { %8710 = vmatmul.bf16.gmra.mxu3 %v8264_v60  ;;  %v8224_v22 = vsel %vm8222_vm14, %v8223_v52, %v8221_v18  ;;  %v8231_v3 = vmul.f32 %v8230_v24, %v15833_v31  ;;  %v8589_v30 = vadd.f32 %v8588_v63, %v8539_v6 }
 0x905   : > { %v8267_v8 = vpack.c.bf16 %v8224_v22, %v8176_v40  ;;  %v8185_v42 = vsel %vm8184_vm15, %v15808_v54, %v8183_v26 }
 0x906   : > { %v8233_v61 = vsel %vm8232_vm0, %v15833_v31, %v8231_v3  ;;  %v8188_v11 = vsel %vm8186_vm1, %v8187_v58, %v8185_v42 }
 0x907   : > { %v8236_v59 = vsel %vm8234_vm2, %v8235_v17, %v8233_v61 }
 0x908   : > { %v8268_v41 = vpack.c.bf16 %v8236_v59, %v8188_v11  ;;  %v8541_v37 = vpop.f32.mrf.mxu0  ;;  %v8590_v31 = vpop.f32.mrf.mxu1 }
 0x909   : > { %v8591_v13 = vadd.f32 %v8590_v31, %v8541_v37 }
 0x90b   : > { %8666 = vmatmul.bf16.gmra.mxu2 %v8267_v8 }
 0x90f   : > { %v8632_v43 = vpop.f32.mrf.mxu2 }
 0x910   : > { %v8633_v15 = vadd.f32 %v8632_v43, %v8584_v28  ;;  %v8544_v34 = vpop.f32.mrf.mxu0  ;;  %v8593_v39 = vpop.f32.mrf.mxu1 }
 0x911   : > { %v8594_v19 = vadd.f32 %v8593_v39, %v8544_v34 }
 0x914   : > { %8715 = vmatmul.bf16.gmra.mxu3 %v8268_v41 }
 0x916   : > { %v8681_v12 = vpop.f32.mrf.mxu3 }
 0x917   : > { %v8682_v9 = vadd.f32 %v8681_v12, %v8633_v15  ;;  %v8634_v47 = vpop.f32.mrf.mxu2 }
 0x918   : > { %v8635_v57 = vadd.f32 %v8634_v47, %v8586_v16  ;;  %v8546_v55 = vpop.f32.mrf.mxu0  ;;  %v8595_v53 = vpop.f32.mrf.mxu1 }
 0x919   : > { %v8721_v54 = vmax.f32 %v8682_v9, 1e-05  ;;  %v8596_v40 = vadd.f32 %v8595_v53, %v8546_v55 }
 0x91b   : > { %12039 = vlog2.f32 %v8721_v54 }
 0x91e   : > { %v8683_v21 = vpop.f32.mrf.mxu3 }
 0x91f   : > { %v8684_v23 = vadd.f32 %v8683_v21, %v8635_v57 }
 0x920   : > { %v8637_v32 = vpop.f32.mrf.mxu2  ;;  %v8549_v18 = vpop.f32.mrf.mxu0 }
 0x921   : > { %v12040_v5 = vpop.eup %12039  ;;  %v8722_v14 = vmax.f32 %v8684_v23, 1e-05  ;;  %v8638_v62 = vadd.f32 %v8637_v32, %v8589_v30  ;;  %v8598_v22 = vpop.f32.mrf.mxu1 }
 0x922   : > { %v8738_v44 = vmul.f32 0.6931472, %v12040_v5  ;;  %v8599_v43 = vadd.f32 %v8598_v22, %v8549_v18 }
 0x923   : > { %12041 = vlog2.f32 %v8722_v14 }
 0x924   : > { %v8769_v50 = vmul.f32 0.4342945, %v8738_v44 }
 0x926   : > { %v8686_v33 = vpop.f32.mrf.mxu3  ;;  %8785 = vxpose.xlu0.b32.start [1/16] %v8769_v50, 128 }
 0x927   : > { %v8687_v29 = vadd.f32 %v8686_v33, %v8638_v62 }
 0x928   : > { %v8639_v45 = vpop.f32.mrf.mxu2  ;;  %v8551_v41 = vpop.f32.mrf.mxu0 }
 0x929   : > { %v12042_v0 = vpop.eup %12041  ;;  %v8723_v35 = vmax.f32 %v8687_v29, 1e-05  ;;  %v8640_v51 = vadd.f32 %v8639_v45, %v8591_v13  ;;  %v8600_v48 = vpop.f32.mrf.mxu1 }
 0x92a   : > { %v8740_v56 = vmul.f32 0.6931472, %v12042_v0  ;;  %v8601_v31 = vadd.f32 %v8600_v48, %v8551_v41 }
 0x92b   : > { %12043 = vlog2.f32 %v8723_v35 }
 0x92c   : > { %v8770_v27 = vmul.f32 0.4342945, %v8740_v56 }
 0x92e   : > { %v8688_v1 = vpop.f32.mrf.mxu3  ;;  %8786 = vxpose.xlu0.b32.cont [2/16] %v8770_v27, 128 }
 0x92f   : > { %v8689_v25 = vadd.f32 %v8688_v1, %v8640_v51 }
 0x930   : > { %v8642_v4 = vpop.f32.mrf.mxu2  ;;  %v8554_v54 = vpop.f32.mrf.mxu0 }
 0x931   : > { %v12044_v36 = vpop.eup %12043  ;;  %v8724_v49 = vmax.f32 %v8689_v25, 1e-05  ;;  %v8643_v7 = vadd.f32 %v8642_v4, %v8594_v19  ;;  %v8603_v37 = vpop.f32.mrf.mxu1 }
 0x932   : > { %v8742_v60 = vmul.f32 0.6931472, %v12044_v36  ;;  %v8604_v30 = vadd.f32 %v8603_v37, %v8554_v54 }
 0x933   : > { %12045 = vlog2.f32 %v8724_v49 }
 0x934   : > { %v8771_v20 = vmul.f32 0.4342945, %v8742_v60 }
 0x936   : > { %8787 = vxpose.xlu0.b32.cont [3/16] %v8771_v20, 128 }
 0x937   : > { %v8691_v10 = vpop.f32.mrf.mxu3 }
 0x938   : > { %v8692_v2 = vadd.f32 %v8691_v10, %v8643_v7  ;;  %v8644_v38 = vpop.f32.mrf.mxu2  ;;  %v8556_v50 = vpop.f32.mrf.mxu0 }
 0x939   : > { %v12046_v52 = vpop.eup %12045  ;;  %v8645_v42 = vadd.f32 %v8644_v38, %v8596_v40  ;;  %v8605_v62 = vpop.f32.mrf.mxu1 }
 0x93a   : > { %v8725_v26 = vmax.f32 %v8692_v2, 1e-05  ;;  %v8744_v24 = vmul.f32 0.6931472, %v12046_v52  ;;  %v8606_v13 = vadd.f32 %v8605_v62, %v8556_v50 }
 0x93c   : > { %12047 = vlog2.f32 %v8725_v26  ;;  %v8772_v8 = vmul.f32 0.4342945, %v8744_v24 }
 0x93e   : > { %8788 = vxpose.xlu0.b32.cont [4/16] %v8772_v8, 128 }
 0x93f   : > { %v8693_v3 = vpop.f32.mrf.mxu3 }
 0x940   : > { %v8694_v58 = vadd.f32 %v8693_v3, %v8645_v42  ;;  %v8559_v51 = vpop.f32.mrf.mxu0 }
 0x941   : > { %v8608_v25 = vpop.f32.mrf.mxu1 }
 0x942   : > { %v12048_v17 = vpop.eup %12047  ;;  %v8726_v61 = vmax.f32 %v8694_v58, 1e-05  ;;  %v8647_v11 = vpop.f32.mrf.mxu2  ;;  %v8609_v2 = vadd.f32 %v8608_v25, %v8559_v51 }
 0x943   : > { %v8746_v59 = vmul.f32 0.6931472, %v12048_v17  ;;  %v8648_v28 = vadd.f32 %v8647_v11, %v8599_v43 }
 0x944   : > { %12049 = vlog2.f32 %v8726_v61 }
 0x945   : > { %v8773_v46 = vmul.f32 0.4342945, %v8746_v59 }
 0x947   : > { %8789 = vxpose.xlu0.b32.cont [5/16] %v8773_v46, 128 }
 0x948   : > { %v8561_v20 = vpop.f32.mrf.mxu0 }
 0x949   : > { %v8610_v7 = vpop.f32.mrf.mxu1 }
 0x94a   : > { %v12050_v6 = vpop.eup %12049  ;;  %v8649_v12 = vpop.f32.mrf.mxu2  ;;  %v8611_v8 = vadd.f32 %v8610_v7, %v8561_v20 }
 0x94b   : > { %v8748_v63 = vmul.f32 0.6931472, %v12050_v6  ;;  %v8650_v57 = vadd.f32 %v8649_v12, %v8601_v31 }
 0x94d   : > { %v8774_v47 = vmul.f32 0.4342945, %v8748_v63 }
 0x94e   : > { %v8696_v15 = vpop.f32.mrf.mxu3 }
 0x94f   : > { %v8697_v9 = vadd.f32 %v8696_v15, %v8648_v28  ;;  %8790 = vxpose.xlu0.b32.cont [6/16] %v8774_v47, 128 }
 0x950   : > { %v8564_v42 = vpop.f32.mrf.mxu0 }
 0x951   : > { %v8727_v16 = vmax.f32 %v8697_v9, 1e-05  ;;  %v8613_v3 = vpop.f32.mrf.mxu1 }
 0x952   : > { %v8614_v43 = vadd.f32 %v8613_v3, %v8564_v42 }
 0x953   : > { %12051 = vlog2.f32 %v8727_v16 }
 0x954   : > { %v8652_v32 = vpop.f32.mrf.mxu2 }
 0x955   : > { %v8653_v33 = vadd.f32 %v8652_v32, %v8604_v30 }
 0x956   : > { %v8698_v21 = vpop.f32.mrf.mxu3 }
 0x957   : > { %v8699_v23 = vadd.f32 %v8698_v21, %v8650_v57 }
 0x958   : > { %v8566_v6 = vpop.f32.mrf.mxu0 }
 0x959   : > { %v12052_v5 = vpop.eup %12051  ;;  %v8728_v14 = vmax.f32 %v8699_v23, 1e-05  ;;  %v8615_v28 = vpop.f32.mrf.mxu1 }
 0x95a   : > { %v8750_v44 = vmul.f32 0.6931472, %v12052_v5  ;;  %v8616_v31 = vadd.f32 %v8615_v28, %v8566_v6 }
 0x95b   : > { %12053 = vlog2.f32 %v8728_v14 }
 0x95c   : > { %v8775_v34 = vmul.f32 0.4342945, %v8750_v44  ;;  %v8654_v35 = vpop.f32.mrf.mxu2 }
 0x95d   : > { %v8655_v1 = vadd.f32 %v8654_v35, %v8606_v13 }
 0x95e   : > { %v8701_v39 = vpop.f32.mrf.mxu3  ;;  %8791 = vxpose.xlu0.b32.cont [7/16] %v8775_v34, 128 }
 0x95f   : > { %v8702_v29 = vadd.f32 %v8701_v39, %v8653_v33 }
 0x960   : > { %v8569_v57 = vpop.f32.mrf.mxu0 }
 0x961   : > { %v12054_v45 = vpop.eup %12053  ;;  %v8729_v0 = vmax.f32 %v8702_v29, 1e-05  ;;  %v8618_v23 = vpop.f32.mrf.mxu1 }
 0x962   : > { %v8752_v56 = vmul.f32 0.6931472, %v12054_v45  ;;  %v8619_v62 = vadd.f32 %v8618_v23, %v8569_v57 }
 0x963   : > { %12055 = vlog2.f32 %v8729_v0 }
 0x964   : > { %v8776_v27 = vmul.f32 0.4342945, %v8752_v56 }
 0x966   : > { %v8703_v4 = vpop.f32.mrf.mxu3  ;;  %8792 = vxpose.xlu0.b32.cont [8/16] %v8776_v27, 128 }
 0x967   : > { %v8704_v55 = vadd.f32 %v8703_v4, %v8655_v1 }
 0x968   : > { %v8571_v45 = vpop.f32.mrf.mxu0 }
 0x969   : > { %v12056_v36 = vpop.eup %12055  ;;  %v8730_v53 = vmax.f32 %v8704_v55, 1e-05  ;;  %v8620_v0 = vpop.f32.mrf.mxu1 }
 0x96a   : > { %v8754_v49 = vmul.f32 0.6931472, %v12056_v36  ;;  %v8621_v51 = vadd.f32 %v8620_v0, %v8571_v45 }
 0x96b   : > { %12057 = vlog2.f32 %v8730_v53 }
 0x96c   : > { %v8777_v60 = vmul.f32 0.4342945, %v8754_v49 }
 0x96e   : > { %v8657_v19 = vpop.f32.mrf.mxu2  ;;  %8793 = vxpose.xlu0.b32.cont [9/16] %v8777_v60, 128 }
 0x96f   : > { %v8658_v52 = vadd.f32 %v8657_v19, %v8609_v2 }
 0x971   : > { %v12058_v10 = vpop.eup %12057 }
 0x972   : > { %v8756_v38 = vmul.f32 0.6931472, %v12058_v10 }
 0x974   : > { %v8778_v18 = vmul.f32 0.4342945, %v8756_v38 }
 0x975   : > { %v8706_v26 = vpop.f32.mrf.mxu3 }
 0x976   : > { %v8707_v24 = vadd.f32 %v8706_v26, %v8658_v52  ;;  %v8659_v40 = vpop.f32.mrf.mxu2  ;;  %8794 = vxpose.xlu0.b32.cont [10/16] %v8778_v18, 128 }
 0x977   : > { %v8660_v58 = vadd.f32 %v8659_v40, %v8611_v8 }
 0x978   : > { %v8731_v22 = vmax.f32 %v8707_v24, 1e-05 }
 0x97a   : > { %12059 = vlog2.f32 %v8731_v22 }
 0x97d   : > { %v8708_v17 = vpop.f32.mrf.mxu3 }
 0x97e   : > { %v8709_v61 = vadd.f32 %v8708_v17, %v8660_v58  ;;  %v8662_v11 = vpop.f32.mrf.mxu2 }
 0x97f   : > { %v8663_v63 = vadd.f32 %v8662_v11, %v8614_v43 }
 0x980   : > { %v12060_v59 = vpop.eup %12059  ;;  %v8732_v41 = vmax.f32 %v8709_v61, 1e-05 }
 0x981   : > { %v8758_v46 = vmul.f32 0.6931472, %v12060_v59 }
 0x982   : > { %12061 = vlog2.f32 %v8732_v41 }
 0x983   : > { %v8779_v48 = vmul.f32 0.4342945, %v8758_v46 }
 0x985   : > { %8795 = vxpose.xlu0.b32.cont [11/16] %v8779_v48, 128 }
 0x986   : > { %v8664_v12 = vpop.f32.mrf.mxu2 }
 0x987   : > { %v8711_v15 = vpop.f32.mrf.mxu3  ;;  %v8665_v21 = vadd.f32 %v8664_v12, %v8616_v31 }
 0x988   : > { %v12062_v9 = vpop.eup %12061  ;;  %v8712_v47 = vadd.f32 %v8711_v15, %v8663_v63 }
 0x989   : > { %v8760_v54 = vmul.f32 0.6931472, %v12062_v9 }
 0x98a   : > { %v8733_v16 = vmax.f32 %v8712_v47, 1e-05 }
 0x98b   : > { %v8780_v37 = vmul.f32 0.4342945, %v8760_v54 }
 0x98c   : > { %12063 = vlog2.f32 %v8733_v16 }
 0x98d   : > { %8796 = vxpose.xlu0.b32.cont [12/16] %v8780_v37, 128 }
 0x98e   : > { %v8667_v14 = vpop.f32.mrf.mxu2 }
 0x98f   : > { %v8713_v32 = vpop.f32.mrf.mxu3  ;;  %v8668_v33 = vadd.f32 %v8667_v14, %v8619_v62 }
 0x990   : > { %v8714_v5 = vadd.f32 %v8713_v32, %v8665_v21 }
 0x992   : > { %v12064_v44 = vpop.eup %12063  ;;  %v8734_v30 = vmax.f32 %v8714_v5, 1e-05 }
 0x993   : > { %v8762_v50 = vmul.f32 0.6931472, %v12064_v44 }
 0x994   : > { %12065 = vlog2.f32 %v8734_v30 }
 0x995   : > { %v8781_v34 = vmul.f32 0.4342945, %v8762_v50 }
 0x996   : > { %v8669_v13 = vpop.f32.mrf.mxu2 }
 0x997   : > { %v8716_v39 = vpop.f32.mrf.mxu3  ;;  %8797 = vxpose.xlu0.b32.cont [13/16] %v8781_v34, 128  ;;  %v8670_v25 = vadd.f32 %v8669_v13, %v8621_v51 }
 0x998   : > { %v8717_v29 = vadd.f32 %v8716_v39, %v8668_v33 }
 0x99a   : > { %v12066_v35 = vpop.eup %12065  ;;  %v8735_v56 = vmax.f32 %v8717_v29, 1e-05 }
 0x99b   : > { %v8764_v27 = vmul.f32 0.6931472, %v12066_v35 }
 0x99c   : > { %12067 = vlog2.f32 %v8735_v56 }
 0x99d   : > { %v8782_v1 = vmul.f32 0.4342945, %v8764_v27 }
 0x99f   : > { %v8718_v4 = vpop.f32.mrf.mxu3  ;;  %8798 = vxpose.xlu0.b32.cont [14/16] %v8782_v1, 128 }
 0x9a0   : > { %v8719_v55 = vadd.f32 %v8718_v4, %v8670_v25 }
 0x9a2   : > { %v12068_v36 = vpop.eup %12067  ;;  %v8736_v53 = vmax.f32 %v8719_v55, 1e-05 }
 0x9a3   : > { %v8766_v49 = vmul.f32 0.6931472, %v12068_v36 }
 0x9a4   : > { %12069 = vlog2.f32 %v8736_v53 }
 0x9a5   : > { %v8783_v60 = vmul.f32 0.4342945, %v8766_v49 }
 0x9a7   : > { %8799 = vxpose.xlu0.b32.cont [15/16] %v8783_v60, 128 }
 0x9aa   : > { %v12070_v19 = vpop.eup %12069 }
 0x9ab   : > { %v8768_v20 = vmul.f32 0.6931472, %v12070_v19 }
 0x9ad   : > { %v8784_v7 = vmul.f32 0.4342945, %v8768_v20 }
 0x9af   : > { %8800 = vxpose.xlu0.b32.end [16/16] %v8784_v7, 128 }
 0x9db   : > { %v8801_v10 = vpop.trf.xlu0 }
 0x9dc   : > { %8817 = vst [vmem:[%s15895_s21] sm:$0xff] %v8801_v10 }
 0x9e3   : > { %v8802_v2 = vpop.trf.xlu0 }
 0x9e4   : > { %8818 = vst [vmem:[%s15895_s21 + $0x8] sm:$0xff] %v8802_v2 }
 0x9eb   : > { %v8803_v38 = vpop.trf.xlu0 }
 0x9ec   : > { %8819 = vst [vmem:[%s15895_s21 + $0x10] sm:$0xff] %v8803_v38 }
 0x9f3   : > { %v8804_v52 = vpop.trf.xlu0 }
 0x9f4   : > { %8820 = vst [vmem:[%s15895_s21 + $0x18] sm:$0xff] %v8804_v52 }
 0x9fb   : > { %v8805_v26 = vpop.trf.xlu0 }
 0x9fc   : > { %8821 = vst [vmem:[%s15895_s21 + $0x20] sm:$0xff] %v8805_v26 }
 0xa03   : > { %v8806_v18 = vpop.trf.xlu0 }
 0xa04   : > { %8822 = vst [vmem:[%s15895_s21 + $0x28] sm:$0xff] %v8806_v18 }
 0xa0b   : > { %v8807_v24 = vpop.trf.xlu0 }
 0xa0c   : > { %8823 = vst [vmem:[%s15895_s21 + $0x30] sm:$0xff] %v8807_v24 }
 0xa13   : > { %v8808_v40 = vpop.trf.xlu0 }
 0xa14   : > { %8824 = vst [vmem:[%s15895_s21 + $0x38] sm:$0xff] %v8808_v40 }
 0xa1b   : > { %v8809_v22 = vpop.trf.xlu0 }
 0xa1c   : > { %8825 = vst [vmem:[%s15895_s21 + $0x40] sm:$0xff] %v8809_v22 }
 0xa23   : > { %v8810_v8 = vpop.trf.xlu0 }
 0xa24   : > { %8826 = vst [vmem:[%s15895_s21 + $0x48] sm:$0xff] %v8810_v8 }
 0xa2b   : > { %v8811_v42 = vpop.trf.xlu0 }
 0xa2c   : > { %8827 = vst [vmem:[%s15895_s21 + $0x50] sm:$0xff] %v8811_v42 }
 0xa33   : > { %v8812_v3 = vpop.trf.xlu0 }
 0xa34   : > { %8828 = vst [vmem:[%s15895_s21 + $0x58] sm:$0xff] %v8812_v3 }
 0xa3b   : > { %v8813_v58 = vpop.trf.xlu0 }
 0xa3c   : > { %8829 = vst [vmem:[%s15895_s21 + $0x60] sm:$0xff] %v8813_v58 }
 0xa43   : > { %v8814_v17 = vpop.trf.xlu0 }
 0xa44   : > { %8830 = vst [vmem:[%s15895_s21 + $0x68] sm:$0xff] %v8814_v17 }
 0xa4b   : > { %v8815_v61 = vpop.trf.xlu0 }
 0xa4c   : > { %8831 = vst [vmem:[%s15895_s21 + $0x70] sm:$0xff] %v8815_v61 }
 0xa53   : > { %v8816_v11 = vpop.trf.xlu0 }
 0xa54   : > { %8832 = vst [vmem:[%s15895_s21 + $0x78] sm:$0xff] %v8816_v11 }
 0xa55   : > { %12218 = shalt.err (!%p12215_p0)
}
 0xa56   : > { %s12295_s10 = smov 128   ;;  %s12296_s5 = smov 8  }
 0xa57   : > { %11827 = dma.vmem_to_hbm [thread:$0]  (%p12401_p7), %s8848_s27, 2048, %s8850_s22, %s8834_s7, %s12295_s10, %s12295_s10, %s12296_s5  }
 0xa58 PF: > { %s8864_s12 = sand.u32 1, %s12265_s15   ;;  %p11844_p3 = pnand %p8987_p11, %p12367_p6 }
 0xa59   : > { %s8865_s0 = scalar_lea.sflag [#allocation4], %s8864_s12 }
 0xa5a   : > { %p11845_p5 = pneg %p11844_p3 }
 0xa5c   : > { %12260 = dma.done.wait (%p11845_p5), %s8865_s0, 2048  }
 0xa5d   : > { %12262 = vsyncadd (%p11845_p5), %s8865_s0, 4294965248  ;;  %s24_s20 = sadd.s32 1, %s12285_s20   ;;  %s16882_s18 = sld [smem:[#allocation16_spill]] }
 0xa5e   : > { %p21_p9 = scmp.ge.s32.totalorder %s24_s20, 4   ;;  %s16883_s19 = sld [smem:[#allocation17_spill]] }
 0xa5f   : > { %s16884_s15 = smov %s12269_s16  ;;  %s16885_s16 = smov %s12273_s17 }
 0xa60   : > { %s16886_s17 = smov %s12410_s6  ;;  %23 = sbr.rel (!%p21_p9) target bundleno = 13 (0xd), region = 102 }
 0xa65   :  { %8871 = vsyncpa [#allocation3], 1 }
 0xa66   :  { %8873 = vsyncpa [#allocation3 + $0x1], 1 }
 0xa67   :  { %8874 = vsyncpa [#allocation6], 1 }
 0xa68   :  { %8876 = vsyncpa [#allocation6 + $0x1], 1 }
 0xa69   :  { %8877 = vsyncpa [#allocation9], 1 }
 0xa6a   :  { %8878 = vsyncpa [#allocation4], 1 }
 0xa6b   :  { %8880 = vsyncpa [#allocation4 + $0x1], 1 }

</bundles_post_ra>
